<compile_context>
chip_gen: v7x
topology: tpu7x:2x2x1
jax: 0.10.0
libtpu: 0.0.40
codegen_flags: <defaults>
</compile_context>

<pallas_src>
import functools

import numpy as np
import jax
import jax.numpy as jnp
from jax.experimental import pallas as pl
from jax.experimental.pallas import tpu as pltpu


# ----------------------------------------------------------------------------
# Fused generator kernel: 4 x (ConvT [-> BN -> ReLU]) + Sigmoid, all in VMEM.
# ----------------------------------------------------------------------------
def _generator_kernel(z_ref, w1_ref, g1_ref, b1_ref,
                      w2_ref, r2_ref, g2_ref, b2_ref,
                      w3_ref, r3_ref, g3_ref, b3_ref,
                      w4_ref, r4_ref, o_ref, *, n_batch, eps):
    f32 = jnp.float32
    bf16 = jnp.bfloat16

    def mm(a, b):
        # (M, K) x (K, N) on the MXU: bf16 operands, f32 accumulation.
        return jax.lax.dot_general(
            a.astype(bf16), b.astype(bf16),
            dimension_numbers=(((1,), (0,)), ((), ())),
            preferred_element_type=f32)

    def mm_nt(a, b):
        # (M, K) x (N, K) -> (M, N): contract the last dim of both operands.
        return jax.lax.dot_general(
            a.astype(bf16), b.astype(bf16),
            dimension_numbers=(((1,), (1,)), ((), ())),
            preferred_element_type=f32)

    def convt(feats, w_ref, r_ref, cout, taps, feats_hw_major=False):
        # feats: per-sample feature maps.
        #   default layout: (Cin, HW_in)  -> plain GEMM
        #   hw_major      : (HW_in, Cin)  -> GEMM with RHS transposed
        # Returns per-sample (cout, HW_out) maps (channels in rows).
        outs = []
        for f in feats:
            y = mm_nt(w_ref[...], f) if feats_hw_major else mm(w_ref[...], f)
            # (taps*cout, HW_in) -> stack tap blocks along lanes: (cout, taps*HW_in)
            ycat = jnp.concatenate(
                [y[t * cout:(t + 1) * cout, :] for t in range(taps)], axis=1)
            # Overlap-add / crop via the precomputed 0/1 scatter matrix (MXU).
            outs.append(mm(ycat, r_ref[...]))
        return outs

    def bn_relu_rows(feats, g_ref, b_ref):
        # BatchNorm2d (training-mode biased batch stats over N,H,W) + ReLU.
        # Channels live in rows; stats reduce over lanes and over samples. f32.
        hw = feats[0].shape[1]
        cnt = float(len(feats) * hw)
        s = sum(jnp.sum(f, axis=1, keepdims=True) for f in feats)
        ss = sum(jnp.sum(f * f, axis=1, keepdims=True) for f in feats)
        mean = s / cnt
        var = jnp.maximum(ss / cnt - mean * mean, 0.0)
        scale = g_ref[...] * jax.lax.rsqrt(var + eps)
        shift = b_ref[...] - mean * scale
        return [jnp.maximum(f * scale + shift, 0.0) for f in feats]

    # ---- Layer 1: ConvT(nz -> 4*ngf, k=4, s=1, p=0), 1x1 -> 4x4 ------------
    # For a 1x1 input this is a plain GEMM z @ W(nz, 16*C1); re-pack the
    # (spatial, channel) columns into a (16, C1) map with static slices.
    c1 = g1_ref.shape[1]
    hw1 = w1_ref.shape[1] // c1
    f1_raw = []
    for n in range(n_batch):
        y = mm(z_ref[n:n + 1, :], w1_ref[...])            # (1, hw1*c1)
        f1_raw.append(jnp.concatenate(
            [y[:, p * c1:(p + 1) * c1] for p in range(hw1)], axis=0))  # (hw1, c1)
    # BN over (batch, spatial) per channel; channels are in columns here.
    cnt1 = float(n_batch * hw1)
    s1 = sum(jnp.sum(f, axis=0, keepdims=True) for f in f1_raw)
    ss1 = sum(jnp.sum(f * f, axis=0, keepdims=True) for f in f1_raw)
    mean1 = s1 / cnt1
    var1 = jnp.maximum(ss1 / cnt1 - mean1 * mean1, 0.0)
    scale1 = g1_ref[...] * jax.lax.rsqrt(var1 + eps)
    shift1 = b1_ref[...] - mean1 * scale1
    f1 = [jnp.maximum(f * scale1 + shift1, 0.0) for f in f1_raw]   # (hw1, c1)

    # ---- Layer 2: ConvT(4*ngf -> 2*ngf, k=4, s=2, p=1), 4x4 -> 8x8 ---------
    c2 = g2_ref.shape[0]
    taps2 = w2_ref.shape[0] // c2
    f2 = bn_relu_rows(
        convt(f1, w2_ref, r2_ref, c2, taps2, feats_hw_major=True),
        g2_ref, b2_ref)                                            # (c2, 64)

    # ---- Layer 3: ConvT(2*ngf -> ngf, k=4, s=2, p=1), 8x8 -> 16x16 ---------
    c3 = g3_ref.shape[0]
    taps3 = w3_ref.shape[0] // c3
    f3 = bn_relu_rows(
        convt(f2, w3_ref, r3_ref, c3, taps3), g3_ref, b3_ref)      # (c3, 256)

    # ---- Layer 4: ConvT(ngf -> nc, k=2, s=2, p=2), 16x16 -> 28x28 + sigmoid -
    taps4 = r4_ref.shape[0] // r3_ref.shape[1]
    c4 = w4_ref.shape[0] // taps4
    logits = convt(f3, w4_ref, r4_ref, c4, taps4)                  # (c4, 784)
    for n in range(n_batch):
        xl = jnp.maximum(logits[n], -30.0)          # keep exp(-x) finite
        prob = pl.reciprocal(1.0 + jnp.exp(-xl), approx=True)      # EUP sigmoid
        o_ref[n * c4:(n + 1) * c4, :] = jnp.clip(prob, 0.0, 1.0).astype(o_ref.dtype)


def _generator_pallas(z2d, packed):
    (w1g, g1, b1, w2t, r2, g2, b2, w3t, r3, g3, b3, w4t, r4) = packed
    n_batch = z2d.shape[0]
    taps4 = r4.shape[0] // r3.shape[1]
    c4 = w4t.shape[0] // taps4
    hw_out = r4.shape[1]                              # 28 * 28, lane-dense output
    args = (z2d,) + tuple(packed)
    kernel = functools.partial(_generator_kernel, n_batch=n_batch, eps=1e-5)
    return pl.pallas_call(
        kernel,
        grid=(1,),
        in_specs=[pl.BlockSpec(a.shape, lambda i: (0, 0)) for a in args],
        out_specs=pl.BlockSpec((n_batch * c4, hw_out), lambda i: (0, 0)),
        out_shape=jax.ShapeDtypeStruct((n_batch * c4, hw_out), jnp.float32),
        compiler_params=pltpu.CompilerParams(
            dimension_semantics=("arbitrary",),
            vmem_limit_bytes=32 * 1024 * 1024,
        ),
    )(*args)


@jax.jit
def generator_forward(x_nchw, packed):
    n = x_nchw.shape[0]
    z2d = x_nchw.reshape(n, -1).astype(jnp.float32)   # (N, nz, 1, 1) -> (N, nz)
    img = _generator_pallas(z2d, packed)              # (N*nc, 784)
    return img.reshape(n, -1, 28, 28)                 # NCHW, 28x28 fixed by arch


# ----------------------------------------------------------------------------
# One-time parameter preparation (weight re-layout + 0/1 overlap-add matrices).
# ----------------------------------------------------------------------------
def _build_scatter(k, s, p, h_in, w_in):
    """0/1 overlap-add ('col2im') matrix for ConvTranspose2d(k, stride=s, pad=p).

    Row (tap=kh*k+kw, h, w) -> column (oh, ow) with oh = s*h - p + kh,
    ow = s*w - p + kw; out-of-range targets are dropped (the crop)."""
    oh_dim = (h_in - 1) * s - 2 * p + k
    ow_dim = (w_in - 1) * s - 2 * p + k
    r = np.zeros((k * k * h_in * w_in, oh_dim * ow_dim), np.float32)
    for kh in range(k):
        for kw in range(k):
            t = kh * k + kw
            for h in range(h_in):
                oh = h * s - p + kh
                if oh < 0 or oh >= oh_dim:
                    continue
                for w in range(w_in):
                    ow = w * s - p + kw
                    if ow < 0 or ow >= ow_dim:
                        continue
                    r[(t * h_in + h) * w_in + w, oh * ow_dim + ow] = 1.0
    return r


def prepare_params(params):
    """Re-layout PyTorch-style parameters for the fused kernel (done once)."""
    w1, w2, w3, w4 = params["w1"], params["w2"], params["w3"], params["w4"]
    nz, c1 = w1.shape[0], w1.shape[1]
    c2, c3 = w2.shape[1], w3.shape[1]
    bf16 = jnp.bfloat16
    # Layer 1: columns ordered (spatial, cout); layers 2-4: rows (tap, cout).
    w1g = jnp.transpose(w1, (0, 2, 3, 1)).reshape(nz, 16 * c1).astype(bf16)
    w2t = jnp.transpose(w2, (2, 3, 1, 0)).reshape(16 * c2, c1).astype(bf16)
    w3t = jnp.transpose(w3, (2, 3, 1, 0)).reshape(16 * c3, c2).astype(bf16)
    w4t = jnp.transpose(w4, (2, 3, 1, 0)).reshape(4 * w4.shape[1], c3).astype(bf16)
    # 0/1 scatter matrices (exact in bf16). Total < 2.5 MB -> VMEM-resident.
    r2 = jnp.asarray(_build_scatter(4, 2, 1, 4, 4), bf16)       # (256, 64)
    r3 = jnp.asarray(_build_scatter(4, 2, 1, 8, 8), bf16)       # (1024, 256)
    r4 = jnp.asarray(_build_scatter(2, 2, 2, 16, 16), bf16)     # (1024, 784)
    g1 = params["g1"].reshape(1, c1).astype(jnp.float32)
    b1 = params["b1"].reshape(1, c1).astype(jnp.float32)
    g2 = params["g2"].reshape(c2, 1).astype(jnp.float32)
    b2 = params["b2"].reshape(c2, 1).astype(jnp.float32)
    g3 = params["g3"].reshape(c3, 1).astype(jnp.float32)
    b3 = params["b3"].reshape(c3, 1).astype(jnp.float32)
    return (w1g, g1, b1, w2t, r2, g2, b2, w3t, r3, g3, b3, w4t, r4)


# ----------------------------------------------------------------------------
# Pure-JAX reference (f32) of the same module, for a correctness check.
# ----------------------------------------------------------------------------
def _convT_ref(x, w, s, p):
    n, cin, h, wd = x.shape
    cout, k = w.shape[1], w.shape[2]
    fh = (h - 1) * s + k
    fw = (wd - 1) * s + k
    full = jnp.zeros((n, cout, fh, fw), jnp.float32)
    for kh in range(k):
        for kw in range(k):
            contrib = jnp.einsum("nchw,cd->ndhw", x, w[:, :, kh, kw])
            full = full.at[:, :, kh:kh + (h - 1) * s + 1:s,
                           kw:kw + (wd - 1) * s + 1:s].add(contrib)
    return full[:, :, p:fh - p, p:fw - p]


def _bn_relu_ref(x, g, b, eps=1e-5):
    mean = jnp.mean(x, axis=(0, 2, 3), keepdims=True)
    var = jnp.mean(jnp.square(x - mean), axis=(0, 2, 3), keepdims=True)
    y = (x - mean) * jax.lax.rsqrt(var + eps)
    y = y * g.reshape(1, -1, 1, 1) + b.reshape(1, -1, 1, 1)
    return jnp.maximum(y, 0.0)


def generator_ref(x, params):
    h = _bn_relu_ref(_convT_ref(x, params["w1"], 1, 0), params["g1"], params["b1"])
    h = _bn_relu_ref(_convT_ref(h, params["w2"], 2, 1), params["g2"], params["b2"])
    h = _bn_relu_ref(_convT_ref(h, params["w3"], 2, 1), params["g3"], params["b3"])
    return jax.nn.sigmoid(_convT_ref(h, params["w4"], 2, 2))


# ----------------------------------------------------------------------------
if __name__ == "__main__":
    nz, ngf, nc, N = 16, 8, 1, 2
    keys = jax.random.split(jax.random.PRNGKey(0), 11)
    params = {
        # ConvTranspose2d weights: (Cin, Cout, kH, kW), bias=False
        "w1": 0.02 * jax.random.normal(keys[0], (nz, 4 * ngf, 4, 4), jnp.float32),
        "w2": 0.02 * jax.random.normal(keys[1], (4 * ngf, 2 * ngf, 4, 4), jnp.float32),
        "w3": 0.02 * jax.random.normal(keys[2], (2 * ngf, ngf, 4, 4), jnp.float32),
        "w4": 0.02 * jax.random.normal(keys[3], (ngf, nc, 2, 2), jnp.float32),
        # BatchNorm affine params
        "g1": 1.0 + 0.1 * jax.random.normal(keys[4], (4 * ngf,), jnp.float32),
        "b1": 0.1 * jax.random.normal(keys[5], (4 * ngf,), jnp.float32),
        "g2": 1.0 + 0.1 * jax.random.normal(keys[6], (2 * ngf,), jnp.float32),
        "b2": 0.1 * jax.random.normal(keys[7], (2 * ngf,), jnp.float32),
        "g3": 1.0 + 0.1 * jax.random.normal(keys[8], (ngf,), jnp.float32),
        "b3": 0.1 * jax.random.normal(keys[9], (ngf,), jnp.float32),
    }
    # latent input, PyTorch convention: (N, nz, 1, 1) NCHW
    x = jax.random.normal(keys[10], (N, nz, 1, 1), jnp.float32)

    packed = prepare_params(params)            # one-time re-layout
    out = generator_forward(x, packed)         # jitted, single fused Pallas call
    out = jax.block_until_ready(out)

    assert out.shape == (N, nc, 28, 28), out.shape
    assert bool(jnp.all(jnp.isfinite(out)))
    assert bool(jnp.all((out >= 0.0) & (out <= 1.0)))      # sigmoid range

    # bf16 MXU operands + approx-reciprocal sigmoid => small tolerance vs f32 ref.
    ref = generator_ref(x, params)
    max_err = float(jnp.max(jnp.abs(out - ref)))
    assert max_err < 2e-2, f"max |kernel - ref| = {max_err}"

    print("KERNEL_OK")
</pallas_src>

<mosaic_0001>
module attributes {stable_mosaic.version = 11 : i64} {
  func.func @_generator_kernel(%arg0: i32, %arg1: memref<2x16xf32, #tpu.memory_space<vmem>>, %arg2: memref<16x512xbf16, #tpu.memory_space<vmem>>, %arg3: memref<1x32xf32, #tpu.memory_space<vmem>>, %arg4: memref<1x32xf32, #tpu.memory_space<vmem>>, %arg5: memref<256x32xbf16, #tpu.memory_space<vmem>>, %arg6: memref<256x64xbf16, #tpu.memory_space<vmem>>, %arg7: memref<16x1xf32, #tpu.memory_space<vmem>>, %arg8: memref<16x1xf32, #tpu.memory_space<vmem>>, %arg9: memref<128x16xbf16, #tpu.memory_space<vmem>>, %arg10: memref<1024x256xbf16, #tpu.memory_space<vmem>>, %arg11: memref<8x1xf32, #tpu.memory_space<vmem>>, %arg12: memref<8x1xf32, #tpu.memory_space<vmem>>, %arg13: memref<4x8xbf16, #tpu.memory_space<vmem>>, %arg14: memref<1024x784xbf16, #tpu.memory_space<vmem>>, %arg15: memref<2x784xf32, #tpu.memory_space<vmem>>) attributes {dimension_semantics = [#tpu.dimension_semantics<arbitrary>], iteration_bounds = array<i64: 1>, scalar_prefetch = 0 : i64, scratch_operands = 0 : i64, tpu.core_type = #tpu.core_type<tc>, window_params = [{pipeline_mode = #tpu.pipeline_mode<synchronous>, transform_indices = @transform_0, window_bounds = array<i64: 2, 16>}, {pipeline_mode = #tpu.pipeline_mode<synchronous>, transform_indices = @transform_1, window_bounds = array<i64: 16, 512>}, {pipeline_mode = #tpu.pipeline_mode<synchronous>, transform_indices = @transform_2, window_bounds = array<i64: 1, 32>}, {pipeline_mode = #tpu.pipeline_mode<synchronous>, transform_indices = @transform_3, window_bounds = array<i64: 1, 32>}, {pipeline_mode = #tpu.pipeline_mode<synchronous>, transform_indices = @transform_4, window_bounds = array<i64: 256, 32>}, {pipeline_mode = #tpu.pipeline_mode<synchronous>, transform_indices = @transform_5, window_bounds = array<i64: 256, 64>}, {pipeline_mode = #tpu.pipeline_mode<synchronous>, transform_indices = @transform_6, window_bounds = array<i64: 16, 1>}, {pipeline_mode = #tpu.pipeline_mode<synchronous>, transform_indices = @transform_7, window_bounds = array<i64: 16, 1>}, {pipeline_mode = #tpu.pipeline_mode<synchronous>, transform_indices = @transform_8, window_bounds = array<i64: 128, 16>}, {pipeline_mode = #tpu.pipeline_mode<synchronous>, transform_indices = @transform_9, window_bounds = array<i64: 1024, 256>}, {pipeline_mode = #tpu.pipeline_mode<synchronous>, transform_indices = @transform_10, window_bounds = array<i64: 8, 1>}, {pipeline_mode = #tpu.pipeline_mode<synchronous>, transform_indices = @transform_11, window_bounds = array<i64: 8, 1>}, {pipeline_mode = #tpu.pipeline_mode<synchronous>, transform_indices = @transform_12, window_bounds = array<i64: 4, 8>}, {pipeline_mode = #tpu.pipeline_mode<synchronous>, transform_indices = @transform_13, window_bounds = array<i64: 1024, 784>}, {pipeline_mode = #tpu.pipeline_mode<synchronous>, transform_indices = @transform_14, window_bounds = array<i64: 2, 784>}]} {
    %c0 = arith.constant 0 : index
    %c0_0 = arith.constant 0 : index
    %0 = vector.load %arg1[%c0, %c0_0] : memref<2x16xf32, #tpu.memory_space<vmem>>, vector<1x16xf32>
    %c0_1 = arith.constant 0 : index
    %c0_2 = arith.constant 0 : index
    %1 = vector.load %arg2[%c0_1, %c0_2] : memref<16x512xbf16, #tpu.memory_space<vmem>>, vector<16x512xbf16>
    %2 = arith.truncf %0 : vector<1x16xf32> to vector<1x16xbf16>
    %cst = arith.constant dense<0.000000e+00> : vector<1x512xf32>
    %3 = tpu.matmul %2, %1, %cst {dimension_numbers = #tpu.dot_dimension_numbers<[1], [0], [0], [1], [0, 0, 1, 1], [], []>} : vector<1x16xbf16>, vector<16x512xbf16>, vector<1x512xf32> -> vector<1x512xf32>
    %4 = vector.extract_strided_slice %3 {offsets = [0, 0], sizes = [1, 32], strides = [1, 1]} : vector<1x512xf32> to vector<1x32xf32>
    %5 = vector.extract_strided_slice %3 {offsets = [0, 32], sizes = [1, 32], strides = [1, 1]} : vector<1x512xf32> to vector<1x32xf32>
    %6 = vector.extract_strided_slice %3 {offsets = [0, 64], sizes = [1, 32], strides = [1, 1]} : vector<1x512xf32> to vector<1x32xf32>
    %7 = vector.extract_strided_slice %3 {offsets = [0, 96], sizes = [1, 32], strides = [1, 1]} : vector<1x512xf32> to vector<1x32xf32>
    %8 = vector.extract_strided_slice %3 {offsets = [0, 128], sizes = [1, 32], strides = [1, 1]} : vector<1x512xf32> to vector<1x32xf32>
    %9 = vector.extract_strided_slice %3 {offsets = [0, 160], sizes = [1, 32], strides = [1, 1]} : vector<1x512xf32> to vector<1x32xf32>
    %10 = vector.extract_strided_slice %3 {offsets = [0, 192], sizes = [1, 32], strides = [1, 1]} : vector<1x512xf32> to vector<1x32xf32>
    %11 = vector.extract_strided_slice %3 {offsets = [0, 224], sizes = [1, 32], strides = [1, 1]} : vector<1x512xf32> to vector<1x32xf32>
    %12 = vector.extract_strided_slice %3 {offsets = [0, 256], sizes = [1, 32], strides = [1, 1]} : vector<1x512xf32> to vector<1x32xf32>
    %13 = vector.extract_strided_slice %3 {offsets = [0, 288], sizes = [1, 32], strides = [1, 1]} : vector<1x512xf32> to vector<1x32xf32>
    %14 = vector.extract_strided_slice %3 {offsets = [0, 320], sizes = [1, 32], strides = [1, 1]} : vector<1x512xf32> to vector<1x32xf32>
    %15 = vector.extract_strided_slice %3 {offsets = [0, 352], sizes = [1, 32], strides = [1, 1]} : vector<1x512xf32> to vector<1x32xf32>
    %16 = vector.extract_strided_slice %3 {offsets = [0, 384], sizes = [1, 32], strides = [1, 1]} : vector<1x512xf32> to vector<1x32xf32>
    %17 = vector.extract_strided_slice %3 {offsets = [0, 416], sizes = [1, 32], strides = [1, 1]} : vector<1x512xf32> to vector<1x32xf32>
    %18 = vector.extract_strided_slice %3 {offsets = [0, 448], sizes = [1, 32], strides = [1, 1]} : vector<1x512xf32> to vector<1x32xf32>
    %19 = vector.extract_strided_slice %3 {offsets = [0, 480], sizes = [1, 32], strides = [1, 1]} : vector<1x512xf32> to vector<1x32xf32>
    %20 = tpu.concatenate %4, %5, %6, %7, %8, %9, %10, %11, %12, %13, %14, %15, %16, %17, %18, %19 in 0 : vector<1x32xf32>, vector<1x32xf32>, vector<1x32xf32>, vector<1x32xf32>, vector<1x32xf32>, vector<1x32xf32>, vector<1x32xf32>, vector<1x32xf32>, vector<1x32xf32>, vector<1x32xf32>, vector<1x32xf32>, vector<1x32xf32>, vector<1x32xf32>, vector<1x32xf32>, vector<1x32xf32>, vector<1x32xf32> -> vector<16x32xf32>
    %c1 = arith.constant 1 : index
    %c0_3 = arith.constant 0 : index
    %21 = vector.load %arg1[%c1, %c0_3] : memref<2x16xf32, #tpu.memory_space<vmem>>, vector<1x16xf32>
    %c0_4 = arith.constant 0 : index
    %c0_5 = arith.constant 0 : index
    %22 = vector.load %arg2[%c0_4, %c0_5] : memref<16x512xbf16, #tpu.memory_space<vmem>>, vector<16x512xbf16>
    %23 = arith.truncf %21 : vector<1x16xf32> to vector<1x16xbf16>
    %cst_6 = arith.constant dense<0.000000e+00> : vector<1x512xf32>
    %24 = tpu.matmul %23, %22, %cst_6 {dimension_numbers = #tpu.dot_dimension_numbers<[1], [0], [0], [1], [0, 0, 1, 1], [], []>} : vector<1x16xbf16>, vector<16x512xbf16>, vector<1x512xf32> -> vector<1x512xf32>
    %25 = vector.extract_strided_slice %24 {offsets = [0, 0], sizes = [1, 32], strides = [1, 1]} : vector<1x512xf32> to vector<1x32xf32>
    %26 = vector.extract_strided_slice %24 {offsets = [0, 32], sizes = [1, 32], strides = [1, 1]} : vector<1x512xf32> to vector<1x32xf32>
    %27 = vector.extract_strided_slice %24 {offsets = [0, 64], sizes = [1, 32], strides = [1, 1]} : vector<1x512xf32> to vector<1x32xf32>
    %28 = vector.extract_strided_slice %24 {offsets = [0, 96], sizes = [1, 32], strides = [1, 1]} : vector<1x512xf32> to vector<1x32xf32>
    %29 = vector.extract_strided_slice %24 {offsets = [0, 128], sizes = [1, 32], strides = [1, 1]} : vector<1x512xf32> to vector<1x32xf32>
    %30 = vector.extract_strided_slice %24 {offsets = [0, 160], sizes = [1, 32], strides = [1, 1]} : vector<1x512xf32> to vector<1x32xf32>
    %31 = vector.extract_strided_slice %24 {offsets = [0, 192], sizes = [1, 32], strides = [1, 1]} : vector<1x512xf32> to vector<1x32xf32>
    %32 = vector.extract_strided_slice %24 {offsets = [0, 224], sizes = [1, 32], strides = [1, 1]} : vector<1x512xf32> to vector<1x32xf32>
    %33 = vector.extract_strided_slice %24 {offsets = [0, 256], sizes = [1, 32], strides = [1, 1]} : vector<1x512xf32> to vector<1x32xf32>
    %34 = vector.extract_strided_slice %24 {offsets = [0, 288], sizes = [1, 32], strides = [1, 1]} : vector<1x512xf32> to vector<1x32xf32>
    %35 = vector.extract_strided_slice %24 {offsets = [0, 320], sizes = [1, 32], strides = [1, 1]} : vector<1x512xf32> to vector<1x32xf32>
    %36 = vector.extract_strided_slice %24 {offsets = [0, 352], sizes = [1, 32], strides = [1, 1]} : vector<1x512xf32> to vector<1x32xf32>
    %37 = vector.extract_strided_slice %24 {offsets = [0, 384], sizes = [1, 32], strides = [1, 1]} : vector<1x512xf32> to vector<1x32xf32>
    %38 = vector.extract_strided_slice %24 {offsets = [0, 416], sizes = [1, 32], strides = [1, 1]} : vector<1x512xf32> to vector<1x32xf32>
    %39 = vector.extract_strided_slice %24 {offsets = [0, 448], sizes = [1, 32], strides = [1, 1]} : vector<1x512xf32> to vector<1x32xf32>
    %40 = vector.extract_strided_slice %24 {offsets = [0, 480], sizes = [1, 32], strides = [1, 1]} : vector<1x512xf32> to vector<1x32xf32>
    %41 = tpu.concatenate %25, %26, %27, %28, %29, %30, %31, %32, %33, %34, %35, %36, %37, %38, %39, %40 in 0 : vector<1x32xf32>, vector<1x32xf32>, vector<1x32xf32>, vector<1x32xf32>, vector<1x32xf32>, vector<1x32xf32>, vector<1x32xf32>, vector<1x32xf32>, vector<1x32xf32>, vector<1x32xf32>, vector<1x32xf32>, vector<1x32xf32>, vector<1x32xf32>, vector<1x32xf32>, vector<1x32xf32>, vector<1x32xf32> -> vector<16x32xf32>
    %cst_7 = arith.constant dense<0.000000e+00> : vector<32xf32>
    %42 = vector.multi_reduction <add>, %20, %cst_7 [0] : vector<16x32xf32> to vector<32xf32>
    %43 = vector.shape_cast %42 : vector<32xf32> to vector<1x32xf32>
    %cst_8 = arith.constant 0.000000e+00 : f32
    %44 = vector.broadcast %cst_8 : f32 to vector<1x32xf32>
    %45 = arith.addf %44, %43 : vector<1x32xf32>
    %cst_9 = arith.constant dense<0.000000e+00> : vector<32xf32>
    %46 = vector.multi_reduction <add>, %41, %cst_9 [0] : vector<16x32xf32> to vector<32xf32>
    %47 = vector.shape_cast %46 : vector<32xf32> to vector<1x32xf32>
    %48 = arith.addf %45, %47 : vector<1x32xf32>
    %49 = arith.mulf %20, %20 : vector<16x32xf32>
    %cst_10 = arith.constant dense<0.000000e+00> : vector<32xf32>
    %50 = vector.multi_reduction <add>, %49, %cst_10 [0] : vector<16x32xf32> to vector<32xf32>
    %51 = vector.shape_cast %50 : vector<32xf32> to vector<1x32xf32>
    %cst_11 = arith.constant 0.000000e+00 : f32
    %52 = vector.broadcast %cst_11 : f32 to vector<1x32xf32>
    %53 = arith.addf %52, %51 : vector<1x32xf32>
    %54 = arith.mulf %41, %41 : vector<16x32xf32>
    %cst_12 = arith.constant dense<0.000000e+00> : vector<32xf32>
    %55 = vector.multi_reduction <add>, %54, %cst_12 [0] : vector<16x32xf32> to vector<32xf32>
    %56 = vector.shape_cast %55 : vector<32xf32> to vector<1x32xf32>
    %57 = arith.addf %53, %56 : vector<1x32xf32>
    %cst_13 = arith.constant 3.200000e+01 : f32
    %58 = vector.broadcast %cst_13 : f32 to vector<1x32xf32>
    %59 = arith.divf %48, %58 : vector<1x32xf32>
    %cst_14 = arith.constant 3.200000e+01 : f32
    %60 = vector.broadcast %cst_14 : f32 to vector<1x32xf32>
    %61 = arith.divf %57, %60 : vector<1x32xf32>
    %62 = arith.mulf %59, %59 : vector<1x32xf32>
    %63 = arith.subf %61, %62 : vector<1x32xf32>
    %cst_15 = arith.constant 0.000000e+00 : f32
    %64 = vector.broadcast %cst_15 : f32 to vector<1x32xf32>
    %65 = arith.maximumf %63, %64 : vector<1x32xf32>
    %c0_16 = arith.constant 0 : index
    %c0_17 = arith.constant 0 : index
    %66 = vector.load %arg3[%c0_16, %c0_17] : memref<1x32xf32, #tpu.memory_space<vmem>>, vector<1x32xf32>
    %cst_18 = arith.constant 9.99999974E-6 : f32
    %67 = vector.broadcast %cst_18 : f32 to vector<1x32xf32>
    %68 = arith.addf %65, %67 : vector<1x32xf32>
    %69 = math.rsqrt %68 : vector<1x32xf32>
    %70 = arith.mulf %66, %69 : vector<1x32xf32>
    %c0_19 = arith.constant 0 : index
    %c0_20 = arith.constant 0 : index
    %71 = vector.load %arg4[%c0_19, %c0_20] : memref<1x32xf32, #tpu.memory_space<vmem>>, vector<1x32xf32>
    %72 = arith.mulf %59, %70 : vector<1x32xf32>
    %73 = arith.subf %71, %72 : vector<1x32xf32>
    %74 = vector.broadcast %70 : vector<1x32xf32> to vector<16x32xf32>
    %75 = arith.mulf %20, %74 : vector<16x32xf32>
    %76 = vector.broadcast %73 : vector<1x32xf32> to vector<16x32xf32>
    %77 = arith.addf %75, %76 : vector<16x32xf32>
    %cst_21 = arith.constant 0.000000e+00 : f32
    %78 = vector.broadcast %cst_21 : f32 to vector<16x32xf32>
    %79 = arith.maximumf %77, %78 : vector<16x32xf32>
    %80 = vector.broadcast %70 : vector<1x32xf32> to vector<16x32xf32>
    %81 = arith.mulf %41, %80 : vector<16x32xf32>
    %82 = vector.broadcast %73 : vector<1x32xf32> to vector<16x32xf32>
    %83 = arith.addf %81, %82 : vector<16x32xf32>
    %cst_22 = arith.constant 0.000000e+00 : f32
    %84 = vector.broadcast %cst_22 : f32 to vector<16x32xf32>
    %85 = arith.maximumf %83, %84 : vector<16x32xf32>
    %c0_23 = arith.constant 0 : index
    %c0_24 = arith.constant 0 : index
    %86 = vector.load %arg5[%c0_23, %c0_24] : memref<256x32xbf16, #tpu.memory_space<vmem>>, vector<256x32xbf16>
    %87 = arith.truncf %79 : vector<16x32xf32> to vector<16x32xbf16>
    %cst_25 = arith.constant dense<0.000000e+00> : vector<256x16xf32>
    %88 = tpu.matmul %86, %87, %cst_25 {dimension_numbers = #tpu.dot_dimension_numbers<[1], [1], [0], [0], [0, 0, 1, 0], [], []>} : vector<256x32xbf16>, vector<16x32xbf16>, vector<256x16xf32> -> vector<256x16xf32>
    %89 = vector.extract_strided_slice %88 {offsets = [0, 0], sizes = [16, 16], strides = [1, 1]} : vector<256x16xf32> to vector<16x16xf32>
    %90 = vector.extract_strided_slice %88 {offsets = [16, 0], sizes = [16, 16], strides = [1, 1]} : vector<256x16xf32> to vector<16x16xf32>
    %91 = vector.extract_strided_slice %88 {offsets = [32, 0], sizes = [16, 16], strides = [1, 1]} : vector<256x16xf32> to vector<16x16xf32>
    %92 = vector.extract_strided_slice %88 {offsets = [48, 0], sizes = [16, 16], strides = [1, 1]} : vector<256x16xf32> to vector<16x16xf32>
    %93 = vector.extract_strided_slice %88 {offsets = [64, 0], sizes = [16, 16], strides = [1, 1]} : vector<256x16xf32> to vector<16x16xf32>
    %94 = vector.extract_strided_slice %88 {offsets = [80, 0], sizes = [16, 16], strides = [1, 1]} : vector<256x16xf32> to vector<16x16xf32>
    %95 = vector.extract_strided_slice %88 {offsets = [96, 0], sizes = [16, 16], strides = [1, 1]} : vector<256x16xf32> to vector<16x16xf32>
    %96 = vector.extract_strided_slice %88 {offsets = [112, 0], sizes = [16, 16], strides = [1, 1]} : vector<256x16xf32> to vector<16x16xf32>
    %97 = vector.extract_strided_slice %88 {offsets = [128, 0], sizes = [16, 16], strides = [1, 1]} : vector<256x16xf32> to vector<16x16xf32>
    %98 = vector.extract_strided_slice %88 {offsets = [144, 0], sizes = [16, 16], strides = [1, 1]} : vector<256x16xf32> to vector<16x16xf32>
    %99 = vector.extract_strided_slice %88 {offsets = [160, 0], sizes = [16, 16], strides = [1, 1]} : vector<256x16xf32> to vector<16x16xf32>
    %100 = vector.extract_strided_slice %88 {offsets = [176, 0], sizes = [16, 16], strides = [1, 1]} : vector<256x16xf32> to vector<16x16xf32>
    %101 = vector.extract_strided_slice %88 {offsets = [192, 0], sizes = [16, 16], strides = [1, 1]} : vector<256x16xf32> to vector<16x16xf32>
    %102 = vector.extract_strided_slice %88 {offsets = [208, 0], sizes = [16, 16], strides = [1, 1]} : vector<256x16xf32> to vector<16x16xf32>
    %103 = vector.extract_strided_slice %88 {offsets = [224, 0], sizes = [16, 16], strides = [1, 1]} : vector<256x16xf32> to vector<16x16xf32>
    %104 = vector.extract_strided_slice %88 {offsets = [240, 0], sizes = [16, 16], strides = [1, 1]} : vector<256x16xf32> to vector<16x16xf32>
    %105 = tpu.concatenate %89, %90, %91, %92, %93, %94, %95, %96, %97, %98, %99, %100, %101, %102, %103, %104 in 1 : vector<16x16xf32>, vector<16x16xf32>, vector<16x16xf32>, vector<16x16xf32>, vector<16x16xf32>, vector<16x16xf32>, vector<16x16xf32>, vector<16x16xf32>, vector<16x16xf32>, vector<16x16xf32>, vector<16x16xf32>, vector<16x16xf32>, vector<16x16xf32>, vector<16x16xf32>, vector<16x16xf32>, vector<16x16xf32> -> vector<16x256xf32>
    %c0_26 = arith.constant 0 : index
    %c0_27 = arith.constant 0 : index
    %106 = vector.load %arg6[%c0_26, %c0_27] : memref<256x64xbf16, #tpu.memory_space<vmem>>, vector<256x64xbf16>
    %107 = arith.truncf %105 : vector<16x256xf32> to vector<16x256xbf16>
    %cst_28 = arith.constant dense<0.000000e+00> : vector<16x64xf32>
    %108 = tpu.matmul %107, %106, %cst_28 {dimension_numbers = #tpu.dot_dimension_numbers<[1], [0], [0], [1], [0, 0, 1, 1], [], []>} : vector<16x256xbf16>, vector<256x64xbf16>, vector<16x64xf32> -> vector<16x64xf32>
    %c0_29 = arith.constant 0 : index
    %c0_30 = arith.constant 0 : index
    %109 = vector.load %arg5[%c0_29, %c0_30] : memref<256x32xbf16, #tpu.memory_space<vmem>>, vector<256x32xbf16>
    %110 = arith.truncf %85 : vector<16x32xf32> to vector<16x32xbf16>
    %cst_31 = arith.constant dense<0.000000e+00> : vector<256x16xf32>
    %111 = tpu.matmul %109, %110, %cst_31 {dimension_numbers = #tpu.dot_dimension_numbers<[1], [1], [0], [0], [0, 0, 1, 0], [], []>} : vector<256x32xbf16>, vector<16x32xbf16>, vector<256x16xf32> -> vector<256x16xf32>
    %112 = vector.extract_strided_slice %111 {offsets = [0, 0], sizes = [16, 16], strides = [1, 1]} : vector<256x16xf32> to vector<16x16xf32>
    %113 = vector.extract_strided_slice %111 {offsets = [16, 0], sizes = [16, 16], strides = [1, 1]} : vector<256x16xf32> to vector<16x16xf32>
    %114 = vector.extract_strided_slice %111 {offsets = [32, 0], sizes = [16, 16], strides = [1, 1]} : vector<256x16xf32> to vector<16x16xf32>
    %115 = vector.extract_strided_slice %111 {offsets = [48, 0], sizes = [16, 16], strides = [1, 1]} : vector<256x16xf32> to vector<16x16xf32>
    %116 = vector.extract_strided_slice %111 {offsets = [64, 0], sizes = [16, 16], strides = [1, 1]} : vector<256x16xf32> to vector<16x16xf32>
    %117 = vector.extract_strided_slice %111 {offsets = [80, 0], sizes = [16, 16], strides = [1, 1]} : vector<256x16xf32> to vector<16x16xf32>
    %118 = vector.extract_strided_slice %111 {offsets = [96, 0], sizes = [16, 16], strides = [1, 1]} : vector<256x16xf32> to vector<16x16xf32>
    %119 = vector.extract_strided_slice %111 {offsets = [112, 0], sizes = [16, 16], strides = [1, 1]} : vector<256x16xf32> to vector<16x16xf32>
    %120 = vector.extract_strided_slice %111 {offsets = [128, 0], sizes = [16, 16], strides = [1, 1]} : vector<256x16xf32> to vector<16x16xf32>
    %121 = vector.extract_strided_slice %111 {offsets = [144, 0], sizes = [16, 16], strides = [1, 1]} : vector<256x16xf32> to vector<16x16xf32>
    %122 = vector.extract_strided_slice %111 {offsets = [160, 0], sizes = [16, 16], strides = [1, 1]} : vector<256x16xf32> to vector<16x16xf32>
    %123 = vector.extract_strided_slice %111 {offsets = [176, 0], sizes = [16, 16], strides = [1, 1]} : vector<256x16xf32> to vector<16x16xf32>
    %124 = vector.extract_strided_slice %111 {offsets = [192, 0], sizes = [16, 16], strides = [1, 1]} : vector<256x16xf32> to vector<16x16xf32>
    %125 = vector.extract_strided_slice %111 {offsets = [208, 0], sizes = [16, 16], strides = [1, 1]} : vector<256x16xf32> to vector<16x16xf32>
    %126 = vector.extract_strided_slice %111 {offsets = [224, 0], sizes = [16, 16], strides = [1, 1]} : vector<256x16xf32> to vector<16x16xf32>
    %127 = vector.extract_strided_slice %111 {offsets = [240, 0], sizes = [16, 16], strides = [1, 1]} : vector<256x16xf32> to vector<16x16xf32>
    %128 = tpu.concatenate %112, %113, %114, %115, %116, %117, %118, %119, %120, %121, %122, %123, %124, %125, %126, %127 in 1 : vector<16x16xf32>, vector<16x16xf32>, vector<16x16xf32>, vector<16x16xf32>, vector<16x16xf32>, vector<16x16xf32>, vector<16x16xf32>, vector<16x16xf32>, vector<16x16xf32>, vector<16x16xf32>, vector<16x16xf32>, vector<16x16xf32>, vector<16x16xf32>, vector<16x16xf32>, vector<16x16xf32>, vector<16x16xf32> -> vector<16x256xf32>
    %c0_32 = arith.constant 0 : index
    %c0_33 = arith.constant 0 : index
    %129 = vector.load %arg6[%c0_32, %c0_33] : memref<256x64xbf16, #tpu.memory_space<vmem>>, vector<256x64xbf16>
    %130 = arith.truncf %128 : vector<16x256xf32> to vector<16x256xbf16>
    %cst_34 = arith.constant dense<0.000000e+00> : vector<16x64xf32>
    %131 = tpu.matmul %130, %129, %cst_34 {dimension_numbers = #tpu.dot_dimension_numbers<[1], [0], [0], [1], [0, 0, 1, 1], [], []>} : vector<16x256xbf16>, vector<256x64xbf16>, vector<16x64xf32> -> vector<16x64xf32>
    %cst_35 = arith.constant dense<0.000000e+00> : vector<16xf32>
    %132 = vector.multi_reduction <add>, %108, %cst_35 [1] : vector<16x64xf32> to vector<16xf32>
    %133 = vector.shape_cast %132 : vector<16xf32> to vector<16x1xf32>
    %cst_36 = arith.constant 0.000000e+00 : f32
    %134 = vector.broadcast %cst_36 : f32 to vector<16x1xf32>
    %135 = arith.addf %134, %133 : vector<16x1xf32>
    %cst_37 = arith.constant dense<0.000000e+00> : vector<16xf32>
    %136 = vector.multi_reduction <add>, %131, %cst_37 [1] : vector<16x64xf32> to vector<16xf32>
    %137 = vector.shape_cast %136 : vector<16xf32> to vector<16x1xf32>
    %138 = arith.addf %135, %137 : vector<16x1xf32>
    %139 = arith.mulf %108, %108 : vector<16x64xf32>
    %cst_38 = arith.constant dense<0.000000e+00> : vector<16xf32>
    %140 = vector.multi_reduction <add>, %139, %cst_38 [1] : vector<16x64xf32> to vector<16xf32>
    %141 = vector.shape_cast %140 : vector<16xf32> to vector<16x1xf32>
    %cst_39 = arith.constant 0.000000e+00 : f32
    %142 = vector.broadcast %cst_39 : f32 to vector<16x1xf32>
    %143 = arith.addf %142, %141 : vector<16x1xf32>
    %144 = arith.mulf %131, %131 : vector<16x64xf32>
    %cst_40 = arith.constant dense<0.000000e+00> : vector<16xf32>
    %145 = vector.multi_reduction <add>, %144, %cst_40 [1] : vector<16x64xf32> to vector<16xf32>
    %146 = vector.shape_cast %145 : vector<16xf32> to vector<16x1xf32>
    %147 = arith.addf %143, %146 : vector<16x1xf32>
    %cst_41 = arith.constant 1.280000e+02 : f32
    %148 = vector.broadcast %cst_41 : f32 to vector<16x1xf32>
    %149 = arith.divf %138, %148 : vector<16x1xf32>
    %cst_42 = arith.constant 1.280000e+02 : f32
    %150 = vector.broadcast %cst_42 : f32 to vector<16x1xf32>
    %151 = arith.divf %147, %150 : vector<16x1xf32>
    %152 = arith.mulf %149, %149 : vector<16x1xf32>
    %153 = arith.subf %151, %152 : vector<16x1xf32>
    %cst_43 = arith.constant 0.000000e+00 : f32
    %154 = vector.broadcast %cst_43 : f32 to vector<16x1xf32>
    %155 = arith.maximumf %153, %154 : vector<16x1xf32>
    %c0_44 = arith.constant 0 : index
    %c0_45 = arith.constant 0 : index
    %156 = vector.load %arg7[%c0_44, %c0_45] : memref<16x1xf32, #tpu.memory_space<vmem>>, vector<16x1xf32>
    %cst_46 = arith.constant 9.99999974E-6 : f32
    %157 = vector.broadcast %cst_46 : f32 to vector<16x1xf32>
    %158 = arith.addf %155, %157 : vector<16x1xf32>
    %159 = math.rsqrt %158 : vector<16x1xf32>
    %160 = arith.mulf %156, %159 : vector<16x1xf32>
    %c0_47 = arith.constant 0 : index
    %c0_48 = arith.constant 0 : index
    %161 = vector.load %arg8[%c0_47, %c0_48] : memref<16x1xf32, #tpu.memory_space<vmem>>, vector<16x1xf32>
    %162 = arith.mulf %149, %160 : vector<16x1xf32>
    %163 = arith.subf %161, %162 : vector<16x1xf32>
    %164 = vector.broadcast %160 : vector<16x1xf32> to vector<16x64xf32>
    %165 = arith.mulf %108, %164 : vector<16x64xf32>
    %166 = vector.broadcast %163 : vector<16x1xf32> to vector<16x64xf32>
    %167 = arith.addf %165, %166 : vector<16x64xf32>
    %cst_49 = arith.constant 0.000000e+00 : f32
    %168 = vector.broadcast %cst_49 : f32 to vector<16x64xf32>
    %169 = arith.maximumf %167, %168 : vector<16x64xf32>
    %170 = vector.broadcast %160 : vector<16x1xf32> to vector<16x64xf32>
    %171 = arith.mulf %131, %170 : vector<16x64xf32>
    %172 = vector.broadcast %163 : vector<16x1xf32> to vector<16x64xf32>
    %173 = arith.addf %171, %172 : vector<16x64xf32>
    %cst_50 = arith.constant 0.000000e+00 : f32
    %174 = vector.broadcast %cst_50 : f32 to vector<16x64xf32>
    %175 = arith.maximumf %173, %174 : vector<16x64xf32>
    %c0_51 = arith.constant 0 : index
    %c0_52 = arith.constant 0 : index
    %176 = vector.load %arg9[%c0_51, %c0_52] : memref<128x16xbf16, #tpu.memory_space<vmem>>, vector<128x16xbf16>
    %177 = arith.truncf %169 : vector<16x64xf32> to vector<16x64xbf16>
    %cst_53 = arith.constant dense<0.000000e+00> : vector<128x64xf32>
    %178 = tpu.matmul %176, %177, %cst_53 {dimension_numbers = #tpu.dot_dimension_numbers<[1], [0], [0], [1], [0, 0, 1, 1], [], []>} : vector<128x16xbf16>, vector<16x64xbf16>, vector<128x64xf32> -> vector<128x64xf32>
    %179 = vector.extract_strided_slice %178 {offsets = [0, 0], sizes = [8, 64], strides = [1, 1]} : vector<128x64xf32> to vector<8x64xf32>
    %180 = vector.extract_strided_slice %178 {offsets = [8, 0], sizes = [8, 64], strides = [1, 1]} : vector<128x64xf32> to vector<8x64xf32>
    %181 = vector.extract_strided_slice %178 {offsets = [16, 0], sizes = [8, 64], strides = [1, 1]} : vector<128x64xf32> to vector<8x64xf32>
    %182 = vector.extract_strided_slice %178 {offsets = [24, 0], sizes = [8, 64], strides = [1, 1]} : vector<128x64xf32> to vector<8x64xf32>
    %183 = vector.extract_strided_slice %178 {offsets = [32, 0], sizes = [8, 64], strides = [1, 1]} : vector<128x64xf32> to vector<8x64xf32>
    %184 = vector.extract_strided_slice %178 {offsets = [40, 0], sizes = [8, 64], strides = [1, 1]} : vector<128x64xf32> to vector<8x64xf32>
    %185 = vector.extract_strided_slice %178 {offsets = [48, 0], sizes = [8, 64], strides = [1, 1]} : vector<128x64xf32> to vector<8x64xf32>
    %186 = vector.extract_strided_slice %178 {offsets = [56, 0], sizes = [8, 64], strides = [1, 1]} : vector<128x64xf32> to vector<8x64xf32>
    %187 = vector.extract_strided_slice %178 {offsets = [64, 0], sizes = [8, 64], strides = [1, 1]} : vector<128x64xf32> to vector<8x64xf32>
    %188 = vector.extract_strided_slice %178 {offsets = [72, 0], sizes = [8, 64], strides = [1, 1]} : vector<128x64xf32> to vector<8x64xf32>
    %189 = vector.extract_strided_slice %178 {offsets = [80, 0], sizes = [8, 64], strides = [1, 1]} : vector<128x64xf32> to vector<8x64xf32>
    %190 = vector.extract_strided_slice %178 {offsets = [88, 0], sizes = [8, 64], strides = [1, 1]} : vector<128x64xf32> to vector<8x64xf32>
    %191 = vector.extract_strided_slice %178 {offsets = [96, 0], sizes = [8, 64], strides = [1, 1]} : vector<128x64xf32> to vector<8x64xf32>
    %192 = vector.extract_strided_slice %178 {offsets = [104, 0], sizes = [8, 64], strides = [1, 1]} : vector<128x64xf32> to vector<8x64xf32>
    %193 = vector.extract_strided_slice %178 {offsets = [112, 0], sizes = [8, 64], strides = [1, 1]} : vector<128x64xf32> to vector<8x64xf32>
    %194 = vector.extract_strided_slice %178 {offsets = [120, 0], sizes = [8, 64], strides = [1, 1]} : vector<128x64xf32> to vector<8x64xf32>
    %195 = tpu.concatenate %179, %180, %181, %182, %183, %184, %185, %186, %187, %188, %189, %190, %191, %192, %193, %194 in 1 : vector<8x64xf32>, vector<8x64xf32>, vector<8x64xf32>, vector<8x64xf32>, vector<8x64xf32>, vector<8x64xf32>, vector<8x64xf32>, vector<8x64xf32>, vector<8x64xf32>, vector<8x64xf32>, vector<8x64xf32>, vector<8x64xf32>, vector<8x64xf32>, vector<8x64xf32>, vector<8x64xf32>, vector<8x64xf32> -> vector<8x1024xf32>
    %c0_54 = arith.constant 0 : index
    %c0_55 = arith.constant 0 : index
    %196 = vector.load %arg10[%c0_54, %c0_55] : memref<1024x256xbf16, #tpu.memory_space<vmem>>, vector<1024x256xbf16>
    %197 = arith.truncf %195 : vector<8x1024xf32> to vector<8x1024xbf16>
    %cst_56 = arith.constant dense<0.000000e+00> : vector<8x256xf32>
    %198 = tpu.matmul %197, %196, %cst_56 {dimension_numbers = #tpu.dot_dimension_numbers<[1], [0], [0], [1], [0, 0, 1, 1], [], []>} : vector<8x1024xbf16>, vector<1024x256xbf16>, vector<8x256xf32> -> vector<8x256xf32>
    %c0_57 = arith.constant 0 : index
    %c0_58 = arith.constant 0 : index
    %199 = vector.load %arg9[%c0_57, %c0_58] : memref<128x16xbf16, #tpu.memory_space<vmem>>, vector<128x16xbf16>
    %200 = arith.truncf %175 : vector<16x64xf32> to vector<16x64xbf16>
    %cst_59 = arith.constant dense<0.000000e+00> : vector<128x64xf32>
    %201 = tpu.matmul %199, %200, %cst_59 {dimension_numbers = #tpu.dot_dimension_numbers<[1], [0], [0], [1], [0, 0, 1, 1], [], []>} : vector<128x16xbf16>, vector<16x64xbf16>, vector<128x64xf32> -> vector<128x64xf32>
    %202 = vector.extract_strided_slice %201 {offsets = [0, 0], sizes = [8, 64], strides = [1, 1]} : vector<128x64xf32> to vector<8x64xf32>
    %203 = vector.extract_strided_slice %201 {offsets = [8, 0], sizes = [8, 64], strides = [1, 1]} : vector<128x64xf32> to vector<8x64xf32>
    %204 = vector.extract_strided_slice %201 {offsets = [16, 0], sizes = [8, 64], strides = [1, 1]} : vector<128x64xf32> to vector<8x64xf32>
    %205 = vector.extract_strided_slice %201 {offsets = [24, 0], sizes = [8, 64], strides = [1, 1]} : vector<128x64xf32> to vector<8x64xf32>
    %206 = vector.extract_strided_slice %201 {offsets = [32, 0], sizes = [8, 64], strides = [1, 1]} : vector<128x64xf32> to vector<8x64xf32>
    %207 = vector.extract_strided_slice %201 {offsets = [40, 0], sizes = [8, 64], strides = [1, 1]} : vector<128x64xf32> to vector<8x64xf32>
    %208 = vector.extract_strided_slice %201 {offsets = [48, 0], sizes = [8, 64], strides = [1, 1]} : vector<128x64xf32> to vector<8x64xf32>
    %209 = vector.extract_strided_slice %201 {offsets = [56, 0], sizes = [8, 64], strides = [1, 1]} : vector<128x64xf32> to vector<8x64xf32>
    %210 = vector.extract_strided_slice %201 {offsets = [64, 0], sizes = [8, 64], strides = [1, 1]} : vector<128x64xf32> to vector<8x64xf32>
    %211 = vector.extract_strided_slice %201 {offsets = [72, 0], sizes = [8, 64], strides = [1, 1]} : vector<128x64xf32> to vector<8x64xf32>
    %212 = vector.extract_strided_slice %201 {offsets = [80, 0], sizes = [8, 64], strides = [1, 1]} : vector<128x64xf32> to vector<8x64xf32>
    %213 = vector.extract_strided_slice %201 {offsets = [88, 0], sizes = [8, 64], strides = [1, 1]} : vector<128x64xf32> to vector<8x64xf32>
    %214 = vector.extract_strided_slice %201 {offsets = [96, 0], sizes = [8, 64], strides = [1, 1]} : vector<128x64xf32> to vector<8x64xf32>
    %215 = vector.extract_strided_slice %201 {offsets = [104, 0], sizes = [8, 64], strides = [1, 1]} : vector<128x64xf32> to vector<8x64xf32>
    %216 = vector.extract_strided_slice %201 {offsets = [112, 0], sizes = [8, 64], strides = [1, 1]} : vector<128x64xf32> to vector<8x64xf32>
    %217 = vector.extract_strided_slice %201 {offsets = [120, 0], sizes = [8, 64], strides = [1, 1]} : vector<128x64xf32> to vector<8x64xf32>
    %218 = tpu.concatenate %202, %203, %204, %205, %206, %207, %208, %209, %210, %211, %212, %213, %214, %215, %216, %217 in 1 : vector<8x64xf32>, vector<8x64xf32>, vector<8x64xf32>, vector<8x64xf32>, vector<8x64xf32>, vector<8x64xf32>, vector<8x64xf32>, vector<8x64xf32>, vector<8x64xf32>, vector<8x64xf32>, vector<8x64xf32>, vector<8x64xf32>, vector<8x64xf32>, vector<8x64xf32>, vector<8x64xf32>, vector<8x64xf32> -> vector<8x1024xf32>
    %c0_60 = arith.constant 0 : index
    %c0_61 = arith.constant 0 : index
    %219 = vector.load %arg10[%c0_60, %c0_61] : memref<1024x256xbf16, #tpu.memory_space<vmem>>, vector<1024x256xbf16>
    %220 = arith.truncf %218 : vector<8x1024xf32> to vector<8x1024xbf16>
    %cst_62 = arith.constant dense<0.000000e+00> : vector<8x256xf32>
    %221 = tpu.matmul %220, %219, %cst_62 {dimension_numbers = #tpu.dot_dimension_numbers<[1], [0], [0], [1], [0, 0, 1, 1], [], []>} : vector<8x1024xbf16>, vector<1024x256xbf16>, vector<8x256xf32> -> vector<8x256xf32>
    %cst_63 = arith.constant dense<0.000000e+00> : vector<8xf32>
    %222 = vector.multi_reduction <add>, %198, %cst_63 [1] : vector<8x256xf32> to vector<8xf32>
    %223 = vector.shape_cast %222 : vector<8xf32> to vector<8x1xf32>
    %cst_64 = arith.constant 0.000000e+00 : f32
    %224 = vector.broadcast %cst_64 : f32 to vector<8x1xf32>
    %225 = arith.addf %224, %223 : vector<8x1xf32>
    %cst_65 = arith.constant dense<0.000000e+00> : vector<8xf32>
    %226 = vector.multi_reduction <add>, %221, %cst_65 [1] : vector<8x256xf32> to vector<8xf32>
    %227 = vector.shape_cast %226 : vector<8xf32> to vector<8x1xf32>
    %228 = arith.addf %225, %227 : vector<8x1xf32>
    %229 = arith.mulf %198, %198 : vector<8x256xf32>
    %cst_66 = arith.constant dense<0.000000e+00> : vector<8xf32>
    %230 = vector.multi_reduction <add>, %229, %cst_66 [1] : vector<8x256xf32> to vector<8xf32>
    %231 = vector.shape_cast %230 : vector<8xf32> to vector<8x1xf32>
    %cst_67 = arith.constant 0.000000e+00 : f32
    %232 = vector.broadcast %cst_67 : f32 to vector<8x1xf32>
    %233 = arith.addf %232, %231 : vector<8x1xf32>
    %234 = arith.mulf %221, %221 : vector<8x256xf32>
    %cst_68 = arith.constant dense<0.000000e+00> : vector<8xf32>
    %235 = vector.multi_reduction <add>, %234, %cst_68 [1] : vector<8x256xf32> to vector<8xf32>
    %236 = vector.shape_cast %235 : vector<8xf32> to vector<8x1xf32>
    %237 = arith.addf %233, %236 : vector<8x1xf32>
    %cst_69 = arith.constant 5.120000e+02 : f32
    %238 = vector.broadcast %cst_69 : f32 to vector<8x1xf32>
    %239 = arith.divf %228, %238 : vector<8x1xf32>
    %cst_70 = arith.constant 5.120000e+02 : f32
    %240 = vector.broadcast %cst_70 : f32 to vector<8x1xf32>
    %241 = arith.divf %237, %240 : vector<8x1xf32>
    %242 = arith.mulf %239, %239 : vector<8x1xf32>
    %243 = arith.subf %241, %242 : vector<8x1xf32>
    %cst_71 = arith.constant 0.000000e+00 : f32
    %244 = vector.broadcast %cst_71 : f32 to vector<8x1xf32>
    %245 = arith.maximumf %243, %244 : vector<8x1xf32>
    %c0_72 = arith.constant 0 : index
    %c0_73 = arith.constant 0 : index
    %246 = vector.load %arg11[%c0_72, %c0_73] : memref<8x1xf32, #tpu.memory_space<vmem>>, vector<8x1xf32>
    %cst_74 = arith.constant 9.99999974E-6 : f32
    %247 = vector.broadcast %cst_74 : f32 to vector<8x1xf32>
    %248 = arith.addf %245, %247 : vector<8x1xf32>
    %249 = math.rsqrt %248 : vector<8x1xf32>
    %250 = arith.mulf %246, %249 : vector<8x1xf32>
    %c0_75 = arith.constant 0 : index
    %c0_76 = arith.constant 0 : index
    %251 = vector.load %arg12[%c0_75, %c0_76] : memref<8x1xf32, #tpu.memory_space<vmem>>, vector<8x1xf32>
    %252 = arith.mulf %239, %250 : vector<8x1xf32>
    %253 = arith.subf %251, %252 : vector<8x1xf32>
    %254 = vector.broadcast %250 : vector<8x1xf32> to vector<8x256xf32>
    %255 = arith.mulf %198, %254 : vector<8x256xf32>
    %256 = vector.broadcast %253 : vector<8x1xf32> to vector<8x256xf32>
    %257 = arith.addf %255, %256 : vector<8x256xf32>
    %cst_77 = arith.constant 0.000000e+00 : f32
    %258 = vector.broadcast %cst_77 : f32 to vector<8x256xf32>
    %259 = arith.maximumf %257, %258 : vector<8x256xf32>
    %260 = vector.broadcast %250 : vector<8x1xf32> to vector<8x256xf32>
    %261 = arith.mulf %221, %260 : vector<8x256xf32>
    %262 = vector.broadcast %253 : vector<8x1xf32> to vector<8x256xf32>
    %263 = arith.addf %261, %262 : vector<8x256xf32>
    %cst_78 = arith.constant 0.000000e+00 : f32
    %264 = vector.broadcast %cst_78 : f32 to vector<8x256xf32>
    %265 = arith.maximumf %263, %264 : vector<8x256xf32>
    %c0_79 = arith.constant 0 : index
    %c0_80 = arith.constant 0 : index
    %266 = vector.load %arg13[%c0_79, %c0_80] : memref<4x8xbf16, #tpu.memory_space<vmem>>, vector<4x8xbf16>
    %267 = arith.truncf %259 : vector<8x256xf32> to vector<8x256xbf16>
    %cst_81 = arith.constant dense<0.000000e+00> : vector<4x256xf32>
    %268 = tpu.matmul %266, %267, %cst_81 {dimension_numbers = #tpu.dot_dimension_numbers<[1], [0], [0], [1], [0, 0, 1, 1], [], []>} : vector<4x8xbf16>, vector<8x256xbf16>, vector<4x256xf32> -> vector<4x256xf32>
    %269 = vector.extract_strided_slice %268 {offsets = [0, 0], sizes = [1, 256], strides = [1, 1]} : vector<4x256xf32> to vector<1x256xf32>
    %270 = vector.extract_strided_slice %268 {offsets = [1, 0], sizes = [1, 256], strides = [1, 1]} : vector<4x256xf32> to vector<1x256xf32>
    %271 = vector.extract_strided_slice %268 {offsets = [2, 0], sizes = [1, 256], strides = [1, 1]} : vector<4x256xf32> to vector<1x256xf32>
    %272 = vector.extract_strided_slice %268 {offsets = [3, 0], sizes = [1, 256], strides = [1, 1]} : vector<4x256xf32> to vector<1x256xf32>
    %273 = tpu.concatenate %269, %270, %271, %272 in 1 : vector<1x256xf32>, vector<1x256xf32>, vector<1x256xf32>, vector<1x256xf32> -> vector<1x1024xf32>
    %c0_82 = arith.constant 0 : index
    %c0_83 = arith.constant 0 : index
    %274 = vector.load %arg14[%c0_82, %c0_83] : memref<1024x784xbf16, #tpu.memory_space<vmem>>, vector<1024x784xbf16>
    %275 = arith.truncf %273 : vector<1x1024xf32> to vector<1x1024xbf16>
    %cst_84 = arith.constant dense<0.000000e+00> : vector<1x784xf32>
    %276 = tpu.matmul %275, %274, %cst_84 {dimension_numbers = #tpu.dot_dimension_numbers<[1], [0], [0], [1], [0, 0, 1, 1], [], []>} : vector<1x1024xbf16>, vector<1024x784xbf16>, vector<1x784xf32> -> vector<1x784xf32>
    %c0_85 = arith.constant 0 : index
    %c0_86 = arith.constant 0 : index
    %277 = vector.load %arg13[%c0_85, %c0_86] : memref<4x8xbf16, #tpu.memory_space<vmem>>, vector<4x8xbf16>
    %278 = arith.truncf %265 : vector<8x256xf32> to vector<8x256xbf16>
    %cst_87 = arith.constant dense<0.000000e+00> : vector<4x256xf32>
    %279 = tpu.matmul %277, %278, %cst_87 {dimension_numbers = #tpu.dot_dimension_numbers<[1], [0], [0], [1], [0, 0, 1, 1], [], []>} : vector<4x8xbf16>, vector<8x256xbf16>, vector<4x256xf32> -> vector<4x256xf32>
    %280 = vector.extract_strided_slice %279 {offsets = [0, 0], sizes = [1, 256], strides = [1, 1]} : vector<4x256xf32> to vector<1x256xf32>
    %281 = vector.extract_strided_slice %279 {offsets = [1, 0], sizes = [1, 256], strides = [1, 1]} : vector<4x256xf32> to vector<1x256xf32>
    %282 = vector.extract_strided_slice %279 {offsets = [2, 0], sizes = [1, 256], strides = [1, 1]} : vector<4x256xf32> to vector<1x256xf32>
    %283 = vector.extract_strided_slice %279 {offsets = [3, 0], sizes = [1, 256], strides = [1, 1]} : vector<4x256xf32> to vector<1x256xf32>
    %284 = tpu.concatenate %280, %281, %282, %283 in 1 : vector<1x256xf32>, vector<1x256xf32>, vector<1x256xf32>, vector<1x256xf32> -> vector<1x1024xf32>
    %c0_88 = arith.constant 0 : index
    %c0_89 = arith.constant 0 : index
    %285 = vector.load %arg14[%c0_88, %c0_89] : memref<1024x784xbf16, #tpu.memory_space<vmem>>, vector<1024x784xbf16>
    %286 = arith.truncf %284 : vector<1x1024xf32> to vector<1x1024xbf16>
    %cst_90 = arith.constant dense<0.000000e+00> : vector<1x784xf32>
    %287 = tpu.matmul %286, %285, %cst_90 {dimension_numbers = #tpu.dot_dimension_numbers<[1], [0], [0], [1], [0, 0, 1, 1], [], []>} : vector<1x1024xbf16>, vector<1024x784xbf16>, vector<1x784xf32> -> vector<1x784xf32>
    %cst_91 = arith.constant -3.000000e+01 : f32
    %288 = vector.broadcast %cst_91 : f32 to vector<1x784xf32>
    %289 = arith.maximumf %276, %288 : vector<1x784xf32>
    %cst_92 = arith.constant 0.000000e+00 : f32
    %290 = vector.broadcast %cst_92 : f32 to vector<1x784xf32>
    %291 = arith.subf %290, %289 : vector<1x784xf32>
    %292 = math.exp %291 : vector<1x784xf32>
    %cst_93 = arith.constant 1.000000e+00 : f32
    %293 = vector.broadcast %cst_93 : f32 to vector<1x784xf32>
    %294 = arith.addf %293, %292 : vector<1x784xf32>
    %295 = tpu.reciprocal %294 {approx = true} : vector<1x784xf32> -> vector<1x784xf32>
    %cst_94 = arith.constant 0.000000e+00 : f32
    %cst_95 = arith.constant 1.000000e+00 : f32
    %296 = vector.broadcast %cst_94 : f32 to vector<1x784xf32>
    %297 = arith.maximumf %296, %295 : vector<1x784xf32>
    %298 = vector.broadcast %cst_95 : f32 to vector<1x784xf32>
    %299 = arith.minimumf %298, %297 : vector<1x784xf32>
    %c0_96 = arith.constant 0 : index
    %c0_97 = arith.constant 0 : index
    %300 = vector.load %arg15[%c0_96, %c0_97] : memref<2x784xf32, #tpu.memory_space<vmem>>, vector<1x784xf32>
    tpu.vector_store %arg15[%c0_96, %c0_97], %299 {strides = array<i32>} : memref<2x784xf32, #tpu.memory_space<vmem>>, vector<1x784xf32>,
    %cst_98 = arith.constant -3.000000e+01 : f32
    %301 = vector.broadcast %cst_98 : f32 to vector<1x784xf32>
    %302 = arith.maximumf %287, %301 : vector<1x784xf32>
    %cst_99 = arith.constant 0.000000e+00 : f32
    %303 = vector.broadcast %cst_99 : f32 to vector<1x784xf32>
    %304 = arith.subf %303, %302 : vector<1x784xf32>
    %305 = math.exp %304 : vector<1x784xf32>
    %cst_100 = arith.constant 1.000000e+00 : f32
    %306 = vector.broadcast %cst_100 : f32 to vector<1x784xf32>
    %307 = arith.addf %306, %305 : vector<1x784xf32>
    %308 = tpu.reciprocal %307 {approx = true} : vector<1x784xf32> -> vector<1x784xf32>
    %cst_101 = arith.constant 0.000000e+00 : f32
    %cst_102 = arith.constant 1.000000e+00 : f32
    %309 = vector.broadcast %cst_101 : f32 to vector<1x784xf32>
    %310 = arith.maximumf %309, %308 : vector<1x784xf32>
    %311 = vector.broadcast %cst_102 : f32 to vector<1x784xf32>
    %312 = arith.minimumf %311, %310 : vector<1x784xf32>
    %c1_103 = arith.constant 1 : index
    %c0_104 = arith.constant 0 : index
    %313 = vector.load %arg15[%c1_103, %c0_104] : memref<2x784xf32, #tpu.memory_space<vmem>>, vector<1x784xf32>
    tpu.vector_store %arg15[%c1_103, %c0_104], %312 {strides = array<i32>} : memref<2x784xf32, #tpu.memory_space<vmem>>, vector<1x784xf32>,
    return
  }
  func.func @transform_0(%arg0: i32) -> (i32, i32) {
    %c0_i32 = arith.constant 0 : i32
    %c0_i32_0 = arith.constant 0 : i32
    %c0_i32_1 = arith.constant 0 : i32
    return %c0_i32, %c0_i32_0 : i32, i32
  }
  func.func @transform_1(%arg0: i32) -> (i32, i32) {
    %c0_i32 = arith.constant 0 : i32
    %c0_i32_0 = arith.constant 0 : i32
    %c0_i32_1 = arith.constant 0 : i32
    return %c0_i32, %c0_i32_0 : i32, i32
  }
  func.func @transform_2(%arg0: i32) -> (i32, i32) {
    %c0_i32 = arith.constant 0 : i32
    %c0_i32_0 = arith.constant 0 : i32
    %c0_i32_1 = arith.constant 0 : i32
    return %c0_i32, %c0_i32_0 : i32, i32
  }
  func.func @transform_3(%arg0: i32) -> (i32, i32) {
    %c0_i32 = arith.constant 0 : i32
    %c0_i32_0 = arith.constant 0 : i32
    %c0_i32_1 = arith.constant 0 : i32
    return %c0_i32, %c0_i32_0 : i32, i32
  }
  func.func @transform_4(%arg0: i32) -> (i32, i32) {
    %c0_i32 = arith.constant 0 : i32
    %c0_i32_0 = arith.constant 0 : i32
    %c0_i32_1 = arith.constant 0 : i32
    return %c0_i32, %c0_i32_0 : i32, i32
  }
  func.func @transform_5(%arg0: i32) -> (i32, i32) {
    %c0_i32 = arith.constant 0 : i32
    %c0_i32_0 = arith.constant 0 : i32
    %c0_i32_1 = arith.constant 0 : i32
    return %c0_i32, %c0_i32_0 : i32, i32
  }
  func.func @transform_6(%arg0: i32) -> (i32, i32) {
    %c0_i32 = arith.constant 0 : i32
    %c0_i32_0 = arith.constant 0 : i32
    %c0_i32_1 = arith.constant 0 : i32
    return %c0_i32, %c0_i32_0 : i32, i32
  }
  func.func @transform_7(%arg0: i32) -> (i32, i32) {
    %c0_i32 = arith.constant 0 : i32
    %c0_i32_0 = arith.constant 0 : i32
    %c0_i32_1 = arith.constant 0 : i32
    return %c0_i32, %c0_i32_0 : i32, i32
  }
  func.func @transform_8(%arg0: i32) -> (i32, i32) {
    %c0_i32 = arith.constant 0 : i32
    %c0_i32_0 = arith.constant 0 : i32
    %c0_i32_1 = arith.constant 0 : i32
    return %c0_i32, %c0_i32_0 : i32, i32
  }
  func.func @transform_9(%arg0: i32) -> (i32, i32) {
    %c0_i32 = arith.constant 0 : i32
    %c0_i32_0 = arith.constant 0 : i32
    %c0_i32_1 = arith.constant 0 : i32
    return %c0_i32, %c0_i32_0 : i32, i32
  }
  func.func @transform_10(%arg0: i32) -> (i32, i32) {
    %c0_i32 = arith.constant 0 : i32
    %c0_i32_0 = arith.constant 0 : i32
    %c0_i32_1 = arith.constant 0 : i32
    return %c0_i32, %c0_i32_0 : i32, i32
  }
  func.func @transform_11(%arg0: i32) -> (i32, i32) {
    %c0_i32 = arith.constant 0 : i32
    %c0_i32_0 = arith.constant 0 : i32
    %c0_i32_1 = arith.constant 0 : i32
    return %c0_i32, %c0_i32_0 : i32, i32
  }
  func.func @transform_12(%arg0: i32) -> (i32, i32) {
    %c0_i32 = arith.constant 0 : i32
    %c0_i32_0 = arith.constant 0 : i32
    %c0_i32_1 = arith.constant 0 : i32
    return %c0_i32, %c0_i32_0 : i32, i32
  }
  func.func @transform_13(%arg0: i32) -> (i32, i32) {
    %c0_i32 = arith.constant 0 : i32
    %c0_i32_0 = arith.constant 0 : i32
    %c0_i32_1 = arith.constant 0 : i32
    return %c0_i32, %c0_i32_0 : i32, i32
  }
  func.func @transform_14(%arg0: i32) -> (i32, i32) {
    %c0_i32 = arith.constant 0 : i32
    %c0_i32_0 = arith.constant 0 : i32
    %c0_i32_1 = arith.constant 0 : i32
    return %c0_i32, %c0_i32_0 : i32, i32
  }
}

</mosaic_0001>

<bundles_post_ra>
// kernel: generator_forward.1
= control target key start
LH: loop header
LB: loop body
LE: loop exit
PB: predicated region body
PF: predicated region fallthrough
CT: control target
= control target key end

     0   :  { %v10316_v1 = vmov 0   ;;  %vm74_vm0 = vcmask 130048   ;;  %s10319_s25 = smov 32   ;;  %vm394_vm1 = vcmask 261120   ;;  %vm218_vm2 = vcmask 1041408   ;;  %s10320_s28 = smov 16   ;;  %s14368_s1 = inlined_call_operand.vmem [shape: bf16[16,512], index: 1, kind: input, shape index: {}]   ;;  %s14369_s0 = inlined_call_operand.vmem [shape: f32[2,16], index: 0, kind: input, shape index: {}]   ;;  %s14370_s4 = inlined_call_operand.vmem [shape: bf16[256,32], index: 4, kind: input, shape index: {}]   ;;  %s14371_s5 = inlined_call_operand.vmem [shape: bf16[256,64], index: 5, kind: input, shape index: {}]   ;;  %s14372_s2 = inlined_call_operand.vmem [shape: f32[1,32], index: 2, kind: input, shape index: {}]   ;;  %s14373_s3 = inlined_call_operand.vmem [shape: f32[1,32], index: 3, kind: input, shape index: {}]   ;;  %s14374_s6 = inlined_call_operand.vmem [shape: f32[16,1], index: 6, kind: input, shape index: {}]   ;;  %s14375_s7 = inlined_call_operand.vmem [shape: f32[16,1], index: 7, kind: input, shape index: {}]   ;;  %s14376_s8 = inlined_call_operand.vmem [shape: bf16[128,16], index: 8, kind: input, shape index: {}]   ;;  %s14377_s9 = inlined_call_operand.vmem [shape: bf16[1024,256], index: 9, kind: input, shape index: {}]   ;;  %s14378_s10 = inlined_call_operand.vmem [shape: f32[8,1], index: 10, kind: input, shape index: {}]   ;;  %s14379_s11 = inlined_call_operand.vmem [shape: f32[8,1], index: 11, kind: input, shape index: {}]   ;;  %s14380_s13 = inlined_call_operand.vmem [shape: bf16[1024,784], index: 13, kind: input, shape index: {}]   ;;  %s14381_s12 = inlined_call_operand.vmem [shape: bf16[4,8], index: 12, kind: input, shape index: {}]   ;;  %s14382_s14 = inlined_call_operand.vmem [shape: f32[2,784], index: 14, kind: output, shape index: {}]  }
   0x1   :  { %v8925_v0 = vld [vmem:[%s14368_s1 + $0x4] ss:$16 sps:$4 sm:$0xff]   ;;  %110 = vmatprep.mubr.bf16.mxu0 %v10316_v1  ;;  %151 = vmatprep.mubr.bf16.mxu1 %v10316_v1  ;;  %v8927_v2 = vld [vmem:[%s14368_s1 + $0xc] ss:$16 sps:$4 sm:$0xff]   ;;  %v8929_v3 = vld [vmem:[%s14368_s1] ss:$16 sps:$4 sm:$0xff]  }
   0x2   :  { %8883 = vset.pattern.permute.xlu1 %v10316_v1  ;;  %8884 = vset.pattern.permute.xlu0 %v10316_v1  ;;  %v8930_v4 = vld [vmem:[%s14368_s1 + $0x8] ss:$16 sps:$4 sm:$0xff]   ;;  %v48_v5 = vld [vmem:[%s14369_s0] sm:$0x1]  ;;  %v237_v7 = vld [vmem:[%s14369_s0 + $0x1] sm:$0x1] }
   0x3   :  { %78 = vmatprep.subr.bf16.mxu0 %v8925_v0  ;;  %119 = vmatprep.subr.bf16.mxu1 %v8927_v2  ;;  %v53_v6 = vpack.c.bf16 %v48_v5, %v48_v5  ;;  %v238_v8 = vpack.c.bf16 %v237_v7, %v237_v7  ;;  %s10317_s0 = smov 64   ;;  %s10318_s1 = smov 96   ;;  %v10495_v49 = vld [vmem:[%s14370_s4] sm:$0xff]   ;;  %v10512_v52 = vld [vmem:[%s14371_s5 + $0x48] sm:$0xff]   ;;  %v10526_v54 = vld [vmem:[%s14371_s5 + $0x50] sm:$0xff]   ;;  %vm216_vm3 = vcmask 1040384  }
   0x4   :  { %79 = vmatpush1.bf16.msra.mxu0 %v8929_v3  ;;  %120 = vmatpush1.bf16.msra.mxu1 %v8930_v4  ;;  %v10502_v50 = vld [vmem:[%s14371_s5 + $0x40] sm:$0xff]   ;;  %v10520_v53 = vld [vmem:[%s14371_s5 + $0x8] sm:$0xff]   ;;  %v10531_v55 = vld [vmem:[%s14371_s5 + $0x10] sm:$0xff]   ;;  %vm220_vm4 = vcmask 1042432   ;;  %vm222_vm5 = vcmask 1043456   ;;  %vm224_vm6 = vcmask 1044480  }
   0x5   :  { %242 = vmatprep.subr.bf16.mxu0 %v8925_v0  ;;  %283 = vmatprep.subr.bf16.mxu1 %v8927_v2  ;;  %v10507_v51 = vld [vmem:[%s14371_s5] sm:$0xff]   ;;  %v10536_v56 = vld [vmem:[%s14371_s5 + $0x58] sm:$0xff]   ;;  %v10560_v60 = vld [vmem:[%s14371_s5 + $0x68] sm:$0xff]   ;;  %vm226_vm7 = vcmask 1045504   ;;  %vm228_vm8 = vcmask 1046528   ;;  %s10322_s29 = smov 80  }
   0x6   :  { %v10544_v57 = vld [vmem:[%s14371_s5 + $0x18] sm:$0xff]   ;;  %v10550_v58 = vld [vmem:[%s14371_s5 + $0x60] sm:$0xff]   ;;  %v10568_v61 = vld [vmem:[%s14371_s5 + $0x28] sm:$0xff]   ;;  %vm917_vm9 = vcmask 392192   ;;  %vm920_vm10 = vcmask 523264   ;;  %vm923_vm11 = vcmask 654336  }
   0x7   :  { %7587 = vmatmul.mubr.msk.bf16.vlgmr.msra.gmra.mrb[0].mxu0 %vm74_vm0, %v53_v6  ;;  %7588 = vmatmul.mubr.msk.bf16.vlgmr.msra.gmra.mrb[0].mxu1 %vm74_vm0, %v53_v6  ;;  %v10555_v59 = vld [vmem:[%s14371_s5 + $0x20] sm:$0xff]   ;;  %v10574_v0 = vld [vmem:[%s14371_s5 + $0x70] sm:$0xff]   ;;  %v10584_v5 = vld [vmem:[%s14371_s5 + $0x78] sm:$0xff]   ;;  %vm926_vm12 = vcmask 785408   ;;  %vm929_vm13 = vcmask 916480   ;;  %vm3084_vm14 = vcmask 64512  }
   0x8   :  { %243 = vmatpush1.bf16.msra.mxu0 %v8929_v3  ;;  %274 = vmatprep.mubr.bf16.mxu0 %v10316_v1  ;;  %v10579_v2 = vld [vmem:[%s14371_s5 + $0x30] sm:$0xff]  }
   0x9   :  { %284 = vmatpush1.bf16.msra.mxu1 %v8930_v4  ;;  %315 = vmatprep.mubr.bf16.mxu1 %v10316_v1 }
   0xa   :  { %8316 = vmatprep.subr.bf16.mxu0 %v10502_v50 }
   0xf   :  { %7589 = vmatmul.mubr.msk.bf16.vlgmr.msra.gmra.mrb[4].mxu0 %vm74_vm0, %v238_v8  ;;  %7590 = vmatmul.mubr.msk.bf16.vlgmr.msra.gmra.mrb[4].mxu1 %vm74_vm0, %v238_v8 }
  0x10   :  { %8534 = vmatprep.mubr.msk.bf16.mxu1 %vm394_vm1, %v10495_v49  ;;  %8317 = vmatpush3.bf16.msra.mxu0 %v10507_v51 }
  0x11   :  { %8318 = vmatprep.subr.bf16.mxu0 %v10512_v52 }
  0x14   :  { %8319 = vmatpush3.bf16.msra.mxu0 %v10520_v53 }
  0x15   :  { %8320 = vmatprep.subr.bf16.mxu0 %v10526_v54 }
  0x18   :  { %8321 = vmatpush3.bf16.msra.mxu0 %v10531_v55 }
  0x19   :  { %8322 = vmatprep.subr.bf16.mxu0 %v10536_v56 }
  0x1c   :  { %8323 = vmatpush3.bf16.msra.mxu0 %v10544_v57 }
  0x1d   :  { %8324 = vmatprep.subr.bf16.mxu0 %v10550_v58 }
  0x20   :  { %8325 = vmatpush3.bf16.msra.mxu0 %v10555_v59 }
  0x21   :  { %8326 = vmatprep.subr.bf16.mxu0 %v10560_v60 }
  0x24   :  { %8327 = vmatpush3.bf16.msra.mxu0 %v10568_v61 }
  0x25   :  { %8328 = vmatprep.subr.bf16.mxu0 %v10574_v0 }
  0x28   :  { %8329 = vmatpush3.bf16.msra.mxu0 %v10579_v2 }
  0x29   :  { %8330 = vmatprep.subr.bf16.mxu0 %v10584_v5 }
  0xda   :  { %v10428_v9 = vpop.f32.mrb[0].mxu0  ;;  %v10430_v10 = vpop.f32.mrb[0].mxu1 }
  0xdb   :  { %v10432_v11 = vpop.f32.mrb[1].mxu0  ;;  %v10434_v12 = vpop.f32.mrb[1].mxu1  ;;  %v193_v13 = vrot.slane %v10430_v10, 6  ;;  %v161_v14 = vrot.slane %v10428_v9, 7  ;;  %v197_v19 = vrot.slane %v10430_v10, 5  ;;  %v189_v20 = vrot.slane %v10430_v10, 7 }
  0xdc   :  { %v116_v15 = vpop.f32.mrb[2].mxu0  ;;  %v157_v16 = vpop.f32.mrb[2].mxu1  ;;  %v204_v23 = vrot.slane %v10434_v12, 3  ;;  %v165_v24 = vrot.slane %v10428_v9, 6  ;;  %v208_v31 = vrot.slane %v10434_v12, 2  ;;  %v169_v32 = vrot.slane %v10428_v9, 5 }
  0xdd   :  { %194 = vrot.lane.b32.xlu1 %v193_v13, %s10317_s0  ;;  %v158_v17 = vpop.f32.mrb[3].mxu1  ;;  %162 = vrot.lane.b32.xlu0 %v161_v14, %s10318_s1  ;;  %v117_v18 = vpop.f32.mrb[3].mxu0  ;;  %v212_v33 = vrot.slane %v10434_v12, 1  ;;  %v176_v34 = vrot.slane %v10432_v11, 3  ;;  %v180_v36 = vrot.slane %v10432_v11, 2  ;;  %v184_v38 = vrot.slane %v10432_v11, 1 }
  0xde   :  { %v202_v7 = vrot.slane %v10434_v12, 4  ;;  %v10597_v14 = vld [vmem:[%s14371_s5 + $0x38] sm:$0xff]   ;;  %v174_v17 = vrot.slane %v10432_v11, 4  ;;  %s10323_s5 = smov 112  }
  0xdf   :  { %8331 = vmatpush3.bf16.msra.mxu0 %v10597_v14 }
  0xe1   :  { %198 = vrot.lane.b32.xlu1 %v197_v19, %s10319_s25  ;;  %190 = vrot.lane.b32.xlu0 %v189_v20, %s10318_s1 }
  0xe2   :  { %v10444_v21 = vpop.f32.mrb[4].mxu0  ;;  %v10446_v22 = vpop.f32.mrb[4].mxu1 }
  0xe3   :  { %v10450_v25 = vpop.f32.mrb[5].mxu0  ;;  %v10452_v26 = vpop.f32.mrb[5].mxu1  ;;  %v325_v35 = vrot.slane %v10444_v21, 7  ;;  %v353_v37 = vrot.slane %v10446_v22, 7  ;;  %v329_v39 = vrot.slane %v10444_v21, 6  ;;  %v357_v40 = vrot.slane %v10446_v22, 6 }
  0xe4   :  { %v280_v27 = vpop.f32.mrb[6].mxu0  ;;  %v321_v28 = vpop.f32.mrb[6].mxu1  ;;  %v333_v41 = vrot.slane %v10444_v21, 5  ;;  %v361_v42 = vrot.slane %v10446_v22, 5  ;;  %v368_v43 = vrot.slane %v10452_v26, 3  ;;  %v340_v44 = vrot.slane %v10450_v25, 3 }
  0xe5   :  { %205 = vrot.lane.b32.xlu1 %v204_v23, %s10318_s1  ;;  %166 = vrot.lane.b32.xlu0 %v165_v24, %s10317_s0  ;;  %v281_v29 = vpop.f32.mrb[7].mxu0  ;;  %v322_v30 = vpop.f32.mrb[7].mxu1  ;;  %v372_v45 = vrot.slane %v10452_v26, 2  ;;  %v344_v46 = vrot.slane %v10450_v25, 2  ;;  %v376_v47 = vrot.slane %v10452_v26, 1  ;;  %v348_v48 = vrot.slane %v10450_v25, 1 }
  0xe9   :  { %209 = vrot.lane.b32.xlu1 %v208_v31, %s10317_s0  ;;  %170 = vrot.lane.b32.xlu0 %v169_v32, %s10319_s25 }
  0xed   :  { %213 = vrot.lane.b32.xlu1 %v212_v33, %s10319_s25  ;;  %177 = vrot.lane.b32.xlu0 %v176_v34, %s10318_s1 }
  0xf1   :  { %181 = vrot.lane.b32.xlu0 %v180_v36, %s10317_s0  ;;  %326 = vrot.lane.b32.xlu1 %v325_v35, %s10318_s1 }
  0xf5   :  { %185 = vrot.lane.b32.xlu0 %v184_v38, %s10319_s25  ;;  %354 = vrot.lane.b32.xlu1 %v353_v37, %s10318_s1 }
  0xf9   :  { %330 = vrot.lane.b32.xlu0 %v329_v39, %s10317_s0  ;;  %358 = vrot.lane.b32.xlu1 %v357_v40, %s10317_s0 }
  0xfd   :  { %334 = vrot.lane.b32.xlu0 %v333_v41, %s10319_s25  ;;  %362 = vrot.lane.b32.xlu1 %v361_v42, %s10319_s25 }
 0x101   :  { %369 = vrot.lane.b32.xlu1 %v368_v43, %s10318_s1  ;;  %341 = vrot.lane.b32.xlu0 %v340_v44, %s10318_s1 }
 0x105   :  { %373 = vrot.lane.b32.xlu1 %v372_v45, %s10317_s0  ;;  %345 = vrot.lane.b32.xlu0 %v344_v46, %s10317_s0 }
 0x109   :  { %377 = vrot.lane.b32.xlu1 %v376_v47, %s10319_s25  ;;  %349 = vrot.lane.b32.xlu0 %v348_v48, %s10319_s25 }
 0x14f   :  { %v195_v62 = vpop.permute.xlu1 %194  ;;  %v163_v63 = vpop.permute.xlu0 %162 }
 0x150   :  { %v217_v12 = vsel %vm216_vm3, %v10428_v9, %v163_v63  ;;  %v366_v63 = vrot.slane %v10452_v26, 4 }
 0x153   :  { %v199_v3 = vpop.permute.xlu1 %198  ;;  %v191_v4 = vpop.permute.xlu0 %190 }
 0x154   :  { %v230_v6 = vsel %vm216_vm3, %v10430_v10, %v191_v4 }
 0x155   :  { %v231_v8 = vsel %vm218_vm2, %v230_v6, %v195_v62  ;;  %v338_v62 = vrot.slane %v10450_v25, 4 }
 0x156   :  { %v232_v13 = vsel %vm220_vm4, %v231_v8, %v199_v3 }
 0x157   :  { %v206_v15 = vpop.permute.xlu1 %205  ;;  %v233_v16 = vsel %vm222_vm5, %v232_v13, %v202_v7  ;;  %v167_v10 = vpop.permute.xlu0 %166 }
 0x158   :  { %v219_v18 = vsel %vm218_vm2, %v217_v12, %v167_v10  ;;  %v234_v29 = vsel %vm224_vm6, %v233_v16, %v206_v15 }
 0x15b   :  { %v210_v19 = vpop.permute.xlu1 %209  ;;  %v171_v20 = vpop.permute.xlu0 %170 }
 0x15c   :  { %v221_v23 = vsel %vm220_vm4, %v219_v18, %v171_v20  ;;  %v235_v30 = vsel %vm226_vm7, %v234_v29, %v210_v19 }
 0x15d   :  { %v223_v24 = vsel %vm222_vm5, %v221_v23, %v174_v17 }
 0x15f   :  { %v214_v27 = vpop.permute.xlu1 %213  ;;  %v178_v28 = vpop.permute.xlu0 %177 }
 0x160   :  { %v10610_v11 = vsel %vm228_vm8, %v235_v30, %v214_v27  ;;  %v225_v32 = vsel %vm224_vm6, %v223_v24, %v178_v28 }
 0x161   :  { %v416_v33 = vmul.f32 %v10610_v11, %v10610_v11  ;;  %v396_v38 = vsel %vm394_vm1, %v10610_v11, 0.0 }
 0x163   :  { %v182_v9 = vpop.permute.xlu0 %181  ;;  %v327_v31 = vpop.permute.xlu1 %326  ;;  %v418_v42 = vsel %vm394_vm1, %v416_v33, 0.0 }
 0x164   :  { %v227_v34 = vsel %vm226_vm7, %v225_v32, %v182_v9  ;;  %v380_v47 = vsel %vm216_vm3, %v10444_v21, %v327_v31 }
 0x167   :  { %v186_v35 = vpop.permute.xlu0 %185  ;;  %v355_v36 = vpop.permute.xlu1 %354 }
 0x168   :  { %v10617_v37 = vsel %vm228_vm8, %v227_v34, %v186_v35  ;;  %v387_v48 = vsel %vm216_vm3, %v10446_v22, %v355_v36 }
 0x169   :  { %v395_v39 = vsel %vm394_vm1, %v10617_v37, 0.0  ;;  %v415_v40 = vmul.f32 %v10617_v37, %v10617_v37 }
 0x16a   :  { %v397_v41 = vadd.f32 %v396_v38, %v395_v39 }
 0x16b   :  { %v417_v43 = vsel %vm394_vm1, %v415_v40, 0.0  ;;  %v331_v44 = vpop.permute.xlu0 %330  ;;  %v359_v45 = vpop.permute.xlu1 %358 }
 0x16c   :  { %v419_v46 = vadd.f32 %v418_v42, %v417_v43  ;;  %v381_v3 = vsel %vm218_vm2, %v380_v47, %v331_v44  ;;  %v388_v4 = vsel %vm218_vm2, %v387_v48, %v359_v45  ;;  %v398_v10 = vrot.slane %v397_v41, 4 }
 0x16e   :  { %v420_v26 = vrot.slane %v419_v46, 4  ;;  %v399_v17 = vadd.f32 %v398_v10, %v397_v41 }
 0x16f   :  { %v335_v6 = vpop.permute.xlu0 %334  ;;  %v363_v7 = vpop.permute.xlu1 %362 }
 0x170   :  { %v382_v8 = vsel %vm220_vm4, %v381_v3, %v335_v6  ;;  %v389_v13 = vsel %vm220_vm4, %v388_v4, %v363_v7  ;;  %v421_v28 = vadd.f32 %v420_v26, %v419_v46  ;;  %v400_v34 = vrot.slane %v399_v17, 2 }
 0x171   :  { %v390_v15 = vsel %vm222_vm5, %v389_v13, %v366_v63  ;;  %v383_v21 = vsel %vm222_vm5, %v382_v8, %v338_v62 }
 0x172   :  { %v422_v39 = vrot.slane %v421_v28, 2  ;;  %v401_v42 = vadd.f32 %v400_v34, %v399_v17 }
 0x173   :  { %v370_v16 = vpop.permute.xlu1 %369  ;;  %v342_v22 = vpop.permute.xlu0 %341 }
 0x174   :  { %v391_v18 = vsel %vm224_vm6, %v390_v15, %v370_v16  ;;  %v384_v19 = vsel %vm224_vm6, %v383_v21, %v342_v22  ;;  %v423_v45 = vadd.f32 %v422_v39, %v421_v28  ;;  %v402_v48 = vrot.slane %v401_v42, 1 }
 0x176   :  { %v424_v3 = vrot.slane %v423_v45, 1  ;;  %v403_v7 = vadd.f32 %v402_v48, %v401_v42 }
 0x177   :  { %v374_v25 = vpop.permute.xlu1 %373  ;;  %v346_v12 = vpop.permute.xlu0 %345 }
 0x178   :  { %v392_v20 = vsel %vm226_vm7, %v391_v18, %v374_v25  ;;  %v385_v23 = vsel %vm226_vm7, %v384_v19, %v346_v12  ;;  %v425_v15 = vadd.f32 %v424_v3, %v423_v45  ;;  %v453_v19 = vlaneseq }
 0x17a   :  { %vm13646_vm15 = vcmp.lt.s32.totalorder %v453_v19, 784 }
 0x17b   :  { %v378_v24 = vpop.permute.xlu1 %377  ;;  %v350_v27 = vpop.permute.xlu0 %349 }
 0x17c   :  { %v393_v29 = vsel %vm228_vm8, %v392_v20, %v378_v24  ;;  %v386_v30 = vsel %vm228_vm8, %v385_v23, %v350_v27  ;;  %v10650_v20 = vshrl.u32 %v453_v19, 7  ;;  %v445_v23 = vld [vmem:[%s14372_s2] sm:$0x1]  ;;  %v10093_v19 = vld [vmem:[%s14380_s13 + $0xc4c] ss:$28 sps:$4 sm:$0xff]  }
 0x17d   :  { %v406_v9 = vsel %vm394_vm1, %v393_v29, 0.0  ;;  %v428_v31 = vmul.f32 %v393_v29, %v393_v29  ;;  %v405_v32 = vsel %vm394_vm1, %v386_v30, 0.0  ;;  %v427_v33 = vmul.f32 %v386_v30, %v386_v30 }
 0x17e   :  { %v407_v35 = vadd.f32 %v406_v9, %v405_v32  ;;  %v455_v24 = vsub.s32 0, %v10650_v20  ;;  %v449_v9 = vld [vmem:[%s14373_s3] sm:$0x1] }
 0x17f   :  { %v430_v36 = vsel %vm394_vm1, %v428_v31, 0.0  ;;  %v429_v38 = vsel %vm394_vm1, %v427_v33, 0.0 }
 0x180   :  { %v408_v40 = vrot.slane %v407_v35, 4  ;;  %v431_v41 = vadd.f32 %v430_v36, %v429_v38 }
 0x182   :  { %v409_v43 = vadd.f32 %v408_v40, %v407_v35  ;;  %v432_v44 = vrot.slane %v431_v41, 4 }
 0x184   :  { %v410_v46 = vrot.slane %v409_v43, 2  ;;  %v433_v47 = vadd.f32 %v432_v44, %v431_v41 }
 0x186   :  { %v411_v62 = vadd.f32 %v410_v46, %v409_v43  ;;  %v434_v63 = vrot.slane %v433_v47, 2 }
 0x188   :  { %v412_v4 = vrot.slane %v411_v62, 1  ;;  %v435_v6 = vadd.f32 %v434_v63, %v433_v47 }
 0x18a   :  { %v413_v8 = vadd.f32 %v412_v4, %v411_v62  ;;  %v436_v13 = vrot.slane %v435_v6, 1 }
 0x18c   :  { %v414_v21 = vadd.f32 %v413_v8, %v403_v7  ;;  %v437_v16 = vadd.f32 %v436_v13, %v435_v6 }
 0x18e   :  { %v438_v22 = vadd.f32 %v437_v16, %v425_v15  ;;  %v440_v10 = vmul.f32 0.03125, %v414_v21 }
 0x190   :  { %v441_v25 = vmul.f32 0.03125, %v438_v22  ;;  %v442_v12 = vmul.f32 %v440_v10, %v440_v10 }
 0x192   :  { %v443_v26 = vsub.f32 %v441_v25, %v442_v12 }
 0x194   :  { %v444_v17 = vmax.f32 %v443_v26, 0.0 }
 0x196   :  { %v446_v18 = vadd.f32 1e-05, %v444_v17 }
 0x198   :  { %9803 = vrsqrt.f32 %v446_v18 }
 0x1a2   :  { %v9804_v27 = vpop.eup %9803 }
 0x1a3   :  { %v448_v28 = vmul.f32 %v9804_v27, %v445_v23 }
 0x1a5   :  { %v450_v31 = vmul.f32 %v448_v28, %v440_v10  ;;  %v456_v32 = vrot.slane %v448_v28, %v455_v24 }
 0x1a7   :  { %v451_v33 = vsub.f32 %v449_v9, %v450_v31  ;;  %v470_v34 = vmul.f32 %v456_v32, %v386_v30  ;;  %v458_v35 = vmul.f32 %v456_v32, %v10617_v37  ;;  %v459_v36 = vmul.f32 %v456_v32, %v10610_v11  ;;  %v10669_v11 = vld [vmem:[%s14370_s4 + $0x8] sm:$0xff]   ;;  %v10674_v37 = vld [vmem:[%s14370_s4 + $0x10] sm:$0xff]  }
 0x1a8   :  { %v471_v38 = vmul.f32 %v456_v32, %v393_v29  ;;  %v10691_v29 = vld [vmem:[%s14370_s4 + $0x20] sm:$0xff]  }
 0x1a9   :  { %v464_v39 = vrot.slane %v451_v33, %v455_v24 }
 0x1ab   :  { %v472_v40 = vadd.f32 %v470_v34, %v464_v39  ;;  %v466_v41 = vadd.f32 %v464_v39, %v458_v35  ;;  %v467_v42 = vadd.f32 %v464_v39, %v459_v36  ;;  %v473_v43 = vadd.f32 %v471_v38, %v464_v39 }
 0x1ad   :  { %v474_v44 = vmax.f32 %v472_v40, 0.0  ;;  %v468_v45 = vmax.f32 %v466_v41, 0.0  ;;  %v469_v46 = vmax.f32 %v467_v42, 0.0  ;;  %v475_v47 = vmax.f32 %v473_v43, 0.0 }
 0x1af   :  { %v508_v48 = vpack.c.bf16 %v469_v46, %v468_v45  ;;  %v10661_v62 = vpack.c.bf16 %v475_v47, %v474_v44 }
 0x1b1   :  { %8732 = vmatprep.subr.msk.bf16.mxu1 %vm394_vm1, %v508_v48  ;;  %v638_v30 = vsel %vm394_vm1, %v508_v48, 0 }
 0x1b2   :  { %8533 = vmatpush3.bf16.xpose.msra.mxu1 %v638_v30 }
 0x1b3   :  { %8277 = vmatprep.subr.bf16.mxu1 %v10502_v50  ;;  %v10685_v50 = vld [vmem:[%s14370_s4 + $0x18] sm:$0xff]  }
 0x1b9   :  { %8535 = vmatmul.mubr.msk.bf16.vlgmr.msra.gmra.mrb[8].mxu1 %vm394_vm1, %v10669_v11 }
 0x1ba   :  { %8278 = vmatpush3.bf16.msra.mxu1 %v10507_v51  ;;  %8538 = vmatprep.mubr.msk.bf16.mxu1 %vm394_vm1, %v10674_v37  ;;  %v10703_v51 = vld [vmem:[%s14370_s4 + $0x28] sm:$0xff]  }
 0x1bb   :  { %8279 = vmatprep.subr.bf16.mxu1 %v10512_v52  ;;  %v10709_v52 = vld [vmem:[%s14370_s4 + $0x30] sm:$0xff]  }
 0x1be   :  { %8280 = vmatpush3.bf16.msra.mxu1 %v10520_v53  ;;  %v10721_v53 = vld [vmem:[%s14370_s4 + $0x38] sm:$0xff]  }
 0x1bf   :  { %8281 = vmatprep.subr.bf16.mxu1 %v10526_v54  ;;  %v10727_v54 = vld [vmem:[%s14370_s4 + $0x40] sm:$0xff]  }
 0x1c1   :  { %8539 = vmatmul.mubr.msk.bf16.gmra.mrb[12].mxu1 %vm394_vm1, %v10685_v50 }
 0x1c2   :  { %8282 = vmatpush3.bf16.msra.mxu1 %v10531_v55  ;;  %8542 = vmatprep.mubr.msk.bf16.mxu1 %vm394_vm1, %v10691_v29  ;;  %v10739_v55 = vld [vmem:[%s14370_s4 + $0x48] sm:$0xff]  }
 0x1c3   :  { %8283 = vmatprep.subr.bf16.mxu1 %v10536_v56  ;;  %v10745_v56 = vld [vmem:[%s14370_s4 + $0x50] sm:$0xff]  }
 0x1c6   :  { %8284 = vmatpush3.bf16.msra.mxu1 %v10544_v57  ;;  %v10756_v57 = vld [vmem:[%s14370_s4 + $0x58] sm:$0xff]  }
 0x1c7   :  { %8285 = vmatprep.subr.bf16.mxu1 %v10550_v58  ;;  %v10761_v58 = vld [vmem:[%s14370_s4 + $0x60] sm:$0xff]  }
 0x1c9   :  { %8543 = vmatmul.mubr.msk.bf16.gmra.mrb[16].mxu1 %vm394_vm1, %v10703_v51 }
 0x1ca   :  { %8286 = vmatpush3.bf16.msra.mxu1 %v10555_v59  ;;  %8546 = vmatprep.mubr.msk.bf16.mxu1 %vm394_vm1, %v10709_v52  ;;  %v10770_v59 = vld [vmem:[%s14370_s4 + $0x68] sm:$0xff]  }
 0x1cb   :  { %8287 = vmatprep.subr.bf16.mxu1 %v10560_v60  ;;  %v10775_v60 = vld [vmem:[%s14370_s4 + $0x70] sm:$0xff]  }
 0x1ce   :  { %8288 = vmatpush3.bf16.msra.mxu1 %v10568_v61  ;;  %v10784_v61 = vld [vmem:[%s14370_s4 + $0x78] sm:$0xff]   ;;  %s10321_s4 = smov 48  }
 0x1cf   :  { %8289 = vmatprep.subr.bf16.mxu1 %v10574_v0 }
 0x1d1   :  { %8547 = vmatmul.mubr.msk.bf16.gmra.mrb[20].mxu1 %vm394_vm1, %v10721_v53 }
 0x1d2   :  { %8290 = vmatpush3.bf16.msra.mxu1 %v10579_v2  ;;  %8550 = vmatprep.mubr.msk.bf16.mxu1 %vm394_vm1, %v10727_v54 }
 0x1d3   :  { %8291 = vmatprep.subr.bf16.mxu1 %v10584_v5 }
 0x1d6   :  { %8292 = vmatpush3.bf16.msra.mxu1 %v10597_v14 }
 0x1d7   :  { %8733 = vmatprep.subr.msk.bf16.mxu1 %vm394_vm1, %v10661_v62 }
 0x1d9   :  { %8551 = vmatmul.mubr.msk.bf16.gmra.mrb[24].mxu1 %vm394_vm1, %v10739_v55 }
 0x1da   :  { %8554 = vmatprep.mubr.msk.bf16.mxu1 %vm394_vm1, %v10745_v56 }
 0x1e1   :  { %8555 = vmatmul.mubr.msk.bf16.gmra.mrb[28].mxu1 %vm394_vm1, %v10756_v57 }
 0x1e2   :  { %8558 = vmatprep.mubr.msk.bf16.mxu1 %vm394_vm1, %v10761_v58 }
 0x1e9   :  { %8559 = vmatmul.mubr.msk.bf16.gmra.mrb[32].mxu1 %vm394_vm1, %v10770_v59 }
 0x1ea   :  { %8562 = vmatprep.mubr.msk.bf16.mxu1 %vm394_vm1, %v10775_v60 }
 0x1f1   :  { %8563 = vmatmul.mubr.msk.bf16.gmra.mrb[36].mxu1 %vm394_vm1, %v10784_v61 }
 0x28c   :  { %v8536_v0 = vpop.f32.mrb[8].mxu1 }
 0x28d   :  { %v10788_v2 = vpop.f32.mrb[9].mxu1 }
 0x28e   :  { %v8537_v5 = vpop.f32.mrb[10].mxu1 }
 0x28f   :  { %v8743_v14 = vpack.i.bf16 %v8537_v5, %v8536_v0  ;;  %v10790_v63 = vpop.f32.mrb[11].mxu1 }
 0x291   :  { %8744 = vrot.lane.b32.xlu1 %v8743_v14, %s10320_s28 }
 0x294   :  { %v8540_v3 = vpop.f32.mrb[12].mxu1 }
 0x295   :  { %v690_v4 = vpop.f32.mrb[13].mxu1 }
 0x296   :  { %v8541_v6 = vpop.f32.mrb[14].mxu1 }
 0x297   :  { %v8748_v7 = vpack.i.bf16 %v8541_v6, %v8540_v3  ;;  %v693_v8 = vpop.f32.mrb[15].mxu1 }
 0x298   :  { %v8753_v13 = vpack.i.bf16 %v693_v8, %v690_v4 }
 0x299   :  { %8749 = vrot.lane.b32.xlu1 %v8748_v7, %s10321_s4 }
 0x29c   :  { %v8544_v15 = vpop.f32.mrb[16].mxu1 }
 0x29d   :  { %8754 = vrot.lane.b32.xlu1 %v8753_v13, %s10319_s25  ;;  %v706_v21 = vpop.f32.mrb[17].mxu1 }
 0x29e   :  { %v8545_v16 = vpop.f32.mrb[18].mxu1 }
 0x29f   :  { %v8758_v22 = vpack.i.bf16 %v8545_v16, %v8544_v15  ;;  %v709_v10 = vpop.f32.mrb[19].mxu1 }
 0x2a0   :  { %v8763_v25 = vpack.i.bf16 %v709_v10, %v706_v21 }
 0x2a1   :  { %8759 = vrot.lane.b32.xlu1 %v8758_v22, %s10322_s29 }
 0x2a4   :  { %v8548_v12 = vpop.f32.mrb[20].mxu1 }
 0x2a5   :  { %8764 = vrot.lane.b32.xlu1 %v8763_v25, %s10317_s0  ;;  %v722_v26 = vpop.f32.mrb[21].mxu1 }
 0x2a6   :  { %v8549_v17 = vpop.f32.mrb[22].mxu1 }
 0x2a7   :  { %v8808_v18 = vpack.i.bf16 %v8549_v17, %v8548_v12  ;;  %v725_v23 = vpop.f32.mrb[23].mxu1 }
 0x2a8   :  { %v8768_v24 = vpack.i.bf16 %v725_v23, %v722_v26 }
 0x2aa   :  { %8769 = vrot.lane.b32.xlu1 %v8768_v24, %s10318_s1 }
 0x2ac   :  { %v8552_v27 = vpop.f32.mrb[24].mxu1 }
 0x2ad   :  { %v10798_v28 = vpop.f32.mrb[25].mxu1 }
 0x2ae   :  { %8809 = vrot.lane.b32.xlu1 %v8808_v18, %s10323_s5  ;;  %v8553_v9 = vpop.f32.mrb[26].mxu1 }
 0x2af   :  { %v8773_v31 = vpack.i.bf16 %v8553_v9, %v8552_v27  ;;  %v10801_v32 = vpop.f32.mrb[27].mxu1 }
 0x2b1   :  { %8774 = vrot.lane.b32.xlu0 %v8773_v31, %s10320_s28 }
 0x2b4   :  { %v8556_v33 = vpop.f32.mrb[28].mxu1 }
 0x2b5   :  { %v754_v34 = vpop.f32.mrb[29].mxu1 }
 0x2b6   :  { %v8557_v35 = vpop.f32.mrb[30].mxu1 }
 0x2b7   :  { %v8778_v36 = vpack.i.bf16 %v8557_v35, %v8556_v33  ;;  %v757_v38 = vpop.f32.mrb[31].mxu1 }
 0x2b8   :  { %v8783_v39 = vpack.i.bf16 %v757_v38, %v754_v34 }
 0x2b9   :  { %8779 = vrot.lane.b32.xlu0 %v8778_v36, %s10321_s4 }
 0x2bc   :  { %v8560_v40 = vpop.f32.mrb[32].mxu1 }
 0x2bd   :  { %8784 = vrot.lane.b32.xlu0 %v8783_v39, %s10319_s25  ;;  %v770_v41 = vpop.f32.mrb[33].mxu1 }
 0x2be   :  { %v8561_v42 = vpop.f32.mrb[34].mxu1 }
 0x2bf   :  { %v8788_v43 = vpack.i.bf16 %v8561_v42, %v8560_v40  ;;  %v773_v44 = vpop.f32.mrb[35].mxu1 }
 0x2c0   :  { %v8793_v45 = vpack.i.bf16 %v773_v44, %v770_v41 }
 0x2c1   :  { %8789 = vrot.lane.b32.xlu0 %v8788_v43, %s10322_s29 }
 0x2c4   :  { %v8564_v46 = vpop.f32.mrb[36].mxu1 }
 0x2c5   :  { %8794 = vrot.lane.b32.xlu0 %v8793_v45, %s10317_s0  ;;  %v786_v47 = vpop.f32.mrb[37].mxu1 }
 0x2c6   :  { %v8565_v48 = vpop.f32.mrb[38].mxu1 }
 0x2c7   :  { %v8803_v30 = vpack.i.bf16 %v8565_v48, %v8564_v46  ;;  %v789_v0 = vpop.f32.mrb[39].mxu1 }
 0x2c8   :  { %v8798_v5 = vpack.i.bf16 %v789_v0, %v786_v47 }
 0x2ca   :  { %8799 = vrot.lane.b32.xlu0 %v8798_v5, %s10318_s1 }
 0x2ce   :  { %8804 = vrot.lane.b32.xlu0 %v8803_v30, %s10323_s5 }
 0x303   :  { %v8745_v14 = vpop.permute.xlu1 %8744 }
 0x304   :  { %v8747_v7 = vunpack.i.h.bf16 %v8745_v14  ;;  %v8746_v8 = vunpack.i.l.bf16 %v8745_v14 }
 0x306   :  { %v913_v16 = vsel %vm74_vm0, %v10788_v2, %v8746_v8  ;;  %v914_v22 = vsel %vm74_vm0, %v10790_v63, %v8747_v7 }
 0x30b   :  { %v8750_v3 = vpop.permute.xlu1 %8749 }
 0x30c   :  { %v8752_v17 = vunpack.i.h.bf16 %v8750_v3  ;;  %v8751_v18 = vunpack.i.l.bf16 %v8750_v3 }
 0x30f   :  { %v8755_v4 = vpop.permute.xlu1 %8754 }
 0x310   :  { %v8757_v13 = vunpack.i.h.bf16 %v8755_v4  ;;  %v8756_v15 = vunpack.i.l.bf16 %v8755_v4 }
 0x312   :  { %v916_v10 = vsel %vm394_vm1, %v914_v22, %v8757_v13  ;;  %v915_v25 = vsel %vm394_vm1, %v913_v16, %v8756_v15 }
 0x313   :  { %v8760_v6 = vpop.permute.xlu1 %8759  ;;  %v918_v24 = vsel %vm917_vm9, %v915_v25, %v8751_v18  ;;  %v919_v27 = vsel %vm917_vm9, %v916_v10, %v8752_v17 }
 0x314   :  { %v8762_v33 = vunpack.i.h.bf16 %v8760_v6  ;;  %v8761_v34 = vunpack.i.l.bf16 %v8760_v6 }
 0x317   :  { %v8765_v21 = vpop.permute.xlu1 %8764 }
 0x318   :  { %v8767_v12 = vunpack.i.h.bf16 %v8765_v21  ;;  %v8766_v26 = vunpack.i.l.bf16 %v8765_v21 }
 0x31a   :  { %v922_v2 = vsel %vm920_vm10, %v919_v27, %v8767_v12  ;;  %v921_v63 = vsel %vm920_vm10, %v918_v24, %v8766_v26 }
 0x31b   :  { %v924_v36 = vsel %vm923_vm11, %v921_v63, %v8761_v34  ;;  %v925_v38 = vsel %vm923_vm11, %v922_v2, %v8762_v33 }
 0x31c   :  { %v8770_v23 = vpop.permute.xlu1 %8769 }
 0x31d   :  { %v8772_v9 = vunpack.i.h.bf16 %v8770_v23  ;;  %v8771_v31 = vunpack.i.l.bf16 %v8770_v23 }
 0x31f   :  { %v928_v41 = vsel %vm926_vm12, %v925_v38, %v8772_v9  ;;  %v927_v42 = vsel %vm926_vm12, %v924_v36, %v8771_v31  ;;  %v1119_v38 = vsel %vm394_vm1, %v10661_v62, 0 }
 0x320   :  { %v8810_v35 = vpop.permute.xlu1 %8809 }
 0x321   :  { %v8812_v39 = vunpack.i.h.bf16 %v8810_v35  ;;  %v8811_v40 = vunpack.i.l.bf16 %v8810_v35 }
 0x323   :  { %v930_v43 = vsel %vm929_vm13, %v927_v42, %v8811_v40  ;;  %v931_v44 = vsel %vm929_vm13, %v928_v41, %v8812_v39  ;;  %v8775_v46 = vpop.permute.xlu0 %8774 }
 0x324   :  { %v978_v45 = vpack.c.bf16 %v931_v44, %v930_v43  ;;  %v8777_v0 = vunpack.i.h.bf16 %v8775_v46  ;;  %v8776_v5 = vunpack.i.l.bf16 %v8775_v46 }
 0x326   :  { %v932_v6 = vsel %vm74_vm0, %v10798_v28, %v8776_v5  ;;  %v933_v7 = vsel %vm74_vm0, %v10801_v32, %v8777_v0 }
 0x32b   :  { %v8780_v47 = vpop.permute.xlu0 %8779 }
 0x32c   :  { %v8782_v16 = vunpack.i.h.bf16 %v8780_v47  ;;  %v8781_v22 = vunpack.i.l.bf16 %v8780_v47 }
 0x32f   :  { %v8785_v48 = vpop.permute.xlu0 %8784 }
 0x330   :  { %v8787_v14 = vunpack.i.h.bf16 %v8785_v48  ;;  %v8786_v3 = vunpack.i.l.bf16 %v8785_v48 }
 0x332   :  { %v935_v8 = vsel %vm394_vm1, %v933_v7, %v8787_v14  ;;  %v934_v13 = vsel %vm394_vm1, %v932_v6, %v8786_v3 }
 0x333   :  { %v8790_v30 = vpop.permute.xlu0 %8789  ;;  %v936_v25 = vsel %vm917_vm9, %v934_v13, %v8781_v22  ;;  %v937_v12 = vsel %vm917_vm9, %v935_v8, %v8782_v16 }
 0x334   :  { %v8792_v32 = vunpack.i.h.bf16 %v8790_v30  ;;  %v8791_v23 = vunpack.i.l.bf16 %v8790_v30 }
 0x337   :  { %v8795_v4 = vpop.permute.xlu0 %8794 }
 0x338   :  { %v8797_v15 = vunpack.i.h.bf16 %v8795_v4  ;;  %v8796_v21 = vunpack.i.l.bf16 %v8795_v4 }
 0x33a   :  { %v939_v26 = vsel %vm920_vm10, %v937_v12, %v8797_v15  ;;  %v938_v28 = vsel %vm920_vm10, %v936_v25, %v8796_v21 }
 0x33b   :  { %v940_v27 = vsel %vm923_vm11, %v938_v28, %v8791_v23  ;;  %v941_v2 = vsel %vm923_vm11, %v939_v26, %v8792_v32 }
 0x33c   :  { %v8800_v10 = vpop.permute.xlu0 %8799 }
 0x33d   :  { %v8802_v17 = vunpack.i.h.bf16 %v8800_v10  ;;  %v8801_v18 = vunpack.i.l.bf16 %v8800_v10 }
 0x33f   :  { %v943_v31 = vsel %vm926_vm12, %v941_v2, %v8802_v17  ;;  %v942_v33 = vsel %vm926_vm12, %v940_v27, %v8801_v18 }
 0x340   :  { %v8805_v24 = vpop.permute.xlu0 %8804 }
 0x341   :  { %v8807_v63 = vunpack.i.h.bf16 %v8805_v24  ;;  %v8806_v9 = vunpack.i.l.bf16 %v8805_v24 }
 0x343   :  { %v944_v34 = vsel %vm929_vm13, %v942_v33, %v8806_v9  ;;  %v945_v35 = vsel %vm929_vm13, %v943_v31, %v8807_v63 }
 0x344   :  { %v979_v36 = vpack.c.bf16 %v945_v35, %v944_v34 }
 0x346   :  { %1108 = vmatprep.mubr.bf16.mxu1 %v979_v36 }
 0x347   :  { %1109 = vmatmul.mubr.bf16.vlgmr.msra.gmra.mrb[40].mxu1 %v978_v45 }
 0x348   :  { %8567 = vmatpush3.bf16.xpose.msra.mxu1 %v1119_v38  ;;  %8568 = vmatprep.mubr.msk.bf16.mxu1 %vm394_vm1, %v10495_v49 }
 0x34f   :  { %8569 = vmatmul.mubr.msk.bf16.vlgmr.msra.gmra.mrb[44].mxu1 %vm394_vm1, %v10669_v11 }
 0x350   :  { %8572 = vmatprep.mubr.msk.bf16.mxu1 %vm394_vm1, %v10674_v37 }
 0x357   :  { %8573 = vmatmul.mubr.msk.bf16.gmra.mrb[48].mxu1 %vm394_vm1, %v10685_v50 }
 0x358   :  { %8576 = vmatprep.mubr.msk.bf16.mxu1 %vm394_vm1, %v10691_v29 }
 0x35f   :  { %8577 = vmatmul.mubr.msk.bf16.gmra.mrb[52].mxu1 %vm394_vm1, %v10703_v51 }
 0x360   :  { %8580 = vmatprep.mubr.msk.bf16.mxu1 %vm394_vm1, %v10709_v52 }
 0x367   :  { %8581 = vmatmul.mubr.msk.bf16.gmra.mrb[56].mxu1 %vm394_vm1, %v10721_v53 }
 0x368   :  { %8584 = vmatprep.mubr.msk.bf16.mxu1 %vm394_vm1, %v10727_v54 }
 0x36f   :  { %8585 = vmatmul.mubr.msk.bf16.gmra.mrb[60].mxu1 %vm394_vm1, %v10739_v55 }
 0x370   :  { %8588 = vmatprep.mubr.msk.bf16.mxu1 %vm394_vm1, %v10745_v56 }
 0x377   :  { %8589 = vmatmul.mubr.msk.bf16.gmra.mrb[64].mxu1 %vm394_vm1, %v10756_v57 }
 0x378   :  { %8592 = vmatprep.mubr.msk.bf16.mxu1 %vm394_vm1, %v10761_v58 }
 0x37f   :  { %8593 = vmatmul.mubr.msk.bf16.gmra.mrb[68].mxu1 %vm394_vm1, %v10770_v59 }
 0x380   :  { %8596 = vmatprep.mubr.msk.bf16.mxu1 %vm394_vm1, %v10775_v60 }
 0x387   :  { %8597 = vmatmul.mubr.msk.bf16.gmra.mrb[72].mxu1 %vm394_vm1, %v10784_v61 }
 0x41a   :  { %v8293_v49 = vpop.f32.mrb[40].mxu1 }
 0x41b   :  { %v8294_v62 = vpop.f32.mrb[41].mxu1 }
 0x41c   :  { %v10876_v11 = vadd.f32 %v8294_v62, %v8293_v49  ;;  %v8296_v37 = vpop.f32.mrb[42].mxu1 }
 0x41d   :  { %v8297_v50 = vpop.f32.mrb[43].mxu1 }
 0x41e   :  { %v10878_v29 = vadd.f32 %v8297_v50, %v8296_v37  ;;  %v1481_v63 = vmul.f32 %v10876_v11, %v10876_v11  ;;  %v1465_v31 = vsel %vm920_vm10, %v10876_v11, 0.0 }
 0x420   :  { %v1468_v2 = vsel %vm920_vm10, %v10878_v29, 0.0  ;;  %v1483_v9 = vsel %vm920_vm10, %v1481_v63, 0.0  ;;  %v1482_v33 = vmul.f32 %v10878_v29, %v10878_v29 }
 0x422   :  { %v8570_v51 = vpop.f32.mrb[44].mxu1  ;;  %v1486_v34 = vsel %vm920_vm10, %v1482_v33, 0.0 }
 0x423   :  { %v10880_v52 = vpop.f32.mrb[45].mxu1 }
 0x424   :  { %v8571_v53 = vpop.f32.mrb[46].mxu1 }
 0x425   :  { %v8813_v54 = vpack.i.bf16 %v8571_v53, %v8570_v51  ;;  %v10882_v55 = vpop.f32.mrb[47].mxu1 }
 0x427   :  { %8814 = vrot.lane.b32.xlu1 %v8813_v54, %s10320_s28 }
 0x42a   :  { %v8574_v56 = vpop.f32.mrb[48].mxu1 }
 0x42b   :  { %v1171_v57 = vpop.f32.mrb[49].mxu1 }
 0x42c   :  { %v8575_v58 = vpop.f32.mrb[50].mxu1 }
 0x42d   :  { %v8818_v59 = vpack.i.bf16 %v8575_v58, %v8574_v56  ;;  %v1174_v60 = vpop.f32.mrb[51].mxu1 }
 0x42e   :  { %v8823_v61 = vpack.i.bf16 %v1174_v60, %v1171_v57 }
 0x42f   :  { %8819 = vrot.lane.b32.xlu1 %v8818_v59, %s10321_s4 }
 0x432   :  { %v8578_v39 = vpop.f32.mrb[52].mxu1 }
 0x433   :  { %8824 = vrot.lane.b32.xlu1 %v8823_v61, %s10319_s25  ;;  %v1187_v40 = vpop.f32.mrb[53].mxu1 }
 0x434   :  { %v8579_v41 = vpop.f32.mrb[54].mxu1 }
 0x435   :  { %v8828_v42 = vpack.i.bf16 %v8579_v41, %v8578_v39  ;;  %v1190_v43 = vpop.f32.mrb[55].mxu1 }
 0x436   :  { %v8833_v44 = vpack.i.bf16 %v1190_v43, %v1187_v40 }
 0x437   :  { %8829 = vrot.lane.b32.xlu1 %v8828_v42, %s10322_s29 }
 0x43a   :  { %v8582_v45 = vpop.f32.mrb[56].mxu1 }
 0x43b   :  { %8834 = vrot.lane.b32.xlu1 %v8833_v44, %s10317_s0  ;;  %v1203_v46 = vpop.f32.mrb[57].mxu1 }
 0x43c   :  { %v8583_v47 = vpop.f32.mrb[58].mxu1 }
 0x43d   :  { %v8878_v48 = vpack.i.bf16 %v8583_v47, %v8582_v45  ;;  %v1206_v30 = vpop.f32.mrb[59].mxu1 }
 0x43e   :  { %v8838_v0 = vpack.i.bf16 %v1206_v30, %v1203_v46 }
 0x440   :  { %8839 = vrot.lane.b32.xlu1 %v8838_v0, %s10318_s1 }
 0x442   :  { %v8586_v5 = vpop.f32.mrb[60].mxu1 }
 0x443   :  { %v10890_v14 = vpop.f32.mrb[61].mxu1 }
 0x444   :  { %8879 = vrot.lane.b32.xlu1 %v8878_v48, %s10323_s5  ;;  %v8587_v3 = vpop.f32.mrb[62].mxu1 }
 0x445   :  { %v8843_v4 = vpack.i.bf16 %v8587_v3, %v8586_v5  ;;  %v10893_v6 = vpop.f32.mrb[63].mxu1 }
 0x447   :  { %8844 = vrot.lane.b32.xlu0 %v8843_v4, %s10320_s28 }
 0x44a   :  { %v8590_v7 = vpop.f32.mrb[64].mxu1 }
 0x44b   :  { %v1235_v8 = vpop.f32.mrb[65].mxu1 }
 0x44c   :  { %v8591_v13 = vpop.f32.mrb[66].mxu1 }
 0x44d   :  { %v8848_v15 = vpack.i.bf16 %v8591_v13, %v8590_v7  ;;  %v1238_v21 = vpop.f32.mrb[67].mxu1 }
 0x44e   :  { %v8853_v16 = vpack.i.bf16 %v1238_v21, %v1235_v8 }
 0x44f   :  { %8849 = vrot.lane.b32.xlu0 %v8848_v15, %s10321_s4 }
 0x452   :  { %v8594_v22 = vpop.f32.mrb[68].mxu1 }
 0x453   :  { %8854 = vrot.lane.b32.xlu0 %v8853_v16, %s10319_s25  ;;  %v1251_v10 = vpop.f32.mrb[69].mxu1 }
 0x454   :  { %v8595_v25 = vpop.f32.mrb[70].mxu1 }
 0x455   :  { %v8858_v12 = vpack.i.bf16 %v8595_v25, %v8594_v22  ;;  %v1254_v26 = vpop.f32.mrb[71].mxu1 }
 0x456   :  { %v8863_v28 = vpack.i.bf16 %v1254_v26, %v1251_v10 }
 0x457   :  { %8859 = vrot.lane.b32.xlu0 %v8858_v12, %s10322_s29 }
 0x45a   :  { %v8598_v17 = vpop.f32.mrb[72].mxu1 }
 0x45b   :  { %8864 = vrot.lane.b32.xlu0 %v8863_v28, %s10317_s0  ;;  %v1267_v18 = vpop.f32.mrb[73].mxu1 }
 0x45c   :  { %v8599_v32 = vpop.f32.mrb[74].mxu1 }
 0x45d   :  { %v8873_v23 = vpack.i.bf16 %v8599_v32, %v8598_v17  ;;  %v1270_v24 = vpop.f32.mrb[75].mxu1 }
 0x45e   :  { %v8868_v27 = vpack.i.bf16 %v1270_v24, %v1267_v18 }
 0x460   :  { %8869 = vrot.lane.b32.xlu0 %v8868_v27, %s10318_s1 }
 0x464   :  { %8874 = vrot.lane.b32.xlu0 %v8873_v23, %s10323_s5 }
 0x468   :  { %1469 = vadd.xlane.f32.xlu1 %v1468_v2 }
 0x46c   :  { %1484 = vadd.xlane.f32.xlu1 %v1483_v9 }
 0x483   :  { %1466 = vadd.xlane.f32.xlu0 %v1465_v31 }
 0x487   :  { %1487 = vadd.xlane.f32.xlu0 %v1486_v34 }
 0x499   :  { %v8815_v35 = vpop.permute.xlu1 %8814 }
 0x49a   :  { %v8817_v62 = vunpack.i.h.bf16 %v8815_v35  ;;  %v8816_v37 = vunpack.i.l.bf16 %v8815_v35 }
 0x49c   :  { %v1394_v54 = vsel %vm74_vm0, %v10880_v52, %v8816_v37  ;;  %v1395_v56 = vsel %vm74_vm0, %v10882_v55, %v8817_v62 }
 0x4a1   :  { %v8820_v36 = vpop.permute.xlu1 %8819 }
 0x4a2   :  { %v8822_v61 = vunpack.i.h.bf16 %v8820_v36  ;;  %v8821_v39 = vunpack.i.l.bf16 %v8820_v36 }
 0x4a5   :  { %v8825_v38 = vpop.permute.xlu1 %8824 }
 0x4a6   :  { %v8827_v50 = vunpack.i.h.bf16 %v8825_v38  ;;  %v8826_v51 = vunpack.i.l.bf16 %v8825_v38 }
 0x4a8   :  { %v1397_v57 = vsel %vm394_vm1, %v1395_v56, %v8827_v50  ;;  %v1396_v58 = vsel %vm394_vm1, %v1394_v54, %v8826_v51 }
 0x4a9   :  { %v8830_v49 = vpop.permute.xlu1 %8829  ;;  %v1398_v41 = vsel %vm917_vm9, %v1396_v58, %v8821_v39  ;;  %v1399_v42 = vsel %vm917_vm9, %v1397_v57, %v8822_v61 }
 0x4aa   :  { %v8832_v55 = vunpack.i.h.bf16 %v8830_v49  ;;  %v8831_v46 = vunpack.i.l.bf16 %v8830_v49 }
 0x4ad   :  { %v8835_v53 = vpop.permute.xlu1 %8834 }
 0x4ae   :  { %v8837_v59 = vunpack.i.h.bf16 %v8835_v53  ;;  %v8836_v60 = vunpack.i.l.bf16 %v8835_v53 }
 0x4b0   :  { %v1401_v43 = vsel %vm920_vm10, %v1399_v42, %v8837_v59  ;;  %v1400_v52 = vsel %vm920_vm10, %v1398_v41, %v8836_v60 }
 0x4b1   :  { %v1402_v48 = vsel %vm923_vm11, %v1400_v52, %v8831_v46  ;;  %v1403_v30 = vsel %vm923_vm11, %v1401_v43, %v8832_v55 }
 0x4b2   :  { %v8840_v40 = vpop.permute.xlu1 %8839 }
 0x4b3   :  { %v8842_v44 = vunpack.i.h.bf16 %v8840_v40  ;;  %v8841_v45 = vunpack.i.l.bf16 %v8840_v40 }
 0x4b5   :  { %v1405_v3 = vsel %vm926_vm12, %v1403_v30, %v8842_v44  ;;  %v1404_v4 = vsel %vm926_vm12, %v1402_v48, %v8841_v45 }
 0x4b6   :  { %v8880_v47 = vpop.permute.xlu1 %8879 }
 0x4b7   :  { %v8882_v0 = vunpack.i.h.bf16 %v8880_v47  ;;  %v8881_v5 = vunpack.i.l.bf16 %v8880_v47 }
 0x4b9   :  { %v1406_v7 = vsel %vm929_vm13, %v1404_v4, %v8881_v5  ;;  %v1407_v8 = vsel %vm929_vm13, %v1405_v3, %v8882_v0  ;;  %v8845_v15 = vpop.permute.xlu0 %8844 }
 0x4ba   :  { %v1422_v13 = vpack.c.bf16 %v1407_v8, %v1406_v7  ;;  %v8847_v10 = vunpack.i.h.bf16 %v8845_v15  ;;  %v8846_v25 = vunpack.i.l.bf16 %v8845_v15 }
 0x4bc   :  { %v1408_v17 = vsel %vm74_vm0, %v10890_v14, %v8846_v25  ;;  %v1409_v18 = vsel %vm74_vm0, %v10893_v6, %v8847_v10 }
 0x4c1   :  { %v8850_v21 = vpop.permute.xlu0 %8849 }
 0x4c2   :  { %v8852_v2 = vunpack.i.h.bf16 %v8850_v21  ;;  %v8851_v63 = vunpack.i.l.bf16 %v8850_v21 }
 0x4c5   :  { %v8855_v16 = vpop.permute.xlu0 %8854 }
 0x4c6   :  { %v8857_v12 = vunpack.i.h.bf16 %v8855_v16  ;;  %v8856_v26 = vunpack.i.l.bf16 %v8855_v16 }
 0x4c8   :  { %v1411_v32 = vsel %vm394_vm1, %v1409_v18, %v8857_v12  ;;  %v1410_v23 = vsel %vm394_vm1, %v1408_v17, %v8856_v26 }
 0x4c9   :  { %v8860_v22 = vpop.permute.xlu0 %8859  ;;  %v1412_v31 = vsel %vm917_vm9, %v1410_v23, %v8851_v63  ;;  %v1413_v33 = vsel %vm917_vm9, %v1411_v32, %v8852_v2  ;;  %v1520_v63 = vld [vmem:[%s14375_s7] sm:$0xff] }
 0x4ca   :  { %v8862_v6 = vunpack.i.h.bf16 %v8860_v22  ;;  %v8861_v38 = vunpack.i.l.bf16 %v8860_v22 }
 0x4cd   :  { %v8865_v28 = vpop.permute.xlu0 %8864 }
 0x4ce   :  { %v8867_v24 = vunpack.i.h.bf16 %v8865_v28  ;;  %v8866_v27 = vunpack.i.l.bf16 %v8865_v28 }
 0x4d0   :  { %v1415_v34 = vsel %vm920_vm10, %v1413_v33, %v8867_v24  ;;  %v1414_v14 = vsel %vm920_vm10, %v1412_v31, %v8866_v27  ;;  %v1512_v24 = vld [vmem:[%s14374_s6] sm:$0xff]  ;;  %v1513_v31 = vld [vmem:[%s14374_s6 + $0x8] sm:$0xff] }
 0x4d1   :  { %v1416_v62 = vsel %vm923_vm11, %v1414_v14, %v8861_v38  ;;  %v1417_v37 = vsel %vm923_vm11, %v1415_v34, %v8862_v6  ;;  %v8963_v38 = vld [vmem:[%s14376_s8] sm:$0xff]  }
 0x4d2   :  { %v8870_v9 = vpop.permute.xlu0 %8869 }
 0x4d3   :  { %v8872_v35 = vunpack.i.h.bf16 %v8870_v9  ;;  %v8871_v36 = vunpack.i.l.bf16 %v8870_v9 }
 0x4d5   :  { %v1419_v53 = vsel %vm926_vm12, %v1417_v37, %v8872_v35  ;;  %v1418_v54 = vsel %vm926_vm12, %v1416_v62, %v8871_v36  ;;  %v1521_v35 = vld [vmem:[%s14375_s7 + $0x8] sm:$0xff] }
 0x4d6   :  { %v8875_v49 = vpop.permute.xlu0 %8874 }
 0x4d7   :  { %v8877_v50 = vunpack.i.h.bf16 %v8875_v49  ;;  %v8876_v51 = vunpack.i.l.bf16 %v8875_v49 }
 0x4d9   :  { %v1420_v56 = vsel %vm929_vm13, %v1418_v54, %v8876_v51  ;;  %v1421_v57 = vsel %vm929_vm13, %v1419_v53, %v8877_v50 }
 0x4da   :  { %v1423_v58 = vpack.c.bf16 %v1421_v57, %v1420_v56 }
 0x4dc   :  { %1456 = vmatprep.mubr.bf16.mxu0 %v1423_v58 }
 0x4dd   :  { %1457 = vmatmul.mubr.bf16.vlgmr.msra.gmra.mrb[8].mxu0 %v1422_v13 }
 0x4de   :  { %8602 = vmatprep.mubr.msk.bf16.mxu0 %vm74_vm0, %v8963_v38 }
 0x4f5   :  { %v1470_v47 = vpop.xlane.xlu1 %1469 }
 0x4f9   :  { %v1485_v30 = vpop.xlane.xlu1 %1484 }
 0x510   :  { %v1467_v46 = vpop.xlane.xlu0 %1466 }
 0x514   :  { %v1488_v48 = vpop.xlane.xlu0 %1487 }
 0x5b0   :  { %v8332_v59 = vpop.f32.mrb[8].mxu0 }
 0x5b1   :  { %v8333_v60 = vpop.f32.mrb[9].mxu0 }
 0x5b2   :  { %v10944_v61 = vadd.f32 %v8333_v60, %v8332_v59  ;;  %v8335_v39 = vpop.f32.mrb[10].mxu0 }
 0x5b3   :  { %v8336_v40 = vpop.f32.mrb[11].mxu0 }
 0x5b4   :  { %v10946_v41 = vadd.f32 %v8336_v40, %v8335_v39  ;;  %v1473_v42 = vsel %vm920_vm10, %v10944_v61, 0.0  ;;  %v1491_v43 = vmul.f32 %v10944_v61, %v10944_v61 }
 0x5b5   :  { %1474 = vadd.xlane.f32.xlu0 %v1473_v42 }
 0x5b6   :  { %v1493_v52 = vsel %vm920_vm10, %v1491_v43, 0.0  ;;  %v1476_v44 = vsel %vm920_vm10, %v10946_v41, 0.0  ;;  %v1492_v45 = vmul.f32 %v10946_v41, %v10946_v41 }
 0x5b7   :  { %1494 = vadd.xlane.f32.xlu1 %v1493_v52 }
 0x5b8   :  { %v1496_v55 = vsel %vm920_vm10, %v1492_v45, 0.0  ;;  %v8968_v45 = vld [vmem:[%s14376_s8 + $0x28] sm:$0xff]  }
 0x5b9   :  { %1477 = vadd.xlane.f32.xlu0 %v1476_v44 }
 0x5bd   :  { %1497 = vadd.xlane.f32.xlu0 %v1496_v55  ;;  %v8969_v55 = vld [vmem:[%s14376_s8 + $0x30] sm:$0xff]  }
 0x642   :  { %v1475_v0 = vpop.xlane.xlu0 %1474 }
 0x643   :  { %v1479_v5 = vadd.f32 %v1475_v0, %v1467_v46  ;;  %v8970_v46 = vld [vmem:[%s14376_s8 + $0x38] sm:$0xff]  }
 0x644   :  { %v1495_v3 = vpop.xlane.xlu1 %1494  ;;  %v8974_v0 = vld [vmem:[%s14377_s9 + $0x10] ss:$8 sps:$4 sm:$0xff]  }
 0x645   :  { %v1502_v4 = vmul.f32 0.0078125, %v1479_v5  ;;  %v1499_v7 = vadd.f32 %v1495_v3, %v1485_v30  ;;  %v8976_v30 = vld [vmem:[%s14377_s9 + $0x14] ss:$8 sps:$4 sm:$0xff]   ;;  %v8979_v5 = vld [vmem:[%s14377_s9 + $0x24] ss:$8 sps:$4 sm:$0xff]  }
 0x646   :  { %v1478_v8 = vpop.xlane.xlu0 %1477  ;;  %v8977_v3 = vld [vmem:[%s14377_s9 + $0x20] ss:$8 sps:$4 sm:$0xff]  }
 0x647   :  { %v1506_v13 = vmul.f32 %v1502_v4, %v1502_v4  ;;  %v1504_v15 = vmul.f32 0.0078125, %v1499_v7  ;;  %v1480_v21 = vadd.f32 %v1478_v8, %v1470_v47  ;;  %v8971_v47 = vld [vmem:[%s14377_s9] ss:$8 sps:$4 sm:$0xff]   ;;  %v8980_v7 = vld [vmem:[%s14377_s9 + $0x30] ss:$8 sps:$4 sm:$0xff]  }
 0x648   :  { %v8985_v8 = vld [vmem:[%s14377_s9 + $0x44] ss:$8 sps:$4 sm:$0xff]  }
 0x649   :  { %v1508_v16 = vsub.f32 %v1504_v15, %v1506_v13  ;;  %v1503_v22 = vmul.f32 0.0078125, %v1480_v21  ;;  %v8983_v13 = vld [vmem:[%s14377_s9 + $0x40] ss:$8 sps:$4 sm:$0xff]   ;;  %v8988_v15 = vld [vmem:[%s14377_s9 + $0x54] ss:$8 sps:$4 sm:$0xff]  }
 0x64a   :  { %v1498_v10 = vpop.xlane.xlu0 %1497  ;;  %v8986_v21 = vld [vmem:[%s14377_s9 + $0x50] ss:$8 sps:$4 sm:$0xff]  }
 0x64b   :  { %v1510_v25 = vmax.f32 %v1508_v16, 0.0  ;;  %v1500_v12 = vadd.f32 %v1498_v10, %v1488_v48  ;;  %v1507_v28 = vmul.f32 %v1503_v22, %v1503_v22  ;;  %v8973_v48 = vld [vmem:[%s14377_s9 + $0x4] ss:$8 sps:$4 sm:$0xff]   ;;  %v8994_v10 = vld [vmem:[%s14377_s9 + $0x74] ss:$8 sps:$4 sm:$0xff]  }
 0x64c   :  { %2552 = vmatprep.subr.bf16.mxu1 %v8973_v48  ;;  %v8991_v16 = vld [vmem:[%s14377_s9 + $0x64] ss:$8 sps:$4 sm:$0xff]  }
 0x64d   :  { %v1514_v26 = vadd.f32 1e-05, %v1510_v25  ;;  %v1505_v17 = vmul.f32 0.0078125, %v1500_v12  ;;  %2553 = vmatpush1.bf16.msra.mxu1 %v8971_v47  ;;  %v8992_v25 = vld [vmem:[%s14377_s9 + $0x70] ss:$8 sps:$4 sm:$0xff]  }
 0x64e   :  { %2554 = vmatprep.subr.bf16.mxu1 %v8976_v30  ;;  %v8997_v12 = vld [vmem:[%s14377_s9 + $0x84] ss:$8 sps:$4 sm:$0xff]  }
 0x64f   :  { %9805 = vrsqrt.f32 %v1514_v26  ;;  %v1509_v18 = vsub.f32 %v1505_v17, %v1507_v28  ;;  %v8995_v26 = vld [vmem:[%s14377_s9 + $0x80] ss:$8 sps:$4 sm:$0xff]   ;;  %v9000_v28 = vld [vmem:[%s14377_s9 + $0x94] ss:$8 sps:$4 sm:$0xff]   ;;  %v8998_v17 = vld [vmem:[%s14377_s9 + $0x90] ss:$8 sps:$4 sm:$0xff]  }
 0x651   :  { %v1511_v32 = vmax.f32 %v1509_v18, 0.0  ;;  %2555 = vmatpush1.bf16.msra.mxu1 %v8974_v0  ;;  %v9003_v18 = vld [vmem:[%s14377_s9 + $0xa4] ss:$8 sps:$4 sm:$0xff]  }
 0x652   :  { %2556 = vmatprep.subr.bf16.mxu1 %v8979_v5 }
 0x653   :  { %v1515_v23 = vadd.f32 1e-05, %v1511_v32  ;;  %v9001_v32 = vld [vmem:[%s14377_s9 + $0xa0] ss:$8 sps:$4 sm:$0xff]  }
 0x655   :  { %9807 = vrsqrt.f32 %v1515_v23  ;;  %2557 = vmatpush1.bf16.msra.mxu1 %v8977_v3  ;;  %v9006_v23 = vld [vmem:[%s14377_s9 + $0xb4] ss:$8 sps:$4 sm:$0xff]  }
 0x659   :  { %v9806_v27 = vpop.eup %9805 }
 0x65a   :  { %v1518_v2 = vmul.f32 %v9806_v27, %v1512_v24  ;;  %v9004_v24 = vld [vmem:[%s14377_s9 + $0xb0] ss:$8 sps:$4 sm:$0xff]   ;;  %v9009_v27 = vld [vmem:[%s14377_s9 + $0xc4] ss:$8 sps:$4 sm:$0xff]  }
 0x65c   :  { %1528 = vperm.xlu1 %8883, %v1518_v2   ;;  %v1522_v9 = vmul.f32 %v1518_v2, %v1502_v4  ;;  %v8982_v4 = vld [vmem:[%s14377_s9 + $0x34] ss:$8 sps:$4 sm:$0xff]   ;;  %v9007_v2 = vld [vmem:[%s14377_s9 + $0xc0] ss:$8 sps:$4 sm:$0xff]  }
 0x65d   :  { %2558 = vmatprep.subr.bf16.mxu1 %v8982_v4 }
 0x65e   :  { %v1524_v33 = vsub.f32 %v1520_v63, %v1522_v9  ;;  %2559 = vmatpush1.bf16.msra.mxu1 %v8980_v7  ;;  %v9012_v63 = vld [vmem:[%s14377_s9 + $0xd4] ss:$8 sps:$4 sm:$0xff]   ;;  %v9010_v9 = vld [vmem:[%s14377_s9 + $0xd0] ss:$8 sps:$4 sm:$0xff]  }
 0x65f   :  { %v9808_v34 = vpop.eup %9807  ;;  %2560 = vmatprep.subr.bf16.mxu1 %v8985_v8 }
 0x660   :  { %1540 = vperm.xlu1 %8883, %v1524_v33   ;;  %v1519_v14 = vmul.f32 %v9808_v34, %v1513_v31 }
 0x662   :  { %1533 = vperm.xlu0 %8884, %v1519_v14   ;;  %v1523_v36 = vmul.f32 %v1519_v14, %v1503_v22  ;;  %2561 = vmatpush1.bf16.msra.mxu1 %v8983_v13  ;;  %v8989_v22 = vld [vmem:[%s14377_s9 + $0x60] ss:$8 sps:$4 sm:$0xff]  }
 0x663   :  { %2562 = vmatprep.subr.bf16.mxu1 %v8988_v15 }
 0x664   :  { %v1525_v6 = vsub.f32 %v1521_v35, %v1523_v36 }
 0x666   :  { %1545 = vperm.xlu1 %8883, %v1525_v6   ;;  %2563 = vmatpush1.bf16.msra.mxu1 %v8986_v21 }
 0x667   :  { %2564 = vmatprep.subr.bf16.mxu1 %v8991_v16 }
 0x66a   :  { %2565 = vmatpush1.bf16.msra.mxu1 %v8989_v22 }
 0x66b   :  { %2566 = vmatprep.subr.bf16.mxu1 %v8994_v10 }
 0x66e   :  { %2567 = vmatpush1.bf16.msra.mxu1 %v8992_v25 }
 0x66f   :  { %2568 = vmatprep.subr.bf16.mxu1 %v8997_v12 }
 0x672   :  { %2569 = vmatpush1.bf16.msra.mxu1 %v8995_v26 }
 0x673   :  { %2570 = vmatprep.subr.bf16.mxu1 %v9000_v28 }
 0x676   :  { %2571 = vmatpush1.bf16.msra.mxu1 %v8998_v17 }
 0x677   :  { %2572 = vmatprep.subr.bf16.mxu1 %v9003_v18 }
 0x67a   :  { %2573 = vmatpush1.bf16.msra.mxu1 %v9001_v32 }
 0x67b   :  { %2574 = vmatprep.subr.bf16.mxu1 %v9006_v23 }
 0x67e   :  { %2575 = vmatpush1.bf16.msra.mxu1 %v9004_v24 }
 0x67f   :  { %2576 = vmatprep.subr.bf16.mxu1 %v9009_v27 }
 0x682   :  { %2577 = vmatpush1.bf16.msra.mxu1 %v9007_v2 }
 0x683   :  { %2578 = vmatprep.subr.bf16.mxu1 %v9012_v63 }
 0x686   :  { %2579 = vmatpush1.bf16.msra.mxu1 %v9010_v9 }
 0x6db   :  { %v1529_v49 = vpop.permute.xlu1 %1528 }
 0x6dc   :  { %v1536_v50 = vmul.f32 %v10876_v11, %v1529_v49  ;;  %v1552_v51 = vmul.f32 %v10944_v61, %v1529_v49  ;;  %v8964_v11 = vld [vmem:[%s14376_s8 + $0x8] sm:$0xff]   ;;  %v8966_v61 = vld [vmem:[%s14376_s8 + $0x18] sm:$0xff]  }
 0x6df   :  { %v1541_v62 = vpop.permute.xlu1 %1540 }
 0x6e0   :  { %v1548_v53 = vadd.f32 %v1541_v62, %v1536_v50  ;;  %v1554_v58 = vadd.f32 %v1552_v51, %v1541_v62 }
 0x6e1   :  { %v1534_v37 = vpop.permute.xlu0 %1533 }
 0x6e2   :  { %v1537_v54 = vmul.f32 %v10878_v29, %v1534_v37  ;;  %v1553_v56 = vmul.f32 %v10946_v41, %v1534_v37  ;;  %v1550_v39 = vmax.f32 %v1548_v53, 0.0  ;;  %v1556_v43 = vmax.f32 %v1554_v58, 0.0  ;;  %v8965_v29 = vld [vmem:[%s14376_s8 + $0x10] sm:$0xff]   ;;  %v8967_v41 = vld [vmem:[%s14376_s8 + $0x20] sm:$0xff]  }
 0x6e3   :  { %v9013_v53 = vld [vmem:[%s14377_s9 + $0xe0] ss:$8 sps:$4 sm:$0xff]  }
 0x6e5   :  { %v1546_v57 = vpop.permute.xlu1 %1545 }
 0x6e6   :  { %v1549_v59 = vadd.f32 %v1546_v57, %v1537_v54  ;;  %v1555_v60 = vadd.f32 %v1553_v56, %v1546_v57  ;;  %v9015_v54 = vld [vmem:[%s14377_s9 + $0xe4] ss:$8 sps:$4 sm:$0xff]  }
 0x6e7   :  { %2580 = vmatprep.subr.bf16.mxu1 %v9015_v54 }
 0x6e8   :  { %v1551_v40 = vmax.f32 %v1549_v59, 0.0  ;;  %v1557_v42 = vmax.f32 %v1555_v60, 0.0  ;;  %2581 = vmatpush1.bf16.msra.mxu1 %v9013_v53  ;;  %v9018_v59 = vld [vmem:[%s14377_s9 + $0xf4] ss:$8 sps:$4 sm:$0xff]   ;;  %v9016_v60 = vld [vmem:[%s14377_s9 + $0xf0] ss:$8 sps:$4 sm:$0xff]  }
 0x6e9   :  { %2582 = vmatprep.subr.bf16.mxu1 %v9018_v59 }
 0x6ea   :  { %v1574_v52 = vpack.c.bf16 %v1551_v40, %v1550_v39  ;;  %v2716_v44 = vpack.c.bf16 %v1557_v42, %v1556_v43  ;;  %v9021_v40 = vld [vmem:[%s14377_s9 + $0x104] ss:$8 sps:$4 sm:$0xff]  }
 0x6ec   :  { %8600 = vmatprep.subr.bf16.mxu0 %v1574_v52  ;;  %2583 = vmatpush1.bf16.msra.mxu1 %v9016_v60 }
 0x6ed   :  { %8601 = vmatpush3.bf16.msra.mxu0 %v1574_v52  ;;  %2593 = vmatprep.subr.bf16.mxu1 %v9021_v40 }
 0x6ee   :  { %8618 = vmatprep.subr.bf16.mxu0 %v2716_v44 }
 0x6f0   :  { %8603 = vmatmul.mubr.msk.bf16.vlgmr.msra.gmra.mrb[12].mxu0 %vm74_vm0, %v8964_v11 }
 0x6f1   :  { %8619 = vmatpush3.bf16.msra.mxu0 %v2716_v44  ;;  %8606 = vmatprep.mubr.msk.bf16.mxu0 %vm74_vm0, %v8965_v29 }
 0x6f2   :  { %2862 = vmatprep.subr.bf16.mxu0 %v8973_v48 }
 0x6f8   :  { %8607 = vmatmul.mubr.msk.bf16.gmra.mrb[16].mxu0 %vm74_vm0, %v8966_v61 }
 0x6f9   :  { %8610 = vmatprep.mubr.msk.bf16.mxu0 %vm74_vm0, %v8967_v41 }
 0x700   :  { %8611 = vmatmul.mubr.msk.bf16.gmra.mrb[20].mxu0 %vm74_vm0, %v8968_v45 }
 0x701   :  { %8614 = vmatprep.mubr.msk.bf16.mxu0 %vm74_vm0, %v8969_v55 }
 0x708   :  { %8615 = vmatmul.mubr.msk.bf16.gmra.mrb[24].mxu0 %vm74_vm0, %v8970_v46 }
 0x709   :  { %8620 = vmatprep.mubr.msk.bf16.mxu0 %vm74_vm0, %v8963_v38 }
 0x710   :  { %8621 = vmatmul.mubr.msk.bf16.vlgmr.msra.gmra.mrb[28].mxu0 %vm74_vm0, %v8964_v11 }
 0x711   :  { %8624 = vmatprep.mubr.msk.bf16.mxu0 %vm74_vm0, %v8965_v29  ;;  %2863 = vmatpush1.bf16.msra.mxu0 %v8971_v47 }
 0x712   :  { %2864 = vmatprep.subr.bf16.mxu0 %v8976_v30 }
 0x715   :  { %2865 = vmatpush1.bf16.msra.mxu0 %v8974_v0 }
 0x716   :  { %2866 = vmatprep.subr.bf16.mxu0 %v8979_v5 }
 0x718   :  { %8625 = vmatmul.mubr.msk.bf16.gmra.mrb[32].mxu0 %vm74_vm0, %v8966_v61 }
 0x719   :  { %8628 = vmatprep.mubr.msk.bf16.mxu0 %vm74_vm0, %v8967_v41  ;;  %2867 = vmatpush1.bf16.msra.mxu0 %v8977_v3 }
 0x71a   :  { %2868 = vmatprep.subr.bf16.mxu0 %v8982_v4 }
 0x71d   :  { %2869 = vmatpush1.bf16.msra.mxu0 %v8980_v7 }
 0x71e   :  { %2870 = vmatprep.subr.bf16.mxu0 %v8985_v8 }
 0x720   :  { %8629 = vmatmul.mubr.msk.bf16.gmra.mrb[36].mxu0 %vm74_vm0, %v8968_v45 }
 0x721   :  { %8632 = vmatprep.mubr.msk.bf16.mxu0 %vm74_vm0, %v8969_v55  ;;  %2871 = vmatpush1.bf16.msra.mxu0 %v8983_v13 }
 0x722   :  { %2872 = vmatprep.subr.bf16.mxu0 %v8988_v15 }
 0x725   :  { %2873 = vmatpush1.bf16.msra.mxu0 %v8986_v21 }
 0x726   :  { %2874 = vmatprep.subr.bf16.mxu0 %v8991_v16 }
 0x728   :  { %8633 = vmatmul.mubr.msk.bf16.gmra.mrb[40].mxu0 %vm74_vm0, %v8970_v46 }
 0x729   :  { %2875 = vmatpush1.bf16.msra.mxu0 %v8989_v22 }
 0x72a   :  { %2876 = vmatprep.subr.bf16.mxu0 %v8994_v10 }
 0x72d   :  { %2877 = vmatpush1.bf16.msra.mxu0 %v8992_v25 }
 0x72e   :  { %2878 = vmatprep.subr.bf16.mxu0 %v8997_v12 }
 0x731   :  { %2879 = vmatpush1.bf16.msra.mxu0 %v8995_v26 }
 0x732   :  { %2880 = vmatprep.subr.bf16.mxu0 %v9000_v28 }
 0x735   :  { %2881 = vmatpush1.bf16.msra.mxu0 %v8998_v17 }
 0x736   :  { %2882 = vmatprep.subr.bf16.mxu0 %v9003_v18 }
 0x739   :  { %2883 = vmatpush1.bf16.msra.mxu0 %v9001_v32 }
 0x73a   :  { %2884 = vmatprep.subr.bf16.mxu0 %v9006_v23 }
 0x73d   :  { %2885 = vmatpush1.bf16.msra.mxu0 %v9004_v24 }
 0x73e   :  { %2886 = vmatprep.subr.bf16.mxu0 %v9009_v27  ;;  %v9019_v27 = vld [vmem:[%s14377_s9 + $0x100] ss:$8 sps:$4 sm:$0xff]  }
 0x741   :  { %2887 = vmatpush1.bf16.msra.mxu0 %v9007_v2 }
 0x742   :  { %2888 = vmatprep.subr.bf16.mxu0 %v9012_v63 }
 0x745   :  { %2889 = vmatpush1.bf16.msra.mxu0 %v9010_v9 }
 0x746   :  { %2890 = vmatprep.subr.bf16.mxu0 %v9015_v54  ;;  %v9025_v54 = vld [vmem:[%s14377_s9 + $0x120] ss:$8 sps:$4 sm:$0xff]  }
 0x749   :  { %2891 = vmatpush1.bf16.msra.mxu0 %v9013_v53  ;;  %v9027_v53 = vld [vmem:[%s14377_s9 + $0x124] ss:$8 sps:$4 sm:$0xff]  }
 0x74a   :  { %2892 = vmatprep.subr.bf16.mxu0 %v9018_v59  ;;  %v9031_v59 = vld [vmem:[%s14377_s9 + $0x140] ss:$8 sps:$4 sm:$0xff]  }
 0x74d   :  { %2893 = vmatpush1.bf16.msra.mxu0 %v9016_v60  ;;  %v9036_v60 = vld [vmem:[%s14377_s9 + $0x154] ss:$8 sps:$4 sm:$0xff]  }
 0x74e   :  { %2903 = vmatprep.subr.bf16.mxu0 %v9021_v40  ;;  %v9039_v40 = vld [vmem:[%s14377_s9 + $0x164] ss:$8 sps:$4 sm:$0xff]  }
 0x7c3   :  { %v11098_v31 = vpop.f32.mrb[12].mxu0 }
 0x7c4   :  { %v11100_v33 = vpop.f32.mrb[13].mxu0 }
 0x7c5   :  { %v8605_v34 = vpop.f32.mrb[14].mxu0 }
 0x7c6   :  { %v1676_v14 = vpop.f32.mrb[15].mxu0 }
 0x7cb   :  { %v11102_v35 = vpop.f32.mrb[16].mxu0 }
 0x7cc   :  { %v11104_v36 = vpop.f32.mrb[17].mxu0 }
 0x7cd   :  { %v8609_v6 = vpop.f32.mrb[18].mxu0 }
 0x7ce   :  { %v1692_v38 = vpop.f32.mrb[19].mxu0 }
 0x7d3   :  { %v11106_v49 = vpop.f32.mrb[20].mxu0 }
 0x7d4   :  { %v11108_v62 = vpop.f32.mrb[21].mxu0 }
 0x7d5   :  { %v8613_v37 = vpop.f32.mrb[22].mxu0 }
 0x7d6   :  { %v1708_v50 = vpop.f32.mrb[23].mxu0 }
 0x7db   :  { %v11110_v51 = vpop.f32.mrb[24].mxu0 }
 0x7dc   :  { %v11118_v56 = vpop.f32.mrb[25].mxu0 }
 0x7dd   :  { %v8617_v57 = vpop.f32.mrb[26].mxu0 }
 0x7de   :  { %v1724_v58 = vpop.f32.mrb[27].mxu0 }
 0x7e3   :  { %v8622_v39 = vpop.f32.mrb[28].mxu0 }
 0x7e4   :  { %v2751_v42 = vpop.f32.mrb[29].mxu0 }
 0x7e5   :  { %v8623_v43 = vpop.f32.mrb[30].mxu0 }
 0x7e6   :  { %v8885_v52 = vpack.i.bf16 %v8623_v43, %v8605_v34  ;;  %v2754_v44 = vpop.f32.mrb[31].mxu0  ;;  %v9042_v43 = vld [vmem:[%s14377_s9 + $0x174] ss:$8 sps:$4 sm:$0xff]  }
 0x7e7   :  { %v8890_v11 = vpack.i.bf16 %v2754_v44, %v1676_v14  ;;  %v9045_v44 = vld [vmem:[%s14377_s9 + $0x184] ss:$8 sps:$4 sm:$0xff]  }
 0x7e8   :  { %8886 = vrot.lane.b32.xlu1 %v8885_v52, %s10317_s0  ;;  %v9040_v52 = vld [vmem:[%s14377_s9 + $0x170] ss:$8 sps:$4 sm:$0xff]  }
 0x7eb   :  { %v8626_v29 = vpop.f32.mrb[32].mxu0 }
 0x7ec   :  { %8891 = vrot.lane.b32.xlu1 %v8890_v11, %s10317_s0  ;;  %v11131_v61 = vpop.f32.mrb[33].mxu0  ;;  %v9043_v11 = vld [vmem:[%s14377_s9 + $0x180] ss:$8 sps:$4 sm:$0xff]  }
 0x7ed   :  { %v8627_v41 = vpop.f32.mrb[34].mxu0 }
 0x7ee   :  { %v8895_v45 = vpack.i.bf16 %v8627_v41, %v8609_v6  ;;  %v2770_v55 = vpop.f32.mrb[35].mxu0  ;;  %v9046_v41 = vld [vmem:[%s14377_s9 + $0x190] ss:$8 sps:$4 sm:$0xff]  }
 0x7ef   :  { %v8900_v46 = vpack.i.bf16 %v2770_v55, %v1692_v38  ;;  %v9049_v55 = vld [vmem:[%s14377_s9 + $0x1a0] ss:$8 sps:$4 sm:$0xff]  }
 0x7f0   :  { %8896 = vrot.lane.b32.xlu1 %v8895_v45, %s10317_s0  ;;  %v9051_v45 = vld [vmem:[%s14377_s9 + $0x1a4] ss:$8 sps:$4 sm:$0xff]  }
 0x7f3   :  { %v11134_v47 = vpop.f32.mrb[36].mxu0 }
 0x7f4   :  { %8901 = vrot.lane.b32.xlu1 %v8900_v46, %s10317_s0  ;;  %v11137_v48 = vpop.f32.mrb[37].mxu0  ;;  %v9054_v46 = vld [vmem:[%s14377_s9 + $0x1b4] ss:$8 sps:$4 sm:$0xff]  }
 0x7f5   :  { %v8631_v30 = vpop.f32.mrb[38].mxu0 }
 0x7f6   :  { %v8905_v0 = vpack.i.bf16 %v8631_v30, %v8613_v37  ;;  %v2786_v5 = vpop.f32.mrb[39].mxu0  ;;  %v9052_v30 = vld [vmem:[%s14377_s9 + $0x1b0] ss:$8 sps:$4 sm:$0xff]  }
 0x7f7   :  { %v8910_v3 = vpack.i.bf16 %v2786_v5, %v1708_v50  ;;  %v9055_v5 = vld [vmem:[%s14377_s9 + $0x1c0] ss:$8 sps:$4 sm:$0xff]  }
 0x7f8   :  { %8906 = vrot.lane.b32.xlu1 %v8905_v0, %s10317_s0  ;;  %v9057_v0 = vld [vmem:[%s14377_s9 + $0x1c4] ss:$8 sps:$4 sm:$0xff]  }
 0x7fb   :  { %v11140_v4 = vpop.f32.mrb[40].mxu0 }
 0x7fc   :  { %8911 = vrot.lane.b32.xlu1 %v8910_v3, %s10317_s0  ;;  %v11143_v7 = vpop.f32.mrb[41].mxu0  ;;  %v9060_v3 = vld [vmem:[%s14377_s9 + $0x1d4] ss:$8 sps:$4 sm:$0xff]  }
 0x7fd   :  { %v8635_v8 = vpop.f32.mrb[42].mxu0 }
 0x7fe   :  { %v8915_v13 = vpack.i.bf16 %v8635_v8, %v8617_v57  ;;  %v2802_v15 = vpop.f32.mrb[43].mxu0  ;;  %v9028_v57 = vld [vmem:[%s14377_s9 + $0x130] ss:$8 sps:$4 sm:$0xff]  }
 0x7ff   :  { %v8920_v21 = vpack.i.bf16 %v2802_v15, %v1724_v58  ;;  %v9033_v58 = vld [vmem:[%s14377_s9 + $0x144] ss:$8 sps:$4 sm:$0xff]  }
 0x800   :  { %8916 = vrot.lane.b32.xlu0 %v8915_v13, %s10317_s0  ;;  %v9058_v13 = vld [vmem:[%s14377_s9 + $0x1d0] ss:$8 sps:$4 sm:$0xff]   ;;  %v9063_v15 = vld [vmem:[%s14377_s9 + $0x1e4] ss:$8 sps:$4 sm:$0xff]  }
 0x801   :  { %8921 = vrot.lane.b32.xlu1 %v8920_v21, %s10317_s0 }
 0x85a   :  { %v8887_v16 = vpop.permute.xlu1 %8886 }
 0x85b   :  { %v8889_v22 = vunpack.i.h.bf16 %v8887_v16  ;;  %v8888_v10 = vunpack.i.l.bf16 %v8887_v16  ;;  %v9061_v16 = vld [vmem:[%s14377_s9 + $0x1e0] ss:$8 sps:$4 sm:$0xff]  }
 0x85d   :  { %v1769_v25 = vsel %vm920_vm10, %v11098_v31, %v8888_v10  ;;  %v2847_v12 = vsel %vm920_vm10, %v8622_v39, %v8889_v22  ;;  %v9024_v31 = vld [vmem:[%s14377_s9 + $0x114] ss:$8 sps:$4 sm:$0xff]   ;;  %v9034_v39 = vld [vmem:[%s14377_s9 + $0x150] ss:$8 sps:$4 sm:$0xff]  }
 0x85e   :  { %v8892_v26 = vpop.permute.xlu1 %8891  ;;  %v1905_v28 = vpack.c.bf16 %v1769_v25, %v1769_v25  ;;  %v2855_v17 = vpack.c.bf16 %v2847_v12, %v2847_v12  ;;  %v9066_v22 = vld [vmem:[%s14377_s9 + $0x1f4] ss:$8 sps:$4 sm:$0xff]  }
 0x85f   :  { %v8894_v18 = vunpack.i.h.bf16 %v8892_v26  ;;  %v8893_v32 = vunpack.i.l.bf16 %v8892_v26 }
 0x860   :  { %2584 = vmatprep.mubr.bf16.mxu1 %v1905_v28  ;;  %2894 = vmatprep.mubr.bf16.mxu0 %v2855_v17  ;;  %v9064_v28 = vld [vmem:[%s14377_s9 + $0x1f0] ss:$8 sps:$4 sm:$0xff]   ;;  %v9069_v17 = vld [vmem:[%s14377_s9 + $0x204] ss:$8 sps:$4 sm:$0xff]  }
 0x861   :  { %v2846_v23 = vsel %vm920_vm10, %v2751_v42, %v8894_v18  ;;  %v1768_v24 = vsel %vm920_vm10, %v11100_v33, %v8893_v32  ;;  %v9022_v33 = vld [vmem:[%s14377_s9 + $0x110] ss:$8 sps:$4 sm:$0xff]   ;;  %v9037_v42 = vld [vmem:[%s14377_s9 + $0x160] ss:$8 sps:$4 sm:$0xff]  }
 0x862   :  { %v2854_v2 = vpack.c.bf16 %v2846_v23, %v2846_v23  ;;  %v1904_v63 = vpack.c.bf16 %v1768_v24, %v1768_v24  ;;  %v8897_v9 = vpop.permute.xlu1 %8896  ;;  %v9067_v24 = vld [vmem:[%s14377_s9 + $0x200] ss:$8 sps:$4 sm:$0xff]  }
 0x863   :  { %v8899_v34 = vunpack.i.h.bf16 %v8897_v9  ;;  %v8898_v14 = vunpack.i.l.bf16 %v8897_v9  ;;  %v9070_v9 = vld [vmem:[%s14377_s9 + $0x210] ss:$8 sps:$4 sm:$0xff]  }
 0x864   :  { %2585 = vmatmul.mubr.bf16.vlgmr.msra.gmra.mrb[76].mxu1 %v1904_v63  ;;  %2895 = vmatmul.mubr.bf16.vlgmr.msra.gmra.mrb[44].mxu0 %v2854_v2 }
 0x865   :  { %2594 = vmatpush1.bf16.msra.mxu1 %v9019_v27  ;;  %2904 = vmatpush1.bf16.msra.mxu0 %v9019_v27  ;;  %v1771_v6 = vsel %vm920_vm10, %v11102_v35, %v8898_v14  ;;  %v2849_v38 = vsel %vm920_vm10, %v8626_v29, %v8899_v34  ;;  %v9030_v35 = vld [vmem:[%s14377_s9 + $0x134] ss:$8 sps:$4 sm:$0xff]   ;;  %v9076_v14 = vld [vmem:[%s14377_s9 + $0x230] ss:$8 sps:$4 sm:$0xff]  }
 0x866   :  { %2595 = vmatprep.subr.bf16.mxu1 %v9024_v31  ;;  %2905 = vmatprep.subr.bf16.mxu0 %v9024_v31  ;;  %v1907_v37 = vpack.c.bf16 %v1771_v6, %v1771_v6  ;;  %v2857_v50 = vpack.c.bf16 %v2849_v38, %v2849_v38  ;;  %v9048_v29 = vld [vmem:[%s14377_s9 + $0x194] ss:$8 sps:$4 sm:$0xff]   ;;  %v8902_v8 = vpop.permute.xlu1 %8901  ;;  %v9073_v31 = vld [vmem:[%s14377_s9 + $0x220] ss:$8 sps:$4 sm:$0xff]  }
 0x867   :  { %v8904_v10 = vunpack.i.h.bf16 %v8902_v8  ;;  %v8903_v25 = vunpack.i.l.bf16 %v8902_v8  ;;  %v9078_v34 = vld [vmem:[%s14377_s9 + $0x234] ss:$8 sps:$4 sm:$0xff]   ;;  %v9079_v6 = vld [vmem:[%s14377_s9 + $0x240] ss:$8 sps:$4 sm:$0xff]   ;;  %v9112_v8 = vld [vmem:[%s14377_s9 + $0x2f0] ss:$8 sps:$4 sm:$0xff]  }
 0x868   :  { %2625 = vmatprep.mubr.bf16.mxu1 %v1907_v37  ;;  %2935 = vmatprep.mubr.bf16.mxu0 %v2857_v50  ;;  %v9084_v38 = vld [vmem:[%s14377_s9 + $0x254] ss:$8 sps:$4 sm:$0xff]   ;;  %v9082_v37 = vld [vmem:[%s14377_s9 + $0x250] ss:$8 sps:$4 sm:$0xff]   ;;  %v9087_v50 = vld [vmem:[%s14377_s9 + $0x264] ss:$8 sps:$4 sm:$0xff]  }
 0x869   :  { %2596 = vmatpush1.bf16.msra.mxu1 %v9022_v33  ;;  %2906 = vmatpush1.bf16.msra.mxu0 %v9022_v33  ;;  %v2848_v18 = vsel %vm920_vm10, %v11131_v61, %v8904_v10  ;;  %v1770_v32 = vsel %vm920_vm10, %v11104_v36, %v8903_v25  ;;  %v9072_v36 = vld [vmem:[%s14377_s9 + $0x214] ss:$8 sps:$4 sm:$0xff]   ;;  %v9081_v33 = vld [vmem:[%s14377_s9 + $0x244] ss:$8 sps:$4 sm:$0xff]  }
 0x86a   :  { %2597 = vmatprep.subr.bf16.mxu1 %v9027_v53  ;;  %2907 = vmatprep.subr.bf16.mxu0 %v9027_v53  ;;  %v8907_v21 = vpop.permute.xlu1 %8906  ;;  %v2856_v2 = vpack.c.bf16 %v2848_v18, %v2848_v18  ;;  %v1906_v63 = vpack.c.bf16 %v1770_v32, %v1770_v32  ;;  %v9085_v53 = vld [vmem:[%s14377_s9 + $0x260] ss:$8 sps:$4 sm:$0xff]   ;;  %v9126_v18 = vld [vmem:[%s14377_s9 + $0x334] ss:$8 sps:$4 sm:$0xff]   ;;  %v9124_v32 = vld [vmem:[%s14377_s9 + $0x330] ss:$8 sps:$4 sm:$0xff]  }
 0x86b   :  { %v8908_v12 = vunpack.i.l.bf16 %v8907_v21  ;;  %v8909_v26 = vunpack.i.h.bf16 %v8907_v21 }
 0x86d   :  { %2598 = vmatpush1.bf16.msra.mxu1 %v9025_v54  ;;  %2908 = vmatpush1.bf16.msra.mxu0 %v9025_v54  ;;  %v1773_v23 = vsel %vm920_vm10, %v11106_v49, %v8908_v12  ;;  %v2851_v27 = vsel %vm920_vm10, %v11134_v47, %v8909_v26  ;;  %v9075_v47 = vld [vmem:[%s14377_s9 + $0x224] ss:$8 sps:$4 sm:$0xff]   ;;  %v9090_v54 = vld [vmem:[%s14377_s9 + $0x274] ss:$8 sps:$4 sm:$0xff]  }
 0x86e   :  { %2599 = vmatprep.subr.bf16.mxu1 %v9030_v35  ;;  %2909 = vmatprep.subr.bf16.mxu0 %v9030_v35  ;;  %v1909_v61 = vpack.c.bf16 %v1773_v23, %v1773_v23  ;;  %v2859_v49 = vpack.c.bf16 %v2851_v27, %v2851_v27  ;;  %v9088_v35 = vld [vmem:[%s14377_s9 + $0x270] ss:$8 sps:$4 sm:$0xff]   ;;  %v9129_v23 = vld [vmem:[%s14377_s9 + $0x344] ss:$8 sps:$4 sm:$0xff]   ;;  %v9132_v27 = vld [vmem:[%s14377_s9 + $0x354] ss:$8 sps:$4 sm:$0xff]  }
 0x871   :  { %2600 = vmatpush1.bf16.msra.mxu1 %v9028_v57  ;;  %2910 = vmatpush1.bf16.msra.mxu0 %v9028_v57  ;;  %v9093_v57 = vld [vmem:[%s14377_s9 + $0x284] ss:$8 sps:$4 sm:$0xff]  }
 0x872   :  { %2601 = vmatprep.subr.bf16.mxu1 %v9033_v58  ;;  %2911 = vmatprep.subr.bf16.mxu0 %v9033_v58  ;;  %v9091_v58 = vld [vmem:[%s14377_s9 + $0x280] ss:$8 sps:$4 sm:$0xff]  }
 0x875   :  { %2602 = vmatpush1.bf16.msra.mxu1 %v9031_v59  ;;  %2912 = vmatpush1.bf16.msra.mxu0 %v9031_v59  ;;  %v9096_v59 = vld [vmem:[%s14377_s9 + $0x294] ss:$8 sps:$4 sm:$0xff]  }
 0x876   :  { %2603 = vmatprep.subr.bf16.mxu1 %v9036_v60  ;;  %2913 = vmatprep.subr.bf16.mxu0 %v9036_v60  ;;  %v9094_v60 = vld [vmem:[%s14377_s9 + $0x290] ss:$8 sps:$4 sm:$0xff]  }
 0x879   :  { %2604 = vmatpush1.bf16.msra.mxu1 %v9034_v39  ;;  %2914 = vmatpush1.bf16.msra.mxu0 %v9034_v39  ;;  %v9099_v39 = vld [vmem:[%s14377_s9 + $0x2a4] ss:$8 sps:$4 sm:$0xff]  }
 0x87a   :  { %2605 = vmatprep.subr.bf16.mxu1 %v9039_v40  ;;  %2915 = vmatprep.subr.bf16.mxu0 %v9039_v40  ;;  %v9097_v40 = vld [vmem:[%s14377_s9 + $0x2a0] ss:$8 sps:$4 sm:$0xff]  }
 0x87d   :  { %2606 = vmatpush1.bf16.msra.mxu1 %v9037_v42  ;;  %2916 = vmatpush1.bf16.msra.mxu0 %v9037_v42  ;;  %v9102_v42 = vld [vmem:[%s14377_s9 + $0x2b4] ss:$8 sps:$4 sm:$0xff]  }
 0x87e   :  { %2607 = vmatprep.subr.bf16.mxu1 %v9042_v43  ;;  %2917 = vmatprep.subr.bf16.mxu0 %v9042_v43  ;;  %v9100_v43 = vld [vmem:[%s14377_s9 + $0x2b0] ss:$8 sps:$4 sm:$0xff]  }
 0x881   :  { %2608 = vmatpush1.bf16.msra.mxu1 %v9040_v52  ;;  %2918 = vmatpush1.bf16.msra.mxu0 %v9040_v52  ;;  %v9105_v52 = vld [vmem:[%s14377_s9 + $0x2c4] ss:$8 sps:$4 sm:$0xff]  }
 0x882   :  { %2609 = vmatprep.subr.bf16.mxu1 %v9045_v44  ;;  %2919 = vmatprep.subr.bf16.mxu0 %v9045_v44  ;;  %v9103_v44 = vld [vmem:[%s14377_s9 + $0x2c0] ss:$8 sps:$4 sm:$0xff]  }
 0x885   :  { %2610 = vmatpush1.bf16.msra.mxu1 %v9043_v11  ;;  %2920 = vmatpush1.bf16.msra.mxu0 %v9043_v11  ;;  %v9108_v11 = vld [vmem:[%s14377_s9 + $0x2d4] ss:$8 sps:$4 sm:$0xff]  }
 0x886   :  { %2611 = vmatprep.subr.bf16.mxu1 %v9048_v29  ;;  %2921 = vmatprep.subr.bf16.mxu0 %v9048_v29  ;;  %v9106_v29 = vld [vmem:[%s14377_s9 + $0x2d0] ss:$8 sps:$4 sm:$0xff]  }
 0x889   :  { %2612 = vmatpush1.bf16.msra.mxu1 %v9046_v41  ;;  %2922 = vmatpush1.bf16.msra.mxu0 %v9046_v41  ;;  %v9111_v41 = vld [vmem:[%s14377_s9 + $0x2e4] ss:$8 sps:$4 sm:$0xff]  }
 0x88a   :  { %2613 = vmatprep.subr.bf16.mxu1 %v9051_v45  ;;  %2923 = vmatprep.subr.bf16.mxu0 %v9051_v45  ;;  %v8912_v45 = vpop.permute.xlu1 %8911 }
 0x88d   :  { %2614 = vmatpush1.bf16.msra.mxu1 %v9049_v55  ;;  %2924 = vmatpush1.bf16.msra.mxu0 %v9049_v55  ;;  %v9109_v55 = vld [vmem:[%s14377_s9 + $0x2e0] ss:$8 sps:$4 sm:$0xff]  }
 0x88e   :  { %2615 = vmatprep.subr.bf16.mxu1 %v9054_v46  ;;  %2925 = vmatprep.subr.bf16.mxu0 %v9054_v46  ;;  %v8917_v46 = vpop.permute.xlu0 %8916 }
 0x891   :  { %2616 = vmatpush1.bf16.msra.mxu1 %v9052_v30  ;;  %2926 = vmatpush1.bf16.msra.mxu0 %v9052_v30  ;;  %v9114_v30 = vld [vmem:[%s14377_s9 + $0x2f4] ss:$8 sps:$4 sm:$0xff]  }
 0x892   :  { %2617 = vmatprep.subr.bf16.mxu1 %v9057_v0  ;;  %2927 = vmatprep.subr.bf16.mxu0 %v9057_v0  ;;  %v8913_v0 = vunpack.i.l.bf16 %v8912_v45 }
 0x894   :  { %v1772_v21 = vsel %vm920_vm10, %v11108_v62, %v8913_v0  ;;  %v9120_v62 = vld [vmem:[%s14377_s9 + $0x314] ss:$8 sps:$4 sm:$0xff]  }
 0x895   :  { %2618 = vmatpush1.bf16.msra.mxu1 %v9055_v5  ;;  %2928 = vmatpush1.bf16.msra.mxu0 %v9055_v5  ;;  %v8914_v5 = vunpack.i.h.bf16 %v8912_v45  ;;  %v1908_v25 = vpack.c.bf16 %v1772_v21, %v1772_v21 }
 0x896   :  { %2619 = vmatprep.subr.bf16.mxu1 %v9060_v3  ;;  %2929 = vmatprep.subr.bf16.mxu0 %v9060_v3  ;;  %v8918_v3 = vunpack.i.l.bf16 %v8917_v46 }
 0x898   :  { %v1775_v10 = vsel %vm920_vm10, %v11110_v51, %v8918_v3  ;;  %v9118_v51 = vld [vmem:[%s14377_s9 + $0x310] ss:$8 sps:$4 sm:$0xff]  }
 0x899   :  { %2620 = vmatpush1.bf16.msra.mxu1 %v9058_v13  ;;  %2930 = vmatpush1.bf16.msra.mxu0 %v9058_v13  ;;  %v8919_v13 = vunpack.i.h.bf16 %v8917_v46 }
 0x89a   :  { %2621 = vmatprep.subr.bf16.mxu1 %v9063_v15  ;;  %2931 = vmatprep.subr.bf16.mxu0 %v9063_v15  ;;  %v9117_v15 = vld [vmem:[%s14377_s9 + $0x304] ss:$8 sps:$4 sm:$0xff]  }
 0x89b   :  { %v2853_v12 = vsel %vm920_vm10, %v11140_v4, %v8919_v13  ;;  %v9123_v4 = vld [vmem:[%s14377_s9 + $0x324] ss:$8 sps:$4 sm:$0xff]  }
 0x89d   :  { %2622 = vmatpush1.bf16.msra.mxu1 %v9061_v16  ;;  %2932 = vmatpush1.bf16.msra.mxu0 %v9061_v16  ;;  %v2850_v16 = vsel %vm920_vm10, %v11137_v48, %v8914_v5  ;;  %v1911_v48 = vpack.c.bf16 %v1775_v10, %v1775_v10 }
 0x89e   :  { %2623 = vmatprep.subr.bf16.mxu1 %v9066_v22  ;;  %2933 = vmatprep.subr.bf16.mxu0 %v9066_v22  ;;  %v9115_v22 = vld [vmem:[%s14377_s9 + $0x300] ss:$8 sps:$4 sm:$0xff]   ;;  %v2858_v26 = vpack.c.bf16 %v2850_v16, %v2850_v16 }
 0x8a1   :  { %2624 = vmatpush1.bf16.msra.mxu1 %v9064_v28  ;;  %2934 = vmatpush1.bf16.msra.mxu0 %v9064_v28  ;;  %v2861_v28 = vpack.c.bf16 %v2853_v12, %v2853_v12 }
 0x8a2   :  { %2634 = vmatprep.subr.bf16.mxu1 %v9069_v17  ;;  %2944 = vmatprep.subr.bf16.mxu0 %v9069_v17  ;;  %v9121_v17 = vld [vmem:[%s14377_s9 + $0x320] ss:$8 sps:$4 sm:$0xff]  }
 0x8a4   :  { %2626 = vmatmul.mubr.bf16.vlgmr.msra.gmra.mrb[76].mxu1 %v1906_v63  ;;  %2936 = vmatmul.mubr.bf16.vlgmr.msra.gmra.mrb[44].mxu0 %v2856_v2  ;;  %v9130_v2 = vld [vmem:[%s14377_s9 + $0x350] ss:$8 sps:$4 sm:$0xff]   ;;  %v9135_v63 = vld [vmem:[%s14377_s9 + $0x364] ss:$8 sps:$4 sm:$0xff]  }
 0x8a5   :  { %2635 = vmatpush1.bf16.msra.mxu1 %v9067_v24  ;;  %2666 = vmatprep.mubr.bf16.mxu1 %v1909_v61  ;;  %v9133_v61 = vld [vmem:[%s14377_s9 + $0x360] ss:$8 sps:$4 sm:$0xff]  }
 0x8a6   :  { %2945 = vmatpush1.bf16.msra.mxu0 %v9067_v24  ;;  %2976 = vmatprep.mubr.bf16.mxu0 %v2859_v49  ;;  %v9127_v24 = vld [vmem:[%s14377_s9 + $0x340] ss:$8 sps:$4 sm:$0xff]   ;;  %v9136_v49 = vld [vmem:[%s14377_s9 + $0x370] ss:$8 sps:$4 sm:$0xff]  }
 0x8a7   :  { %2636 = vmatprep.subr.bf16.mxu1 %v9072_v36  ;;  %2946 = vmatprep.subr.bf16.mxu0 %v9072_v36  ;;  %v9138_v36 = vld [vmem:[%s14377_s9 + $0x374] ss:$8 sps:$4 sm:$0xff]  }
 0x8a9   :  { %2637 = vmatpush1.bf16.msra.mxu1 %v9070_v9 }
 0x8aa   :  { %2947 = vmatpush1.bf16.msra.mxu0 %v9070_v9  ;;  %2638 = vmatprep.subr.bf16.mxu1 %v9075_v47  ;;  %v9141_v9 = vld [vmem:[%s14377_s9 + $0x384] ss:$8 sps:$4 sm:$0xff]  }
 0x8ab   :  { %2948 = vmatprep.subr.bf16.mxu0 %v9075_v47  ;;  %v9139_v47 = vld [vmem:[%s14377_s9 + $0x380] ss:$8 sps:$4 sm:$0xff]  }
 0x8ad   :  { %2639 = vmatpush1.bf16.msra.mxu1 %v9073_v31 }
 0x8ae   :  { %2949 = vmatpush1.bf16.msra.mxu0 %v9073_v31  ;;  %2640 = vmatprep.subr.bf16.mxu1 %v9078_v34  ;;  %v9144_v31 = vld [vmem:[%s14377_s9 + $0x394] ss:$8 sps:$4 sm:$0xff]  }
 0x8af   :  { %2950 = vmatprep.subr.bf16.mxu0 %v9078_v34  ;;  %v9142_v34 = vld [vmem:[%s14377_s9 + $0x390] ss:$8 sps:$4 sm:$0xff]  }
 0x8b1   :  { %2641 = vmatpush1.bf16.msra.mxu1 %v9076_v14 }
 0x8b2   :  { %2951 = vmatpush1.bf16.msra.mxu0 %v9076_v14  ;;  %2642 = vmatprep.subr.bf16.mxu1 %v9081_v33  ;;  %v9147_v14 = vld [vmem:[%s14377_s9 + $0x3a4] ss:$8 sps:$4 sm:$0xff]  }
 0x8b3   :  { %2952 = vmatprep.subr.bf16.mxu0 %v9081_v33  ;;  %v9145_v33 = vld [vmem:[%s14377_s9 + $0x3a0] ss:$8 sps:$4 sm:$0xff]  }
 0x8b5   :  { %2643 = vmatpush1.bf16.msra.mxu1 %v9079_v6 }
 0x8b6   :  { %2953 = vmatpush1.bf16.msra.mxu0 %v9079_v6  ;;  %2644 = vmatprep.subr.bf16.mxu1 %v9084_v38  ;;  %v9150_v6 = vld [vmem:[%s14377_s9 + $0x3b4] ss:$8 sps:$4 sm:$0xff]  }
 0x8b7   :  { %2954 = vmatprep.subr.bf16.mxu0 %v9084_v38  ;;  %v9148_v38 = vld [vmem:[%s14377_s9 + $0x3b0] ss:$8 sps:$4 sm:$0xff]  }
 0x8b9   :  { %2645 = vmatpush1.bf16.msra.mxu1 %v9082_v37 }
 0x8ba   :  { %2955 = vmatpush1.bf16.msra.mxu0 %v9082_v37  ;;  %2646 = vmatprep.subr.bf16.mxu1 %v9087_v50  ;;  %v9153_v37 = vld [vmem:[%s14377_s9 + $0x3c4] ss:$8 sps:$4 sm:$0xff]  }
 0x8bb   :  { %2956 = vmatprep.subr.bf16.mxu0 %v9087_v50  ;;  %v9151_v50 = vld [vmem:[%s14377_s9 + $0x3c0] ss:$8 sps:$4 sm:$0xff]  }
 0x8bd   :  { %2647 = vmatpush1.bf16.msra.mxu1 %v9085_v53 }
 0x8be   :  { %2957 = vmatpush1.bf16.msra.mxu0 %v9085_v53  ;;  %2648 = vmatprep.subr.bf16.mxu1 %v9090_v54  ;;  %v9156_v53 = vld [vmem:[%s14377_s9 + $0x3d4] ss:$8 sps:$4 sm:$0xff]  }
 0x8bf   :  { %2958 = vmatprep.subr.bf16.mxu0 %v9090_v54  ;;  %v9154_v54 = vld [vmem:[%s14377_s9 + $0x3d0] ss:$8 sps:$4 sm:$0xff]  }
 0x8c1   :  { %2649 = vmatpush1.bf16.msra.mxu1 %v9088_v35 }
 0x8c2   :  { %2959 = vmatpush1.bf16.msra.mxu0 %v9088_v35  ;;  %2650 = vmatprep.subr.bf16.mxu1 %v9093_v57  ;;  %v9159_v35 = vld [vmem:[%s14377_s9 + $0x3e4] ss:$8 sps:$4 sm:$0xff]  }
 0x8c3   :  { %2960 = vmatprep.subr.bf16.mxu0 %v9093_v57  ;;  %v8922_v57 = vpop.permute.xlu1 %8921 }
 0x8c5   :  { %2651 = vmatpush1.bf16.msra.mxu1 %v9091_v58 }
 0x8c6   :  { %2961 = vmatpush1.bf16.msra.mxu0 %v9091_v58  ;;  %2652 = vmatprep.subr.bf16.mxu1 %v9096_v59  ;;  %v9157_v58 = vld [vmem:[%s14377_s9 + $0x3e0] ss:$8 sps:$4 sm:$0xff]  }
 0x8c7   :  { %2962 = vmatprep.subr.bf16.mxu0 %v9096_v59  ;;  %v9162_v59 = vld [vmem:[%s14377_s9 + $0x3f4] ss:$8 sps:$4 sm:$0xff]  }
 0x8c9   :  { %2653 = vmatpush1.bf16.msra.mxu1 %v9094_v60 }
 0x8ca   :  { %2963 = vmatpush1.bf16.msra.mxu0 %v9094_v60  ;;  %2654 = vmatprep.subr.bf16.mxu1 %v9099_v39  ;;  %v8923_v60 = vunpack.i.l.bf16 %v8922_v57 }
 0x8cb   :  { %2964 = vmatprep.subr.bf16.mxu0 %v9099_v39  ;;  %v8924_v39 = vunpack.i.h.bf16 %v8922_v57  ;;  %v9214_v57 = vld [vmem:[%s14380_s13 + $0x1c8] ss:$28 sps:$4 sm:$0xff]  }
 0x8cd   :  { %2655 = vmatpush1.bf16.msra.mxu1 %v9097_v40 }
 0x8ce   :  { %2965 = vmatpush1.bf16.msra.mxu0 %v9097_v40  ;;  %2656 = vmatprep.subr.bf16.mxu1 %v9102_v42  ;;  %v9160_v40 = vld [vmem:[%s14377_s9 + $0x3f0] ss:$8 sps:$4 sm:$0xff]  }
 0x8cf   :  { %2966 = vmatprep.subr.bf16.mxu0 %v9102_v42  ;;  %v1774_v42 = vsel %vm920_vm10, %v11118_v56, %v8923_v60  ;;  %v9228_v60 = vld [vmem:[%s14380_s13 + $0x23c] ss:$28 sps:$4 sm:$0xff]  }
 0x8d1   :  { %2657 = vmatpush1.bf16.msra.mxu1 %v9100_v43 }
 0x8d2   :  { %2967 = vmatpush1.bf16.msra.mxu0 %v9100_v43  ;;  %2658 = vmatprep.subr.bf16.mxu1 %v9105_v52  ;;  %v2852_v43 = vsel %vm920_vm10, %v11143_v7, %v8924_v39  ;;  %v9226_v39 = vld [vmem:[%s14380_s13 + $0x238] ss:$28 sps:$4 sm:$0xff]  }
 0x8d3   :  { %2968 = vmatprep.subr.bf16.mxu0 %v9105_v52  ;;  %v1910_v52 = vpack.c.bf16 %v1774_v42, %v1774_v42  ;;  %v9232_v42 = vld [vmem:[%s14380_s13 + $0x270] ss:$28 sps:$4 sm:$0xff]  }
 0x8d5   :  { %2659 = vmatpush1.bf16.msra.mxu1 %v9103_v44 }
 0x8d6   :  { %2969 = vmatpush1.bf16.msra.mxu0 %v9103_v44  ;;  %2660 = vmatprep.subr.bf16.mxu1 %v9108_v11  ;;  %v2860_v44 = vpack.c.bf16 %v2852_v43, %v2852_v43  ;;  %v9240_v43 = vld [vmem:[%s14380_s13 + $0x2ac] ss:$28 sps:$4 sm:$0xff]  }
 0x8d7   :  { %2970 = vmatprep.subr.bf16.mxu0 %v9108_v11 }
 0x8d9   :  { %2661 = vmatpush1.bf16.msra.mxu1 %v9106_v29 }
 0x8da   :  { %2971 = vmatpush1.bf16.msra.mxu0 %v9106_v29  ;;  %2662 = vmatprep.subr.bf16.mxu1 %v9111_v41 }
 0x8db   :  { %2972 = vmatprep.subr.bf16.mxu0 %v9111_v41 }
 0x8dd   :  { %2663 = vmatpush1.bf16.msra.mxu1 %v9109_v55 }
 0x8de   :  { %2973 = vmatpush1.bf16.msra.mxu0 %v9109_v55  ;;  %2664 = vmatprep.subr.bf16.mxu1 %v9114_v30 }
 0x8df   :  { %2974 = vmatprep.subr.bf16.mxu0 %v9114_v30 }
 0x8e1   :  { %2665 = vmatpush1.bf16.msra.mxu1 %v9112_v8 }
 0x8e2   :  { %2975 = vmatpush1.bf16.msra.mxu0 %v9112_v8  ;;  %2675 = vmatprep.subr.bf16.mxu1 %v9117_v15 }
 0x8e3   :  { %2985 = vmatprep.subr.bf16.mxu0 %v9117_v15 }
 0x8e4   :  { %2667 = vmatmul.mubr.bf16.vlgmr.msra.gmra.mrb[76].mxu1 %v1908_v25 }
 0x8e5   :  { %2977 = vmatmul.mubr.bf16.vlgmr.msra.gmra.mrb[44].mxu0 %v2858_v26  ;;  %2676 = vmatpush1.bf16.msra.mxu1 %v9115_v22 }
 0x8e6   :  { %2707 = vmatprep.mubr.bf16.mxu1 %v1911_v48  ;;  %2986 = vmatpush1.bf16.msra.mxu0 %v9115_v22 }
 0x8e7   :  { %3017 = vmatprep.mubr.bf16.mxu0 %v2861_v28  ;;  %2677 = vmatprep.subr.bf16.mxu1 %v9120_v62 }
 0x8e8   :  { %2987 = vmatprep.subr.bf16.mxu0 %v9120_v62 }
 0x8e9   :  { %2678 = vmatpush1.bf16.msra.mxu1 %v9118_v51 }
 0x8ea   :  { %2988 = vmatpush1.bf16.msra.mxu0 %v9118_v51  ;;  %2679 = vmatprep.subr.bf16.mxu1 %v9123_v4 }
 0x8eb   :  { %2989 = vmatprep.subr.bf16.mxu0 %v9123_v4 }
 0x8ed   :  { %2680 = vmatpush1.bf16.msra.mxu1 %v9121_v17 }
 0x8ee   :  { %2990 = vmatpush1.bf16.msra.mxu0 %v9121_v17  ;;  %2681 = vmatprep.subr.bf16.mxu1 %v9126_v18 }
 0x8ef   :  { %2991 = vmatprep.subr.bf16.mxu0 %v9126_v18  ;;  %v3052_v18 = vld [vmem:[%s14378_s10] sm:$0xff] }
 0x8f1   :  { %2682 = vmatpush1.bf16.msra.mxu1 %v9124_v32 }
 0x8f2   :  { %2992 = vmatpush1.bf16.msra.mxu0 %v9124_v32  ;;  %2683 = vmatprep.subr.bf16.mxu1 %v9129_v23 }
 0x8f3   :  { %2993 = vmatprep.subr.bf16.mxu0 %v9129_v23 }
 0x8f5   :  { %2684 = vmatpush1.bf16.msra.mxu1 %v9127_v24 }
 0x8f6   :  { %2994 = vmatpush1.bf16.msra.mxu0 %v9127_v24  ;;  %2685 = vmatprep.subr.bf16.mxu1 %v9132_v27  ;;  %v3056_v24 = vld [vmem:[%s14379_s11] sm:$0xff] }
 0x8f7   :  { %2995 = vmatprep.subr.bf16.mxu0 %v9132_v27 }
 0x8f9   :  { %2686 = vmatpush1.bf16.msra.mxu1 %v9130_v2 }
 0x8fa   :  { %2996 = vmatpush1.bf16.msra.mxu0 %v9130_v2  ;;  %2687 = vmatprep.subr.bf16.mxu1 %v9135_v63 }
 0x8fb   :  { %2997 = vmatprep.subr.bf16.mxu0 %v9135_v63  ;;  %v9166_v63 = vld [vmem:[%s14380_s13 + $0x8] ss:$28 sps:$4 sm:$0xff]  }
 0x8fd   :  { %2688 = vmatpush1.bf16.msra.mxu1 %v9133_v61 }
 0x8fe   :  { %2998 = vmatpush1.bf16.msra.mxu0 %v9133_v61  ;;  %2689 = vmatprep.subr.bf16.mxu1 %v9138_v36  ;;  %v9168_v61 = vld [vmem:[%s14380_s13 + $0xc] ss:$28 sps:$4 sm:$0xff]  }
 0x8ff   :  { %2999 = vmatprep.subr.bf16.mxu0 %v9138_v36  ;;  %v9172_v36 = vld [vmem:[%s14380_s13 + $0x40] ss:$28 sps:$4 sm:$0xff]  }
 0x901   :  { %2690 = vmatpush1.bf16.msra.mxu1 %v9136_v49 }
 0x902   :  { %3000 = vmatpush1.bf16.msra.mxu0 %v9136_v49  ;;  %2691 = vmatprep.subr.bf16.mxu1 %v9141_v9  ;;  %v9174_v49 = vld [vmem:[%s14380_s13 + $0x44] ss:$28 sps:$4 sm:$0xff]  }
 0x903   :  { %3001 = vmatprep.subr.bf16.mxu0 %v9141_v9  ;;  %v9180_v9 = vld [vmem:[%s14380_s13 + $0x7c] ss:$28 sps:$4 sm:$0xff]  }
 0x905   :  { %2692 = vmatpush1.bf16.msra.mxu1 %v9139_v47 }
 0x906   :  { %3002 = vmatpush1.bf16.msra.mxu0 %v9139_v47  ;;  %2693 = vmatprep.subr.bf16.mxu1 %v9144_v31  ;;  %v9178_v47 = vld [vmem:[%s14380_s13 + $0x78] ss:$28 sps:$4 sm:$0xff]  }
 0x907   :  { %3003 = vmatprep.subr.bf16.mxu0 %v9144_v31  ;;  %v9186_v31 = vld [vmem:[%s14380_s13 + $0xb4] ss:$28 sps:$4 sm:$0xff]  }
 0x909   :  { %2694 = vmatpush1.bf16.msra.mxu1 %v9142_v34 }
 0x90a   :  { %3004 = vmatpush1.bf16.msra.mxu0 %v9142_v34  ;;  %2695 = vmatprep.subr.bf16.mxu1 %v9147_v14  ;;  %v9184_v34 = vld [vmem:[%s14380_s13 + $0xb0] ss:$28 sps:$4 sm:$0xff]  }
 0x90b   :  { %3005 = vmatprep.subr.bf16.mxu0 %v9147_v14  ;;  %v9192_v14 = vld [vmem:[%s14380_s13 + $0xec] ss:$28 sps:$4 sm:$0xff]  }
 0x90d   :  { %2696 = vmatpush1.bf16.msra.mxu1 %v9145_v33 }
 0x90e   :  { %3006 = vmatpush1.bf16.msra.mxu0 %v9145_v33  ;;  %2697 = vmatprep.subr.bf16.mxu1 %v9150_v6  ;;  %v9190_v33 = vld [vmem:[%s14380_s13 + $0xe8] ss:$28 sps:$4 sm:$0xff]  }
 0x90f   :  { %3007 = vmatprep.subr.bf16.mxu0 %v9150_v6  ;;  %v9198_v6 = vld [vmem:[%s14380_s13 + $0x124] ss:$28 sps:$4 sm:$0xff]  }
 0x911   :  { %2698 = vmatpush1.bf16.msra.mxu1 %v9148_v38 }
 0x912   :  { %3008 = vmatpush1.bf16.msra.mxu0 %v9148_v38  ;;  %2699 = vmatprep.subr.bf16.mxu1 %v9153_v37  ;;  %v9196_v38 = vld [vmem:[%s14380_s13 + $0x120] ss:$28 sps:$4 sm:$0xff]  }
 0x913   :  { %3009 = vmatprep.subr.bf16.mxu0 %v9153_v37  ;;  %v9204_v37 = vld [vmem:[%s14380_s13 + $0x15c] ss:$28 sps:$4 sm:$0xff]  }
 0x915   :  { %2700 = vmatpush1.bf16.msra.mxu1 %v9151_v50 }
 0x916   :  { %3010 = vmatpush1.bf16.msra.mxu0 %v9151_v50  ;;  %2701 = vmatprep.subr.bf16.mxu1 %v9156_v53  ;;  %v9202_v50 = vld [vmem:[%s14380_s13 + $0x158] ss:$28 sps:$4 sm:$0xff]  }
 0x917   :  { %3011 = vmatprep.subr.bf16.mxu0 %v9156_v53  ;;  %v9210_v53 = vld [vmem:[%s14380_s13 + $0x194] ss:$28 sps:$4 sm:$0xff]  }
 0x919   :  { %2702 = vmatpush1.bf16.msra.mxu1 %v9154_v54 }
 0x91a   :  { %3012 = vmatpush1.bf16.msra.mxu0 %v9154_v54  ;;  %2703 = vmatprep.subr.bf16.mxu1 %v9159_v35  ;;  %v9208_v54 = vld [vmem:[%s14380_s13 + $0x190] ss:$28 sps:$4 sm:$0xff]  }
 0x91b   :  { %3013 = vmatprep.subr.bf16.mxu0 %v9159_v35  ;;  %v9216_v35 = vld [vmem:[%s14380_s13 + $0x1cc] ss:$28 sps:$4 sm:$0xff]  }
 0x91d   :  { %2704 = vmatpush1.bf16.msra.mxu1 %v9157_v58 }
 0x91e   :  { %3014 = vmatpush1.bf16.msra.mxu0 %v9157_v58  ;;  %2705 = vmatprep.subr.bf16.mxu1 %v9162_v59  ;;  %v9222_v58 = vld [vmem:[%s14380_s13 + $0x204] ss:$28 sps:$4 sm:$0xff]  }
 0x91f   :  { %3015 = vmatprep.subr.bf16.mxu0 %v9162_v59  ;;  %v9220_v59 = vld [vmem:[%s14380_s13 + $0x200] ss:$28 sps:$4 sm:$0xff]  }
 0x921   :  { %2706 = vmatpush1.bf16.msra.mxu1 %v9160_v40 }
 0x922   :  { %3016 = vmatpush1.bf16.msra.mxu0 %v9160_v40  ;;  %v9234_v40 = vld [vmem:[%s14380_s13 + $0x274] ss:$28 sps:$4 sm:$0xff]  }
 0x923   :  { %6137 = vmatprep.subr.bf16.mxu0 %v9168_v61  ;;  %v9213_v61 = vld [vmem:[%s14380_s13 + $0x1c4] ss:$28 sps:$4 sm:$0xff]  }
 0x924   :  { %2708 = vmatmul.mubr.bf16.vlgmr.msra.gmra.mrb[76].mxu1 %v1910_v52  ;;  %v9238_v52 = vld [vmem:[%s14380_s13 + $0x2a8] ss:$28 sps:$4 sm:$0xff]  }
 0x925   :  { %3018 = vmatmul.mubr.bf16.vlgmr.msra.gmra.mrb[44].mxu0 %v2860_v44  ;;  %3126 = vmatprep.mubr.bf16.mxu1 %v10316_v1  ;;  %v9246_v44 = vld [vmem:[%s14380_s13 + $0x2e4] ss:$28 sps:$4 sm:$0xff]  }
 0x926   :  { %6138 = vmatpush1.bf16.msra.mxu0 %v9166_v63  ;;  %v9205_v63 = vld [vmem:[%s14380_s13 + $0x188] ss:$28 sps:$4 sm:$0xff]  }
 0x927   :  { %6139 = vmatprep.subr.bf16.mxu0 %v9174_v49  ;;  %v9219_v49 = vld [vmem:[%s14380_s13 + $0x1fc] ss:$28 sps:$4 sm:$0xff]  }
 0x92a   :  { %6140 = vmatpush1.bf16.msra.mxu0 %v9172_v36  ;;  %v9211_v36 = vld [vmem:[%s14380_s13 + $0x1c0] ss:$28 sps:$4 sm:$0xff]  }
 0x92b   :  { %6141 = vmatprep.subr.bf16.mxu0 %v9180_v9  ;;  %v9217_v9 = vld [vmem:[%s14380_s13 + $0x1f8] ss:$28 sps:$4 sm:$0xff]  }
 0x92e   :  { %6142 = vmatpush1.bf16.msra.mxu0 %v9178_v47  ;;  %v9225_v47 = vld [vmem:[%s14380_s13 + $0x234] ss:$28 sps:$4 sm:$0xff]  }
 0x92f   :  { %6143 = vmatprep.subr.bf16.mxu0 %v9186_v31  ;;  %v9223_v31 = vld [vmem:[%s14380_s13 + $0x230] ss:$28 sps:$4 sm:$0xff]  }
 0x932   :  { %6144 = vmatpush1.bf16.msra.mxu0 %v9184_v34  ;;  %v9231_v34 = vld [vmem:[%s14380_s13 + $0x26c] ss:$28 sps:$4 sm:$0xff]  }
 0x933   :  { %6145 = vmatprep.subr.bf16.mxu0 %v9192_v14  ;;  %v9229_v14 = vld [vmem:[%s14380_s13 + $0x268] ss:$28 sps:$4 sm:$0xff]  }
 0x936   :  { %6146 = vmatpush1.bf16.msra.mxu0 %v9190_v33  ;;  %v9237_v33 = vld [vmem:[%s14380_s13 + $0x2a4] ss:$28 sps:$4 sm:$0xff]  }
 0x937   :  { %6147 = vmatprep.subr.bf16.mxu0 %v9198_v6  ;;  %v9235_v6 = vld [vmem:[%s14380_s13 + $0x2a0] ss:$28 sps:$4 sm:$0xff]  }
 0x93a   :  { %6148 = vmatpush1.bf16.msra.mxu0 %v9196_v38  ;;  %v9243_v38 = vld [vmem:[%s14380_s13 + $0x2dc] ss:$28 sps:$4 sm:$0xff]  }
 0x93b   :  { %6149 = vmatprep.subr.bf16.mxu0 %v9204_v37  ;;  %v9241_v37 = vld [vmem:[%s14380_s13 + $0x2d8] ss:$28 sps:$4 sm:$0xff]  }
 0x93e   :  { %6150 = vmatpush1.bf16.msra.mxu0 %v9202_v50  ;;  %v9249_v50 = vld [vmem:[%s14380_s13 + $0x314] ss:$28 sps:$4 sm:$0xff]  }
 0x93f   :  { %6151 = vmatprep.subr.bf16.mxu0 %v9210_v53  ;;  %v9247_v53 = vld [vmem:[%s14380_s13 + $0x310] ss:$28 sps:$4 sm:$0xff]  }
 0x942   :  { %6152 = vmatpush1.bf16.msra.mxu0 %v9208_v54  ;;  %v9255_v54 = vld [vmem:[%s14380_s13 + $0x34c] ss:$28 sps:$4 sm:$0xff]  }
 0x943   :  { %6153 = vmatprep.subr.bf16.mxu0 %v9216_v35  ;;  %v9258_v35 = vld [vmem:[%s14380_s13 + $0x354] ss:$28 sps:$4 sm:$0xff]  }
 0x946   :  { %6154 = vmatpush1.bf16.msra.mxu0 %v9214_v57  ;;  %v9253_v57 = vld [vmem:[%s14380_s13 + $0x348] ss:$28 sps:$4 sm:$0xff]  }
 0x947   :  { %6155 = vmatprep.subr.bf16.mxu0 %v9222_v58  ;;  %v9256_v58 = vld [vmem:[%s14380_s13 + $0x350] ss:$28 sps:$4 sm:$0xff]  }
 0x94a   :  { %6156 = vmatpush1.bf16.msra.mxu0 %v9220_v59  ;;  %v9261_v59 = vld [vmem:[%s14380_s13 + $0x384] ss:$28 sps:$4 sm:$0xff]  }
 0x94b   :  { %6157 = vmatprep.subr.bf16.mxu0 %v9228_v60  ;;  %v9264_v60 = vld [vmem:[%s14380_s13 + $0x38c] ss:$28 sps:$4 sm:$0xff]  }
 0x94e   :  { %6158 = vmatpush1.bf16.msra.mxu0 %v9226_v39 }
 0x94f   :  { %6159 = vmatprep.subr.bf16.mxu0 %v9234_v40 }
 0x952   :  { %6160 = vmatpush1.bf16.msra.mxu0 %v9232_v42 }
 0x953   :  { %6161 = vmatprep.subr.bf16.mxu0 %v9240_v43 }
 0x956   :  { %6162 = vmatpush1.bf16.msra.mxu0 %v9238_v52 }
 0x957   :  { %6163 = vmatprep.subr.bf16.mxu0 %v9246_v44  ;;  %v9259_v44 = vld [vmem:[%s14380_s13 + $0x380] ss:$28 sps:$4 sm:$0xff]  }
 0x9f7   :  { %v11462_v11 = vpop.f32.mrb[76].mxu1 }
 0x9f8   :  { %v11464_v29 = vpop.f32.mrb[44].mxu0  ;;  %v11466_v41 = vpop.f32.mrb[77].mxu1  ;;  %v3034_v56 = vmul.f32 %v11462_v11, %v11462_v11 }
 0x9f9   :  { %v11470_v45 = vpop.f32.mrb[45].mxu0  ;;  %v2713_v7 = vpop.f32.mrb[78].mxu1  ;;  %v3026_v55 = vadd.f32 %v11466_v41, %v11462_v11  ;;  %v3035_v46 = vmul.f32 %v11466_v41, %v11466_v41  ;;  %v3040_v30 = vmul.f32 %v11464_v29, %v11464_v29 }
 0x9fa   :  { %v3023_v0 = vpop.f32.mrb[46].mxu0  ;;  %v2714_v5 = vpop.f32.mrb[79].mxu1  ;;  %v3030_v3 = vadd.f32 %v11470_v45, %v11464_v29  ;;  %v3041_v8 = vmul.f32 %v11470_v45, %v11470_v45  ;;  %v9252_v7 = vld [vmem:[%s14380_s13 + $0x31c] ss:$28 sps:$4 sm:$0xff]  }
 0x9fb   :  { %v3024_v13 = vpop.f32.mrb[47].mxu0  ;;  %3027 = vadd.xlane.f32.xlu0 %v3026_v55  ;;  %v3036_v15 = vadd.f32 %v3035_v46, %v3034_v56  ;;  %v9244_v56 = vld [vmem:[%s14380_s13 + $0x2e0] ss:$28 sps:$4 sm:$0xff]   ;;  %v9250_v55 = vld [vmem:[%s14380_s13 + $0x318] ss:$28 sps:$4 sm:$0xff]  }
 0x9fc   :  { %3031 = vadd.xlane.f32.xlu1 %v3030_v3  ;;  %v3042_v21 = vadd.f32 %v3041_v8, %v3040_v30  ;;  %6164 = vmatpush1.bf16.msra.mxu0 %v9244_v56  ;;  %v9262_v56 = vld [vmem:[%s14380_s13 + $0x388] ss:$28 sps:$4 sm:$0xff]  }
 0x9fd   :  { %6165 = vmatprep.subr.bf16.mxu0 %v9252_v7 }
 0x9ff   :  { %3037 = vadd.xlane.f32.xlu0 %v3036_v15 }
 0xa00   :  { %6166 = vmatpush1.bf16.msra.mxu0 %v9250_v55 }
 0xa01   :  { %6167 = vmatprep.subr.bf16.mxu0 %v9258_v35  ;;  %v9333_v35 = vld [vmem:[%s14380_s13 + $0x624] ss:$28 sps:$4 sm:$0xff]  }
 0xa03   :  { %3043 = vadd.xlane.f32.xlu0 %v3042_v21 }
 0xa04   :  { %6168 = vmatpush1.bf16.msra.mxu0 %v9256_v58  ;;  %v9331_v58 = vld [vmem:[%s14380_s13 + $0x620] ss:$28 sps:$4 sm:$0xff]  }
 0xa05   :  { %6178 = vmatprep.subr.bf16.mxu0 %v9264_v60  ;;  %v9339_v60 = vld [vmem:[%s14380_s13 + $0x65c] ss:$28 sps:$4 sm:$0xff]  }
 0xa88   :  { %v3028_v16 = vpop.xlane.xlu0 %3027 }
 0xa89   :  { %v3032_v22 = vpop.xlane.xlu1 %3031 }
 0xa8a   :  { %v3033_v10 = vadd.f32 %v3032_v22, %v3028_v16 }
 0xa8c   :  { %v3038_v25 = vpop.xlane.xlu0 %3037  ;;  %v3047_v12 = vmul.f32 0.001953125, %v3033_v10 }
 0xa8e   :  { %v3049_v48 = vmul.f32 %v3047_v12, %v3047_v12 }
 0xa90   :  { %v3044_v26 = vpop.xlane.xlu0 %3043 }
 0xa91   :  { %v3045_v62 = vadd.f32 %v3044_v26, %v3038_v25  ;;  %v9165_v25 = vld [vmem:[%s14380_s13 + $0x4] ss:$28 sps:$4 sm:$0xff]   ;;  %v9171_v26 = vld [vmem:[%s14380_s13 + $0x3c] ss:$28 sps:$4 sm:$0xff]  }
 0xa93   :  { %v3048_v28 = vmul.f32 0.001953125, %v3045_v62  ;;  %v9169_v62 = vld [vmem:[%s14380_s13 + $0x38] ss:$28 sps:$4 sm:$0xff]  }
 0xa95   :  { %v3050_v51 = vsub.f32 %v3048_v28, %v3049_v48  ;;  %v9177_v48 = vld [vmem:[%s14380_s13 + $0x74] ss:$28 sps:$4 sm:$0xff]  }
 0xa96   :  { %v9175_v28 = vld [vmem:[%s14380_s13 + $0x70] ss:$28 sps:$4 sm:$0xff]  }
 0xa97   :  { %v3051_v4 = vmax.f32 %v3050_v51, 0.0  ;;  %v9183_v51 = vld [vmem:[%s14380_s13 + $0xac] ss:$28 sps:$4 sm:$0xff]  }
 0xa99   :  { %v3053_v17 = vadd.f32 1e-05, %v3051_v4  ;;  %v9181_v4 = vld [vmem:[%s14380_s13 + $0xa8] ss:$28 sps:$4 sm:$0xff]  }
 0xa9b   :  { %9809 = vrsqrt.f32 %v3053_v17  ;;  %v9189_v17 = vld [vmem:[%s14380_s13 + $0xe4] ss:$28 sps:$4 sm:$0xff]  }
 0xaa5   :  { %v9810_v32 = vpop.eup %9809 }
 0xaa6   :  { %v3055_v23 = vmul.f32 %v9810_v32, %v3052_v18  ;;  %v9187_v18 = vld [vmem:[%s14380_s13 + $0xe0] ss:$28 sps:$4 sm:$0xff]  }
 0xaa7   :  { %v9195_v32 = vld [vmem:[%s14380_s13 + $0x11c] ss:$28 sps:$4 sm:$0xff]  }
 0xaa8   :  { %3061 = vperm.xlu1 %8883, %v3055_v23   ;;  %v3057_v27 = vmul.f32 %v3055_v23, %v3047_v12  ;;  %v9193_v23 = vld [vmem:[%s14380_s13 + $0x118] ss:$28 sps:$4 sm:$0xff]  }
 0xaaa   :  { %v3058_v2 = vsub.f32 %v3056_v24, %v3057_v27  ;;  %v9201_v24 = vld [vmem:[%s14380_s13 + $0x154] ss:$28 sps:$4 sm:$0xff]  }
 0xaab   :  { %v9199_v27 = vld [vmem:[%s14380_s13 + $0x150] ss:$28 sps:$4 sm:$0xff]  }
 0xaac   :  { %3068 = vperm.xlu0 %8884, %v3058_v2   ;;  %v9207_v2 = vld [vmem:[%s14380_s13 + $0x18c] ss:$28 sps:$4 sm:$0xff]  }
 0xb27   :  { %v3062_v46 = vpop.permute.xlu1 %3061 }
 0xb28   :  { %v3075_v30 = vmul.f32 %v3062_v46, %v11464_v29  ;;  %v3076_v0 = vmul.f32 %v3062_v46, %v11470_v45  ;;  %v3064_v5 = vmul.f32 %v3062_v46, %v11462_v11  ;;  %v3065_v3 = vmul.f32 %v3062_v46, %v11466_v41  ;;  %v3081_v11 = vld [vmem:[%s14381_s12] sm:$0x3]  ;;  %v9267_v46 = vld [vmem:[%s14380_s13 + $0x3bc] ss:$28 sps:$4 sm:$0xff]  }
 0xb29   :  { %v9163_v41 = vld [vmem:[%s14380_s13] ss:$28 sps:$4 sm:$0xff]  }
 0xb2b   :  { %v3069_v8 = vpop.permute.xlu0 %3068 }
 0xb2c   :  { %v3071_v13 = vadd.f32 %v3069_v8, %v3064_v5  ;;  %v3072_v15 = vadd.f32 %v3069_v8, %v3065_v3  ;;  %v11582_v21 = vadd.f32 %v3075_v30, %v3069_v8  ;;  %v11584_v16 = vadd.f32 %v3076_v0, %v3069_v8  ;;  %v9270_v30 = vld [vmem:[%s14380_s13 + $0x3c4] ss:$28 sps:$4 sm:$0xff]   ;;  %v9265_v5 = vld [vmem:[%s14380_s13 + $0x3b8] ss:$28 sps:$4 sm:$0xff]  }
 0xb2d   :  { %v9268_v3 = vld [vmem:[%s14380_s13 + $0x3c0] ss:$28 sps:$4 sm:$0xff]   ;;  %v9273_v8 = vld [vmem:[%s14380_s13 + $0x3f4] ss:$28 sps:$4 sm:$0xff]  }
 0xb2e   :  { %v3073_v22 = vmax.f32 %v3071_v13, 0.0  ;;  %v3074_v10 = vmax.f32 %v3072_v15, 0.0  ;;  %v9276_v13 = vld [vmem:[%s14380_s13 + $0x3fc] ss:$28 sps:$4 sm:$0xff]   ;;  %v9271_v15 = vld [vmem:[%s14380_s13 + $0x3f0] ss:$28 sps:$4 sm:$0xff]  }
 0xb30   :  { %v3082_v29 = vpack.c.bf16 %v3073_v22, %v3073_v22  ;;  %v3083_v12 = vpack.c.bf16 %v3074_v10, %v3074_v10  ;;  %v9274_v22 = vld [vmem:[%s14380_s13 + $0x3f8] ss:$28 sps:$4 sm:$0xff]   ;;  %v9279_v10 = vld [vmem:[%s14380_s13 + $0x42c] ss:$28 sps:$4 sm:$0xff]  }
 0xb32   :  { %7807 = vmatprep.subr.msk.bf16.mxu1 %vm222_vm5, %v3083_v12  ;;  %v3089_v45 = vsel %vm222_vm5, %v3082_v29, 0  ;;  %v9277_v29 = vld [vmem:[%s14380_s13 + $0x428] ss:$28 sps:$4 sm:$0xff]   ;;  %v9280_v12 = vld [vmem:[%s14380_s13 + $0x430] ss:$28 sps:$4 sm:$0xff]  }
 0xb33   :  { %3095 = vmatpush1.bf16.msra.mxu1 %v3089_v45  ;;  %v9283_v45 = vld [vmem:[%s14380_s13 + $0x460] ss:$28 sps:$4 sm:$0xff]  }
 0xb34   :  { %5973 = vmatprep.subr.bf16.mxu1 %v9165_v25  ;;  %v9282_v25 = vld [vmem:[%s14380_s13 + $0x434] ss:$28 sps:$4 sm:$0xff]  }
 0xb36   :  { %7808 = vmatmul.mubr.msk.bf16.vlgmr.msra.gmra.mrb[80].mxu1 %vm3084_vm14, %v3081_v11  ;;  %v9285_v11 = vld [vmem:[%s14380_s13 + $0x464] ss:$28 sps:$4 sm:$0xff]  }
 0xb37   :  { %5974 = vmatpush1.bf16.msra.mxu1 %v9163_v41  ;;  %v9288_v41 = vld [vmem:[%s14380_s13 + $0x46c] ss:$28 sps:$4 sm:$0xff]  }
 0xb38   :  { %5975 = vmatprep.subr.bf16.mxu1 %v9171_v26  ;;  %v9286_v26 = vld [vmem:[%s14380_s13 + $0x468] ss:$28 sps:$4 sm:$0xff]  }
 0xb3b   :  { %5976 = vmatpush1.bf16.msra.mxu1 %v9169_v62  ;;  %v9291_v62 = vld [vmem:[%s14380_s13 + $0x49c] ss:$28 sps:$4 sm:$0xff]  }
 0xb3c   :  { %5977 = vmatprep.subr.bf16.mxu1 %v9177_v48  ;;  %v9294_v48 = vld [vmem:[%s14380_s13 + $0x4a4] ss:$28 sps:$4 sm:$0xff]  }
 0xb3f   :  { %5978 = vmatpush1.bf16.msra.mxu1 %v9175_v28  ;;  %v9289_v28 = vld [vmem:[%s14380_s13 + $0x498] ss:$28 sps:$4 sm:$0xff]  }
 0xb40   :  { %5979 = vmatprep.subr.bf16.mxu1 %v9183_v51  ;;  %v9292_v51 = vld [vmem:[%s14380_s13 + $0x4a0] ss:$28 sps:$4 sm:$0xff]  }
 0xb43   :  { %5980 = vmatpush1.bf16.msra.mxu1 %v9181_v4  ;;  %v9297_v4 = vld [vmem:[%s14380_s13 + $0x4d4] ss:$28 sps:$4 sm:$0xff]  }
 0xb44   :  { %5981 = vmatprep.subr.bf16.mxu1 %v9189_v17  ;;  %v9300_v17 = vld [vmem:[%s14380_s13 + $0x4dc] ss:$28 sps:$4 sm:$0xff]  }
 0xb47   :  { %5982 = vmatpush1.bf16.msra.mxu1 %v9187_v18  ;;  %v9295_v18 = vld [vmem:[%s14380_s13 + $0x4d0] ss:$28 sps:$4 sm:$0xff]  }
 0xb48   :  { %5983 = vmatprep.subr.bf16.mxu1 %v9195_v32  ;;  %v9298_v32 = vld [vmem:[%s14380_s13 + $0x4d8] ss:$28 sps:$4 sm:$0xff]  }
 0xb4b   :  { %5984 = vmatpush1.bf16.msra.mxu1 %v9193_v23  ;;  %v9303_v23 = vld [vmem:[%s14380_s13 + $0x50c] ss:$28 sps:$4 sm:$0xff]  }
 0xb4c   :  { %5985 = vmatprep.subr.bf16.mxu1 %v9201_v24  ;;  %v9306_v24 = vld [vmem:[%s14380_s13 + $0x514] ss:$28 sps:$4 sm:$0xff]  }
 0xb4f   :  { %5986 = vmatpush1.bf16.msra.mxu1 %v9199_v27  ;;  %v9301_v27 = vld [vmem:[%s14380_s13 + $0x508] ss:$28 sps:$4 sm:$0xff]  }
 0xb50   :  { %5987 = vmatprep.subr.bf16.mxu1 %v9207_v2  ;;  %v9304_v2 = vld [vmem:[%s14380_s13 + $0x510] ss:$28 sps:$4 sm:$0xff]  }
 0xb53   :  { %5988 = vmatpush1.bf16.msra.mxu1 %v9205_v63  ;;  %v9309_v63 = vld [vmem:[%s14380_s13 + $0x544] ss:$28 sps:$4 sm:$0xff]  }
 0xb54   :  { %5989 = vmatprep.subr.bf16.mxu1 %v9213_v61  ;;  %v9312_v61 = vld [vmem:[%s14380_s13 + $0x54c] ss:$28 sps:$4 sm:$0xff]  }
 0xb57   :  { %5990 = vmatpush1.bf16.msra.mxu1 %v9211_v36  ;;  %v9307_v36 = vld [vmem:[%s14380_s13 + $0x540] ss:$28 sps:$4 sm:$0xff]  }
 0xb58   :  { %5991 = vmatprep.subr.bf16.mxu1 %v9219_v49  ;;  %v9310_v49 = vld [vmem:[%s14380_s13 + $0x548] ss:$28 sps:$4 sm:$0xff]  }
 0xb5b   :  { %5992 = vmatpush1.bf16.msra.mxu1 %v9217_v9  ;;  %v9315_v9 = vld [vmem:[%s14380_s13 + $0x57c] ss:$28 sps:$4 sm:$0xff]  }
 0xb5c   :  { %5993 = vmatprep.subr.bf16.mxu1 %v9225_v47  ;;  %v9318_v47 = vld [vmem:[%s14380_s13 + $0x584] ss:$28 sps:$4 sm:$0xff]  }
 0xb5f   :  { %5994 = vmatpush1.bf16.msra.mxu1 %v9223_v31  ;;  %v9313_v31 = vld [vmem:[%s14380_s13 + $0x578] ss:$28 sps:$4 sm:$0xff]  }
 0xb60   :  { %5995 = vmatprep.subr.bf16.mxu1 %v9231_v34  ;;  %v9316_v34 = vld [vmem:[%s14380_s13 + $0x580] ss:$28 sps:$4 sm:$0xff]  }
 0xb63   :  { %5996 = vmatpush1.bf16.msra.mxu1 %v9229_v14  ;;  %v9321_v14 = vld [vmem:[%s14380_s13 + $0x5b4] ss:$28 sps:$4 sm:$0xff]  }
 0xb64   :  { %5997 = vmatprep.subr.bf16.mxu1 %v9237_v33  ;;  %v9324_v33 = vld [vmem:[%s14380_s13 + $0x5bc] ss:$28 sps:$4 sm:$0xff]  }
 0xb67   :  { %5998 = vmatpush1.bf16.msra.mxu1 %v9235_v6  ;;  %v9319_v6 = vld [vmem:[%s14380_s13 + $0x5b0] ss:$28 sps:$4 sm:$0xff]  }
 0xb68   :  { %5999 = vmatprep.subr.bf16.mxu1 %v9243_v38  ;;  %v9322_v38 = vld [vmem:[%s14380_s13 + $0x5b8] ss:$28 sps:$4 sm:$0xff]  }
 0xb6b   :  { %6000 = vmatpush1.bf16.msra.mxu1 %v9241_v37  ;;  %v9327_v37 = vld [vmem:[%s14380_s13 + $0x5ec] ss:$28 sps:$4 sm:$0xff]  }
 0xb6c   :  { %6001 = vmatprep.subr.bf16.mxu1 %v9249_v50  ;;  %v9330_v50 = vld [vmem:[%s14380_s13 + $0x5f4] ss:$28 sps:$4 sm:$0xff]  }
 0xb6f   :  { %6002 = vmatpush1.bf16.msra.mxu1 %v9247_v53  ;;  %v9325_v53 = vld [vmem:[%s14380_s13 + $0x5e8] ss:$28 sps:$4 sm:$0xff]  }
 0xb70   :  { %6003 = vmatprep.subr.bf16.mxu1 %v9255_v54  ;;  %v9328_v54 = vld [vmem:[%s14380_s13 + $0x5f0] ss:$28 sps:$4 sm:$0xff]  }
 0xb73   :  { %6004 = vmatpush1.bf16.msra.mxu1 %v9253_v57  ;;  %v9336_v57 = vld [vmem:[%s14380_s13 + $0x62c] ss:$28 sps:$4 sm:$0xff]  }
 0xb74   :  { %6014 = vmatprep.subr.bf16.mxu1 %v9261_v59  ;;  %v9334_v59 = vld [vmem:[%s14380_s13 + $0x628] ss:$28 sps:$4 sm:$0xff]  }
 0xc09   :  { %v11700_v39 = vpop.f32.mrb[80].mxu1 }
 0xc0a   :  { %v11702_v40 = vpop.f32.mrb[81].mxu1  ;;  %v11717_v7 = vpack.c.bf16 %v11700_v39, %v11700_v39 }
 0xc0b   :  { %v3138_v42 = vrot.slane %v11702_v40, 1  ;;  %v11707_v43 = vpack.c.bf16 %v11702_v40, %v11702_v40  ;;  %v3132_v52 = vpop.f32.mrb[82].mxu1 }
 0xc0c   :  { %v3133_v55 = vpop.f32.mrb[83].mxu1  ;;  %v9337_v52 = vld [vmem:[%s14380_s13 + $0x658] ss:$28 sps:$4 sm:$0xff]  }
 0xc0d   :  { %v11725_v0 = vpack.c.bf16 %v3138_v42, %v3138_v42  ;;  %6005 = vmatprep.mubr.bf16.mxu1 %v11707_v43  ;;  %6169 = vmatprep.mubr.bf16.mxu0 %v11707_v43  ;;  %v9342_v42 = vld [vmem:[%s14380_s13 + $0x664] ss:$28 sps:$4 sm:$0xff]   ;;  %v9348_v55 = vld [vmem:[%s14380_s13 + $0x69c] ss:$28 sps:$4 sm:$0xff]  }
 0xc0e   :  { %6006 = vmatmul.mubr.bf16.vlgmr.msra.gmra.mrb[84].mxu1 %v11717_v7  ;;  %6170 = vmatmul.mubr.bf16.vlgmr.msra.gmra.mrb[48].mxu0 %v11717_v7 }
 0xc0f   :  { %6015 = vmatpush1.bf16.msra.mxu1 %v9259_v44  ;;  %6179 = vmatpush1.bf16.msra.mxu0 %v9262_v56  ;;  %v9340_v44 = vld [vmem:[%s14380_s13 + $0x660] ss:$28 sps:$4 sm:$0xff]   ;;  %v9345_v56 = vld [vmem:[%s14380_s13 + $0x694] ss:$28 sps:$4 sm:$0xff]  }
 0xc10   :  { %6016 = vmatprep.subr.bf16.mxu1 %v9267_v46  ;;  %6180 = vmatprep.subr.bf16.mxu0 %v9270_v30  ;;  %v9343_v46 = vld [vmem:[%s14380_s13 + $0x690] ss:$28 sps:$4 sm:$0xff]   ;;  %v9346_v30 = vld [vmem:[%s14380_s13 + $0x698] ss:$28 sps:$4 sm:$0xff]  }
 0xc11   :  { %6046 = vmatprep.mubr.bf16.mxu1 %v11725_v0  ;;  %6210 = vmatprep.mubr.bf16.mxu0 %v11725_v0 }
 0xc13   :  { %6017 = vmatpush1.bf16.msra.mxu1 %v9265_v5  ;;  %6181 = vmatpush1.bf16.msra.mxu0 %v9268_v3  ;;  %v9351_v5 = vld [vmem:[%s14380_s13 + $0x6cc] ss:$28 sps:$4 sm:$0xff]   ;;  %v9354_v3 = vld [vmem:[%s14380_s13 + $0x6d4] ss:$28 sps:$4 sm:$0xff]  }
 0xc14   :  { %6018 = vmatprep.subr.bf16.mxu1 %v9273_v8  ;;  %6182 = vmatprep.subr.bf16.mxu0 %v9276_v13  ;;  %v9349_v8 = vld [vmem:[%s14380_s13 + $0x6c8] ss:$28 sps:$4 sm:$0xff]   ;;  %v9352_v13 = vld [vmem:[%s14380_s13 + $0x6d0] ss:$28 sps:$4 sm:$0xff]  }
 0xc17   :  { %6019 = vmatpush1.bf16.msra.mxu1 %v9271_v15  ;;  %6183 = vmatpush1.bf16.msra.mxu0 %v9274_v22  ;;  %v3137_v15 = vrot.slane %v11700_v39, 1  ;;  %v9357_v22 = vld [vmem:[%s14380_s13 + $0x704] ss:$28 sps:$4 sm:$0xff]  }
 0xc18   :  { %6020 = vmatprep.subr.bf16.mxu1 %v9279_v10  ;;  %6184 = vmatprep.subr.bf16.mxu0 %v9282_v25  ;;  %v9360_v10 = vld [vmem:[%s14380_s13 + $0x70c] ss:$28 sps:$4 sm:$0xff]   ;;  %v3142_v25 = vrot.slane %v11702_v40, 2 }
 0xc1b   :  { %6021 = vmatpush1.bf16.msra.mxu1 %v9277_v29  ;;  %6185 = vmatpush1.bf16.msra.mxu0 %v9280_v12  ;;  %v9355_v29 = vld [vmem:[%s14380_s13 + $0x700] ss:$28 sps:$4 sm:$0xff]   ;;  %v11918_v12 = vpack.c.bf16 %v3137_v15, %v3137_v15 }
 0xc1c   :  { %6022 = vmatprep.subr.bf16.mxu1 %v9285_v11  ;;  %6186 = vmatprep.subr.bf16.mxu0 %v9288_v41  ;;  %v9358_v11 = vld [vmem:[%s14380_s13 + $0x708] ss:$28 sps:$4 sm:$0xff]   ;;  %v11923_v41 = vpack.c.bf16 %v3142_v25, %v3142_v25  ;;  %v9427_v15 = vld [vmem:[%s14380_s13 + $0x9a0] ss:$28 sps:$4 sm:$0xff]  }
 0xc1d   :  { %v9438_v25 = vld [vmem:[%s14380_s13 + $0x9e4] ss:$28 sps:$4 sm:$0xff]  }
 0xc1f   :  { %6023 = vmatpush1.bf16.msra.mxu1 %v9283_v45  ;;  %6187 = vmatpush1.bf16.msra.mxu0 %v9286_v26  ;;  %v9363_v45 = vld [vmem:[%s14380_s13 + $0x73c] ss:$28 sps:$4 sm:$0xff]   ;;  %v9366_v26 = vld [vmem:[%s14380_s13 + $0x744] ss:$28 sps:$4 sm:$0xff]  }
 0xc20   :  { %6024 = vmatprep.subr.bf16.mxu1 %v9291_v62  ;;  %6188 = vmatprep.subr.bf16.mxu0 %v9294_v48  ;;  %v9361_v62 = vld [vmem:[%s14380_s13 + $0x738] ss:$28 sps:$4 sm:$0xff]   ;;  %v9364_v48 = vld [vmem:[%s14380_s13 + $0x740] ss:$28 sps:$4 sm:$0xff]  }
 0xc23   :  { %6025 = vmatpush1.bf16.msra.mxu1 %v9289_v28  ;;  %6189 = vmatpush1.bf16.msra.mxu0 %v9292_v51  ;;  %v9369_v28 = vld [vmem:[%s14380_s13 + $0x774] ss:$28 sps:$4 sm:$0xff]   ;;  %v9372_v51 = vld [vmem:[%s14380_s13 + $0x77c] ss:$28 sps:$4 sm:$0xff]  }
 0xc24   :  { %6026 = vmatprep.subr.bf16.mxu1 %v9297_v4  ;;  %6190 = vmatprep.subr.bf16.mxu0 %v9300_v17  ;;  %v9367_v4 = vld [vmem:[%s14380_s13 + $0x770] ss:$28 sps:$4 sm:$0xff]   ;;  %v9370_v17 = vld [vmem:[%s14380_s13 + $0x778] ss:$28 sps:$4 sm:$0xff]  }
 0xc27   :  { %6027 = vmatpush1.bf16.msra.mxu1 %v9295_v18  ;;  %6191 = vmatpush1.bf16.msra.mxu0 %v9298_v32  ;;  %v9375_v18 = vld [vmem:[%s14380_s13 + $0x7ac] ss:$28 sps:$4 sm:$0xff]   ;;  %v9378_v32 = vld [vmem:[%s14380_s13 + $0x7b4] ss:$28 sps:$4 sm:$0xff]  }
 0xc28   :  { %6028 = vmatprep.subr.bf16.mxu1 %v9303_v23  ;;  %6192 = vmatprep.subr.bf16.mxu0 %v9306_v24  ;;  %v9373_v23 = vld [vmem:[%s14380_s13 + $0x7a8] ss:$28 sps:$4 sm:$0xff]   ;;  %v9376_v24 = vld [vmem:[%s14380_s13 + $0x7b0] ss:$28 sps:$4 sm:$0xff]  }
 0xc2b   :  { %6029 = vmatpush1.bf16.msra.mxu1 %v9301_v27  ;;  %6193 = vmatpush1.bf16.msra.mxu0 %v9304_v2  ;;  %v9381_v27 = vld [vmem:[%s14380_s13 + $0x7e4] ss:$28 sps:$4 sm:$0xff]   ;;  %v9384_v2 = vld [vmem:[%s14380_s13 + $0x7ec] ss:$28 sps:$4 sm:$0xff]  }
 0xc2c   :  { %6030 = vmatprep.subr.bf16.mxu1 %v9309_v63  ;;  %6194 = vmatprep.subr.bf16.mxu0 %v9312_v61  ;;  %v9379_v63 = vld [vmem:[%s14380_s13 + $0x7e0] ss:$28 sps:$4 sm:$0xff]   ;;  %v9382_v61 = vld [vmem:[%s14380_s13 + $0x7e8] ss:$28 sps:$4 sm:$0xff]  }
 0xc2f   :  { %6031 = vmatpush1.bf16.msra.mxu1 %v9307_v36  ;;  %6195 = vmatpush1.bf16.msra.mxu0 %v9310_v49  ;;  %v9387_v36 = vld [vmem:[%s14380_s13 + $0x81c] ss:$28 sps:$4 sm:$0xff]   ;;  %v9390_v49 = vld [vmem:[%s14380_s13 + $0x824] ss:$28 sps:$4 sm:$0xff]  }
 0xc30   :  { %6032 = vmatprep.subr.bf16.mxu1 %v9315_v9  ;;  %6196 = vmatprep.subr.bf16.mxu0 %v9318_v47  ;;  %v9385_v9 = vld [vmem:[%s14380_s13 + $0x818] ss:$28 sps:$4 sm:$0xff]   ;;  %v9388_v47 = vld [vmem:[%s14380_s13 + $0x820] ss:$28 sps:$4 sm:$0xff]  }
 0xc33   :  { %6033 = vmatpush1.bf16.msra.mxu1 %v9313_v31  ;;  %6197 = vmatpush1.bf16.msra.mxu0 %v9316_v34  ;;  %v9393_v31 = vld [vmem:[%s14380_s13 + $0x854] ss:$28 sps:$4 sm:$0xff]   ;;  %v9396_v34 = vld [vmem:[%s14380_s13 + $0x85c] ss:$28 sps:$4 sm:$0xff]  }
 0xc34   :  { %6034 = vmatprep.subr.bf16.mxu1 %v9321_v14  ;;  %6198 = vmatprep.subr.bf16.mxu0 %v9324_v33  ;;  %v9391_v14 = vld [vmem:[%s14380_s13 + $0x850] ss:$28 sps:$4 sm:$0xff]   ;;  %v9394_v33 = vld [vmem:[%s14380_s13 + $0x858] ss:$28 sps:$4 sm:$0xff]  }
 0xc37   :  { %6035 = vmatpush1.bf16.msra.mxu1 %v9319_v6  ;;  %6199 = vmatpush1.bf16.msra.mxu0 %v9322_v38  ;;  %v9399_v6 = vld [vmem:[%s14380_s13 + $0x88c] ss:$28 sps:$4 sm:$0xff]   ;;  %v9402_v38 = vld [vmem:[%s14380_s13 + $0x894] ss:$28 sps:$4 sm:$0xff]  }
 0xc38   :  { %6036 = vmatprep.subr.bf16.mxu1 %v9327_v37  ;;  %6200 = vmatprep.subr.bf16.mxu0 %v9330_v50  ;;  %v9397_v37 = vld [vmem:[%s14380_s13 + $0x888] ss:$28 sps:$4 sm:$0xff]   ;;  %v9400_v50 = vld [vmem:[%s14380_s13 + $0x890] ss:$28 sps:$4 sm:$0xff]  }
 0xc3b   :  { %6037 = vmatpush1.bf16.msra.mxu1 %v9325_v53  ;;  %6201 = vmatpush1.bf16.msra.mxu0 %v9328_v54  ;;  %v9405_v53 = vld [vmem:[%s14380_s13 + $0x8c4] ss:$28 sps:$4 sm:$0xff]   ;;  %v9408_v54 = vld [vmem:[%s14380_s13 + $0x8cc] ss:$28 sps:$4 sm:$0xff]  }
 0xc3c   :  { %6038 = vmatprep.subr.bf16.mxu1 %v9333_v35  ;;  %6202 = vmatprep.subr.bf16.mxu0 %v9336_v57  ;;  %v9403_v35 = vld [vmem:[%s14380_s13 + $0x8c0] ss:$28 sps:$4 sm:$0xff]   ;;  %v9406_v57 = vld [vmem:[%s14380_s13 + $0x8c8] ss:$28 sps:$4 sm:$0xff]  }
 0xc3f   :  { %6039 = vmatpush1.bf16.msra.mxu1 %v9331_v58  ;;  %6203 = vmatpush1.bf16.msra.mxu0 %v9334_v59  ;;  %v9411_v58 = vld [vmem:[%s14380_s13 + $0x8fc] ss:$28 sps:$4 sm:$0xff]   ;;  %v9414_v59 = vld [vmem:[%s14380_s13 + $0x904] ss:$28 sps:$4 sm:$0xff]  }
 0xc40   :  { %6040 = vmatprep.subr.bf16.mxu1 %v9339_v60  ;;  %6204 = vmatprep.subr.bf16.mxu0 %v9342_v42  ;;  %v9409_v60 = vld [vmem:[%s14380_s13 + $0x8f8] ss:$28 sps:$4 sm:$0xff]   ;;  %v9412_v42 = vld [vmem:[%s14380_s13 + $0x900] ss:$28 sps:$4 sm:$0xff]  }
 0xc43   :  { %6041 = vmatpush1.bf16.msra.mxu1 %v9337_v52  ;;  %6205 = vmatpush1.bf16.msra.mxu0 %v9340_v44  ;;  %v9417_v52 = vld [vmem:[%s14380_s13 + $0x934] ss:$28 sps:$4 sm:$0xff]   ;;  %v9420_v44 = vld [vmem:[%s14380_s13 + $0x93c] ss:$28 sps:$4 sm:$0xff]  }
 0xc44   :  { %6042 = vmatprep.subr.bf16.mxu1 %v9345_v56  ;;  %6206 = vmatprep.subr.bf16.mxu0 %v9348_v55  ;;  %v9415_v56 = vld [vmem:[%s14380_s13 + $0x930] ss:$28 sps:$4 sm:$0xff]   ;;  %v9418_v55 = vld [vmem:[%s14380_s13 + $0x938] ss:$28 sps:$4 sm:$0xff]  }
 0xc47   :  { %6043 = vmatpush1.bf16.msra.mxu1 %v9343_v46  ;;  %6207 = vmatpush1.bf16.msra.mxu0 %v9346_v30  ;;  %v9423_v46 = vld [vmem:[%s14380_s13 + $0x96c] ss:$28 sps:$4 sm:$0xff]   ;;  %v9426_v30 = vld [vmem:[%s14380_s13 + $0x974] ss:$28 sps:$4 sm:$0xff]  }
 0xc48   :  { %6044 = vmatprep.subr.bf16.mxu1 %v9351_v5  ;;  %6208 = vmatprep.subr.bf16.mxu0 %v9354_v3  ;;  %v9421_v5 = vld [vmem:[%s14380_s13 + $0x968] ss:$28 sps:$4 sm:$0xff]   ;;  %v9424_v3 = vld [vmem:[%s14380_s13 + $0x970] ss:$28 sps:$4 sm:$0xff]  }
 0xc4b   :  { %6045 = vmatpush1.bf16.msra.mxu1 %v9349_v8  ;;  %6209 = vmatpush1.bf16.msra.mxu0 %v9352_v13  ;;  %v9429_v8 = vld [vmem:[%s14380_s13 + $0x9a4] ss:$28 sps:$4 sm:$0xff]   ;;  %v9432_v13 = vld [vmem:[%s14380_s13 + $0x9ac] ss:$28 sps:$4 sm:$0xff]  }
 0xc4c   :  { %6055 = vmatprep.subr.bf16.mxu1 %v9357_v22  ;;  %6219 = vmatprep.subr.bf16.mxu0 %v9360_v10  ;;  %v9430_v22 = vld [vmem:[%s14380_s13 + $0x9a8] ss:$28 sps:$4 sm:$0xff]   ;;  %v9435_v10 = vld [vmem:[%s14380_s13 + $0x9dc] ss:$28 sps:$4 sm:$0xff]  }
 0xc4e   :  { %6047 = vmatmul.mubr.bf16.vlgmr.msra.gmra.mrb[84].mxu1 %v11918_v12  ;;  %6211 = vmatmul.mubr.bf16.vlgmr.msra.gmra.mrb[48].mxu0 %v11918_v12 }
 0xc4f   :  { %6056 = vmatpush1.bf16.msra.mxu1 %v9355_v29  ;;  %6087 = vmatprep.mubr.bf16.mxu1 %v11923_v41  ;;  %v9433_v29 = vld [vmem:[%s14380_s13 + $0x9d8] ss:$28 sps:$4 sm:$0xff]  }
 0xc50   :  { %6220 = vmatpush1.bf16.msra.mxu0 %v9358_v11  ;;  %6251 = vmatprep.mubr.bf16.mxu0 %v11923_v41  ;;  %v9436_v11 = vld [vmem:[%s14380_s13 + $0x9e0] ss:$28 sps:$4 sm:$0xff]  }
 0xc51   :  { %6057 = vmatprep.subr.bf16.mxu1 %v9363_v45  ;;  %6221 = vmatprep.subr.bf16.mxu0 %v9366_v26  ;;  %v9441_v45 = vld [vmem:[%s14380_s13 + $0xa14] ss:$28 sps:$4 sm:$0xff]   ;;  %v9444_v26 = vld [vmem:[%s14380_s13 + $0xa1c] ss:$28 sps:$4 sm:$0xff]  }
 0xc53   :  { %6058 = vmatpush1.bf16.msra.mxu1 %v9361_v62  ;;  %v9439_v62 = vld [vmem:[%s14380_s13 + $0xa10] ss:$28 sps:$4 sm:$0xff]  }
 0xc54   :  { %6222 = vmatpush1.bf16.msra.mxu0 %v9364_v48  ;;  %6059 = vmatprep.subr.bf16.mxu1 %v9369_v28  ;;  %v9442_v48 = vld [vmem:[%s14380_s13 + $0xa18] ss:$28 sps:$4 sm:$0xff]   ;;  %v9447_v28 = vld [vmem:[%s14380_s13 + $0xa4c] ss:$28 sps:$4 sm:$0xff]  }
 0xc55   :  { %6223 = vmatprep.subr.bf16.mxu0 %v9372_v51  ;;  %v9450_v51 = vld [vmem:[%s14380_s13 + $0xa54] ss:$28 sps:$4 sm:$0xff]  }
 0xc57   :  { %6060 = vmatpush1.bf16.msra.mxu1 %v9367_v4  ;;  %v9445_v4 = vld [vmem:[%s14380_s13 + $0xa48] ss:$28 sps:$4 sm:$0xff]  }
 0xc58   :  { %6224 = vmatpush1.bf16.msra.mxu0 %v9370_v17  ;;  %6061 = vmatprep.subr.bf16.mxu1 %v9375_v18  ;;  %v3141_v17 = vrot.slane %v11700_v39, 2  ;;  %v9448_v18 = vld [vmem:[%s14380_s13 + $0xa50] ss:$28 sps:$4 sm:$0xff]  }
 0xc59   :  { %6225 = vmatprep.subr.bf16.mxu0 %v9378_v32  ;;  %v9453_v32 = vld [vmem:[%s14380_s13 + $0xa84] ss:$28 sps:$4 sm:$0xff]  }
 0xc5b   :  { %6062 = vmatpush1.bf16.msra.mxu1 %v9373_v23  ;;  %v9456_v23 = vld [vmem:[%s14380_s13 + $0xa8c] ss:$28 sps:$4 sm:$0xff]  }
 0xc5c   :  { %6226 = vmatpush1.bf16.msra.mxu0 %v9376_v24  ;;  %6063 = vmatprep.subr.bf16.mxu1 %v9381_v27  ;;  %v3146_v24 = vrot.slane %v11702_v40, 3  ;;  %v9451_v27 = vld [vmem:[%s14380_s13 + $0xa80] ss:$28 sps:$4 sm:$0xff]  }
 0xc5d   :  { %6227 = vmatprep.subr.bf16.mxu0 %v9384_v2  ;;  %v12120_v2 = vpack.c.bf16 %v3141_v17, %v3141_v17  ;;  %v9462_v40 = vld [vmem:[%s14380_s13 + $0xac4] ss:$28 sps:$4 sm:$0xff]  }
 0xc5e   :  { %v9525_v17 = vld [vmem:[%s14380_s13 + $0xd24] ss:$28 sps:$4 sm:$0xff]  }
 0xc5f   :  { %6064 = vmatpush1.bf16.msra.mxu1 %v9379_v63  ;;  %v9454_v63 = vld [vmem:[%s14380_s13 + $0xa88] ss:$28 sps:$4 sm:$0xff]  }
 0xc60   :  { %6228 = vmatpush1.bf16.msra.mxu0 %v9382_v61  ;;  %6065 = vmatprep.subr.bf16.mxu1 %v9387_v36  ;;  %v9459_v61 = vld [vmem:[%s14380_s13 + $0xabc] ss:$28 sps:$4 sm:$0xff]   ;;  %v12128_v36 = vpack.c.bf16 %v3146_v24, %v3146_v24 }
 0xc61   :  { %6229 = vmatprep.subr.bf16.mxu0 %v9390_v49  ;;  %v9457_v49 = vld [vmem:[%s14380_s13 + $0xab8] ss:$28 sps:$4 sm:$0xff]  }
 0xc62   :  { %v9531_v24 = vld [vmem:[%s14380_s13 + $0xd5c] ss:$28 sps:$4 sm:$0xff]  }
 0xc63   :  { %6066 = vmatpush1.bf16.msra.mxu1 %v9385_v9  ;;  %v9460_v9 = vld [vmem:[%s14380_s13 + $0xac0] ss:$28 sps:$4 sm:$0xff]  }
 0xc64   :  { %6230 = vmatpush1.bf16.msra.mxu0 %v9388_v47  ;;  %6067 = vmatprep.subr.bf16.mxu1 %v9393_v31  ;;  %v9465_v47 = vld [vmem:[%s14380_s13 + $0xaf4] ss:$28 sps:$4 sm:$0xff]   ;;  %v9468_v31 = vld [vmem:[%s14380_s13 + $0xafc] ss:$28 sps:$4 sm:$0xff]  }
 0xc65   :  { %6231 = vmatprep.subr.bf16.mxu0 %v9396_v34  ;;  %v9463_v34 = vld [vmem:[%s14380_s13 + $0xaf0] ss:$28 sps:$4 sm:$0xff]  }
 0xc67   :  { %6068 = vmatpush1.bf16.msra.mxu1 %v9391_v14  ;;  %v9466_v14 = vld [vmem:[%s14380_s13 + $0xaf8] ss:$28 sps:$4 sm:$0xff]  }
 0xc68   :  { %6232 = vmatpush1.bf16.msra.mxu0 %v9394_v33  ;;  %6069 = vmatprep.subr.bf16.mxu1 %v9399_v6  ;;  %v9471_v33 = vld [vmem:[%s14380_s13 + $0xb2c] ss:$28 sps:$4 sm:$0xff]   ;;  %v9474_v6 = vld [vmem:[%s14380_s13 + $0xb34] ss:$28 sps:$4 sm:$0xff]  }
 0xc69   :  { %6233 = vmatprep.subr.bf16.mxu0 %v9402_v38  ;;  %v9469_v38 = vld [vmem:[%s14380_s13 + $0xb28] ss:$28 sps:$4 sm:$0xff]  }
 0xc6b   :  { %6070 = vmatpush1.bf16.msra.mxu1 %v9397_v37  ;;  %v9472_v37 = vld [vmem:[%s14380_s13 + $0xb30] ss:$28 sps:$4 sm:$0xff]  }
 0xc6c   :  { %6234 = vmatpush1.bf16.msra.mxu0 %v9400_v50  ;;  %6071 = vmatprep.subr.bf16.mxu1 %v9405_v53  ;;  %v9477_v50 = vld [vmem:[%s14380_s13 + $0xb64] ss:$28 sps:$4 sm:$0xff]   ;;  %v9480_v53 = vld [vmem:[%s14380_s13 + $0xb6c] ss:$28 sps:$4 sm:$0xff]  }
 0xc6d   :  { %6235 = vmatprep.subr.bf16.mxu0 %v9408_v54  ;;  %v9475_v54 = vld [vmem:[%s14380_s13 + $0xb60] ss:$28 sps:$4 sm:$0xff]  }
 0xc6f   :  { %6072 = vmatpush1.bf16.msra.mxu1 %v9403_v35  ;;  %v9478_v35 = vld [vmem:[%s14380_s13 + $0xb68] ss:$28 sps:$4 sm:$0xff]  }
 0xc70   :  { %6236 = vmatpush1.bf16.msra.mxu0 %v9406_v57  ;;  %6073 = vmatprep.subr.bf16.mxu1 %v9411_v58  ;;  %v9483_v57 = vld [vmem:[%s14380_s13 + $0xb9c] ss:$28 sps:$4 sm:$0xff]   ;;  %v9486_v58 = vld [vmem:[%s14380_s13 + $0xba4] ss:$28 sps:$4 sm:$0xff]  }
 0xc71   :  { %6237 = vmatprep.subr.bf16.mxu0 %v9414_v59  ;;  %v9481_v59 = vld [vmem:[%s14380_s13 + $0xb98] ss:$28 sps:$4 sm:$0xff]  }
 0xc73   :  { %6074 = vmatpush1.bf16.msra.mxu1 %v9409_v60  ;;  %v9484_v60 = vld [vmem:[%s14380_s13 + $0xba0] ss:$28 sps:$4 sm:$0xff]  }
 0xc74   :  { %6238 = vmatpush1.bf16.msra.mxu0 %v9412_v42  ;;  %6075 = vmatprep.subr.bf16.mxu1 %v9417_v52  ;;  %v9489_v42 = vld [vmem:[%s14380_s13 + $0xbd4] ss:$28 sps:$4 sm:$0xff]   ;;  %v9492_v52 = vld [vmem:[%s14380_s13 + $0xbdc] ss:$28 sps:$4 sm:$0xff]  }
 0xc75   :  { %6239 = vmatprep.subr.bf16.mxu0 %v9420_v44  ;;  %v9487_v44 = vld [vmem:[%s14380_s13 + $0xbd0] ss:$28 sps:$4 sm:$0xff]  }
 0xc77   :  { %6076 = vmatpush1.bf16.msra.mxu1 %v9415_v56  ;;  %v9490_v56 = vld [vmem:[%s14380_s13 + $0xbd8] ss:$28 sps:$4 sm:$0xff]  }
 0xc78   :  { %6240 = vmatpush1.bf16.msra.mxu0 %v9418_v55  ;;  %6077 = vmatprep.subr.bf16.mxu1 %v9423_v46  ;;  %v9495_v55 = vld [vmem:[%s14380_s13 + $0xc0c] ss:$28 sps:$4 sm:$0xff]   ;;  %v9498_v46 = vld [vmem:[%s14380_s13 + $0xc14] ss:$28 sps:$4 sm:$0xff]  }
 0xc79   :  { %6241 = vmatprep.subr.bf16.mxu0 %v9426_v30  ;;  %v9493_v30 = vld [vmem:[%s14380_s13 + $0xc08] ss:$28 sps:$4 sm:$0xff]  }
 0xc7b   :  { %6078 = vmatpush1.bf16.msra.mxu1 %v9421_v5  ;;  %v9496_v5 = vld [vmem:[%s14380_s13 + $0xc10] ss:$28 sps:$4 sm:$0xff]  }
 0xc7c   :  { %6242 = vmatpush1.bf16.msra.mxu0 %v9424_v3  ;;  %6079 = vmatprep.subr.bf16.mxu1 %v9429_v8  ;;  %v9501_v3 = vld [vmem:[%s14380_s13 + $0xc44] ss:$28 sps:$4 sm:$0xff]   ;;  %v9504_v8 = vld [vmem:[%s14380_s13 + $0xc4c] ss:$28 sps:$4 sm:$0xff]  }
 0xc7d   :  { %6243 = vmatprep.subr.bf16.mxu0 %v9432_v13  ;;  %v9499_v13 = vld [vmem:[%s14380_s13 + $0xc40] ss:$28 sps:$4 sm:$0xff]  }
 0xc7f   :  { %6080 = vmatpush1.bf16.msra.mxu1 %v9427_v15  ;;  %v9502_v15 = vld [vmem:[%s14380_s13 + $0xc48] ss:$28 sps:$4 sm:$0xff]  }
 0xc80   :  { %6244 = vmatpush1.bf16.msra.mxu0 %v9430_v22  ;;  %6081 = vmatprep.subr.bf16.mxu1 %v9435_v10  ;;  %v9507_v22 = vld [vmem:[%s14380_s13 + $0xc7c] ss:$28 sps:$4 sm:$0xff]   ;;  %v9510_v10 = vld [vmem:[%s14380_s13 + $0xc84] ss:$28 sps:$4 sm:$0xff]  }
 0xc81   :  { %6245 = vmatprep.subr.bf16.mxu0 %v9438_v25  ;;  %v9505_v25 = vld [vmem:[%s14380_s13 + $0xc78] ss:$28 sps:$4 sm:$0xff]  }
 0xc83   :  { %6082 = vmatpush1.bf16.msra.mxu1 %v9433_v29  ;;  %v9508_v29 = vld [vmem:[%s14380_s13 + $0xc80] ss:$28 sps:$4 sm:$0xff]  }
 0xc84   :  { %6246 = vmatpush1.bf16.msra.mxu0 %v9436_v11  ;;  %6083 = vmatprep.subr.bf16.mxu1 %v9441_v45  ;;  %v9513_v11 = vld [vmem:[%s14380_s13 + $0xcb4] ss:$28 sps:$4 sm:$0xff]   ;;  %v9516_v45 = vld [vmem:[%s14380_s13 + $0xcbc] ss:$28 sps:$4 sm:$0xff]  }
 0xc85   :  { %6247 = vmatprep.subr.bf16.mxu0 %v9444_v26  ;;  %v9511_v26 = vld [vmem:[%s14380_s13 + $0xcb0] ss:$28 sps:$4 sm:$0xff]  }
 0xc87   :  { %6084 = vmatpush1.bf16.msra.mxu1 %v9439_v62  ;;  %v9514_v62 = vld [vmem:[%s14380_s13 + $0xcb8] ss:$28 sps:$4 sm:$0xff]  }
 0xc88   :  { %6248 = vmatpush1.bf16.msra.mxu0 %v9442_v48  ;;  %6085 = vmatprep.subr.bf16.mxu1 %v9447_v28  ;;  %v9519_v48 = vld [vmem:[%s14380_s13 + $0xcec] ss:$28 sps:$4 sm:$0xff]   ;;  %v9522_v28 = vld [vmem:[%s14380_s13 + $0xcf4] ss:$28 sps:$4 sm:$0xff]  }
 0xc89   :  { %6249 = vmatprep.subr.bf16.mxu0 %v9450_v51  ;;  %v9517_v51 = vld [vmem:[%s14380_s13 + $0xce8] ss:$28 sps:$4 sm:$0xff]  }
 0xc8b   :  { %6086 = vmatpush1.bf16.msra.mxu1 %v9445_v4  ;;  %v9520_v4 = vld [vmem:[%s14380_s13 + $0xcf0] ss:$28 sps:$4 sm:$0xff]  }
 0xc8c   :  { %6250 = vmatpush1.bf16.msra.mxu0 %v9448_v18  ;;  %6096 = vmatprep.subr.bf16.mxu1 %v9453_v32  ;;  %v9528_v18 = vld [vmem:[%s14380_s13 + $0xd2c] ss:$28 sps:$4 sm:$0xff]   ;;  %v9523_v32 = vld [vmem:[%s14380_s13 + $0xd20] ss:$28 sps:$4 sm:$0xff]  }
 0xc8d   :  { %6260 = vmatprep.subr.bf16.mxu0 %v9456_v23  ;;  %v9526_v23 = vld [vmem:[%s14380_s13 + $0xd28] ss:$28 sps:$4 sm:$0xff]  }
 0xc8e   :  { %6088 = vmatmul.mubr.bf16.vlgmr.msra.gmra.mrb[84].mxu1 %v12120_v2 }
 0xc8f   :  { %6252 = vmatmul.mubr.bf16.vlgmr.msra.gmra.mrb[48].mxu0 %v12120_v2  ;;  %6097 = vmatpush1.bf16.msra.mxu1 %v9451_v27  ;;  %v9534_v27 = vld [vmem:[%s14380_s13 + $0xd64] ss:$28 sps:$4 sm:$0xff]  }
 0xc90   :  { %6128 = vmatprep.mubr.bf16.mxu1 %v12128_v36  ;;  %6261 = vmatpush1.bf16.msra.mxu0 %v9454_v63  ;;  %v9529_v63 = vld [vmem:[%s14380_s13 + $0xd58] ss:$28 sps:$4 sm:$0xff]  }
 0xc91   :  { %6292 = vmatprep.mubr.bf16.mxu0 %v12128_v36  ;;  %6098 = vmatprep.subr.bf16.mxu1 %v9459_v61  ;;  %v9532_v61 = vld [vmem:[%s14380_s13 + $0xd60] ss:$28 sps:$4 sm:$0xff]  }
 0xc92   :  { %6262 = vmatprep.subr.bf16.mxu0 %v9462_v40  ;;  %v9537_v40 = vld [vmem:[%s14380_s13 + $0xd94] ss:$28 sps:$4 sm:$0xff]  }
 0xc93   :  { %6099 = vmatpush1.bf16.msra.mxu1 %v9457_v49  ;;  %v9540_v49 = vld [vmem:[%s14380_s13 + $0xd9c] ss:$28 sps:$4 sm:$0xff]  }
 0xc94   :  { %6263 = vmatpush1.bf16.msra.mxu0 %v9460_v9  ;;  %6100 = vmatprep.subr.bf16.mxu1 %v9465_v47  ;;  %v9535_v9 = vld [vmem:[%s14380_s13 + $0xd90] ss:$28 sps:$4 sm:$0xff]   ;;  %v9538_v47 = vld [vmem:[%s14380_s13 + $0xd98] ss:$28 sps:$4 sm:$0xff]  }
 0xc95   :  { %6264 = vmatprep.subr.bf16.mxu0 %v9468_v31  ;;  %v9543_v31 = vld [vmem:[%s14380_s13 + $0xdcc] ss:$28 sps:$4 sm:$0xff]  }
 0xc97   :  { %6101 = vmatpush1.bf16.msra.mxu1 %v9463_v34  ;;  %v9546_v34 = vld [vmem:[%s14380_s13 + $0xdd4] ss:$28 sps:$4 sm:$0xff]  }
 0xc98   :  { %6265 = vmatpush1.bf16.msra.mxu0 %v9466_v14  ;;  %6102 = vmatprep.subr.bf16.mxu1 %v9471_v33  ;;  %v9541_v14 = vld [vmem:[%s14380_s13 + $0xdc8] ss:$28 sps:$4 sm:$0xff]   ;;  %v3145_v33 = vrot.slane %v11700_v39, 3  ;;  %v9547_v39 = vld [vmem:[%s14380_s13 + $0x10] ss:$28 sps:$4 sm:$0xff]  }
 0xc99   :  { %6266 = vmatprep.subr.bf16.mxu0 %v9474_v6  ;;  %v9544_v6 = vld [vmem:[%s14380_s13 + $0xdd0] ss:$28 sps:$4 sm:$0xff]  }
 0xc9b   :  { %6103 = vmatpush1.bf16.msra.mxu1 %v9469_v38  ;;  %v9549_v38 = vld [vmem:[%s14380_s13 + $0x14] ss:$28 sps:$4 sm:$0xff]  }
 0xc9c   :  { %6267 = vmatpush1.bf16.msra.mxu0 %v9472_v37  ;;  %6104 = vmatprep.subr.bf16.mxu1 %v9477_v50  ;;  %v9550_v37 = vld [vmem:[%s14380_s13 + $0x1d8] ss:$28 sps:$4 sm:$0xff]   ;;  %v12321_v50 = vpack.c.bf16 %v3145_v33, %v3145_v33  ;;  %v9607_v33 = vld [vmem:[%s14380_s13 + $0x2b0] ss:$28 sps:$4 sm:$0xff]  }
 0xc9d   :  { %6268 = vmatprep.subr.bf16.mxu0 %v9480_v53  ;;  %v9551_v53 = vld [vmem:[%s14380_s13 + $0x18] ss:$28 sps:$4 sm:$0xff]  }
 0xc9f   :  { %6105 = vmatpush1.bf16.msra.mxu1 %v9475_v54  ;;  %v9554_v54 = vld [vmem:[%s14380_s13 + $0x4c] ss:$28 sps:$4 sm:$0xff]  }
 0xca0   :  { %6269 = vmatpush1.bf16.msra.mxu0 %v9478_v35  ;;  %6106 = vmatprep.subr.bf16.mxu1 %v9483_v57  ;;  %v9555_v35 = vld [vmem:[%s14380_s13 + $0x210] ss:$28 sps:$4 sm:$0xff]   ;;  %v9552_v57 = vld [vmem:[%s14380_s13 + $0x48] ss:$28 sps:$4 sm:$0xff]  }
 0xca1   :  { %6270 = vmatprep.subr.bf16.mxu0 %v9486_v58  ;;  %v9556_v58 = vld [vmem:[%s14380_s13 + $0x50] ss:$28 sps:$4 sm:$0xff]  }
 0xca3   :  { %6107 = vmatpush1.bf16.msra.mxu1 %v9481_v59  ;;  %v9559_v59 = vld [vmem:[%s14380_s13 + $0x84] ss:$28 sps:$4 sm:$0xff]  }
 0xca4   :  { %6271 = vmatpush1.bf16.msra.mxu0 %v9484_v60  ;;  %6108 = vmatprep.subr.bf16.mxu1 %v9489_v42  ;;  %v9560_v60 = vld [vmem:[%s14380_s13 + $0x248] ss:$28 sps:$4 sm:$0xff]   ;;  %v9557_v42 = vld [vmem:[%s14380_s13 + $0x80] ss:$28 sps:$4 sm:$0xff]  }
 0xca5   :  { %6272 = vmatprep.subr.bf16.mxu0 %v9492_v52  ;;  %v9561_v52 = vld [vmem:[%s14380_s13 + $0x88] ss:$28 sps:$4 sm:$0xff]  }
 0xca7   :  { %6109 = vmatpush1.bf16.msra.mxu1 %v9487_v44  ;;  %v9565_v44 = vld [vmem:[%s14380_s13 + $0x280] ss:$28 sps:$4 sm:$0xff]  }
 0xca8   :  { %6273 = vmatpush1.bf16.msra.mxu0 %v9490_v56  ;;  %6110 = vmatprep.subr.bf16.mxu1 %v9495_v55  ;;  %v9562_v56 = vld [vmem:[%s14380_s13 + $0xb8] ss:$28 sps:$4 sm:$0xff]   ;;  %v9566_v55 = vld [vmem:[%s14380_s13 + $0xc0] ss:$28 sps:$4 sm:$0xff]  }
 0xca9   :  { %6274 = vmatprep.subr.bf16.mxu0 %v9498_v46  ;;  %v9569_v46 = vld [vmem:[%s14380_s13 + $0xf4] ss:$28 sps:$4 sm:$0xff]  }
 0xcab   :  { %6111 = vmatpush1.bf16.msra.mxu1 %v9493_v30  ;;  %v9570_v30 = vld [vmem:[%s14380_s13 + $0x2b8] ss:$28 sps:$4 sm:$0xff]  }
 0xcac   :  { %6275 = vmatpush1.bf16.msra.mxu0 %v9496_v5  ;;  %6112 = vmatprep.subr.bf16.mxu1 %v9501_v3  ;;  %v9567_v5 = vld [vmem:[%s14380_s13 + $0xf0] ss:$28 sps:$4 sm:$0xff]   ;;  %v9571_v3 = vld [vmem:[%s14380_s13 + $0xf8] ss:$28 sps:$4 sm:$0xff]  }
 0xcad   :  { %6276 = vmatprep.subr.bf16.mxu0 %v9504_v8  ;;  %v9574_v8 = vld [vmem:[%s14380_s13 + $0x12c] ss:$28 sps:$4 sm:$0xff]  }
 0xcaf   :  { %6113 = vmatpush1.bf16.msra.mxu1 %v9499_v13  ;;  %v9575_v13 = vld [vmem:[%s14380_s13 + $0x2f0] ss:$28 sps:$4 sm:$0xff]  }
 0xcb0   :  { %6277 = vmatpush1.bf16.msra.mxu0 %v9502_v15  ;;  %6114 = vmatprep.subr.bf16.mxu1 %v9507_v22  ;;  %v9572_v15 = vld [vmem:[%s14380_s13 + $0x128] ss:$28 sps:$4 sm:$0xff]   ;;  %v9576_v22 = vld [vmem:[%s14380_s13 + $0x130] ss:$28 sps:$4 sm:$0xff]  }
 0xcb1   :  { %6278 = vmatprep.subr.bf16.mxu0 %v9510_v10  ;;  %v9579_v10 = vld [vmem:[%s14380_s13 + $0x164] ss:$28 sps:$4 sm:$0xff]  }
 0xcb3   :  { %6115 = vmatpush1.bf16.msra.mxu1 %v9505_v25  ;;  %v9580_v25 = vld [vmem:[%s14380_s13 + $0x328] ss:$28 sps:$4 sm:$0xff]  }
 0xcb4   :  { %6279 = vmatpush1.bf16.msra.mxu0 %v9508_v29  ;;  %6116 = vmatprep.subr.bf16.mxu1 %v9513_v11  ;;  %v9577_v29 = vld [vmem:[%s14380_s13 + $0x160] ss:$28 sps:$4 sm:$0xff]   ;;  %v9581_v11 = vld [vmem:[%s14380_s13 + $0x168] ss:$28 sps:$4 sm:$0xff]  }
 0xcb5   :  { %6280 = vmatprep.subr.bf16.mxu0 %v9516_v45  ;;  %v9584_v45 = vld [vmem:[%s14380_s13 + $0x19c] ss:$28 sps:$4 sm:$0xff]  }
 0xcb7   :  { %6117 = vmatpush1.bf16.msra.mxu1 %v9511_v26  ;;  %v9585_v26 = vld [vmem:[%s14380_s13 + $0x360] ss:$28 sps:$4 sm:$0xff]  }
 0xcb8   :  { %6281 = vmatpush1.bf16.msra.mxu0 %v9514_v62  ;;  %6118 = vmatprep.subr.bf16.mxu1 %v9519_v48  ;;  %v9582_v62 = vld [vmem:[%s14380_s13 + $0x198] ss:$28 sps:$4 sm:$0xff]   ;;  %v9586_v48 = vld [vmem:[%s14380_s13 + $0x1a0] ss:$28 sps:$4 sm:$0xff]  }
 0xcb9   :  { %6282 = vmatprep.subr.bf16.mxu0 %v9522_v28  ;;  %v9589_v28 = vld [vmem:[%s14380_s13 + $0x1d4] ss:$28 sps:$4 sm:$0xff]  }
 0xcbb   :  { %6119 = vmatpush1.bf16.msra.mxu1 %v9517_v51  ;;  %v9590_v51 = vld [vmem:[%s14380_s13 + $0x558] ss:$28 sps:$4 sm:$0xff]  }
 0xcbc   :  { %6283 = vmatpush1.bf16.msra.mxu0 %v9520_v4  ;;  %6120 = vmatprep.subr.bf16.mxu1 %v9525_v17  ;;  %v9587_v4 = vld [vmem:[%s14380_s13 + $0x1d0] ss:$28 sps:$4 sm:$0xff]   ;;  %v9591_v17 = vld [vmem:[%s14380_s13 + $0x398] ss:$28 sps:$4 sm:$0xff]  }
 0xcbd   :  { %6284 = vmatprep.subr.bf16.mxu0 %v9528_v18  ;;  %v9594_v18 = vld [vmem:[%s14380_s13 + $0x20c] ss:$28 sps:$4 sm:$0xff]  }
 0xcbf   :  { %6121 = vmatpush1.bf16.msra.mxu1 %v9523_v32  ;;  %v9595_v32 = vld [vmem:[%s14380_s13 + $0x590] ss:$28 sps:$4 sm:$0xff]  }
 0xcc0   :  { %6285 = vmatpush1.bf16.msra.mxu0 %v9526_v23  ;;  %6122 = vmatprep.subr.bf16.mxu1 %v9531_v24  ;;  %v9592_v23 = vld [vmem:[%s14380_s13 + $0x208] ss:$28 sps:$4 sm:$0xff]   ;;  %v9596_v24 = vld [vmem:[%s14380_s13 + $0x3d0] ss:$28 sps:$4 sm:$0xff]  }
 0xcc1   :  { %6286 = vmatprep.subr.bf16.mxu0 %v9534_v27  ;;  %v9599_v27 = vld [vmem:[%s14380_s13 + $0x244] ss:$28 sps:$4 sm:$0xff]  }
 0xcc3   :  { %6123 = vmatpush1.bf16.msra.mxu1 %v9529_v63  ;;  %v9600_v63 = vld [vmem:[%s14380_s13 + $0x5c8] ss:$28 sps:$4 sm:$0xff]  }
 0xcc4   :  { %6287 = vmatpush1.bf16.msra.mxu0 %v9532_v61  ;;  %6124 = vmatprep.subr.bf16.mxu1 %v9537_v40  ;;  %v9597_v61 = vld [vmem:[%s14380_s13 + $0x240] ss:$28 sps:$4 sm:$0xff]   ;;  %v9601_v40 = vld [vmem:[%s14380_s13 + $0x408] ss:$28 sps:$4 sm:$0xff]  }
 0xcc5   :  { %6288 = vmatprep.subr.bf16.mxu0 %v9540_v49  ;;  %v9604_v49 = vld [vmem:[%s14380_s13 + $0x27c] ss:$28 sps:$4 sm:$0xff]  }
 0xcc7   :  { %6125 = vmatpush1.bf16.msra.mxu1 %v9535_v9  ;;  %v9605_v9 = vld [vmem:[%s14380_s13 + $0x600] ss:$28 sps:$4 sm:$0xff]  }
 0xcc8   :  { %6289 = vmatpush1.bf16.msra.mxu0 %v9538_v47  ;;  %6126 = vmatprep.subr.bf16.mxu1 %v9543_v31  ;;  %v9602_v47 = vld [vmem:[%s14380_s13 + $0x278] ss:$28 sps:$4 sm:$0xff]   ;;  %v9606_v31 = vld [vmem:[%s14380_s13 + $0x440] ss:$28 sps:$4 sm:$0xff]  }
 0xcc9   :  { %6290 = vmatprep.subr.bf16.mxu0 %v9546_v34  ;;  %v9609_v34 = vld [vmem:[%s14380_s13 + $0x2b4] ss:$28 sps:$4 sm:$0xff]  }
 0xccb   :  { %6127 = vmatpush1.bf16.msra.mxu1 %v9541_v14  ;;  %v9610_v14 = vld [vmem:[%s14380_s13 + $0x638] ss:$28 sps:$4 sm:$0xff]  }
 0xccc   :  { %6291 = vmatpush1.bf16.msra.mxu0 %v9544_v6  ;;  %6301 = vmatprep.subr.bf16.mxu1 %v9549_v38  ;;  %v9611_v6 = vld [vmem:[%s14380_s13 + $0x478] ss:$28 sps:$4 sm:$0xff]   ;;  %v9614_v38 = vld [vmem:[%s14380_s13 + $0x2ec] ss:$28 sps:$4 sm:$0xff]  }
 0xccd   :  { %8356 = vmatprep.subr.bf16.mxu0 %v9550_v37  ;;  %v9615_v37 = vld [vmem:[%s14380_s13 + $0x670] ss:$28 sps:$4 sm:$0xff]  }
 0xcce   :  { %6129 = vmatmul.mubr.bf16.vlgmr.msra.gmra.mrb[84].mxu1 %v12321_v50 }
 0xccf   :  { %6293 = vmatmul.mubr.bf16.vlgmr.msra.gmra.mrb[48].mxu0 %v12321_v50  ;;  %6302 = vmatpush1.bf16.msra.mxu1 %v9547_v39  ;;  %v9612_v39 = vld [vmem:[%s14380_s13 + $0x2e8] ss:$28 sps:$4 sm:$0xff]  }
 0xcd0   :  { %6333 = vmatprep.mubr.bf16.mxu1 %v11707_v43  ;;  %8357 = vmatpush3.bf16.msra.mxu0 %v9551_v53  ;;  %v9616_v53 = vld [vmem:[%s14380_s13 + $0x4b0] ss:$28 sps:$4 sm:$0xff]  }
 0xcd1   :  { %6497 = vmatprep.mubr.bf16.mxu0 %v11707_v43  ;;  %6303 = vmatprep.subr.bf16.mxu1 %v9554_v54  ;;  %v9564_v43 = vld [vmem:[%s14380_s13 + $0xbc] ss:$28 sps:$4 sm:$0xff]   ;;  %v9619_v54 = vld [vmem:[%s14380_s13 + $0x324] ss:$28 sps:$4 sm:$0xff]  }
 0xcd2   :  { %8358 = vmatprep.subr.bf16.mxu0 %v9555_v35  ;;  %v9620_v35 = vld [vmem:[%s14380_s13 + $0x6a8] ss:$28 sps:$4 sm:$0xff]  }
 0xcd3   :  { %6304 = vmatpush1.bf16.msra.mxu1 %v9552_v57  ;;  %v9617_v57 = vld [vmem:[%s14380_s13 + $0x320] ss:$28 sps:$4 sm:$0xff]  }
 0xcd4   :  { %8359 = vmatpush3.bf16.msra.mxu0 %v9556_v58  ;;  %6305 = vmatprep.subr.bf16.mxu1 %v9559_v59  ;;  %v9621_v58 = vld [vmem:[%s14380_s13 + $0x4e8] ss:$28 sps:$4 sm:$0xff]   ;;  %v9624_v59 = vld [vmem:[%s14380_s13 + $0x35c] ss:$28 sps:$4 sm:$0xff]  }
 0xcd5   :  { %8360 = vmatprep.subr.bf16.mxu0 %v9560_v60  ;;  %v9625_v60 = vld [vmem:[%s14380_s13 + $0x6e0] ss:$28 sps:$4 sm:$0xff]  }
 0xcd7   :  { %6306 = vmatpush1.bf16.msra.mxu1 %v9557_v42  ;;  %v9622_v42 = vld [vmem:[%s14380_s13 + $0x358] ss:$28 sps:$4 sm:$0xff]  }
 0xcd8   :  { %8361 = vmatpush3.bf16.msra.mxu0 %v9561_v52  ;;  %6307 = vmatprep.subr.bf16.mxu1 %v9564_v43  ;;  %v9626_v52 = vld [vmem:[%s14380_s13 + $0x520] ss:$28 sps:$4 sm:$0xff]   ;;  %v9629_v43 = vld [vmem:[%s14380_s13 + $0x394] ss:$28 sps:$4 sm:$0xff]  }
 0xcd9   :  { %8362 = vmatprep.subr.bf16.mxu0 %v9565_v44  ;;  %v9630_v44 = vld [vmem:[%s14380_s13 + $0x8d8] ss:$28 sps:$4 sm:$0xff]  }
 0xcdb   :  { %6308 = vmatpush1.bf16.msra.mxu1 %v9562_v56  ;;  %v9627_v56 = vld [vmem:[%s14380_s13 + $0x390] ss:$28 sps:$4 sm:$0xff]  }
 0xcdc   :  { %8363 = vmatpush3.bf16.msra.mxu0 %v9566_v55  ;;  %6309 = vmatprep.subr.bf16.mxu1 %v9569_v46  ;;  %v9631_v55 = vld [vmem:[%s14380_s13 + $0x718] ss:$28 sps:$4 sm:$0xff]   ;;  %v9634_v46 = vld [vmem:[%s14380_s13 + $0x3cc] ss:$28 sps:$4 sm:$0xff]  }
 0xcdd   :  { %8364 = vmatprep.subr.bf16.mxu0 %v9570_v30  ;;  %v9635_v30 = vld [vmem:[%s14380_s13 + $0x910] ss:$28 sps:$4 sm:$0xff]  }
 0xcdf   :  { %6310 = vmatpush1.bf16.msra.mxu1 %v9567_v5  ;;  %v9632_v5 = vld [vmem:[%s14380_s13 + $0x3c8] ss:$28 sps:$4 sm:$0xff]  }
 0xce0   :  { %8365 = vmatpush3.bf16.msra.mxu0 %v9571_v3  ;;  %6311 = vmatprep.subr.bf16.mxu1 %v9574_v8  ;;  %v9636_v3 = vld [vmem:[%s14380_s13 + $0x750] ss:$28 sps:$4 sm:$0xff]   ;;  %v9640_v8 = vld [vmem:[%s14380_s13 + $0x948] ss:$28 sps:$4 sm:$0xff]  }
 0xce1   :  { %8366 = vmatprep.subr.bf16.mxu0 %v9575_v13  ;;  %v9641_v13 = vld [vmem:[%s14380_s13 + $0x788] ss:$28 sps:$4 sm:$0xff]  }
 0xce3   :  { %6312 = vmatpush1.bf16.msra.mxu1 %v9572_v15  ;;  %v9644_v15 = vld [vmem:[%s14380_s13 + $0x43c] ss:$28 sps:$4 sm:$0xff]  }
 0xce4   :  { %8367 = vmatpush3.bf16.msra.mxu0 %v9576_v22  ;;  %6313 = vmatprep.subr.bf16.mxu1 %v9579_v10  ;;  %v9645_v22 = vld [vmem:[%s14380_s13 + $0x980] ss:$28 sps:$4 sm:$0xff]   ;;  %v9642_v10 = vld [vmem:[%s14380_s13 + $0x438] ss:$28 sps:$4 sm:$0xff]  }
 0xce5   :  { %8368 = vmatprep.subr.bf16.mxu0 %v9580_v25  ;;  %v9646_v25 = vld [vmem:[%s14380_s13 + $0x7c0] ss:$28 sps:$4 sm:$0xff]  }
 0xce7   :  { %6314 = vmatpush1.bf16.msra.mxu1 %v9577_v29  ;;  %v9649_v29 = vld [vmem:[%s14380_s13 + $0x474] ss:$28 sps:$4 sm:$0xff]  }
 0xce8   :  { %8369 = vmatpush3.bf16.msra.mxu0 %v9581_v11  ;;  %6315 = vmatprep.subr.bf16.mxu1 %v9584_v45  ;;  %v9650_v11 = vld [vmem:[%s14380_s13 + $0x9b8] ss:$28 sps:$4 sm:$0xff]   ;;  %v9647_v45 = vld [vmem:[%s14380_s13 + $0x470] ss:$28 sps:$4 sm:$0xff]  }
 0xce9   :  { %8370 = vmatprep.subr.bf16.mxu0 %v9585_v26  ;;  %v9651_v26 = vld [vmem:[%s14380_s13 + $0x7f8] ss:$28 sps:$4 sm:$0xff]  }
 0xceb   :  { %6316 = vmatpush1.bf16.msra.mxu1 %v9582_v62  ;;  %v9654_v62 = vld [vmem:[%s14380_s13 + $0x4ac] ss:$28 sps:$4 sm:$0xff]  }
 0xcec   :  { %8371 = vmatpush3.bf16.msra.mxu0 %v9586_v48  ;;  %6317 = vmatprep.subr.bf16.mxu1 %v9589_v28  ;;  %v9655_v48 = vld [vmem:[%s14380_s13 + $0x9f0] ss:$28 sps:$4 sm:$0xff]   ;;  %v9652_v28 = vld [vmem:[%s14380_s13 + $0x4a8] ss:$28 sps:$4 sm:$0xff]  }
 0xced   :  { %8378 = vmatprep.subr.bf16.mxu0 %v9590_v51  ;;  %v9656_v51 = vld [vmem:[%s14380_s13 + $0x830] ss:$28 sps:$4 sm:$0xff]  }
 0xcef   :  { %6498 = vmatmul.mubr.bf16.vlgmr.msra.gmra.mrb[52].mxu0 %v11717_v7  ;;  %6318 = vmatpush1.bf16.msra.mxu1 %v9587_v4  ;;  %v9659_v4 = vld [vmem:[%s14380_s13 + $0x4e4] ss:$28 sps:$4 sm:$0xff]  }
 0xcf0   :  { %8379 = vmatpush3.bf16.msra.mxu0 %v9591_v17  ;;  %6537 = vmatprep.mubr.bf16.mxu0 %v11725_v0  ;;  %v9660_v17 = vld [vmem:[%s14380_s13 + $0xa28] ss:$28 sps:$4 sm:$0xff]  }
 0xcf1   :  { %6319 = vmatprep.subr.bf16.mxu1 %v9594_v18  ;;  %8380 = vmatprep.subr.bf16.mxu0 %v9595_v32  ;;  %v9657_v18 = vld [vmem:[%s14380_s13 + $0x4e0] ss:$28 sps:$4 sm:$0xff]   ;;  %v9661_v32 = vld [vmem:[%s14380_s13 + $0x868] ss:$28 sps:$4 sm:$0xff]  }
 0xcf3   :  { %6320 = vmatpush1.bf16.msra.mxu1 %v9592_v23  ;;  %v9664_v23 = vld [vmem:[%s14380_s13 + $0x51c] ss:$28 sps:$4 sm:$0xff]  }
 0xcf4   :  { %8381 = vmatpush3.bf16.msra.mxu0 %v9596_v24  ;;  %6321 = vmatprep.subr.bf16.mxu1 %v9599_v27  ;;  %v9665_v24 = vld [vmem:[%s14380_s13 + $0xa60] ss:$28 sps:$4 sm:$0xff]   ;;  %v9662_v27 = vld [vmem:[%s14380_s13 + $0x518] ss:$28 sps:$4 sm:$0xff]  }
 0xcf5   :  { %8382 = vmatprep.subr.bf16.mxu0 %v9600_v63  ;;  %v9666_v63 = vld [vmem:[%s14380_s13 + $0x8a0] ss:$28 sps:$4 sm:$0xff]  }
 0xcf7   :  { %6322 = vmatpush1.bf16.msra.mxu1 %v9597_v61  ;;  %v9669_v61 = vld [vmem:[%s14380_s13 + $0x554] ss:$28 sps:$4 sm:$0xff]  }
 0xcf8   :  { %8383 = vmatpush3.bf16.msra.mxu0 %v9601_v40  ;;  %6323 = vmatprep.subr.bf16.mxu1 %v9604_v49  ;;  %v9670_v40 = vld [vmem:[%s14380_s13 + $0xc58] ss:$28 sps:$4 sm:$0xff]   ;;  %v9667_v49 = vld [vmem:[%s14380_s13 + $0x550] ss:$28 sps:$4 sm:$0xff]  }
 0xcf9   :  { %8384 = vmatprep.subr.bf16.mxu0 %v9605_v9  ;;  %v9671_v9 = vld [vmem:[%s14380_s13 + $0xa98] ss:$28 sps:$4 sm:$0xff]  }
 0xcfb   :  { %6324 = vmatpush1.bf16.msra.mxu1 %v9602_v47  ;;  %v9674_v47 = vld [vmem:[%s14380_s13 + $0x58c] ss:$28 sps:$4 sm:$0xff]  }
 0xcfc   :  { %8385 = vmatpush3.bf16.msra.mxu0 %v9606_v31  ;;  %6325 = vmatprep.subr.bf16.mxu1 %v9609_v34  ;;  %v9675_v31 = vld [vmem:[%s14380_s13 + $0xc90] ss:$28 sps:$4 sm:$0xff]   ;;  %v9672_v34 = vld [vmem:[%s14380_s13 + $0x588] ss:$28 sps:$4 sm:$0xff]  }
 0xcfd   :  { %8386 = vmatprep.subr.bf16.mxu0 %v9610_v14  ;;  %v9676_v14 = vld [vmem:[%s14380_s13 + $0xad0] ss:$28 sps:$4 sm:$0xff]  }
 0xcff   :  { %6326 = vmatpush1.bf16.msra.mxu1 %v9607_v33  ;;  %v9679_v33 = vld [vmem:[%s14380_s13 + $0x5c4] ss:$28 sps:$4 sm:$0xff]  }
 0xd00   :  { %8387 = vmatpush3.bf16.msra.mxu0 %v9611_v6  ;;  %6327 = vmatprep.subr.bf16.mxu1 %v9614_v38  ;;  %v9680_v6 = vld [vmem:[%s14380_s13 + $0xcc8] ss:$28 sps:$4 sm:$0xff]   ;;  %v9677_v38 = vld [vmem:[%s14380_s13 + $0x5c0] ss:$28 sps:$4 sm:$0xff]  }
 0xd01   :  { %8388 = vmatprep.subr.bf16.mxu0 %v9615_v37  ;;  %v9681_v37 = vld [vmem:[%s14380_s13 + $0xb08] ss:$28 sps:$4 sm:$0xff]  }
 0xd03   :  { %6328 = vmatpush1.bf16.msra.mxu1 %v9612_v39  ;;  %v9684_v39 = vld [vmem:[%s14380_s13 + $0x5fc] ss:$28 sps:$4 sm:$0xff]  }
 0xd04   :  { %8389 = vmatpush3.bf16.msra.mxu0 %v9616_v53  ;;  %6329 = vmatprep.subr.bf16.mxu1 %v9619_v54  ;;  %v9685_v53 = vld [vmem:[%s14380_s13 + $0xd00] ss:$28 sps:$4 sm:$0xff]   ;;  %v9682_v54 = vld [vmem:[%s14380_s13 + $0x5f8] ss:$28 sps:$4 sm:$0xff]  }
 0xd05   :  { %8390 = vmatprep.subr.bf16.mxu0 %v9620_v35  ;;  %v9686_v35 = vld [vmem:[%s14380_s13 + $0xb40] ss:$28 sps:$4 sm:$0xff]  }
 0xd07   :  { %6330 = vmatpush1.bf16.msra.mxu1 %v9617_v57  ;;  %v9689_v57 = vld [vmem:[%s14380_s13 + $0x634] ss:$28 sps:$4 sm:$0xff]  }
 0xd08   :  { %8391 = vmatpush3.bf16.msra.mxu0 %v9621_v58  ;;  %6331 = vmatprep.subr.bf16.mxu1 %v9624_v59  ;;  %v9690_v58 = vld [vmem:[%s14380_s13 + $0xd38] ss:$28 sps:$4 sm:$0xff]   ;;  %v9687_v59 = vld [vmem:[%s14380_s13 + $0x630] ss:$28 sps:$4 sm:$0xff]  }
 0xd09   :  { %8392 = vmatprep.subr.bf16.mxu0 %v9625_v60  ;;  %v9691_v60 = vld [vmem:[%s14380_s13 + $0xb78] ss:$28 sps:$4 sm:$0xff]  }
 0xd0b   :  { %6332 = vmatpush1.bf16.msra.mxu1 %v9622_v42  ;;  %v9694_v42 = vld [vmem:[%s14380_s13 + $0x66c] ss:$28 sps:$4 sm:$0xff]  }
 0xd0c   :  { %8393 = vmatpush3.bf16.msra.mxu0 %v9626_v52  ;;  %6342 = vmatprep.subr.bf16.mxu1 %v9629_v43  ;;  %v9695_v52 = vld [vmem:[%s14380_s13 + $0xd70] ss:$28 sps:$4 sm:$0xff]   ;;  %v9692_v43 = vld [vmem:[%s14380_s13 + $0x668] ss:$28 sps:$4 sm:$0xff]  }
 0xd0d   :  { %8400 = vmatprep.subr.bf16.mxu0 %v9630_v44  ;;  %v9696_v44 = vld [vmem:[%s14380_s13 + $0xbb0] ss:$28 sps:$4 sm:$0xff]  }
 0xd0e   :  { %6334 = vmatmul.mubr.bf16.vlgmr.msra.gmra.mrb[88].mxu1 %v11717_v7  ;;  %v9639_v7 = vld [vmem:[%s14380_s13 + $0x404] ss:$28 sps:$4 sm:$0xff]  }
 0xd0f   :  { %6538 = vmatmul.mubr.bf16.vlgmr.msra.gmra.mrb[56].mxu0 %v11918_v12  ;;  %6343 = vmatpush1.bf16.msra.mxu1 %v9627_v56  ;;  %v9699_v56 = vld [vmem:[%s14380_s13 + $0x6a4] ss:$28 sps:$4 sm:$0xff]  }
 0xd10   :  { %6374 = vmatprep.mubr.bf16.mxu1 %v11725_v0  ;;  %8401 = vmatpush3.bf16.msra.mxu0 %v9631_v55  ;;  %v9637_v0 = vld [vmem:[%s14380_s13 + $0x400] ss:$28 sps:$4 sm:$0xff]   ;;  %v9700_v55 = vld [vmem:[%s14380_s13 + $0xda8] ss:$28 sps:$4 sm:$0xff]  }
 0xd11   :  { %6577 = vmatprep.mubr.bf16.mxu0 %v11923_v41  ;;  %6344 = vmatprep.subr.bf16.mxu1 %v9634_v46  ;;  %v9697_v46 = vld [vmem:[%s14380_s13 + $0x6a0] ss:$28 sps:$4 sm:$0xff]  }
 0xd12   :  { %8402 = vmatprep.subr.bf16.mxu0 %v9635_v30  ;;  %v9701_v30 = vld [vmem:[%s14380_s13 + $0xbe8] ss:$28 sps:$4 sm:$0xff]  }
 0xd13   :  { %6345 = vmatpush1.bf16.msra.mxu1 %v9632_v5  ;;  %v9704_v5 = vld [vmem:[%s14380_s13 + $0x6dc] ss:$28 sps:$4 sm:$0xff]  }
 0xd14   :  { %8403 = vmatpush3.bf16.msra.mxu0 %v9636_v3  ;;  %6346 = vmatprep.subr.bf16.mxu1 %v9639_v7  ;;  %v9705_v3 = vld [vmem:[%s14380_s13 + $0xde0] ss:$28 sps:$4 sm:$0xff]   ;;  %v3079_v7 = vmax.f32 %v11582_v21, 0.0 }
 0xd15   :  { %8404 = vmatprep.subr.bf16.mxu0 %v9640_v8  ;;  %v3080_v8 = vmax.f32 %v11584_v16, 0.0  ;;  %v9707_v16 = vld [vmem:[%s14380_s13 + $0x710] ss:$28 sps:$4 sm:$0xff]  }
 0xd17   :  { %6347 = vmatpush1.bf16.msra.mxu1 %v9637_v0  ;;  %v9702_v0 = vld [vmem:[%s14380_s13 + $0x6d8] ss:$28 sps:$4 sm:$0xff]   ;;  %v6626_v21 = vpack.c.bf16 %v3080_v8, %v3080_v8  ;;  %v9749_v8 = vld [vmem:[%s14380_s13 + $0xa20] ss:$28 sps:$4 sm:$0xff]  }
 0xd18   :  { %8405 = vmatpush3.bf16.msra.mxu0 %v9641_v13  ;;  %6348 = vmatprep.subr.bf16.mxu1 %v9644_v15  ;;  %v9706_v13 = vld [vmem:[%s14380_s13 + $0xc20] ss:$28 sps:$4 sm:$0xff]   ;;  %v9709_v15 = vld [vmem:[%s14380_s13 + $0x714] ss:$28 sps:$4 sm:$0xff]  }
 0xd19   :  { %8406 = vmatprep.subr.bf16.mxu0 %v9645_v22  ;;  %v6625_v22 = vpack.c.bf16 %v3079_v7, %v3079_v7  ;;  %v9890_v7 = vld [vmem:[%s14380_s13 + $0x26c] ss:$28 sps:$4 sm:$0xff]  }
 0xd1b   :  { %6349 = vmatpush1.bf16.msra.mxu1 %v9642_v10  ;;  %v9712_v10 = vld [vmem:[%s14380_s13 + $0x74c] ss:$28 sps:$4 sm:$0xff]  }
 0xd1c   :  { %8407 = vmatpush3.bf16.msra.mxu0 %v9646_v25  ;;  %6350 = vmatprep.subr.bf16.mxu1 %v9649_v29  ;;  %v6628_v25 = vsel %vm222_vm5, %v6625_v22, 0  ;;  %v9710_v29 = vld [vmem:[%s14380_s13 + $0x748] ss:$28 sps:$4 sm:$0xff]   ;;  %v9752_v22 = vld [vmem:[%s14380_s13 + $0xa58] ss:$28 sps:$4 sm:$0xff]  }
 0xd1d   :  { %8408 = vmatprep.subr.bf16.mxu0 %v9650_v11  ;;  %v9715_v11 = vld [vmem:[%s14380_s13 + $0x784] ss:$28 sps:$4 sm:$0xff]  }
 0xd1f   :  { %6351 = vmatpush1.bf16.msra.mxu1 %v9647_v45  ;;  %v9713_v45 = vld [vmem:[%s14380_s13 + $0x780] ss:$28 sps:$4 sm:$0xff]  }
 0xd20   :  { %8409 = vmatpush3.bf16.msra.mxu0 %v9651_v26  ;;  %6352 = vmatprep.subr.bf16.mxu1 %v9654_v62  ;;  %v9868_v26 = vld [vmem:[%s14381_s12] sm:$0x3]  ;;  %v9721_v62 = vld [vmem:[%s14380_s13 + $0x7f4] ss:$28 sps:$4 sm:$0xff]  }
 0xd21   :  { %8410 = vmatprep.subr.bf16.mxu0 %v9655_v48  ;;  %v9869_v48 = vld [vmem:[%s14380_s13] ss:$28 sps:$4 sm:$0xff]  }
 0xd23   :  { %6353 = vmatpush1.bf16.msra.mxu1 %v9652_v28  ;;  %v9870_v28 = vld [vmem:[%s14380_s13 + $0x3c] ss:$28 sps:$4 sm:$0xff]  }
 0xd24   :  { %8411 = vmatpush3.bf16.msra.mxu0 %v9656_v51  ;;  %6354 = vmatprep.subr.bf16.mxu1 %v9659_v4  ;;  %v9719_v51 = vld [vmem:[%s14380_s13 + $0x7f0] ss:$28 sps:$4 sm:$0xff]  }
 0xd25   :  { %8412 = vmatprep.subr.bf16.mxu0 %v9660_v17  ;;  %v9724_v4 = vld [vmem:[%s14380_s13 + $0x82c] ss:$28 sps:$4 sm:$0xff]   ;;  %v9871_v17 = vld [vmem:[%s14380_s13 + $0x38] ss:$28 sps:$4 sm:$0xff]  }
 0xd27   :  { %6355 = vmatpush1.bf16.msra.mxu1 %v9657_v18  ;;  %v9872_v18 = vld [vmem:[%s14380_s13 + $0x74] ss:$28 sps:$4 sm:$0xff]  }
 0xd28   :  { %8413 = vmatpush3.bf16.msra.mxu0 %v9661_v32  ;;  %6356 = vmatprep.subr.bf16.mxu1 %v9664_v23  ;;  %v9722_v32 = vld [vmem:[%s14380_s13 + $0x828] ss:$28 sps:$4 sm:$0xff]  }
 0xd29   :  { %8414 = vmatprep.subr.bf16.mxu0 %v9665_v24  ;;  %v9727_v23 = vld [vmem:[%s14380_s13 + $0x864] ss:$28 sps:$4 sm:$0xff]   ;;  %v9873_v24 = vld [vmem:[%s14380_s13 + $0x70] ss:$28 sps:$4 sm:$0xff]  }
 0xd2b   :  { %6357 = vmatpush1.bf16.msra.mxu1 %v9662_v27  ;;  %v9874_v27 = vld [vmem:[%s14380_s13 + $0xac] ss:$28 sps:$4 sm:$0xff]  }
 0xd2c   :  { %8415 = vmatpush3.bf16.msra.mxu0 %v9666_v63  ;;  %6358 = vmatprep.subr.bf16.mxu1 %v9669_v61  ;;  %v9725_v63 = vld [vmem:[%s14380_s13 + $0x860] ss:$28 sps:$4 sm:$0xff]  }
 0xd2d   :  { %8422 = vmatprep.subr.bf16.mxu0 %v9670_v40  ;;  %v9730_v61 = vld [vmem:[%s14380_s13 + $0x89c] ss:$28 sps:$4 sm:$0xff]   ;;  %v9875_v40 = vld [vmem:[%s14380_s13 + $0xa8] ss:$28 sps:$4 sm:$0xff]  }
 0xd2f   :  { %6578 = vmatmul.mubr.bf16.vlgmr.msra.gmra.mrb[60].mxu0 %v12120_v2  ;;  %6359 = vmatpush1.bf16.msra.mxu1 %v9667_v49  ;;  %v9876_v49 = vld [vmem:[%s14380_s13 + $0xe4] ss:$28 sps:$4 sm:$0xff]  }
 0xd30   :  { %8423 = vmatpush3.bf16.msra.mxu0 %v9671_v9  ;;  %6617 = vmatprep.mubr.bf16.mxu0 %v12128_v36  ;;  %v9728_v9 = vld [vmem:[%s14380_s13 + $0x898] ss:$28 sps:$4 sm:$0xff]  }
 0xd31   :  { %6360 = vmatprep.subr.bf16.mxu1 %v9674_v47  ;;  %8424 = vmatprep.subr.bf16.mxu0 %v9675_v31  ;;  %v9733_v47 = vld [vmem:[%s14380_s13 + $0x8d4] ss:$28 sps:$4 sm:$0xff]   ;;  %v9877_v31 = vld [vmem:[%s14380_s13 + $0xe0] ss:$28 sps:$4 sm:$0xff]  }
 0xd33   :  { %6361 = vmatpush1.bf16.msra.mxu1 %v9672_v34  ;;  %v9878_v34 = vld [vmem:[%s14380_s13 + $0x11c] ss:$28 sps:$4 sm:$0xff]  }
 0xd34   :  { %8425 = vmatpush3.bf16.msra.mxu0 %v9676_v14  ;;  %6362 = vmatprep.subr.bf16.mxu1 %v9679_v33  ;;  %v9731_v14 = vld [vmem:[%s14380_s13 + $0x8d0] ss:$28 sps:$4 sm:$0xff]  }
 0xd35   :  { %8426 = vmatprep.subr.bf16.mxu0 %v9680_v6  ;;  %v9736_v33 = vld [vmem:[%s14380_s13 + $0x90c] ss:$28 sps:$4 sm:$0xff]   ;;  %v9879_v6 = vld [vmem:[%s14380_s13 + $0x118] ss:$28 sps:$4 sm:$0xff]  }
 0xd37   :  { %6363 = vmatpush1.bf16.msra.mxu1 %v9677_v38  ;;  %v9880_v38 = vld [vmem:[%s14380_s13 + $0x154] ss:$28 sps:$4 sm:$0xff]  }
 0xd38   :  { %8427 = vmatpush3.bf16.msra.mxu0 %v9681_v37  ;;  %6364 = vmatprep.subr.bf16.mxu1 %v9684_v39  ;;  %v9734_v37 = vld [vmem:[%s14380_s13 + $0x908] ss:$28 sps:$4 sm:$0xff]  }
 0xd39   :  { %8428 = vmatprep.subr.bf16.mxu0 %v9685_v53  ;;  %v9739_v39 = vld [vmem:[%s14380_s13 + $0x944] ss:$28 sps:$4 sm:$0xff]   ;;  %v9881_v53 = vld [vmem:[%s14380_s13 + $0x150] ss:$28 sps:$4 sm:$0xff]  }
 0xd3b   :  { %6365 = vmatpush1.bf16.msra.mxu1 %v9682_v54  ;;  %v9882_v54 = vld [vmem:[%s14380_s13 + $0x18c] ss:$28 sps:$4 sm:$0xff]  }
 0xd3c   :  { %8429 = vmatpush3.bf16.msra.mxu0 %v9686_v35  ;;  %6366 = vmatprep.subr.bf16.mxu1 %v9689_v57  ;;  %v9737_v35 = vld [vmem:[%s14380_s13 + $0x940] ss:$28 sps:$4 sm:$0xff]  }
 0xd3d   :  { %8430 = vmatprep.subr.bf16.mxu0 %v9690_v58  ;;  %v9742_v57 = vld [vmem:[%s14380_s13 + $0x97c] ss:$28 sps:$4 sm:$0xff]   ;;  %v9883_v58 = vld [vmem:[%s14380_s13 + $0x188] ss:$28 sps:$4 sm:$0xff]  }
 0xd3f   :  { %6367 = vmatpush1.bf16.msra.mxu1 %v9687_v59  ;;  %v9884_v59 = vld [vmem:[%s14380_s13 + $0x1c4] ss:$28 sps:$4 sm:$0xff]  }
 0xd40   :  { %8431 = vmatpush3.bf16.msra.mxu0 %v9691_v60  ;;  %6368 = vmatprep.subr.bf16.mxu1 %v9694_v42  ;;  %v9740_v60 = vld [vmem:[%s14380_s13 + $0x978] ss:$28 sps:$4 sm:$0xff]  }
 0xd41   :  { %8432 = vmatprep.subr.bf16.mxu0 %v9695_v52  ;;  %v9745_v42 = vld [vmem:[%s14380_s13 + $0x9b4] ss:$28 sps:$4 sm:$0xff]   ;;  %v9885_v52 = vld [vmem:[%s14380_s13 + $0x1c0] ss:$28 sps:$4 sm:$0xff]  }
 0xd43   :  { %6369 = vmatpush1.bf16.msra.mxu1 %v9692_v43  ;;  %v9886_v43 = vld [vmem:[%s14380_s13 + $0x1fc] ss:$28 sps:$4 sm:$0xff]  }
 0xd44   :  { %8433 = vmatpush3.bf16.msra.mxu0 %v9696_v44  ;;  %6370 = vmatprep.subr.bf16.mxu1 %v9699_v56  ;;  %v9743_v44 = vld [vmem:[%s14380_s13 + $0x9b0] ss:$28 sps:$4 sm:$0xff]  }
 0xd45   :  { %8434 = vmatprep.subr.bf16.mxu0 %v9700_v55  ;;  %v9748_v56 = vld [vmem:[%s14380_s13 + $0x9ec] ss:$28 sps:$4 sm:$0xff]   ;;  %v9887_v55 = vld [vmem:[%s14380_s13 + $0x1f8] ss:$28 sps:$4 sm:$0xff]  }
 0xd47   :  { %6371 = vmatpush1.bf16.msra.mxu1 %v9697_v46  ;;  %v9888_v46 = vld [vmem:[%s14380_s13 + $0x234] ss:$28 sps:$4 sm:$0xff]  }
 0xd48   :  { %8435 = vmatpush3.bf16.msra.mxu0 %v9701_v30  ;;  %6372 = vmatprep.subr.bf16.mxu1 %v9704_v5  ;;  %v9746_v30 = vld [vmem:[%s14380_s13 + $0x9e8] ss:$28 sps:$4 sm:$0xff]  }
 0xd49   :  { %8436 = vmatprep.subr.bf16.mxu0 %v9705_v3  ;;  %v9751_v5 = vld [vmem:[%s14380_s13 + $0xa24] ss:$28 sps:$4 sm:$0xff]   ;;  %v9889_v3 = vld [vmem:[%s14380_s13 + $0x230] ss:$28 sps:$4 sm:$0xff]  }
 0xd4b   :  { %6373 = vmatpush1.bf16.msra.mxu1 %v9702_v0  ;;  %v9754_v0 = vld [vmem:[%s14380_s13 + $0xa5c] ss:$28 sps:$4 sm:$0xff]  }
 0xd4c   :  { %8437 = vmatpush3.bf16.msra.mxu0 %v9706_v13  ;;  %6383 = vmatprep.subr.bf16.mxu1 %v9709_v15  ;;  %v9891_v13 = vld [vmem:[%s14380_s13 + $0x268] ss:$28 sps:$4 sm:$0xff]  }
 0xd4d   :  { %8257 = vmatprep.subr.msk.bf16.mxu0 %vm222_vm5, %v6626_v21  ;;  %v9892_v15 = vld [vmem:[%s14380_s13 + $0x2a4] ss:$28 sps:$4 sm:$0xff]   ;;  %v9757_v21 = vld [vmem:[%s14380_s13 + $0xa94] ss:$28 sps:$4 sm:$0xff]  }
 0xd4e   :  { %6375 = vmatmul.mubr.bf16.vlgmr.msra.gmra.mrb[88].mxu1 %v11918_v12  ;;  %v9867_v12 = vld [vmem:[%s14380_s13 + $0x4] ss:$28 sps:$4 sm:$0xff]  }
 0xd4f   :  { %6618 = vmatmul.mubr.bf16.vlgmr.msra.gmra.mrb[64].mxu0 %v12321_v50  ;;  %6384 = vmatpush1.bf16.msra.mxu1 %v9707_v16  ;;  %v9893_v16 = vld [vmem:[%s14380_s13 + $0x2a0] ss:$28 sps:$4 sm:$0xff]  }
 0xd50   :  { %6415 = vmatprep.mubr.bf16.mxu1 %v11923_v41  ;;  %6634 = vmatpush1.bf16.msra.mxu0 %v6628_v25  ;;  %v9718_v41 = vld [vmem:[%s14380_s13 + $0x7bc] ss:$28 sps:$4 sm:$0xff]   ;;  %v9755_v25 = vld [vmem:[%s14380_s13 + $0xa90] ss:$28 sps:$4 sm:$0xff]  }
 0xd51   :  { %6385 = vmatprep.subr.bf16.mxu1 %v9712_v10  ;;  %6665 = vmatprep.mubr.bf16.mxu0 %v10316_v1  ;;  %v9716_v1 = vld [vmem:[%s14380_s13 + $0x7b8] ss:$28 sps:$4 sm:$0xff]  }
 0xd52   :  { %6696 = vmatprep.subr.bf16.mxu0 %v9867_v12  ;;  %v9894_v10 = vld [vmem:[%s14380_s13 + $0x2dc] ss:$28 sps:$4 sm:$0xff]   ;;  %v9896_v12 = vld [vmem:[%s14380_s13 + $0x314] ss:$28 sps:$4 sm:$0xff]  }
 0xd53   :  { %6386 = vmatpush1.bf16.msra.mxu1 %v9710_v29  ;;  %v9760_v29 = vld [vmem:[%s14380_s13 + $0xacc] ss:$28 sps:$4 sm:$0xff]  }
 0xd54   :  { %6387 = vmatprep.subr.bf16.mxu1 %v9715_v11  ;;  %v9895_v11 = vld [vmem:[%s14380_s13 + $0x2d8] ss:$28 sps:$4 sm:$0xff]  }
 0xd57   :  { %8258 = vmatmul.mubr.msk.bf16.vlgmr.msra.gmra.mrb[68].mxu0 %vm3084_vm14, %v9868_v26  ;;  %6388 = vmatpush1.bf16.msra.mxu1 %v9713_v45  ;;  %v9758_v45 = vld [vmem:[%s14380_s13 + $0xac8] ss:$28 sps:$4 sm:$0xff]   ;;  %v9897_v26 = vld [vmem:[%s14380_s13 + $0x310] ss:$28 sps:$4 sm:$0xff]  }
 0xd58   :  { %6389 = vmatprep.subr.bf16.mxu1 %v9718_v41  ;;  %6697 = vmatpush1.bf16.msra.mxu0 %v9869_v48  ;;  %v9763_v41 = vld [vmem:[%s14380_s13 + $0xb04] ss:$28 sps:$4 sm:$0xff]  }
 0xd59   :  { %6698 = vmatprep.subr.bf16.mxu0 %v9870_v28  ;;  %v9900_v48 = vld [vmem:[%s14380_s13 + $0x384] ss:$28 sps:$4 sm:$0xff]   ;;  %v9764_v28 = vld [vmem:[%s14380_s13 + $0xb38] ss:$28 sps:$4 sm:$0xff]  }
 0xd5b   :  { %6390 = vmatpush1.bf16.msra.mxu1 %v9716_v1  ;;  %v9766_v1 = vld [vmem:[%s14380_s13 + $0xb3c] ss:$28 sps:$4 sm:$0xff]  }
 0xd5c   :  { %6391 = vmatprep.subr.bf16.mxu1 %v9721_v62  ;;  %6699 = vmatpush1.bf16.msra.mxu0 %v9871_v17  ;;  %v9899_v62 = vld [vmem:[%s14380_s13 + $0x348] ss:$28 sps:$4 sm:$0xff]  }
 0xd5d   :  { %6700 = vmatprep.subr.bf16.mxu0 %v9872_v18  ;;  %v9772_v17 = vld [vmem:[%s14380_s13 + $0xbac] ss:$28 sps:$4 sm:$0xff]  }
 0xd5e   :  { %v9770_v18 = vld [vmem:[%s14380_s13 + $0xba8] ss:$28 sps:$4 sm:$0xff]  }
 0xd5f   :  { %6392 = vmatpush1.bf16.msra.mxu1 %v9719_v51  ;;  %v9769_v51 = vld [vmem:[%s14380_s13 + $0xb74] ss:$28 sps:$4 sm:$0xff]  }
 0xd60   :  { %6393 = vmatprep.subr.bf16.mxu1 %v9724_v4  ;;  %6701 = vmatpush1.bf16.msra.mxu0 %v9873_v24  ;;  %v9767_v4 = vld [vmem:[%s14380_s13 + $0xb70] ss:$28 sps:$4 sm:$0xff]  }
 0xd61   :  { %6702 = vmatprep.subr.bf16.mxu0 %v9874_v27 }
 0xd63   :  { %6394 = vmatpush1.bf16.msra.mxu1 %v9722_v32  ;;  %v9775_v32 = vld [vmem:[%s14380_s13 + $0xbe4] ss:$28 sps:$4 sm:$0xff]  }
 0xd64   :  { %6395 = vmatprep.subr.bf16.mxu1 %v9727_v23  ;;  %6703 = vmatpush1.bf16.msra.mxu0 %v9875_v40 }
 0xd65   :  { %6704 = vmatprep.subr.bf16.mxu0 %v9876_v49 }
 0xd67   :  { %6396 = vmatpush1.bf16.msra.mxu1 %v9725_v63 }
 0xd68   :  { %6397 = vmatprep.subr.bf16.mxu1 %v9730_v61  ;;  %6705 = vmatpush1.bf16.msra.mxu0 %v9877_v31 }
 0xd69   :  { %6706 = vmatprep.subr.bf16.mxu0 %v9878_v34 }
 0xd6b   :  { %6398 = vmatpush1.bf16.msra.mxu1 %v9728_v9 }
 0xd6c   :  { %6399 = vmatprep.subr.bf16.mxu1 %v9733_v47  ;;  %6707 = vmatpush1.bf16.msra.mxu0 %v9879_v6  ;;  %v9773_v47 = vld [vmem:[%s14380_s13 + $0xbe0] ss:$28 sps:$4 sm:$0xff]  }
 0xd6d   :  { %6708 = vmatprep.subr.bf16.mxu0 %v9880_v38  ;;  %v9778_v6 = vld [vmem:[%s14380_s13 + $0xc1c] ss:$28 sps:$4 sm:$0xff]  }
 0xd6f   :  { %6400 = vmatpush1.bf16.msra.mxu1 %v9731_v14 }
 0xd70   :  { %6401 = vmatprep.subr.bf16.mxu1 %v9736_v33  ;;  %6709 = vmatpush1.bf16.msra.mxu0 %v9881_v53 }
 0xd71   :  { %6710 = vmatprep.subr.bf16.mxu0 %v9882_v54 }
 0xd73   :  { %6402 = vmatpush1.bf16.msra.mxu1 %v9734_v37 }
 0xd74   :  { %6403 = vmatprep.subr.bf16.mxu1 %v9739_v39  ;;  %6711 = vmatpush1.bf16.msra.mxu0 %v9883_v58  ;;  %v9776_v58 = vld [vmem:[%s14380_s13 + $0xc18] ss:$28 sps:$4 sm:$0xff]  }
 0xd75   :  { %6712 = vmatprep.subr.bf16.mxu0 %v9884_v59 }
 0xd77   :  { %6404 = vmatpush1.bf16.msra.mxu1 %v9737_v35 }
 0xd78   :  { %6405 = vmatprep.subr.bf16.mxu1 %v9742_v57  ;;  %6713 = vmatpush1.bf16.msra.mxu0 %v9885_v52  ;;  %v9784_v52 = vld [vmem:[%s14380_s13 + $0xc8c] ss:$28 sps:$4 sm:$0xff]  }
 0xd79   :  { %6714 = vmatprep.subr.bf16.mxu0 %v9886_v43  ;;  %v9782_v43 = vld [vmem:[%s14380_s13 + $0xc88] ss:$28 sps:$4 sm:$0xff]  }
 0xd7b   :  { %6406 = vmatpush1.bf16.msra.mxu1 %v9740_v60  ;;  %v9781_v60 = vld [vmem:[%s14380_s13 + $0xc54] ss:$28 sps:$4 sm:$0xff]  }
 0xd7c   :  { %6407 = vmatprep.subr.bf16.mxu1 %v9745_v42  ;;  %6715 = vmatpush1.bf16.msra.mxu0 %v9887_v55  ;;  %v9779_v42 = vld [vmem:[%s14380_s13 + $0xc50] ss:$28 sps:$4 sm:$0xff]  }
 0xd7d   :  { %6716 = vmatprep.subr.bf16.mxu0 %v9888_v46 }
 0xd7f   :  { %6408 = vmatpush1.bf16.msra.mxu1 %v9743_v44  ;;  %v9787_v44 = vld [vmem:[%s14380_s13 + $0xcc4] ss:$28 sps:$4 sm:$0xff]  }
 0xd80   :  { %6409 = vmatprep.subr.bf16.mxu1 %v9748_v56  ;;  %6717 = vmatpush1.bf16.msra.mxu0 %v9889_v3 }
 0xd81   :  { %6718 = vmatprep.subr.bf16.mxu0 %v9890_v7  ;;  %v9790_v7 = vld [vmem:[%s14380_s13 + $0xcfc] ss:$28 sps:$4 sm:$0xff]  }
 0xd83   :  { %6410 = vmatpush1.bf16.msra.mxu1 %v9746_v30  ;;  %v9785_v30 = vld [vmem:[%s14380_s13 + $0xcc0] ss:$28 sps:$4 sm:$0xff]  }
 0xd84   :  { %6411 = vmatprep.subr.bf16.mxu1 %v9751_v5  ;;  %6719 = vmatpush1.bf16.msra.mxu0 %v9891_v13 }
 0xd85   :  { %6720 = vmatprep.subr.bf16.mxu0 %v9892_v15  ;;  %v9788_v15 = vld [vmem:[%s14380_s13 + $0xcf8] ss:$28 sps:$4 sm:$0xff]  }
 0xd87   :  { %6412 = vmatpush1.bf16.msra.mxu1 %v9749_v8 }
 0xd88   :  { %6413 = vmatprep.subr.bf16.mxu1 %v9754_v0  ;;  %6721 = vmatpush1.bf16.msra.mxu0 %v9893_v16  ;;  %v10324_v16 = vmov 1966171168  }
 0xd89   :  { %6722 = vmatprep.subr.bf16.mxu0 %v9894_v10  ;;  %v7415_v10 = vunpack.c.l.s4 %v10324_v16  ;;  %v9926_v16 = vld [vmem:[%s14380_s13 + $0x2a8] ss:$28 sps:$4 sm:$0xff]  }
 0xd8b   :  { %6414 = vmatpush1.bf16.msra.mxu1 %v9752_v22  ;;  %v9793_v22 = vld [vmem:[%s14380_s13 + $0xd34] ss:$28 sps:$4 sm:$0xff]  }
 0xd8c   :  { %6424 = vmatprep.subr.bf16.mxu1 %v9757_v21  ;;  %6723 = vmatpush1.bf16.msra.mxu0 %v9895_v11  ;;  %v9791_v21 = vld [vmem:[%s14380_s13 + $0xd30] ss:$28 sps:$4 sm:$0xff]   ;;  %v9794_v11 = vld [vmem:[%s14380_s13 + $0xd68] ss:$28 sps:$4 sm:$0xff]  }
 0xd8d   :  { %6724 = vmatprep.subr.bf16.mxu0 %v9896_v12 }
 0xd8e   :  { %6416 = vmatmul.mubr.bf16.vlgmr.msra.gmra.mrb[88].mxu1 %v12120_v2  ;;  %v9898_v2 = vld [vmem:[%s14380_s13 + $0x34c] ss:$28 sps:$4 sm:$0xff]  }
 0xd8f   :  { %6425 = vmatpush1.bf16.msra.mxu1 %v9755_v25  ;;  %6456 = vmatprep.mubr.bf16.mxu1 %v12128_v36  ;;  %v9761_v36 = vld [vmem:[%s14380_s13 + $0xb00] ss:$28 sps:$4 sm:$0xff]   ;;  %v9796_v25 = vld [vmem:[%s14380_s13 + $0xd6c] ss:$28 sps:$4 sm:$0xff]  }
 0xd90   :  { %6426 = vmatprep.subr.bf16.mxu1 %v9760_v29  ;;  %6725 = vmatpush1.bf16.msra.mxu0 %v9897_v26  ;;  %v9799_v26 = vld [vmem:[%s14380_s13 + $0xda4] ss:$28 sps:$4 sm:$0xff]  }
 0xd91   :  { %6726 = vmatprep.subr.bf16.mxu0 %v9898_v2 }
 0xd93   :  { %6427 = vmatpush1.bf16.msra.mxu1 %v9758_v45  ;;  %v7416_v45 = vunpack.c.0.s8 %v7415_v10  ;;  %v9927_v10 = vld [vmem:[%s14380_s13 + $0x2e4] ss:$28 sps:$4 sm:$0xff]  }
 0xd94   :  { %6428 = vmatprep.subr.bf16.mxu1 %v9763_v41  ;;  %6727 = vmatpush1.bf16.msra.mxu0 %v9899_v62 }
 0xd95   :  { %6737 = vmatprep.subr.bf16.mxu0 %v9900_v48 }
 0xd97   :  { %6429 = vmatpush1.bf16.msra.mxu1 %v9761_v36 }
 0xd98   :  { %6430 = vmatprep.subr.bf16.mxu1 %v9766_v1 }
 0xd9b   :  { %6431 = vmatpush1.bf16.msra.mxu1 %v9764_v28 }
 0xd9c   :  { %6432 = vmatprep.subr.bf16.mxu1 %v9769_v51 }
 0xd9f   :  { %6433 = vmatpush1.bf16.msra.mxu1 %v9767_v4 }
 0xda0   :  { %6434 = vmatprep.subr.bf16.mxu1 %v9772_v17 }
 0xda1   :  { %v6130_v23 = vpop.f32.mrb[84].mxu1 }
 0xda2   :  { %v7348_v24 = vmax.f32 %v6130_v23, -30.0  ;;  %v6294_v27 = vpop.f32.mrb[48].mxu0  ;;  %v6132_v63 = vpop.f32.mrb[85].mxu1 }
 0xda3   :  { %v7350_v61 = vmax.f32 %v6294_v27, -30.0  ;;  %v7349_v40 = vmax.f32 %v6132_v63, -30.0  ;;  %v6296_v49 = vpop.f32.mrb[49].mxu0  ;;  %v6134_v9 = vpop.f32.mrb[86].mxu1  ;;  %6435 = vmatpush1.bf16.msra.mxu1 %v9770_v18  ;;  %v9797_v18 = vld [vmem:[%s14380_s13 + $0xda0] ss:$28 sps:$4 sm:$0xff]  }
 0xda4   :  { %v7355_v31 = vsub.f32 0.0, %v7348_v24  ;;  %v7351_v34 = vmax.f32 %v6296_v49, -30.0  ;;  %v6298_v14 = vpop.f32.mrb[50].mxu0  ;;  %v6135_v33 = vpop.f32.mrb[87].mxu1  ;;  %6436 = vmatprep.subr.bf16.mxu1 %v9775_v32  ;;  %v13010_v32 = vsub.s32 %v7416_v45, %v10650_v20  ;;  %v9802_v63 = vld [vmem:[%s14380_s13 + $0xddc] ss:$28 sps:$4 sm:$0xff]  }
 0xda5   :  { %v7357_v38 = vsub.f32 0.0, %v7350_v61  ;;  %v7356_v37 = vsub.f32 0.0, %v7349_v40  ;;  %v6299_v39 = vpop.f32.mrb[51].mxu0  ;;  %v9901_v14 = vld [vmem:[%s14380_s13 + $0xc] ss:$28 sps:$4 sm:$0xff]  }
 0xda6   :  { %v7362_v53 = vmul.f32 1.442695, %v7355_v31  ;;  %v7358_v54 = vsub.f32 0.0, %v7351_v34  ;;  %v9902_v33 = vld [vmem:[%s14380_s13 + $0x8] ss:$28 sps:$4 sm:$0xff]  }
 0xda7   :  { %v7366_v35 = vmul.f32 1.442695, %v7357_v38  ;;  %v7364_v57 = vmul.f32 1.442695, %v7356_v37  ;;  %6437 = vmatpush1.bf16.msra.mxu1 %v9773_v47  ;;  %v9800_v47 = vld [vmem:[%s14380_s13 + $0xdd8] ss:$28 sps:$4 sm:$0xff]  }
 0xda8   :  { %9811 = vpow2.f32 %v7362_v53  ;;  %v7368_v59 = vmul.f32 1.442695, %v7358_v54  ;;  %6438 = vmatprep.subr.bf16.mxu1 %v9778_v6  ;;  %v9903_v6 = vld [vmem:[%s14380_s13 + $0x44] ss:$28 sps:$4 sm:$0xff]   ;;  %v9905_v37 = vld [vmem:[%s14380_s13 + $0x7c] ss:$28 sps:$4 sm:$0xff]  }
 0xda9   :  { %9813 = vpow2.f32 %v7366_v35  ;;  %v9904_v38 = vld [vmem:[%s14380_s13 + $0x40] ss:$28 sps:$4 sm:$0xff]   ;;  %v9907_v39 = vld [vmem:[%s14380_s13 + $0xb4] ss:$28 sps:$4 sm:$0xff]   ;;  %v9909_v54 = vld [vmem:[%s14380_s13 + $0xec] ss:$28 sps:$4 sm:$0xff]  }
 0xdaa   :  { %9815 = vpow2.f32 %v7364_v57  ;;  %v9908_v53 = vld [vmem:[%s14380_s13 + $0xb0] ss:$28 sps:$4 sm:$0xff]   ;;  %v9910_v35 = vld [vmem:[%s14380_s13 + $0xe8] ss:$28 sps:$4 sm:$0xff]  }
 0xdab   :  { %9817 = vpow2.f32 %v7368_v59  ;;  %6439 = vmatpush1.bf16.msra.mxu1 %v9776_v58  ;;  %v9911_v57 = vld [vmem:[%s14380_s13 + $0x124] ss:$28 sps:$4 sm:$0xff]  }
 0xdac   :  { %6440 = vmatprep.subr.bf16.mxu1 %v9781_v60  ;;  %v9912_v60 = vld [vmem:[%s14380_s13 + $0x120] ss:$28 sps:$4 sm:$0xff]  }
 0xdaf   :  { %6441 = vmatpush1.bf16.msra.mxu1 %v9779_v42 }
 0xdb0   :  { %6442 = vmatprep.subr.bf16.mxu1 %v9784_v52 }
 0xdb2   :  { %v9812_v56 = vpop.eup %9811 }
 0xdb3   :  { %v9814_v55 = vpop.eup %9813  ;;  %v7376_v46 = vadd.f32 1.0, %v9812_v56  ;;  %6443 = vmatpush1.bf16.msra.mxu1 %v9782_v43  ;;  %v9913_v43 = vld [vmem:[%s14380_s13 + $0x15c] ss:$28 sps:$4 sm:$0xff]  }
 0xdb4   :  { %v9816_v5 = vpop.eup %9815  ;;  %v7378_v3 = vadd.f32 1.0, %v9814_v55  ;;  %6444 = vmatprep.subr.bf16.mxu1 %v9787_v44  ;;  %v9914_v55 = vld [vmem:[%s14380_s13 + $0x158] ss:$28 sps:$4 sm:$0xff]  }
 0xdb5   :  { %v9818_v8 = vpop.eup %9817  ;;  %9819 = vrcp.f32 %v7376_v46  ;;  %v7377_v0 = vadd.f32 1.0, %v9816_v5  ;;  %v9915_v46 = vld [vmem:[%s14380_s13 + $0x194] ss:$28 sps:$4 sm:$0xff]   ;;  %v9917_v5 = vld [vmem:[%s14380_s13 + $0x1cc] ss:$28 sps:$4 sm:$0xff]  }
 0xdb6   :  { %9821 = vrcp.f32 %v7378_v3  ;;  %v7379_v13 = vadd.f32 1.0, %v9818_v8  ;;  %v9918_v3 = vld [vmem:[%s14380_s13 + $0x1c8] ss:$28 sps:$4 sm:$0xff]   ;;  %v9920_v8 = vld [vmem:[%s14380_s13 + $0x200] ss:$28 sps:$4 sm:$0xff]  }
 0xdb7   :  { %9823 = vrcp.f32 %v7377_v0  ;;  %6445 = vmatpush1.bf16.msra.mxu1 %v9785_v30  ;;  %v9916_v30 = vld [vmem:[%s14380_s13 + $0x190] ss:$28 sps:$4 sm:$0xff]   ;;  %v9921_v0 = vld [vmem:[%s14380_s13 + $0x23c] ss:$28 sps:$4 sm:$0xff]  }
 0xdb8   :  { %9825 = vrcp.f32 %v7379_v13  ;;  %6446 = vmatprep.subr.bf16.mxu1 %v9790_v7  ;;  %v9919_v7 = vld [vmem:[%s14380_s13 + $0x204] ss:$28 sps:$4 sm:$0xff]   ;;  %v9922_v13 = vld [vmem:[%s14380_s13 + $0x238] ss:$28 sps:$4 sm:$0xff]  }
 0xdbb   :  { %6447 = vmatpush1.bf16.msra.mxu1 %v9788_v15  ;;  %v9923_v15 = vld [vmem:[%s14380_s13 + $0x274] ss:$28 sps:$4 sm:$0xff]  }
 0xdbc   :  { %6448 = vmatprep.subr.bf16.mxu1 %v9793_v22  ;;  %v9924_v22 = vld [vmem:[%s14380_s13 + $0x270] ss:$28 sps:$4 sm:$0xff]  }
 0xdbf   :  { %v9820_v29 = vpop.eup %9819  ;;  %6449 = vmatpush1.bf16.msra.mxu1 %v9791_v21  ;;  %v9925_v21 = vld [vmem:[%s14380_s13 + $0x2ac] ss:$28 sps:$4 sm:$0xff]  }
 0xdc0   :  { %v9822_v12 = vpop.eup %9821  ;;  %v7390_v41 = vmax.f32 %v9820_v29, 0.0  ;;  %6450 = vmatprep.subr.bf16.mxu1 %v9796_v25 }
 0xdc1   :  { %v9824_v2 = vpop.eup %9823  ;;  %v7392_v36 = vmax.f32 %v9822_v12, 0.0 }
 0xdc2   :  { %v9826_v1 = vpop.eup %9825  ;;  %v7397_v62 = vmin.f32 %v7390_v41, 1.0  ;;  %v7391_v48 = vmax.f32 %v9824_v2, 0.0  ;;  %v8372_v28 = vpop.f32.mrb[52].mxu0  ;;  %v9929_v41 = vld [vmem:[%s14380_s13 + $0x31c] ss:$28 sps:$4 sm:$0xff]  }
 0xdc3   :  { %v7399_v51 = vmin.f32 %v7392_v36, 1.0  ;;  %v7393_v4 = vmax.f32 %v9826_v1, 0.0  ;;  %v8373_v17 = vpop.f32.mrb[53].mxu0  ;;  %6451 = vmatpush1.bf16.msra.mxu1 %v9794_v11  ;;  %v9928_v11 = vld [vmem:[%s14380_s13 + $0x2e0] ss:$28 sps:$4 sm:$0xff]  }
 0xdc4   :  { %v7398_v23 = vmin.f32 %v7391_v48, 1.0  ;;  %v8374_v24 = vadd.f32 %v8373_v17, %v8372_v28  ;;  %v8375_v27 = vpop.f32.mrb[54].mxu0  ;;  %6452 = vmatprep.subr.bf16.mxu1 %v9799_v26  ;;  %v9930_v36 = vld [vmem:[%s14380_s13 + $0x318] ss:$28 sps:$4 sm:$0xff]   ;;  %v9933_v48 = vld [vmem:[%s14380_s13 + $0x38c] ss:$28 sps:$4 sm:$0xff]  }
 0xdc5   :  { %v7400_v61 = vmin.f32 %v7393_v4, 1.0  ;;  %v8376_v40 = vpop.f32.mrb[55].mxu0  ;;  %v9931_v1 = vld [vmem:[%s14380_s13 + $0x354] ss:$28 sps:$4 sm:$0xff]  }
 0xdc6   :  { %v7411_v49 = vcombine.low %v7397_v62, %v7398_v23  ;;  %v9932_v62 = vld [vmem:[%s14380_s13 + $0x350] ss:$28 sps:$4 sm:$0xff]  }
 0xdc7   :  { %v7412_v9 = vcombine.low %v7399_v51, %v7400_v61  ;;  %6453 = vmatpush1.bf16.msra.mxu1 %v9797_v18 }
 0xdc8   :  { %v13019_v20 = vrot.slane %v7411_v49, %v13010_v32  ;;  %6454 = vmatprep.subr.bf16.mxu1 %v9802_v63 }
 0xdc9   :  { %v13022_v31 = vrot.slane %v7412_v9, %v13010_v32 }
 0xdcb   :  { %v7442_v34 = vcombine.low %v13019_v20, %v13022_v31  ;;  %6455 = vmatpush1.bf16.msra.mxu1 %v9800_v47  ;;  %v10091_v20 = vld [vmem:[%s14380_s13 + $0xc10] ss:$28 sps:$4 sm:$0xff]   ;;  %v10092_v31 = vld [vmem:[%s14380_s13 + $0xc44] ss:$28 sps:$4 sm:$0xff]  }
 0xdcc   :  { %6860 = vmatprep.subr.bf16.mxu1 %v9901_v14  ;;  %v9934_v14 = vld [vmem:[%s14380_s13 + $0x380] ss:$28 sps:$4 sm:$0xff]  }
 0xdce   :  { %6457 = vmatmul.mubr.bf16.vlgmr.msra.gmra.mrb[88].mxu1 %v12321_v50  ;;  %v9906_v50 = vld [vmem:[%s14380_s13 + $0x78] ss:$28 sps:$4 sm:$0xff]  }
 0xdcf   :  { %6861 = vmatpush1.bf16.msra.mxu1 %v9902_v33  ;;  %v9935_v33 = vld [vmem:[%s14380_s13 + $0x388] ss:$28 sps:$4 sm:$0xff]  }
 0xdd0   :  { %6862 = vmatprep.subr.bf16.mxu1 %v9903_v6  ;;  %v9936_v6 = vld [vmem:[%s14380_s13 + $0x3bc] ss:$28 sps:$4 sm:$0xff]  }
 0xdd3   :  { %6863 = vmatpush1.bf16.msra.mxu1 %v9904_v38  ;;  %v9937_v38 = vld [vmem:[%s14380_s13 + $0x3c4] ss:$28 sps:$4 sm:$0xff]  }
 0xdd4   :  { %6864 = vmatprep.subr.bf16.mxu1 %v9905_v37  ;;  %v9938_v37 = vld [vmem:[%s14380_s13 + $0x3b8] ss:$28 sps:$4 sm:$0xff]  }
 0xdd7   :  { %6865 = vmatpush1.bf16.msra.mxu1 %v9906_v50  ;;  %v9939_v50 = vld [vmem:[%s14380_s13 + $0x3c0] ss:$28 sps:$4 sm:$0xff]  }
 0xdd8   :  { %6866 = vmatprep.subr.bf16.mxu1 %v9907_v39  ;;  %v9940_v39 = vld [vmem:[%s14380_s13 + $0x3f4] ss:$28 sps:$4 sm:$0xff]  }
 0xddb   :  { %6867 = vmatpush1.bf16.msra.mxu1 %v9908_v53  ;;  %v9941_v53 = vld [vmem:[%s14380_s13 + $0x3fc] ss:$28 sps:$4 sm:$0xff]  }
 0xddc   :  { %6868 = vmatprep.subr.bf16.mxu1 %v9909_v54  ;;  %v9942_v54 = vld [vmem:[%s14380_s13 + $0x3f0] ss:$28 sps:$4 sm:$0xff]  }
 0xddf   :  { %6869 = vmatpush1.bf16.msra.mxu1 %v9910_v35  ;;  %v9943_v35 = vld [vmem:[%s14380_s13 + $0x3f8] ss:$28 sps:$4 sm:$0xff]  }
 0xde0   :  { %6870 = vmatprep.subr.bf16.mxu1 %v9911_v57  ;;  %v9944_v57 = vld [vmem:[%s14380_s13 + $0x42c] ss:$28 sps:$4 sm:$0xff]  }
 0xde2   :  { %v8394_v58 = vpop.f32.mrb[56].mxu0 }
 0xde3   :  { %v8395_v59 = vpop.f32.mrb[57].mxu0  ;;  %6871 = vmatpush1.bf16.msra.mxu1 %v9912_v60  ;;  %v9947_v60 = vld [vmem:[%s14380_s13 + $0x430] ss:$28 sps:$4 sm:$0xff]  }
 0xde4   :  { %v8396_v42 = vadd.f32 %v8395_v59, %v8394_v58  ;;  %v8397_v52 = vpop.f32.mrb[58].mxu0  ;;  %6872 = vmatprep.subr.bf16.mxu1 %v9913_v43  ;;  %v9945_v58 = vld [vmem:[%s14380_s13 + $0x434] ss:$28 sps:$4 sm:$0xff]   ;;  %v9946_v59 = vld [vmem:[%s14380_s13 + $0x428] ss:$28 sps:$4 sm:$0xff]  }
 0xde5   :  { %v8398_v44 = vpop.f32.mrb[59].mxu0  ;;  %v9949_v52 = vld [vmem:[%s14380_s13 + $0x46c] ss:$28 sps:$4 sm:$0xff]   ;;  %v9950_v43 = vld [vmem:[%s14380_s13 + $0x460] ss:$28 sps:$4 sm:$0xff]  }
 0xde6   :  { %v6540_v56 = vadd.f32 %v8396_v42, %v8374_v24  ;;  %v9948_v42 = vld [vmem:[%s14380_s13 + $0x464] ss:$28 sps:$4 sm:$0xff]  }
 0xde7   :  { %6873 = vmatpush1.bf16.msra.mxu1 %v9914_v55  ;;  %v9951_v44 = vld [vmem:[%s14380_s13 + $0x468] ss:$28 sps:$4 sm:$0xff]  }
 0xde8   :  { %6874 = vmatprep.subr.bf16.mxu1 %v9915_v46  ;;  %v9953_v55 = vld [vmem:[%s14380_s13 + $0x4a4] ss:$28 sps:$4 sm:$0xff]   ;;  %v9954_v46 = vld [vmem:[%s14380_s13 + $0x498] ss:$28 sps:$4 sm:$0xff]  }
 0xdeb   :  { %6875 = vmatpush1.bf16.msra.mxu1 %v9916_v30  ;;  %v9955_v30 = vld [vmem:[%s14380_s13 + $0x4a0] ss:$28 sps:$4 sm:$0xff]  }
 0xdec   :  { %6876 = vmatprep.subr.bf16.mxu1 %v9917_v5  ;;  %v9956_v5 = vld [vmem:[%s14380_s13 + $0x4d4] ss:$28 sps:$4 sm:$0xff]  }
 0xdef   :  { %6877 = vmatpush1.bf16.msra.mxu1 %v9918_v3  ;;  %v9957_v3 = vld [vmem:[%s14380_s13 + $0x4dc] ss:$28 sps:$4 sm:$0xff]  }
 0xdf0   :  { %6878 = vmatprep.subr.bf16.mxu1 %v9919_v7  ;;  %v9958_v7 = vld [vmem:[%s14380_s13 + $0x4d0] ss:$28 sps:$4 sm:$0xff]  }
 0xdf3   :  { %6879 = vmatpush1.bf16.msra.mxu1 %v9920_v8  ;;  %v9959_v8 = vld [vmem:[%s14380_s13 + $0x4d8] ss:$28 sps:$4 sm:$0xff]  }
 0xdf4   :  { %6880 = vmatprep.subr.bf16.mxu1 %v9921_v0  ;;  %v9960_v0 = vld [vmem:[%s14380_s13 + $0x50c] ss:$28 sps:$4 sm:$0xff]  }
 0xdf7   :  { %6881 = vmatpush1.bf16.msra.mxu1 %v9922_v13  ;;  %v9961_v13 = vld [vmem:[%s14380_s13 + $0x514] ss:$28 sps:$4 sm:$0xff]  }
 0xdf8   :  { %6882 = vmatprep.subr.bf16.mxu1 %v9923_v15  ;;  %v9962_v15 = vld [vmem:[%s14380_s13 + $0x508] ss:$28 sps:$4 sm:$0xff]  }
 0xdfb   :  { %6883 = vmatpush1.bf16.msra.mxu1 %v9924_v22  ;;  %v9963_v22 = vld [vmem:[%s14380_s13 + $0x510] ss:$28 sps:$4 sm:$0xff]  }
 0xdfc   :  { %6884 = vmatprep.subr.bf16.mxu1 %v9925_v21  ;;  %v9964_v21 = vld [vmem:[%s14380_s13 + $0x544] ss:$28 sps:$4 sm:$0xff]  }
 0xdff   :  { %6885 = vmatpush1.bf16.msra.mxu1 %v9926_v16  ;;  %v9965_v16 = vld [vmem:[%s14380_s13 + $0x54c] ss:$28 sps:$4 sm:$0xff]  }
 0xe00   :  { %6886 = vmatprep.subr.bf16.mxu1 %v9927_v10  ;;  %v9966_v10 = vld [vmem:[%s14380_s13 + $0x540] ss:$28 sps:$4 sm:$0xff]  }
 0xe02   :  { %v8416_v25 = vpop.f32.mrb[60].mxu0 }
 0xe03   :  { %v8417_v29 = vpop.f32.mrb[61].mxu0  ;;  %6887 = vmatpush1.bf16.msra.mxu1 %v9928_v11  ;;  %v9969_v11 = vld [vmem:[%s14380_s13 + $0x584] ss:$28 sps:$4 sm:$0xff]  }
 0xe04   :  { %v8418_v12 = vadd.f32 %v8417_v29, %v8416_v25  ;;  %v8419_v45 = vpop.f32.mrb[62].mxu0  ;;  %6888 = vmatprep.subr.bf16.mxu1 %v9929_v41  ;;  %v9967_v25 = vld [vmem:[%s14380_s13 + $0x548] ss:$28 sps:$4 sm:$0xff]   ;;  %v9968_v29 = vld [vmem:[%s14380_s13 + $0x57c] ss:$28 sps:$4 sm:$0xff]  }
 0xe05   :  { %v8420_v26 = vpop.f32.mrb[63].mxu0  ;;  %v9971_v45 = vld [vmem:[%s14380_s13 + $0x580] ss:$28 sps:$4 sm:$0xff]   ;;  %v9972_v41 = vld [vmem:[%s14380_s13 + $0x5b4] ss:$28 sps:$4 sm:$0xff]  }
 0xe06   :  { %v6580_v2 = vadd.f32 %v8418_v12, %v6540_v56  ;;  %v9952_v56 = vld [vmem:[%s14380_s13 + $0x49c] ss:$28 sps:$4 sm:$0xff]  }
 0xe07   :  { %6889 = vmatpush1.bf16.msra.mxu1 %v9930_v36  ;;  %v9970_v12 = vld [vmem:[%s14380_s13 + $0x578] ss:$28 sps:$4 sm:$0xff]  }
 0xe08   :  { %6890 = vmatprep.subr.bf16.mxu1 %v9931_v1  ;;  %v9973_v26 = vld [vmem:[%s14380_s13 + $0x5bc] ss:$28 sps:$4 sm:$0xff]   ;;  %v9976_v1 = vld [vmem:[%s14380_s13 + $0x5ec] ss:$28 sps:$4 sm:$0xff]  }
 0xe09   :  { %v9975_v36 = vld [vmem:[%s14380_s13 + $0x5b8] ss:$28 sps:$4 sm:$0xff]  }
 0xe0b   :  { %6891 = vmatpush1.bf16.msra.mxu1 %v9932_v62  ;;  %v9977_v62 = vld [vmem:[%s14380_s13 + $0x5f4] ss:$28 sps:$4 sm:$0xff]  }
 0xe0c   :  { %6901 = vmatprep.subr.bf16.mxu1 %v9933_v48  ;;  %v9978_v48 = vld [vmem:[%s14380_s13 + $0x5e8] ss:$28 sps:$4 sm:$0xff]  }
 0xe22   :  { %v8438_v28 = vpop.f32.mrb[64].mxu0 }
 0xe23   :  { %v8439_v51 = vpop.f32.mrb[65].mxu0 }
 0xe24   :  { %v8440_v4 = vadd.f32 %v8439_v51, %v8438_v28  ;;  %v8441_v17 = vpop.f32.mrb[66].mxu0  ;;  %v9979_v28 = vld [vmem:[%s14380_s13 + $0x5f0] ss:$28 sps:$4 sm:$0xff]   ;;  %v9980_v51 = vld [vmem:[%s14380_s13 + $0x624] ss:$28 sps:$4 sm:$0xff]  }
 0xe25   :  { %v8442_v18 = vpop.f32.mrb[67].mxu0  ;;  %v9982_v17 = vld [vmem:[%s14380_s13 + $0x620] ss:$28 sps:$4 sm:$0xff]  }
 0xe26   :  { %v13126_v23 = vadd.f32 %v8440_v4, %v6580_v2  ;;  %v9974_v2 = vld [vmem:[%s14380_s13 + $0x5b0] ss:$28 sps:$4 sm:$0xff]   ;;  %v9983_v18 = vld [vmem:[%s14380_s13 + $0x628] ss:$28 sps:$4 sm:$0xff]  }
 0xe27   :  { %v9981_v4 = vld [vmem:[%s14380_s13 + $0x62c] ss:$28 sps:$4 sm:$0xff]  }
 0xe2a   :  { %v13128_v24 = vpop.f32.mrb[68].mxu0 }
 0xe2b   :  { %v13130_v27 = vpop.f32.mrb[69].mxu0  ;;  %v13139_v9 = vpack.c.bf16 %v13128_v24, %v13128_v24 }
 0xe2c   :  { %v6677_v63 = vrot.slane %v13130_v27, 1  ;;  %v6671_v61 = vpop.f32.mrb[70].mxu0  ;;  %v13135_v40 = vpack.c.bf16 %v13130_v27, %v13130_v27 }
 0xe2d   :  { %v6672_v49 = vpop.f32.mrb[71].mxu0  ;;  %v9985_v61 = vld [vmem:[%s14380_s13 + $0x664] ss:$28 sps:$4 sm:$0xff]  }
 0xe2e   :  { %v13141_v47 = vpack.c.bf16 %v6677_v63, %v6677_v63  ;;  %6728 = vmatprep.mubr.bf16.mxu0 %v13135_v40  ;;  %6892 = vmatprep.mubr.bf16.mxu1 %v13135_v40  ;;  %v9984_v63 = vld [vmem:[%s14380_s13 + $0x65c] ss:$28 sps:$4 sm:$0xff]  }
 0xe2f   :  { %6729 = vmatmul.mubr.bf16.vlgmr.msra.gmra.mrb[72].mxu0 %v13139_v9  ;;  %6893 = vmatmul.mubr.bf16.vlgmr.msra.gmra.mrb[92].mxu1 %v13139_v9  ;;  %v9986_v49 = vld [vmem:[%s14380_s13 + $0x658] ss:$28 sps:$4 sm:$0xff]  }
 0xe30   :  { %6738 = vmatpush1.bf16.msra.mxu0 %v9934_v14  ;;  %6902 = vmatpush1.bf16.msra.mxu1 %v9935_v33  ;;  %v9987_v14 = vld [vmem:[%s14380_s13 + $0x660] ss:$28 sps:$4 sm:$0xff]   ;;  %v9988_v33 = vld [vmem:[%s14380_s13 + $0x694] ss:$28 sps:$4 sm:$0xff]  }
 0xe31   :  { %6739 = vmatprep.subr.bf16.mxu0 %v9936_v6  ;;  %6903 = vmatprep.subr.bf16.mxu1 %v9937_v38  ;;  %v9989_v6 = vld [vmem:[%s14380_s13 + $0x69c] ss:$28 sps:$4 sm:$0xff]   ;;  %v9990_v38 = vld [vmem:[%s14380_s13 + $0x690] ss:$28 sps:$4 sm:$0xff]  }
 0xe32   :  { %6769 = vmatprep.mubr.bf16.mxu0 %v13141_v47  ;;  %6933 = vmatprep.mubr.bf16.mxu1 %v13141_v47 }
 0xe34   :  { %6740 = vmatpush1.bf16.msra.mxu0 %v9938_v37  ;;  %6904 = vmatpush1.bf16.msra.mxu1 %v9939_v50  ;;  %v9991_v37 = vld [vmem:[%s14380_s13 + $0x698] ss:$28 sps:$4 sm:$0xff]   ;;  %v6676_v50 = vrot.slane %v13128_v24, 1 }
 0xe35   :  { %6741 = vmatprep.subr.bf16.mxu0 %v9940_v39  ;;  %6905 = vmatprep.subr.bf16.mxu1 %v9941_v53  ;;  %v9992_v39 = vld [vmem:[%s14380_s13 + $0x6cc] ss:$28 sps:$4 sm:$0xff]   ;;  %v9993_v53 = vld [vmem:[%s14380_s13 + $0x6d4] ss:$28 sps:$4 sm:$0xff]  }
 0xe38   :  { %6742 = vmatpush1.bf16.msra.mxu0 %v9942_v54  ;;  %6906 = vmatpush1.bf16.msra.mxu1 %v9943_v35  ;;  %v6681_v54 = vrot.slane %v13130_v27, 2  ;;  %v9994_v35 = vld [vmem:[%s14380_s13 + $0x6c8] ss:$28 sps:$4 sm:$0xff]  }
 0xe39   :  { %6743 = vmatprep.subr.bf16.mxu0 %v9944_v57  ;;  %6907 = vmatprep.subr.bf16.mxu1 %v9945_v58  ;;  %v9995_v57 = vld [vmem:[%s14380_s13 + $0x6d0] ss:$28 sps:$4 sm:$0xff]   ;;  %v13337_v58 = vpack.c.bf16 %v6676_v50, %v6676_v50 }
 0xe3a   :  { %v10040_v50 = vld [vmem:[%s14380_s13 + $0x96c] ss:$28 sps:$4 sm:$0xff]  }
 0xe3c   :  { %6744 = vmatpush1.bf16.msra.mxu0 %v9946_v59  ;;  %6908 = vmatpush1.bf16.msra.mxu1 %v9947_v60  ;;  %v9996_v59 = vld [vmem:[%s14380_s13 + $0x704] ss:$28 sps:$4 sm:$0xff]   ;;  %v9997_v60 = vld [vmem:[%s14380_s13 + $0x70c] ss:$28 sps:$4 sm:$0xff]  }
 0xe3d   :  { %6745 = vmatprep.subr.bf16.mxu0 %v9948_v42  ;;  %6909 = vmatprep.subr.bf16.mxu1 %v9949_v52  ;;  %v13345_v42 = vpack.c.bf16 %v6681_v54, %v6681_v54  ;;  %v9998_v52 = vld [vmem:[%s14380_s13 + $0x700] ss:$28 sps:$4 sm:$0xff]   ;;  %v10042_v54 = vld [vmem:[%s14380_s13 + $0x968] ss:$28 sps:$4 sm:$0xff]  }
 0xe40   :  { %6746 = vmatpush1.bf16.msra.mxu0 %v9950_v43  ;;  %6910 = vmatpush1.bf16.msra.mxu1 %v9951_v44  ;;  %v9999_v43 = vld [vmem:[%s14380_s13 + $0x708] ss:$28 sps:$4 sm:$0xff]   ;;  %v10000_v44 = vld [vmem:[%s14380_s13 + $0x73c] ss:$28 sps:$4 sm:$0xff]  }
 0xe41   :  { %6747 = vmatprep.subr.bf16.mxu0 %v9952_v56  ;;  %6911 = vmatprep.subr.bf16.mxu1 %v9953_v55  ;;  %v10001_v56 = vld [vmem:[%s14380_s13 + $0x744] ss:$28 sps:$4 sm:$0xff]   ;;  %v10002_v55 = vld [vmem:[%s14380_s13 + $0x738] ss:$28 sps:$4 sm:$0xff]  }
 0xe44   :  { %6748 = vmatpush1.bf16.msra.mxu0 %v9954_v46  ;;  %6912 = vmatpush1.bf16.msra.mxu1 %v9955_v30  ;;  %v10003_v46 = vld [vmem:[%s14380_s13 + $0x740] ss:$28 sps:$4 sm:$0xff]   ;;  %v10004_v30 = vld [vmem:[%s14380_s13 + $0x774] ss:$28 sps:$4 sm:$0xff]  }
 0xe45   :  { %6749 = vmatprep.subr.bf16.mxu0 %v9956_v5  ;;  %6913 = vmatprep.subr.bf16.mxu1 %v9957_v3  ;;  %v10005_v5 = vld [vmem:[%s14380_s13 + $0x77c] ss:$28 sps:$4 sm:$0xff]   ;;  %v10006_v3 = vld [vmem:[%s14380_s13 + $0x770] ss:$28 sps:$4 sm:$0xff]  }
 0xe48   :  { %6750 = vmatpush1.bf16.msra.mxu0 %v9958_v7  ;;  %6914 = vmatpush1.bf16.msra.mxu1 %v9959_v8  ;;  %v10007_v7 = vld [vmem:[%s14380_s13 + $0x778] ss:$28 sps:$4 sm:$0xff]   ;;  %v10008_v8 = vld [vmem:[%s14380_s13 + $0x7ac] ss:$28 sps:$4 sm:$0xff]  }
 0xe49   :  { %6751 = vmatprep.subr.bf16.mxu0 %v9960_v0  ;;  %6915 = vmatprep.subr.bf16.mxu1 %v9961_v13  ;;  %v10009_v0 = vld [vmem:[%s14380_s13 + $0x7b4] ss:$28 sps:$4 sm:$0xff]   ;;  %v10010_v13 = vld [vmem:[%s14380_s13 + $0x7a8] ss:$28 sps:$4 sm:$0xff]  }
 0xe4c   :  { %6752 = vmatpush1.bf16.msra.mxu0 %v9962_v15  ;;  %6916 = vmatpush1.bf16.msra.mxu1 %v9963_v22  ;;  %v10011_v15 = vld [vmem:[%s14380_s13 + $0x7b0] ss:$28 sps:$4 sm:$0xff]   ;;  %v10012_v22 = vld [vmem:[%s14380_s13 + $0x7e4] ss:$28 sps:$4 sm:$0xff]  }
 0xe4d   :  { %6753 = vmatprep.subr.bf16.mxu0 %v9964_v21  ;;  %6917 = vmatprep.subr.bf16.mxu1 %v9965_v16  ;;  %v10013_v21 = vld [vmem:[%s14380_s13 + $0x7ec] ss:$28 sps:$4 sm:$0xff]   ;;  %v10014_v16 = vld [vmem:[%s14380_s13 + $0x7e0] ss:$28 sps:$4 sm:$0xff]  }
 0xe50   :  { %6754 = vmatpush1.bf16.msra.mxu0 %v9966_v10  ;;  %6918 = vmatpush1.bf16.msra.mxu1 %v9967_v25  ;;  %v10015_v10 = vld [vmem:[%s14380_s13 + $0x7e8] ss:$28 sps:$4 sm:$0xff]   ;;  %v10016_v25 = vld [vmem:[%s14380_s13 + $0x81c] ss:$28 sps:$4 sm:$0xff]  }
 0xe51   :  { %6755 = vmatprep.subr.bf16.mxu0 %v9968_v29  ;;  %6919 = vmatprep.subr.bf16.mxu1 %v9969_v11  ;;  %v10017_v29 = vld [vmem:[%s14380_s13 + $0x824] ss:$28 sps:$4 sm:$0xff]   ;;  %v10018_v11 = vld [vmem:[%s14380_s13 + $0x818] ss:$28 sps:$4 sm:$0xff]  }
 0xe54   :  { %6756 = vmatpush1.bf16.msra.mxu0 %v9970_v12  ;;  %6920 = vmatpush1.bf16.msra.mxu1 %v9971_v45  ;;  %v10019_v12 = vld [vmem:[%s14380_s13 + $0x820] ss:$28 sps:$4 sm:$0xff]   ;;  %v10020_v45 = vld [vmem:[%s14380_s13 + $0x854] ss:$28 sps:$4 sm:$0xff]  }
 0xe55   :  { %6757 = vmatprep.subr.bf16.mxu0 %v9972_v41  ;;  %6921 = vmatprep.subr.bf16.mxu1 %v9973_v26  ;;  %v10021_v41 = vld [vmem:[%s14380_s13 + $0x85c] ss:$28 sps:$4 sm:$0xff]   ;;  %v10022_v26 = vld [vmem:[%s14380_s13 + $0x850] ss:$28 sps:$4 sm:$0xff]  }
 0xe58   :  { %6758 = vmatpush1.bf16.msra.mxu0 %v9974_v2  ;;  %6922 = vmatpush1.bf16.msra.mxu1 %v9975_v36  ;;  %v10023_v2 = vld [vmem:[%s14380_s13 + $0x858] ss:$28 sps:$4 sm:$0xff]   ;;  %v10024_v36 = vld [vmem:[%s14380_s13 + $0x88c] ss:$28 sps:$4 sm:$0xff]  }
 0xe59   :  { %6759 = vmatprep.subr.bf16.mxu0 %v9976_v1  ;;  %6923 = vmatprep.subr.bf16.mxu1 %v9977_v62  ;;  %v10025_v1 = vld [vmem:[%s14380_s13 + $0x894] ss:$28 sps:$4 sm:$0xff]   ;;  %v10026_v62 = vld [vmem:[%s14380_s13 + $0x888] ss:$28 sps:$4 sm:$0xff]  }
 0xe5c   :  { %6760 = vmatpush1.bf16.msra.mxu0 %v9978_v48  ;;  %6924 = vmatpush1.bf16.msra.mxu1 %v9979_v28  ;;  %v10027_v48 = vld [vmem:[%s14380_s13 + $0x890] ss:$28 sps:$4 sm:$0xff]   ;;  %v10028_v28 = vld [vmem:[%s14380_s13 + $0x8c4] ss:$28 sps:$4 sm:$0xff]  }
 0xe5d   :  { %6761 = vmatprep.subr.bf16.mxu0 %v9980_v51  ;;  %6925 = vmatprep.subr.bf16.mxu1 %v9981_v4  ;;  %v10029_v51 = vld [vmem:[%s14380_s13 + $0x8cc] ss:$28 sps:$4 sm:$0xff]   ;;  %v10030_v4 = vld [vmem:[%s14380_s13 + $0x8c0] ss:$28 sps:$4 sm:$0xff]  }
 0xe60   :  { %6762 = vmatpush1.bf16.msra.mxu0 %v9982_v17  ;;  %6926 = vmatpush1.bf16.msra.mxu1 %v9983_v18  ;;  %v10031_v17 = vld [vmem:[%s14380_s13 + $0x8c8] ss:$28 sps:$4 sm:$0xff]   ;;  %v10032_v18 = vld [vmem:[%s14380_s13 + $0x8fc] ss:$28 sps:$4 sm:$0xff]  }
 0xe61   :  { %6763 = vmatprep.subr.bf16.mxu0 %v9984_v63  ;;  %6927 = vmatprep.subr.bf16.mxu1 %v9985_v61  ;;  %v10033_v63 = vld [vmem:[%s14380_s13 + $0x904] ss:$28 sps:$4 sm:$0xff]   ;;  %v7354_v61 = vmax.f32 %v13126_v23, -30.0 }
 0xe63   :  { %v7361_v23 = vsub.f32 0.0, %v7354_v61 }
 0xe64   :  { %6764 = vmatpush1.bf16.msra.mxu0 %v9986_v49  ;;  %6928 = vmatpush1.bf16.msra.mxu1 %v9987_v14  ;;  %v10034_v49 = vld [vmem:[%s14380_s13 + $0x8f8] ss:$28 sps:$4 sm:$0xff]   ;;  %v10035_v14 = vld [vmem:[%s14380_s13 + $0x900] ss:$28 sps:$4 sm:$0xff]  }
 0xe65   :  { %6765 = vmatprep.subr.bf16.mxu0 %v9988_v33  ;;  %6929 = vmatprep.subr.bf16.mxu1 %v9989_v6  ;;  %v10036_v33 = vld [vmem:[%s14380_s13 + $0x934] ss:$28 sps:$4 sm:$0xff]   ;;  %v10037_v6 = vld [vmem:[%s14380_s13 + $0x93c] ss:$28 sps:$4 sm:$0xff]  }
 0xe68   :  { %6766 = vmatpush1.bf16.msra.mxu0 %v9990_v38  ;;  %6930 = vmatpush1.bf16.msra.mxu1 %v9991_v37  ;;  %v10038_v38 = vld [vmem:[%s14380_s13 + $0x930] ss:$28 sps:$4 sm:$0xff]   ;;  %v10039_v37 = vld [vmem:[%s14380_s13 + $0x938] ss:$28 sps:$4 sm:$0xff]  }
 0xe69   :  { %6767 = vmatprep.subr.bf16.mxu0 %v9992_v39  ;;  %6931 = vmatprep.subr.bf16.mxu1 %v9993_v53  ;;  %v10041_v39 = vld [vmem:[%s14380_s13 + $0x974] ss:$28 sps:$4 sm:$0xff]   ;;  %v7374_v53 = vmul.f32 1.442695, %v7361_v23  ;;  %v10069_v23 = vld [vmem:[%s14380_s13 + $0xafc] ss:$28 sps:$4 sm:$0xff]  }
 0xe6b   :  { %9827 = vpow2.f32 %v7374_v53 }
 0xe6c   :  { %6768 = vmatpush1.bf16.msra.mxu0 %v9994_v35  ;;  %6932 = vmatpush1.bf16.msra.mxu1 %v9995_v57  ;;  %v10043_v35 = vld [vmem:[%s14380_s13 + $0x970] ss:$28 sps:$4 sm:$0xff]   ;;  %v10044_v57 = vld [vmem:[%s14380_s13 + $0x9a4] ss:$28 sps:$4 sm:$0xff]  }
 0xe6d   :  { %6778 = vmatprep.subr.bf16.mxu0 %v9996_v59  ;;  %6942 = vmatprep.subr.bf16.mxu1 %v9997_v60  ;;  %v10045_v59 = vld [vmem:[%s14380_s13 + $0x9ac] ss:$28 sps:$4 sm:$0xff]   ;;  %v10046_v60 = vld [vmem:[%s14380_s13 + $0x9a0] ss:$28 sps:$4 sm:$0xff]  }
 0xe6f   :  { %6770 = vmatmul.mubr.bf16.vlgmr.msra.gmra.mrb[72].mxu0 %v13337_v58  ;;  %6934 = vmatmul.mubr.bf16.vlgmr.msra.gmra.mrb[92].mxu1 %v13337_v58 }
 0xe70   :  { %6779 = vmatpush1.bf16.msra.mxu0 %v9998_v52  ;;  %6810 = vmatprep.mubr.bf16.mxu0 %v13345_v42 }
 0xe71   :  { %6943 = vmatpush1.bf16.msra.mxu1 %v9999_v43  ;;  %6974 = vmatprep.mubr.bf16.mxu1 %v13345_v42  ;;  %v10047_v43 = vld [vmem:[%s14380_s13 + $0x9a8] ss:$28 sps:$4 sm:$0xff]  }
 0xe72   :  { %6780 = vmatprep.subr.bf16.mxu0 %v10000_v44  ;;  %6944 = vmatprep.subr.bf16.mxu1 %v10001_v56  ;;  %v10048_v56 = vld [vmem:[%s14380_s13 + $0x9dc] ss:$28 sps:$4 sm:$0xff]  }
 0xe74   :  { %6781 = vmatpush1.bf16.msra.mxu0 %v10002_v55 }
 0xe75   :  { %6945 = vmatpush1.bf16.msra.mxu1 %v10003_v46  ;;  %6782 = vmatprep.subr.bf16.mxu0 %v10004_v30  ;;  %v10049_v46 = vld [vmem:[%s14380_s13 + $0x9e4] ss:$28 sps:$4 sm:$0xff]  }
 0xe76   :  { %6946 = vmatprep.subr.bf16.mxu1 %v10005_v5 }
 0xe78   :  { %6783 = vmatpush1.bf16.msra.mxu0 %v10006_v3 }
 0xe79   :  { %6947 = vmatpush1.bf16.msra.mxu1 %v10007_v7  ;;  %6784 = vmatprep.subr.bf16.mxu0 %v10008_v8 }
 0xe7a   :  { %6948 = vmatprep.subr.bf16.mxu1 %v10009_v0  ;;  %v10050_v0 = vld [vmem:[%s14380_s13 + $0x9d8] ss:$28 sps:$4 sm:$0xff]  }
 0xe7c   :  { %6785 = vmatpush1.bf16.msra.mxu0 %v10010_v13 }
 0xe7d   :  { %6949 = vmatpush1.bf16.msra.mxu1 %v10011_v15  ;;  %6786 = vmatprep.subr.bf16.mxu0 %v10012_v22  ;;  %v10051_v15 = vld [vmem:[%s14380_s13 + $0x9e0] ss:$28 sps:$4 sm:$0xff]   ;;  %v10052_v22 = vld [vmem:[%s14380_s13 + $0xa14] ss:$28 sps:$4 sm:$0xff]  }
 0xe7e   :  { %6950 = vmatprep.subr.bf16.mxu1 %v10013_v21 }
 0xe80   :  { %6787 = vmatpush1.bf16.msra.mxu0 %v10014_v16  ;;  %v10053_v16 = vld [vmem:[%s14380_s13 + $0xa1c] ss:$28 sps:$4 sm:$0xff]  }
 0xe81   :  { %6951 = vmatpush1.bf16.msra.mxu1 %v10015_v10  ;;  %6788 = vmatprep.subr.bf16.mxu0 %v10016_v25  ;;  %v10054_v10 = vld [vmem:[%s14380_s13 + $0xa10] ss:$28 sps:$4 sm:$0xff]   ;;  %v6680_v25 = vrot.slane %v13128_v24, 2 }
 0xe82   :  { %6952 = vmatprep.subr.bf16.mxu1 %v10017_v29  ;;  %v10055_v29 = vld [vmem:[%s14380_s13 + $0xa18] ss:$28 sps:$4 sm:$0xff]  }
 0xe84   :  { %6789 = vmatpush1.bf16.msra.mxu0 %v10018_v11  ;;  %v10056_v11 = vld [vmem:[%s14380_s13 + $0xa4c] ss:$28 sps:$4 sm:$0xff]  }
 0xe85   :  { %6953 = vmatpush1.bf16.msra.mxu1 %v10019_v12  ;;  %6790 = vmatprep.subr.bf16.mxu0 %v10020_v45  ;;  %v9828_v12 = vpop.eup %9827  ;;  %v10057_v45 = vld [vmem:[%s14380_s13 + $0xa54] ss:$28 sps:$4 sm:$0xff]  }
 0xe86   :  { %6954 = vmatprep.subr.bf16.mxu1 %v10021_v41  ;;  %v6685_v41 = vrot.slane %v13130_v27, 3  ;;  %v10061_v27 = vld [vmem:[%s14380_s13 + $0xa8c] ss:$28 sps:$4 sm:$0xff]  }
 0xe88   :  { %6791 = vmatpush1.bf16.msra.mxu0 %v10022_v26  ;;  %v10058_v26 = vld [vmem:[%s14380_s13 + $0xa48] ss:$28 sps:$4 sm:$0xff]  }
 0xe89   :  { %6955 = vmatpush1.bf16.msra.mxu1 %v10023_v2  ;;  %6792 = vmatprep.subr.bf16.mxu0 %v10024_v36  ;;  %v7382_v2 = vadd.f32 1.0, %v9828_v12  ;;  %v13537_v36 = vpack.c.bf16 %v6680_v25, %v6680_v25  ;;  %v10088_v12 = vld [vmem:[%s14380_s13 + $0xc0c] ss:$28 sps:$4 sm:$0xff]  }
 0xe8a   :  { %6956 = vmatprep.subr.bf16.mxu1 %v10025_v1  ;;  %v10059_v1 = vld [vmem:[%s14380_s13 + $0xa50] ss:$28 sps:$4 sm:$0xff]  }
 0xe8c   :  { %6793 = vmatpush1.bf16.msra.mxu0 %v10026_v62  ;;  %v10060_v62 = vld [vmem:[%s14380_s13 + $0xa84] ss:$28 sps:$4 sm:$0xff]  }
 0xe8d   :  { %6957 = vmatpush1.bf16.msra.mxu1 %v10027_v48  ;;  %6794 = vmatprep.subr.bf16.mxu0 %v10028_v28  ;;  %v13548_v48 = vpack.c.bf16 %v6685_v41, %v6685_v41  ;;  %v10062_v28 = vld [vmem:[%s14380_s13 + $0xa80] ss:$28 sps:$4 sm:$0xff]  }
 0xe8e   :  { %6958 = vmatprep.subr.bf16.mxu1 %v10029_v51 }
 0xe90   :  { %6795 = vmatpush1.bf16.msra.mxu0 %v10030_v4  ;;  %v10063_v4 = vld [vmem:[%s14380_s13 + $0xa88] ss:$28 sps:$4 sm:$0xff]  }
 0xe91   :  { %6959 = vmatpush1.bf16.msra.mxu1 %v10031_v17  ;;  %6796 = vmatprep.subr.bf16.mxu0 %v10032_v18 }
 0xe92   :  { %6960 = vmatprep.subr.bf16.mxu1 %v10033_v63  ;;  %v10064_v63 = vld [vmem:[%s14380_s13 + $0xabc] ss:$28 sps:$4 sm:$0xff]  }
 0xe94   :  { %6797 = vmatpush1.bf16.msra.mxu0 %v10034_v49  ;;  %v10065_v49 = vld [vmem:[%s14380_s13 + $0xac4] ss:$28 sps:$4 sm:$0xff]  }
 0xe95   :  { %6961 = vmatpush1.bf16.msra.mxu1 %v10035_v14  ;;  %6798 = vmatprep.subr.bf16.mxu0 %v10036_v33  ;;  %v10066_v14 = vld [vmem:[%s14380_s13 + $0xab8] ss:$28 sps:$4 sm:$0xff]   ;;  %v10067_v33 = vld [vmem:[%s14380_s13 + $0xac0] ss:$28 sps:$4 sm:$0xff]  }
 0xe96   :  { %6962 = vmatprep.subr.bf16.mxu1 %v10037_v6  ;;  %v10068_v6 = vld [vmem:[%s14380_s13 + $0xaf4] ss:$28 sps:$4 sm:$0xff]  }
 0xe98   :  { %6799 = vmatpush1.bf16.msra.mxu0 %v10038_v38  ;;  %v10070_v38 = vld [vmem:[%s14380_s13 + $0xaf0] ss:$28 sps:$4 sm:$0xff]  }
 0xe99   :  { %6963 = vmatpush1.bf16.msra.mxu1 %v10039_v37  ;;  %6800 = vmatprep.subr.bf16.mxu0 %v10040_v50  ;;  %v10071_v37 = vld [vmem:[%s14380_s13 + $0xaf8] ss:$28 sps:$4 sm:$0xff]   ;;  %v10072_v50 = vld [vmem:[%s14380_s13 + $0xb2c] ss:$28 sps:$4 sm:$0xff]  }
 0xe9a   :  { %6964 = vmatprep.subr.bf16.mxu1 %v10041_v39  ;;  %v10073_v39 = vld [vmem:[%s14380_s13 + $0xb34] ss:$28 sps:$4 sm:$0xff]  }
 0xe9c   :  { %6801 = vmatpush1.bf16.msra.mxu0 %v10042_v54  ;;  %v10074_v54 = vld [vmem:[%s14380_s13 + $0xb28] ss:$28 sps:$4 sm:$0xff]  }
 0xe9d   :  { %6965 = vmatpush1.bf16.msra.mxu1 %v10043_v35  ;;  %6802 = vmatprep.subr.bf16.mxu0 %v10044_v57  ;;  %v10075_v35 = vld [vmem:[%s14380_s13 + $0xb30] ss:$28 sps:$4 sm:$0xff]   ;;  %v10076_v57 = vld [vmem:[%s14380_s13 + $0xb64] ss:$28 sps:$4 sm:$0xff]  }
 0xe9e   :  { %6966 = vmatprep.subr.bf16.mxu1 %v10045_v59 }
 0xea0   :  { %6803 = vmatpush1.bf16.msra.mxu0 %v10046_v60 }
 0xea1   :  { %v6458_v52 = vpop.f32.mrb[88].mxu1  ;;  %6967 = vmatpush1.bf16.msra.mxu1 %v10047_v43  ;;  %6804 = vmatprep.subr.bf16.mxu0 %v10048_v56 }
 0xea2   :  { %v7352_v44 = vmax.f32 %v6458_v52, -30.0  ;;  %v6460_v55 = vpop.f32.mrb[89].mxu1  ;;  %6968 = vmatprep.subr.bf16.mxu1 %v10049_v46  ;;  %v10077_v52 = vld [vmem:[%s14380_s13 + $0xb6c] ss:$28 sps:$4 sm:$0xff]  }
 0xea3   :  { %v7353_v30 = vmax.f32 %v6460_v55, -30.0  ;;  %v6462_v5 = vpop.f32.mrb[90].mxu1  ;;  %v10078_v55 = vld [vmem:[%s14380_s13 + $0xb60] ss:$28 sps:$4 sm:$0xff]  }
 0xea4   :  { %v7359_v3 = vsub.f32 0.0, %v7352_v44  ;;  %v6463_v7 = vpop.f32.mrb[91].mxu1  ;;  %6805 = vmatpush1.bf16.msra.mxu0 %v10050_v0  ;;  %v10080_v5 = vld [vmem:[%s14380_s13 + $0xb9c] ss:$28 sps:$4 sm:$0xff]  }
 0xea5   :  { %v7360_v8 = vsub.f32 0.0, %v7353_v30  ;;  %6969 = vmatpush1.bf16.msra.mxu1 %v10051_v15  ;;  %6806 = vmatprep.subr.bf16.mxu0 %v10052_v22  ;;  %v10079_v30 = vld [vmem:[%s14380_s13 + $0xb68] ss:$28 sps:$4 sm:$0xff]   ;;  %v10083_v15 = vld [vmem:[%s14380_s13 + $0xba0] ss:$28 sps:$4 sm:$0xff]  }
 0xea6   :  { %v7370_v13 = vmul.f32 1.442695, %v7359_v3  ;;  %6970 = vmatprep.subr.bf16.mxu1 %v10053_v16  ;;  %v10084_v22 = vld [vmem:[%s14380_s13 + $0xbd4] ss:$28 sps:$4 sm:$0xff]  }
 0xea7   :  { %v7372_v21 = vmul.f32 1.442695, %v7360_v8  ;;  %v10081_v8 = vld [vmem:[%s14380_s13 + $0xba4] ss:$28 sps:$4 sm:$0xff]  }
 0xea8   :  { %9829 = vpow2.f32 %v7370_v13  ;;  %6807 = vmatpush1.bf16.msra.mxu0 %v10054_v10  ;;  %v10082_v13 = vld [vmem:[%s14380_s13 + $0xb98] ss:$28 sps:$4 sm:$0xff]  }
 0xea9   :  { %9831 = vpow2.f32 %v7372_v21  ;;  %6971 = vmatpush1.bf16.msra.mxu1 %v10055_v29  ;;  %6808 = vmatprep.subr.bf16.mxu0 %v10056_v11  ;;  %v10085_v10 = vld [vmem:[%s14380_s13 + $0xbdc] ss:$28 sps:$4 sm:$0xff]   ;;  %v10086_v29 = vld [vmem:[%s14380_s13 + $0xbd0] ss:$28 sps:$4 sm:$0xff]  }
 0xeaa   :  { %6972 = vmatprep.subr.bf16.mxu1 %v10057_v45  ;;  %9833 = vrcp.f32 %v7382_v2  ;;  %v10087_v11 = vld [vmem:[%s14380_s13 + $0xbd8] ss:$28 sps:$4 sm:$0xff]   ;;  %v7450_v45 = vrot.slane %v7442_v34, %v13010_v32  ;;  %v10094_v34 = vld [vmem:[%s14380_s13 + $0xc40] ss:$28 sps:$4 sm:$0xff]  }
 0xeac   :  { %6809 = vmatpush1.bf16.msra.mxu0 %v10058_v26  ;;  %v10089_v26 = vld [vmem:[%s14380_s13 + $0xc14] ss:$28 sps:$4 sm:$0xff]  }
 0xead   :  { %6973 = vmatpush1.bf16.msra.mxu1 %v10059_v1  ;;  %6819 = vmatprep.subr.bf16.mxu0 %v10060_v62  ;;  %v10090_v62 = vld [vmem:[%s14380_s13 + $0xc08] ss:$28 sps:$4 sm:$0xff]  }
 0xeae   :  { %6983 = vmatprep.subr.bf16.mxu1 %v10061_v27  ;;  %v10095_v27 = vld [vmem:[%s14380_s13 + $0xc48] ss:$28 sps:$4 sm:$0xff]  }
 0xeaf   :  { %6811 = vmatmul.mubr.bf16.vlgmr.msra.gmra.mrb[72].mxu0 %v13537_v36 }
 0xeb0   :  { %6975 = vmatmul.mubr.bf16.vlgmr.msra.gmra.mrb[92].mxu1 %v13537_v36  ;;  %6820 = vmatpush1.bf16.msra.mxu0 %v10062_v28  ;;  %v10096_v28 = vld [vmem:[%s14380_s13 + $0xc7c] ss:$28 sps:$4 sm:$0xff]  }
 0xeb1   :  { %6851 = vmatprep.mubr.bf16.mxu0 %v13548_v48  ;;  %6984 = vmatpush1.bf16.msra.mxu1 %v10063_v4  ;;  %v10098_v4 = vld [vmem:[%s14380_s13 + $0xc78] ss:$28 sps:$4 sm:$0xff]  }
 0xeb2   :  { %v9830_v51 = vpop.eup %9829  ;;  %7015 = vmatprep.mubr.bf16.mxu1 %v13548_v48  ;;  %6821 = vmatprep.subr.bf16.mxu0 %v10064_v63  ;;  %v10101_v63 = vld [vmem:[%s14380_s13 + $0xcbc] ss:$28 sps:$4 sm:$0xff]  }
 0xeb3   :  { %v9832_v17 = vpop.eup %9831  ;;  %v7380_v18 = vadd.f32 1.0, %v9830_v51  ;;  %6985 = vmatprep.subr.bf16.mxu1 %v10065_v49  ;;  %v10097_v51 = vld [vmem:[%s14380_s13 + $0xc84] ss:$28 sps:$4 sm:$0xff]   ;;  %v10103_v49 = vld [vmem:[%s14380_s13 + $0xcb8] ss:$28 sps:$4 sm:$0xff]  }
 0xeb4   :  { %v7381_v61 = vadd.f32 1.0, %v9832_v17  ;;  %6822 = vmatpush1.bf16.msra.mxu0 %v10066_v14  ;;  %v9834_v53 = vpop.eup %9833  ;;  %v10099_v17 = vld [vmem:[%s14380_s13 + $0xc80] ss:$28 sps:$4 sm:$0xff]   ;;  %v10104_v14 = vld [vmem:[%s14380_s13 + $0xcec] ss:$28 sps:$4 sm:$0xff]  }
 0xeb5   :  { %9835 = vrcp.f32 %v7380_v18  ;;  %6986 = vmatpush1.bf16.msra.mxu1 %v10067_v33  ;;  %6823 = vmatprep.subr.bf16.mxu0 %v10068_v6  ;;  %v7396_v60 = vmax.f32 %v9834_v53, 0.0  ;;  %v10100_v18 = vld [vmem:[%s14380_s13 + $0xcb4] ss:$28 sps:$4 sm:$0xff]   ;;  %v10106_v6 = vld [vmem:[%s14380_s13 + $0xce8] ss:$28 sps:$4 sm:$0xff]  }
 0xeb6   :  { %9837 = vrcp.f32 %v7381_v61  ;;  %6987 = vmatprep.subr.bf16.mxu1 %v10069_v23  ;;  %v10102_v61 = vld [vmem:[%s14380_s13 + $0xcb0] ss:$28 sps:$4 sm:$0xff]   ;;  %v10112_v53 = vld [vmem:[%s14380_s13 + $0xd5c] ss:$28 sps:$4 sm:$0xff]  }
 0xeb7   :  { %v7403_v3 = vmin.f32 %v7396_v60, 1.0  ;;  %v10105_v33 = vld [vmem:[%s14380_s13 + $0xcf4] ss:$28 sps:$4 sm:$0xff]   ;;  %v10117_v60 = vld [vmem:[%s14380_s13 + $0xd9c] ss:$28 sps:$4 sm:$0xff]  }
 0xeb8   :  { %6824 = vmatpush1.bf16.msra.mxu0 %v10070_v38  ;;  %v10107_v23 = vld [vmem:[%s14380_s13 + $0xcf0] ss:$28 sps:$4 sm:$0xff]   ;;  %v10108_v38 = vld [vmem:[%s14380_s13 + $0xd24] ss:$28 sps:$4 sm:$0xff]  }
 0xeb9   :  { %6988 = vmatpush1.bf16.msra.mxu1 %v10071_v37  ;;  %6825 = vmatprep.subr.bf16.mxu0 %v10072_v50  ;;  %v7441_v21 = vrot.slane %v7403_v3, %v13010_v32  ;;  %v10109_v37 = vld [vmem:[%s14380_s13 + $0xd2c] ss:$28 sps:$4 sm:$0xff]   ;;  %v10110_v50 = vld [vmem:[%s14380_s13 + $0xd20] ss:$28 sps:$4 sm:$0xff]   ;;  %v10125_v3 = vld [vmem:[%s14380_s13 + $0x1d8] ss:$28 sps:$4 sm:$0xff]  }
 0xeba   :  { %6989 = vmatprep.subr.bf16.mxu1 %v10073_v39  ;;  %v10111_v39 = vld [vmem:[%s14380_s13 + $0xd28] ss:$28 sps:$4 sm:$0xff]  }
 0xebc   :  { %6826 = vmatpush1.bf16.msra.mxu0 %v10074_v54  ;;  %v10113_v54 = vld [vmem:[%s14380_s13 + $0xd64] ss:$28 sps:$4 sm:$0xff]  }
 0xebd   :  { %6990 = vmatpush1.bf16.msra.mxu1 %v10075_v35  ;;  %6827 = vmatprep.subr.bf16.mxu0 %v10076_v57  ;;  %v10114_v35 = vld [vmem:[%s14380_s13 + $0xd58] ss:$28 sps:$4 sm:$0xff]   ;;  %v10115_v57 = vld [vmem:[%s14380_s13 + $0xd60] ss:$28 sps:$4 sm:$0xff]  }
 0xebe   :  { %6991 = vmatprep.subr.bf16.mxu1 %v10077_v52  ;;  %v10118_v52 = vld [vmem:[%s14380_s13 + $0xd90] ss:$28 sps:$4 sm:$0xff]  }
 0xebf   :  { %v9836_v59 = vpop.eup %9835 }
 0xec0   :  { %v9838_v43 = vpop.eup %9837  ;;  %v7394_v44 = vmax.f32 %v9836_v59, 0.0  ;;  %6828 = vmatpush1.bf16.msra.mxu0 %v10078_v55  ;;  %v10116_v59 = vld [vmem:[%s14380_s13 + $0xd94] ss:$28 sps:$4 sm:$0xff]  }
 0xec1   :  { %v7395_v56 = vmax.f32 %v9838_v43, 0.0  ;;  %6992 = vmatpush1.bf16.msra.mxu1 %v10079_v30  ;;  %6829 = vmatprep.subr.bf16.mxu0 %v10080_v5  ;;  %v6684_v43 = vrot.slane %v13128_v24, 3  ;;  %v10121_v55 = vld [vmem:[%s14380_s13 + $0xdd4] ss:$28 sps:$4 sm:$0xff]  }
 0xec2   :  { %v7401_v46 = vmin.f32 %v7394_v44, 1.0  ;;  %6993 = vmatprep.subr.bf16.mxu1 %v10081_v8  ;;  %v10119_v44 = vld [vmem:[%s14380_s13 + $0xd98] ss:$28 sps:$4 sm:$0xff]   ;;  %v10123_v30 = vld [vmem:[%s14380_s13 + $0xdd0] ss:$28 sps:$4 sm:$0xff]  }
 0xec3   :  { %v7402_v7 = vmin.f32 %v7395_v56, 1.0  ;;  %v10120_v56 = vld [vmem:[%s14380_s13 + $0xdcc] ss:$28 sps:$4 sm:$0xff]   ;;  %v13755_v24 = vpack.c.bf16 %v6684_v43, %v6684_v43  ;;  %v10124_v5 = vld [vmem:[%s14380_s13 + $0x14] ss:$28 sps:$4 sm:$0xff]  }
 0xec4   :  { %6830 = vmatpush1.bf16.msra.mxu0 %v10082_v13  ;;  %v10127_v8 = vld [vmem:[%s14380_s13 + $0x18] ss:$28 sps:$4 sm:$0xff]   ;;  %v10129_v13 = vld [vmem:[%s14380_s13 + $0x210] ss:$28 sps:$4 sm:$0xff]  }
 0xec5   :  { %v7413_v0 = vcombine.low %v7401_v46, %v7402_v7  ;;  %6994 = vmatpush1.bf16.msra.mxu1 %v10083_v15  ;;  %6831 = vmatprep.subr.bf16.mxu0 %v10084_v22  ;;  %v10122_v46 = vld [vmem:[%s14380_s13 + $0xdc8] ss:$28 sps:$4 sm:$0xff]   ;;  %v10126_v7 = vld [vmem:[%s14380_s13 + $0x10] ss:$28 sps:$4 sm:$0xff]   ;;  %v10173_v43 = vld [vmem:[%s14380_s13 + $0x638] ss:$28 sps:$4 sm:$0xff]  }
 0xec6   :  { %6995 = vmatprep.subr.bf16.mxu1 %v10085_v10  ;;  %v10130_v15 = vld [vmem:[%s14380_s13 + $0x48] ss:$28 sps:$4 sm:$0xff]   ;;  %v10131_v22 = vld [vmem:[%s14380_s13 + $0x50] ss:$28 sps:$4 sm:$0xff]  }
 0xec7   :  { %v7434_v16 = vrot.slane %v7413_v0, %v13010_v32  ;;  %v10128_v0 = vld [vmem:[%s14380_s13 + $0x4c] ss:$28 sps:$4 sm:$0xff]  }
 0xec8   :  { %6832 = vmatpush1.bf16.msra.mxu0 %v10086_v29  ;;  %v10135_v10 = vld [vmem:[%s14380_s13 + $0x88] ss:$28 sps:$4 sm:$0xff]   ;;  %v10137_v29 = vld [vmem:[%s14380_s13 + $0x280] ss:$28 sps:$4 sm:$0xff]  }
 0xec9   :  { %v7443_v25 = vcombine.low %v7434_v16, %v7441_v21  ;;  %6996 = vmatpush1.bf16.msra.mxu1 %v10087_v11  ;;  %6833 = vmatprep.subr.bf16.mxu0 %v10088_v12  ;;  %v10133_v21 = vld [vmem:[%s14380_s13 + $0x248] ss:$28 sps:$4 sm:$0xff]   ;;  %v10134_v16 = vld [vmem:[%s14380_s13 + $0x80] ss:$28 sps:$4 sm:$0xff]   ;;  %v10138_v11 = vld [vmem:[%s14380_s13 + $0xb8] ss:$28 sps:$4 sm:$0xff]  }
 0xeca   :  { %6997 = vmatprep.subr.bf16.mxu1 %v10089_v26  ;;  %v10139_v12 = vld [vmem:[%s14380_s13 + $0xc0] ss:$28 sps:$4 sm:$0xff]   ;;  %v10142_v26 = vld [vmem:[%s14380_s13 + $0xf0] ss:$28 sps:$4 sm:$0xff]  }
 0xecb   :  { %v7457_v41 = vrot.slane %v7443_v25, %v13010_v32  ;;  %v10136_v25 = vld [vmem:[%s14380_s13 + $0xbc] ss:$28 sps:$4 sm:$0xff]  }
 0xecc   :  { %6834 = vmatpush1.bf16.msra.mxu0 %v10090_v62  ;;  %v10144_v62 = vld [vmem:[%s14380_s13 + $0x12c] ss:$28 sps:$4 sm:$0xff]  }
 0xecd   :  { %v7458_v1 = vcombine.low %v7450_v45, %v7457_v41  ;;  %6998 = vmatpush1.bf16.msra.mxu1 %v10091_v20  ;;  %6835 = vmatprep.subr.bf16.mxu0 %v10092_v31  ;;  %v10140_v45 = vld [vmem:[%s14380_s13 + $0xf4] ss:$28 sps:$4 sm:$0xff]   ;;  %v10146_v31 = vld [vmem:[%s14380_s13 + $0x128] ss:$28 sps:$4 sm:$0xff]  }
 0xece   :  { %6999 = vmatprep.subr.bf16.mxu1 %v10093_v19  ;;  %v10141_v41 = vld [vmem:[%s14380_s13 + $0x2b8] ss:$28 sps:$4 sm:$0xff]   ;;  %v10145_v20 = vld [vmem:[%s14380_s13 + $0x2f0] ss:$28 sps:$4 sm:$0xff]  }
 0xecf   :  { %7464 = vst.msk [vmem:[%s14382_s14] ss:$2 sm:$0x7f] %vm13646_vm15, %v7458_v1  ;;  %v10143_v1 = vld [vmem:[%s14380_s13 + $0xf8] ss:$28 sps:$4 sm:$0xff]  }
 0xed0   :  { %6836 = vmatpush1.bf16.msra.mxu0 %v10094_v34  ;;  %v10147_v19 = vld [vmem:[%s14380_s13 + $0x130] ss:$28 sps:$4 sm:$0xff]   ;;  %v10148_v34 = vld [vmem:[%s14380_s13 + $0x164] ss:$28 sps:$4 sm:$0xff]  }
 0xed1   :  { %7000 = vmatpush1.bf16.msra.mxu1 %v10095_v27  ;;  %6837 = vmatprep.subr.bf16.mxu0 %v10096_v28  ;;  %v10149_v27 = vld [vmem:[%s14380_s13 + $0x328] ss:$28 sps:$4 sm:$0xff]   ;;  %v10150_v28 = vld [vmem:[%s14380_s13 + $0x160] ss:$28 sps:$4 sm:$0xff]  }
 0xed2   :  { %7001 = vmatprep.subr.bf16.mxu1 %v10097_v51  ;;  %v10151_v51 = vld [vmem:[%s14380_s13 + $0x168] ss:$28 sps:$4 sm:$0xff]  }
 0xed4   :  { %6838 = vmatpush1.bf16.msra.mxu0 %v10098_v4  ;;  %v10152_v4 = vld [vmem:[%s14380_s13 + $0x19c] ss:$28 sps:$4 sm:$0xff]  }
 0xed5   :  { %7002 = vmatpush1.bf16.msra.mxu1 %v10099_v17  ;;  %6839 = vmatprep.subr.bf16.mxu0 %v10100_v18  ;;  %v10153_v17 = vld [vmem:[%s14380_s13 + $0x360] ss:$28 sps:$4 sm:$0xff]   ;;  %v10154_v18 = vld [vmem:[%s14380_s13 + $0x198] ss:$28 sps:$4 sm:$0xff]  }
 0xed6   :  { %7003 = vmatprep.subr.bf16.mxu1 %v10101_v63  ;;  %v10155_v63 = vld [vmem:[%s14380_s13 + $0x1a0] ss:$28 sps:$4 sm:$0xff]  }
 0xed8   :  { %6840 = vmatpush1.bf16.msra.mxu0 %v10102_v61  ;;  %v10156_v61 = vld [vmem:[%s14380_s13 + $0x1d4] ss:$28 sps:$4 sm:$0xff]  }
 0xed9   :  { %7004 = vmatpush1.bf16.msra.mxu1 %v10103_v49  ;;  %6841 = vmatprep.subr.bf16.mxu0 %v10104_v14  ;;  %v10157_v49 = vld [vmem:[%s14380_s13 + $0x558] ss:$28 sps:$4 sm:$0xff]   ;;  %v10158_v14 = vld [vmem:[%s14380_s13 + $0x1d0] ss:$28 sps:$4 sm:$0xff]  }
 0xeda   :  { %7005 = vmatprep.subr.bf16.mxu1 %v10105_v33  ;;  %v10159_v33 = vld [vmem:[%s14380_s13 + $0x398] ss:$28 sps:$4 sm:$0xff]  }
 0xedc   :  { %6842 = vmatpush1.bf16.msra.mxu0 %v10106_v6  ;;  %v10160_v6 = vld [vmem:[%s14380_s13 + $0x20c] ss:$28 sps:$4 sm:$0xff]  }
 0xedd   :  { %7006 = vmatpush1.bf16.msra.mxu1 %v10107_v23  ;;  %6843 = vmatprep.subr.bf16.mxu0 %v10108_v38  ;;  %v10161_v23 = vld [vmem:[%s14380_s13 + $0x590] ss:$28 sps:$4 sm:$0xff]   ;;  %v10162_v38 = vld [vmem:[%s14380_s13 + $0x208] ss:$28 sps:$4 sm:$0xff]  }
 0xede   :  { %7007 = vmatprep.subr.bf16.mxu1 %v10109_v37  ;;  %v10163_v37 = vld [vmem:[%s14380_s13 + $0x3d0] ss:$28 sps:$4 sm:$0xff]  }
 0xee0   :  { %6844 = vmatpush1.bf16.msra.mxu0 %v10110_v50  ;;  %v10164_v50 = vld [vmem:[%s14380_s13 + $0x244] ss:$28 sps:$4 sm:$0xff]  }
 0xee1   :  { %7008 = vmatpush1.bf16.msra.mxu1 %v10111_v39  ;;  %6845 = vmatprep.subr.bf16.mxu0 %v10112_v53  ;;  %v10165_v39 = vld [vmem:[%s14380_s13 + $0x5c8] ss:$28 sps:$4 sm:$0xff]   ;;  %v10166_v53 = vld [vmem:[%s14380_s13 + $0x240] ss:$28 sps:$4 sm:$0xff]  }
 0xee2   :  { %7009 = vmatprep.subr.bf16.mxu1 %v10113_v54  ;;  %v10167_v54 = vld [vmem:[%s14380_s13 + $0x408] ss:$28 sps:$4 sm:$0xff]  }
 0xee4   :  { %6846 = vmatpush1.bf16.msra.mxu0 %v10114_v35  ;;  %v10168_v35 = vld [vmem:[%s14380_s13 + $0x27c] ss:$28 sps:$4 sm:$0xff]  }
 0xee5   :  { %7010 = vmatpush1.bf16.msra.mxu1 %v10115_v57  ;;  %6847 = vmatprep.subr.bf16.mxu0 %v10116_v59  ;;  %v10169_v57 = vld [vmem:[%s14380_s13 + $0x600] ss:$28 sps:$4 sm:$0xff]   ;;  %v10170_v59 = vld [vmem:[%s14380_s13 + $0x278] ss:$28 sps:$4 sm:$0xff]  }
 0xee6   :  { %7011 = vmatprep.subr.bf16.mxu1 %v10117_v60  ;;  %v10171_v60 = vld [vmem:[%s14380_s13 + $0x440] ss:$28 sps:$4 sm:$0xff]  }
 0xee8   :  { %6848 = vmatpush1.bf16.msra.mxu0 %v10118_v52  ;;  %v10172_v52 = vld [vmem:[%s14380_s13 + $0x2b4] ss:$28 sps:$4 sm:$0xff]  }
 0xee9   :  { %7012 = vmatpush1.bf16.msra.mxu1 %v10119_v44  ;;  %6849 = vmatprep.subr.bf16.mxu0 %v10120_v56  ;;  %v10174_v44 = vld [vmem:[%s14380_s13 + $0x2b0] ss:$28 sps:$4 sm:$0xff]   ;;  %v10175_v56 = vld [vmem:[%s14380_s13 + $0x478] ss:$28 sps:$4 sm:$0xff]  }
 0xeea   :  { %7013 = vmatprep.subr.bf16.mxu1 %v10121_v55  ;;  %v10176_v55 = vld [vmem:[%s14380_s13 + $0x2ec] ss:$28 sps:$4 sm:$0xff]  }
 0xeec   :  { %6850 = vmatpush1.bf16.msra.mxu0 %v10122_v46  ;;  %v10177_v46 = vld [vmem:[%s14380_s13 + $0x670] ss:$28 sps:$4 sm:$0xff]  }
 0xeed   :  { %7014 = vmatpush1.bf16.msra.mxu1 %v10123_v30  ;;  %7024 = vmatprep.subr.bf16.mxu0 %v10124_v5  ;;  %v10178_v30 = vld [vmem:[%s14380_s13 + $0x2e8] ss:$28 sps:$4 sm:$0xff]   ;;  %v10179_v5 = vld [vmem:[%s14380_s13 + $0x4b0] ss:$28 sps:$4 sm:$0xff]  }
 0xeee   :  { %8444 = vmatprep.subr.bf16.mxu1 %v10125_v3  ;;  %v10180_v3 = vld [vmem:[%s14380_s13 + $0x324] ss:$28 sps:$4 sm:$0xff]  }
 0xeef   :  { %6852 = vmatmul.mubr.bf16.vlgmr.msra.gmra.mrb[72].mxu0 %v13755_v24 }
 0xef0   :  { %7016 = vmatmul.mubr.bf16.vlgmr.msra.gmra.mrb[92].mxu1 %v13755_v24  ;;  %7025 = vmatpush1.bf16.msra.mxu0 %v10126_v7  ;;  %v10181_v7 = vld [vmem:[%s14380_s13 + $0x6a8] ss:$28 sps:$4 sm:$0xff]  }
 0xef1   :  { %7056 = vmatprep.mubr.bf16.mxu0 %v13135_v40  ;;  %8445 = vmatpush3.bf16.msra.mxu1 %v10127_v8  ;;  %v10182_v8 = vld [vmem:[%s14380_s13 + $0x320] ss:$28 sps:$4 sm:$0xff]  }
 0xef2   :  { %7220 = vmatprep.mubr.bf16.mxu1 %v13135_v40  ;;  %7026 = vmatprep.subr.bf16.mxu0 %v10128_v0  ;;  %v10132_v40 = vld [vmem:[%s14380_s13 + $0x84] ss:$28 sps:$4 sm:$0xff]  }
 0xef3   :  { %8446 = vmatprep.subr.bf16.mxu1 %v10129_v13  ;;  %v10183_v0 = vld [vmem:[%s14380_s13 + $0x4e8] ss:$28 sps:$4 sm:$0xff]   ;;  %v10184_v13 = vld [vmem:[%s14380_s13 + $0x35c] ss:$28 sps:$4 sm:$0xff]  }
 0xef4   :  { %7027 = vmatpush1.bf16.msra.mxu0 %v10130_v15  ;;  %v10185_v15 = vld [vmem:[%s14380_s13 + $0x6e0] ss:$28 sps:$4 sm:$0xff]  }
 0xef5   :  { %8447 = vmatpush3.bf16.msra.mxu1 %v10131_v22  ;;  %7028 = vmatprep.subr.bf16.mxu0 %v10132_v40  ;;  %v10186_v22 = vld [vmem:[%s14380_s13 + $0x358] ss:$28 sps:$4 sm:$0xff]   ;;  %v10187_v40 = vld [vmem:[%s14380_s13 + $0x520] ss:$28 sps:$4 sm:$0xff]  }
 0xef6   :  { %8448 = vmatprep.subr.bf16.mxu1 %v10133_v21  ;;  %v10188_v21 = vld [vmem:[%s14380_s13 + $0x394] ss:$28 sps:$4 sm:$0xff]  }
 0xef8   :  { %7029 = vmatpush1.bf16.msra.mxu0 %v10134_v16  ;;  %v10189_v16 = vld [vmem:[%s14380_s13 + $0x8d8] ss:$28 sps:$4 sm:$0xff]  }
 0xef9   :  { %8449 = vmatpush3.bf16.msra.mxu1 %v10135_v10  ;;  %7030 = vmatprep.subr.bf16.mxu0 %v10136_v25  ;;  %v10190_v10 = vld [vmem:[%s14380_s13 + $0x390] ss:$28 sps:$4 sm:$0xff]   ;;  %v10191_v25 = vld [vmem:[%s14380_s13 + $0x718] ss:$28 sps:$4 sm:$0xff]  }
 0xefa   :  { %8450 = vmatprep.subr.bf16.mxu1 %v10137_v29  ;;  %v10193_v29 = vld [vmem:[%s14380_s13 + $0x910] ss:$28 sps:$4 sm:$0xff]  }
 0xefc   :  { %7031 = vmatpush1.bf16.msra.mxu0 %v10138_v11  ;;  %v10195_v11 = vld [vmem:[%s14380_s13 + $0x750] ss:$28 sps:$4 sm:$0xff]  }
 0xefd   :  { %8451 = vmatpush3.bf16.msra.mxu1 %v10139_v12  ;;  %7032 = vmatprep.subr.bf16.mxu0 %v10140_v45  ;;  %v10196_v12 = vld [vmem:[%s14380_s13 + $0x404] ss:$28 sps:$4 sm:$0xff]  }
 0xefe   :  { %8452 = vmatprep.subr.bf16.mxu1 %v10141_v41  ;;  %v10197_v45 = vld [vmem:[%s14380_s13 + $0x948] ss:$28 sps:$4 sm:$0xff]   ;;  %v10198_v41 = vld [vmem:[%s14380_s13 + $0x400] ss:$28 sps:$4 sm:$0xff]  }
 0xf00   :  { %7033 = vmatpush1.bf16.msra.mxu0 %v10142_v26  ;;  %v10199_v26 = vld [vmem:[%s14380_s13 + $0x788] ss:$28 sps:$4 sm:$0xff]  }
 0xf01   :  { %8453 = vmatpush3.bf16.msra.mxu1 %v10143_v1  ;;  %7034 = vmatprep.subr.bf16.mxu0 %v10144_v62  ;;  %v10200_v1 = vld [vmem:[%s14380_s13 + $0x43c] ss:$28 sps:$4 sm:$0xff]  }
 0xf02   :  { %8454 = vmatprep.subr.bf16.mxu1 %v10145_v20  ;;  %v10201_v62 = vld [vmem:[%s14380_s13 + $0x980] ss:$28 sps:$4 sm:$0xff]   ;;  %v10202_v20 = vld [vmem:[%s14380_s13 + $0x438] ss:$28 sps:$4 sm:$0xff]  }
 0xf04   :  { %7035 = vmatpush1.bf16.msra.mxu0 %v10146_v31  ;;  %v10203_v31 = vld [vmem:[%s14380_s13 + $0x7c0] ss:$28 sps:$4 sm:$0xff]  }
 0xf05   :  { %8455 = vmatpush3.bf16.msra.mxu1 %v10147_v19  ;;  %7036 = vmatprep.subr.bf16.mxu0 %v10148_v34  ;;  %v10204_v19 = vld [vmem:[%s14380_s13 + $0x474] ss:$28 sps:$4 sm:$0xff]  }
 0xf06   :  { %8456 = vmatprep.subr.bf16.mxu1 %v10149_v27  ;;  %v10205_v34 = vld [vmem:[%s14380_s13 + $0x9b8] ss:$28 sps:$4 sm:$0xff]   ;;  %v10206_v27 = vld [vmem:[%s14380_s13 + $0x470] ss:$28 sps:$4 sm:$0xff]  }
 0xf08   :  { %7037 = vmatpush1.bf16.msra.mxu0 %v10150_v28  ;;  %v10207_v28 = vld [vmem:[%s14380_s13 + $0x7f8] ss:$28 sps:$4 sm:$0xff]  }
 0xf09   :  { %8457 = vmatpush3.bf16.msra.mxu1 %v10151_v51  ;;  %7038 = vmatprep.subr.bf16.mxu0 %v10152_v4  ;;  %v10208_v51 = vld [vmem:[%s14380_s13 + $0x4ac] ss:$28 sps:$4 sm:$0xff]  }
 0xf0a   :  { %8458 = vmatprep.subr.bf16.mxu1 %v10153_v17  ;;  %v10209_v4 = vld [vmem:[%s14380_s13 + $0x9f0] ss:$28 sps:$4 sm:$0xff]   ;;  %v10210_v17 = vld [vmem:[%s14380_s13 + $0x4a8] ss:$28 sps:$4 sm:$0xff]  }
 0xf0c   :  { %7039 = vmatpush1.bf16.msra.mxu0 %v10154_v18  ;;  %v10211_v18 = vld [vmem:[%s14380_s13 + $0x830] ss:$28 sps:$4 sm:$0xff]  }
 0xf0d   :  { %8459 = vmatpush3.bf16.msra.mxu1 %v10155_v63  ;;  %7040 = vmatprep.subr.bf16.mxu0 %v10156_v61  ;;  %v10212_v63 = vld [vmem:[%s14380_s13 + $0x4e4] ss:$28 sps:$4 sm:$0xff]  }
 0xf0e   :  { %8466 = vmatprep.subr.bf16.mxu1 %v10157_v49  ;;  %v10213_v61 = vld [vmem:[%s14380_s13 + $0xa28] ss:$28 sps:$4 sm:$0xff]   ;;  %v10214_v49 = vld [vmem:[%s14380_s13 + $0x4e0] ss:$28 sps:$4 sm:$0xff]  }
 0xf10   :  { %7221 = vmatmul.mubr.bf16.vlgmr.msra.gmra.mrb[96].mxu1 %v13139_v9  ;;  %7041 = vmatpush1.bf16.msra.mxu0 %v10158_v14  ;;  %v10215_v14 = vld [vmem:[%s14380_s13 + $0x868] ss:$28 sps:$4 sm:$0xff]  }
 0xf11   :  { %8467 = vmatpush3.bf16.msra.mxu1 %v10159_v33  ;;  %7260 = vmatprep.mubr.bf16.mxu1 %v13141_v47  ;;  %v10216_v33 = vld [vmem:[%s14380_s13 + $0x51c] ss:$28 sps:$4 sm:$0xff]  }
 0xf12   :  { %7042 = vmatprep.subr.bf16.mxu0 %v10160_v6  ;;  %8468 = vmatprep.subr.bf16.mxu1 %v10161_v23  ;;  %v10217_v6 = vld [vmem:[%s14380_s13 + $0xa60] ss:$28 sps:$4 sm:$0xff]   ;;  %v10218_v23 = vld [vmem:[%s14380_s13 + $0x518] ss:$28 sps:$4 sm:$0xff]  }
 0xf14   :  { %7043 = vmatpush1.bf16.msra.mxu0 %v10162_v38  ;;  %v10219_v38 = vld [vmem:[%s14380_s13 + $0x8a0] ss:$28 sps:$4 sm:$0xff]  }
 0xf15   :  { %8469 = vmatpush3.bf16.msra.mxu1 %v10163_v37  ;;  %7044 = vmatprep.subr.bf16.mxu0 %v10164_v50  ;;  %v10220_v37 = vld [vmem:[%s14380_s13 + $0x554] ss:$28 sps:$4 sm:$0xff]  }
 0xf16   :  { %8470 = vmatprep.subr.bf16.mxu1 %v10165_v39  ;;  %v10221_v50 = vld [vmem:[%s14380_s13 + $0xc58] ss:$28 sps:$4 sm:$0xff]   ;;  %v10222_v39 = vld [vmem:[%s14380_s13 + $0x550] ss:$28 sps:$4 sm:$0xff]  }
 0xf18   :  { %7045 = vmatpush1.bf16.msra.mxu0 %v10166_v53  ;;  %v10223_v53 = vld [vmem:[%s14380_s13 + $0xa98] ss:$28 sps:$4 sm:$0xff]  }
 0xf19   :  { %8471 = vmatpush3.bf16.msra.mxu1 %v10167_v54  ;;  %7046 = vmatprep.subr.bf16.mxu0 %v10168_v35  ;;  %v10224_v54 = vld [vmem:[%s14380_s13 + $0x58c] ss:$28 sps:$4 sm:$0xff]  }
 0xf1a   :  { %8472 = vmatprep.subr.bf16.mxu1 %v10169_v57  ;;  %v10225_v35 = vld [vmem:[%s14380_s13 + $0xc90] ss:$28 sps:$4 sm:$0xff]   ;;  %v10226_v57 = vld [vmem:[%s14380_s13 + $0x588] ss:$28 sps:$4 sm:$0xff]  }
 0xf1c   :  { %7047 = vmatpush1.bf16.msra.mxu0 %v10170_v59  ;;  %v10227_v59 = vld [vmem:[%s14380_s13 + $0xad0] ss:$28 sps:$4 sm:$0xff]  }
 0xf1d   :  { %8473 = vmatpush3.bf16.msra.mxu1 %v10171_v60  ;;  %7048 = vmatprep.subr.bf16.mxu0 %v10172_v52  ;;  %v10228_v60 = vld [vmem:[%s14380_s13 + $0x5c4] ss:$28 sps:$4 sm:$0xff]  }
 0xf1e   :  { %8474 = vmatprep.subr.bf16.mxu1 %v10173_v43  ;;  %v10229_v52 = vld [vmem:[%s14380_s13 + $0xcc8] ss:$28 sps:$4 sm:$0xff]   ;;  %v10230_v43 = vld [vmem:[%s14380_s13 + $0x5c0] ss:$28 sps:$4 sm:$0xff]  }
 0xf20   :  { %7049 = vmatpush1.bf16.msra.mxu0 %v10174_v44  ;;  %v10231_v44 = vld [vmem:[%s14380_s13 + $0xb08] ss:$28 sps:$4 sm:$0xff]  }
 0xf21   :  { %8475 = vmatpush3.bf16.msra.mxu1 %v10175_v56  ;;  %7050 = vmatprep.subr.bf16.mxu0 %v10176_v55  ;;  %v10232_v56 = vld [vmem:[%s14380_s13 + $0x5fc] ss:$28 sps:$4 sm:$0xff]  }
 0xf22   :  { %8476 = vmatprep.subr.bf16.mxu1 %v10177_v46  ;;  %v10233_v55 = vld [vmem:[%s14380_s13 + $0xd00] ss:$28 sps:$4 sm:$0xff]   ;;  %v10234_v46 = vld [vmem:[%s14380_s13 + $0x5f8] ss:$28 sps:$4 sm:$0xff]  }
 0xf24   :  { %7051 = vmatpush1.bf16.msra.mxu0 %v10178_v30  ;;  %v10235_v30 = vld [vmem:[%s14380_s13 + $0xb40] ss:$28 sps:$4 sm:$0xff]  }
 0xf25   :  { %8477 = vmatpush3.bf16.msra.mxu1 %v10179_v5  ;;  %7052 = vmatprep.subr.bf16.mxu0 %v10180_v3  ;;  %v10236_v5 = vld [vmem:[%s14380_s13 + $0x634] ss:$28 sps:$4 sm:$0xff]  }
 0xf26   :  { %8478 = vmatprep.subr.bf16.mxu1 %v10181_v7  ;;  %v10237_v3 = vld [vmem:[%s14380_s13 + $0xd38] ss:$28 sps:$4 sm:$0xff]   ;;  %v10238_v7 = vld [vmem:[%s14380_s13 + $0x630] ss:$28 sps:$4 sm:$0xff]  }
 0xf28   :  { %7053 = vmatpush1.bf16.msra.mxu0 %v10182_v8  ;;  %v10239_v8 = vld [vmem:[%s14380_s13 + $0xb78] ss:$28 sps:$4 sm:$0xff]  }
 0xf29   :  { %8479 = vmatpush3.bf16.msra.mxu1 %v10183_v0  ;;  %7054 = vmatprep.subr.bf16.mxu0 %v10184_v13  ;;  %v10240_v0 = vld [vmem:[%s14380_s13 + $0x66c] ss:$28 sps:$4 sm:$0xff]  }
 0xf2a   :  { %8480 = vmatprep.subr.bf16.mxu1 %v10185_v15  ;;  %v10241_v13 = vld [vmem:[%s14380_s13 + $0xd70] ss:$28 sps:$4 sm:$0xff]   ;;  %v10242_v15 = vld [vmem:[%s14380_s13 + $0x668] ss:$28 sps:$4 sm:$0xff]  }
 0xf2c   :  { %7055 = vmatpush1.bf16.msra.mxu0 %v10186_v22  ;;  %v10243_v22 = vld [vmem:[%s14380_s13 + $0xbb0] ss:$28 sps:$4 sm:$0xff]  }
 0xf2d   :  { %8481 = vmatpush3.bf16.msra.mxu1 %v10187_v40  ;;  %7065 = vmatprep.subr.bf16.mxu0 %v10188_v21  ;;  %v10244_v40 = vld [vmem:[%s14380_s13 + $0x6a4] ss:$28 sps:$4 sm:$0xff]  }
 0xf2e   :  { %8488 = vmatprep.subr.bf16.mxu1 %v10189_v16  ;;  %v10245_v21 = vld [vmem:[%s14380_s13 + $0xda8] ss:$28 sps:$4 sm:$0xff]   ;;  %v10246_v16 = vld [vmem:[%s14380_s13 + $0x6a0] ss:$28 sps:$4 sm:$0xff]  }
 0xf2f   :  { %7057 = vmatmul.mubr.bf16.vlgmr.msra.gmra.mrb[76].mxu0 %v13139_v9  ;;  %v10192_v9 = vld [vmem:[%s14380_s13 + $0x3cc] ss:$28 sps:$4 sm:$0xff]  }
 0xf30   :  { %7261 = vmatmul.mubr.bf16.vlgmr.msra.gmra.mrb[100].mxu1 %v13337_v58  ;;  %7066 = vmatpush1.bf16.msra.mxu0 %v10190_v10  ;;  %v10247_v10 = vld [vmem:[%s14380_s13 + $0xbe8] ss:$28 sps:$4 sm:$0xff]  }
 0xf31   :  { %7097 = vmatprep.mubr.bf16.mxu0 %v13141_v47  ;;  %8489 = vmatpush3.bf16.msra.mxu1 %v10191_v25  ;;  %v10194_v47 = vld [vmem:[%s14380_s13 + $0x3c8] ss:$28 sps:$4 sm:$0xff]   ;;  %v10248_v25 = vld [vmem:[%s14380_s13 + $0x6dc] ss:$28 sps:$4 sm:$0xff]  }
 0xf32   :  { %7300 = vmatprep.mubr.bf16.mxu1 %v13345_v42  ;;  %7067 = vmatprep.subr.bf16.mxu0 %v10192_v9  ;;  %v10249_v9 = vld [vmem:[%s14380_s13 + $0xde0] ss:$28 sps:$4 sm:$0xff]  }
 0xf33   :  { %8490 = vmatprep.subr.bf16.mxu1 %v10193_v29  ;;  %v10250_v29 = vld [vmem:[%s14380_s13 + $0x6d8] ss:$28 sps:$4 sm:$0xff]  }
 0xf34   :  { %7068 = vmatpush1.bf16.msra.mxu0 %v10194_v47  ;;  %v10251_v47 = vld [vmem:[%s14380_s13 + $0xc20] ss:$28 sps:$4 sm:$0xff]  }
 0xf35   :  { %8491 = vmatpush3.bf16.msra.mxu1 %v10195_v11  ;;  %7069 = vmatprep.subr.bf16.mxu0 %v10196_v12  ;;  %v10252_v11 = vld [vmem:[%s14380_s13 + $0x714] ss:$28 sps:$4 sm:$0xff]  }
 0xf36   :  { %8492 = vmatprep.subr.bf16.mxu1 %v10197_v45  ;;  %v10253_v12 = vld [vmem:[%s14380_s13 + $0x710] ss:$28 sps:$4 sm:$0xff]  }
 0xf37   :  { %v10254_v45 = vld [vmem:[%s14380_s13 + $0x74c] ss:$28 sps:$4 sm:$0xff]  }
 0xf38   :  { %7070 = vmatpush1.bf16.msra.mxu0 %v10198_v41  ;;  %v10255_v41 = vld [vmem:[%s14380_s13 + $0x748] ss:$28 sps:$4 sm:$0xff]  }
 0xf39   :  { %8493 = vmatpush3.bf16.msra.mxu1 %v10199_v26  ;;  %7071 = vmatprep.subr.bf16.mxu0 %v10200_v1  ;;  %v10257_v26 = vld [vmem:[%s14380_s13 + $0x780] ss:$28 sps:$4 sm:$0xff]   ;;  %v10259_v1 = vld [vmem:[%s14380_s13 + $0x7b8] ss:$28 sps:$4 sm:$0xff]  }
 0xf3a   :  { %8494 = vmatprep.subr.bf16.mxu1 %v10201_v62  ;;  %v10260_v62 = vld [vmem:[%s14380_s13 + $0x7f4] ss:$28 sps:$4 sm:$0xff]  }
 0xf3c   :  { %7072 = vmatpush1.bf16.msra.mxu0 %v10202_v20  ;;  %v10261_v20 = vld [vmem:[%s14380_s13 + $0x7f0] ss:$28 sps:$4 sm:$0xff]  }
 0xf3d   :  { %8495 = vmatpush3.bf16.msra.mxu1 %v10203_v31  ;;  %7073 = vmatprep.subr.bf16.mxu0 %v10204_v19  ;;  %v10262_v31 = vld [vmem:[%s14380_s13 + $0x82c] ss:$28 sps:$4 sm:$0xff]  }
 0xf3e   :  { %8496 = vmatprep.subr.bf16.mxu1 %v10205_v34  ;;  %v10263_v19 = vld [vmem:[%s14380_s13 + $0x828] ss:$28 sps:$4 sm:$0xff]  }
 0xf3f   :  { %v10264_v34 = vld [vmem:[%s14380_s13 + $0x864] ss:$28 sps:$4 sm:$0xff]  }
 0xf40   :  { %7074 = vmatpush1.bf16.msra.mxu0 %v10206_v27  ;;  %v10265_v27 = vld [vmem:[%s14380_s13 + $0x860] ss:$28 sps:$4 sm:$0xff]  }
 0xf41   :  { %8497 = vmatpush3.bf16.msra.mxu1 %v10207_v28  ;;  %7075 = vmatprep.subr.bf16.mxu0 %v10208_v51  ;;  %v10266_v28 = vld [vmem:[%s14380_s13 + $0x89c] ss:$28 sps:$4 sm:$0xff]  }
 0xf42   :  { %8498 = vmatprep.subr.bf16.mxu1 %v10209_v4  ;;  %v10267_v51 = vld [vmem:[%s14380_s13 + $0x898] ss:$28 sps:$4 sm:$0xff]  }
 0xf43   :  { %v10268_v4 = vld [vmem:[%s14380_s13 + $0x8d4] ss:$28 sps:$4 sm:$0xff]  }
 0xf44   :  { %7076 = vmatpush1.bf16.msra.mxu0 %v10210_v17  ;;  %v10269_v17 = vld [vmem:[%s14380_s13 + $0x8d0] ss:$28 sps:$4 sm:$0xff]  }
 0xf45   :  { %8499 = vmatpush3.bf16.msra.mxu1 %v10211_v18  ;;  %7077 = vmatprep.subr.bf16.mxu0 %v10212_v63  ;;  %v10270_v18 = vld [vmem:[%s14380_s13 + $0x90c] ss:$28 sps:$4 sm:$0xff]  }
 0xf46   :  { %8500 = vmatprep.subr.bf16.mxu1 %v10213_v61  ;;  %v10271_v63 = vld [vmem:[%s14380_s13 + $0x908] ss:$28 sps:$4 sm:$0xff]  }
 0xf47   :  { %v10272_v61 = vld [vmem:[%s14380_s13 + $0x944] ss:$28 sps:$4 sm:$0xff]  }
 0xf48   :  { %7078 = vmatpush1.bf16.msra.mxu0 %v10214_v49  ;;  %v10273_v49 = vld [vmem:[%s14380_s13 + $0x940] ss:$28 sps:$4 sm:$0xff]  }
 0xf49   :  { %8501 = vmatpush3.bf16.msra.mxu1 %v10215_v14  ;;  %7079 = vmatprep.subr.bf16.mxu0 %v10216_v33  ;;  %v10274_v14 = vld [vmem:[%s14380_s13 + $0x97c] ss:$28 sps:$4 sm:$0xff]  }
 0xf4a   :  { %8502 = vmatprep.subr.bf16.mxu1 %v10217_v6  ;;  %v10275_v33 = vld [vmem:[%s14380_s13 + $0x978] ss:$28 sps:$4 sm:$0xff]  }
 0xf4b   :  { %v10276_v6 = vld [vmem:[%s14380_s13 + $0x9b4] ss:$28 sps:$4 sm:$0xff]  }
 0xf4c   :  { %7080 = vmatpush1.bf16.msra.mxu0 %v10218_v23  ;;  %v10277_v23 = vld [vmem:[%s14380_s13 + $0x9b0] ss:$28 sps:$4 sm:$0xff]  }
 0xf4d   :  { %8503 = vmatpush3.bf16.msra.mxu1 %v10219_v38  ;;  %7081 = vmatprep.subr.bf16.mxu0 %v10220_v37  ;;  %v10278_v38 = vld [vmem:[%s14380_s13 + $0x9ec] ss:$28 sps:$4 sm:$0xff]  }
 0xf4e   :  { %8510 = vmatprep.subr.bf16.mxu1 %v10221_v50  ;;  %v10279_v37 = vld [vmem:[%s14380_s13 + $0x9e8] ss:$28 sps:$4 sm:$0xff]  }
 0xf4f   :  { %v10280_v50 = vld [vmem:[%s14380_s13 + $0xa24] ss:$28 sps:$4 sm:$0xff]  }
 0xf50   :  { %7301 = vmatmul.mubr.bf16.vlgmr.msra.gmra.mrb[104].mxu1 %v13537_v36  ;;  %7082 = vmatpush1.bf16.msra.mxu0 %v10222_v39  ;;  %v10281_v39 = vld [vmem:[%s14380_s13 + $0xa20] ss:$28 sps:$4 sm:$0xff]  }
 0xf51   :  { %8511 = vmatpush3.bf16.msra.mxu1 %v10223_v53  ;;  %7340 = vmatprep.mubr.bf16.mxu1 %v13548_v48  ;;  %v10282_v53 = vld [vmem:[%s14380_s13 + $0xa5c] ss:$28 sps:$4 sm:$0xff]  }
 0xf52   :  { %7083 = vmatprep.subr.bf16.mxu0 %v10224_v54  ;;  %8512 = vmatprep.subr.bf16.mxu1 %v10225_v35  ;;  %v10283_v54 = vld [vmem:[%s14380_s13 + $0xa58] ss:$28 sps:$4 sm:$0xff]  }
 0xf53   :  { %v10284_v35 = vld [vmem:[%s14380_s13 + $0xa94] ss:$28 sps:$4 sm:$0xff]  }
 0xf54   :  { %7084 = vmatpush1.bf16.msra.mxu0 %v10226_v57  ;;  %v10285_v57 = vld [vmem:[%s14380_s13 + $0xa90] ss:$28 sps:$4 sm:$0xff]  }
 0xf55   :  { %8513 = vmatpush3.bf16.msra.mxu1 %v10227_v59  ;;  %7085 = vmatprep.subr.bf16.mxu0 %v10228_v60  ;;  %v10286_v59 = vld [vmem:[%s14380_s13 + $0xacc] ss:$28 sps:$4 sm:$0xff]  }
 0xf56   :  { %8514 = vmatprep.subr.bf16.mxu1 %v10229_v52  ;;  %v10287_v60 = vld [vmem:[%s14380_s13 + $0xac8] ss:$28 sps:$4 sm:$0xff]   ;;  %v10289_v52 = vld [vmem:[%s14380_s13 + $0xb00] ss:$28 sps:$4 sm:$0xff]  }
 0xf58   :  { %7086 = vmatpush1.bf16.msra.mxu0 %v10230_v43  ;;  %v10291_v43 = vld [vmem:[%s14380_s13 + $0xb38] ss:$28 sps:$4 sm:$0xff]  }
 0xf59   :  { %8515 = vmatpush3.bf16.msra.mxu1 %v10231_v44  ;;  %7087 = vmatprep.subr.bf16.mxu0 %v10232_v56  ;;  %v10292_v44 = vld [vmem:[%s14380_s13 + $0xb74] ss:$28 sps:$4 sm:$0xff]  }
 0xf5a   :  { %8516 = vmatprep.subr.bf16.mxu1 %v10233_v55  ;;  %v10293_v56 = vld [vmem:[%s14380_s13 + $0xb70] ss:$28 sps:$4 sm:$0xff]  }
 0xf5b   :  { %v10294_v55 = vld [vmem:[%s14380_s13 + $0xbac] ss:$28 sps:$4 sm:$0xff]  }
 0xf5c   :  { %7088 = vmatpush1.bf16.msra.mxu0 %v10234_v46 }
 0xf5d   :  { %8517 = vmatpush3.bf16.msra.mxu1 %v10235_v30  ;;  %7089 = vmatprep.subr.bf16.mxu0 %v10236_v5 }
 0xf5e   :  { %8518 = vmatprep.subr.bf16.mxu1 %v10237_v3 }
 0xf60   :  { %7090 = vmatpush1.bf16.msra.mxu0 %v10238_v7 }
 0xf61   :  { %8519 = vmatpush3.bf16.msra.mxu1 %v10239_v8  ;;  %7091 = vmatprep.subr.bf16.mxu0 %v10240_v0 }
 0xf62   :  { %8520 = vmatprep.subr.bf16.mxu1 %v10241_v13 }
 0xf64   :  { %7092 = vmatpush1.bf16.msra.mxu0 %v10242_v15  ;;  %v10295_v15 = vld [vmem:[%s14380_s13 + $0xba8] ss:$28 sps:$4 sm:$0xff]  }
 0xf65   :  { %8521 = vmatpush3.bf16.msra.mxu1 %v10243_v22  ;;  %7093 = vmatprep.subr.bf16.mxu0 %v10244_v40 }
 0xf66   :  { %8522 = vmatprep.subr.bf16.mxu1 %v10245_v21 }
 0xf68   :  { %7094 = vmatpush1.bf16.msra.mxu0 %v10246_v16 }
 0xf69   :  { %8523 = vmatpush3.bf16.msra.mxu1 %v10247_v10  ;;  %7095 = vmatprep.subr.bf16.mxu0 %v10248_v25  ;;  %v10296_v10 = vld [vmem:[%s14380_s13 + $0xbe4] ss:$28 sps:$4 sm:$0xff]  }
 0xf6a   :  { %8524 = vmatprep.subr.bf16.mxu1 %v10249_v9 }
 0xf6c   :  { %7096 = vmatpush1.bf16.msra.mxu0 %v10250_v29 }
 0xf6d   :  { %8525 = vmatpush3.bf16.msra.mxu1 %v10251_v47  ;;  %7106 = vmatprep.subr.bf16.mxu0 %v10252_v11 }
 0xf6f   :  { %7098 = vmatmul.mubr.bf16.vlgmr.msra.gmra.mrb[76].mxu0 %v13337_v58  ;;  %v10256_v58 = vld [vmem:[%s14380_s13 + $0x784] ss:$28 sps:$4 sm:$0xff]  }
 0xf70   :  { %7341 = vmatmul.mubr.bf16.vlgmr.msra.gmra.mrb[108].mxu1 %v13755_v24  ;;  %7107 = vmatpush1.bf16.msra.mxu0 %v10253_v12 }
 0xf71   :  { %7138 = vmatprep.mubr.bf16.mxu0 %v13345_v42  ;;  %7108 = vmatprep.subr.bf16.mxu0 %v10254_v45  ;;  %v10258_v42 = vld [vmem:[%s14380_s13 + $0x7bc] ss:$28 sps:$4 sm:$0xff]  }
 0xf74   :  { %7109 = vmatpush1.bf16.msra.mxu0 %v10255_v41  ;;  %v10297_v41 = vld [vmem:[%s14380_s13 + $0xbe0] ss:$28 sps:$4 sm:$0xff]  }
 0xf75   :  { %7110 = vmatprep.subr.bf16.mxu0 %v10256_v58 }
 0xf78   :  { %7111 = vmatpush1.bf16.msra.mxu0 %v10257_v26  ;;  %v10298_v26 = vld [vmem:[%s14380_s13 + $0xc1c] ss:$28 sps:$4 sm:$0xff]  }
 0xf79   :  { %7112 = vmatprep.subr.bf16.mxu0 %v10258_v42  ;;  %v10299_v42 = vld [vmem:[%s14380_s13 + $0xc18] ss:$28 sps:$4 sm:$0xff]  }
 0xf7c   :  { %7113 = vmatpush1.bf16.msra.mxu0 %v10259_v1  ;;  %v10300_v1 = vld [vmem:[%s14380_s13 + $0xc54] ss:$28 sps:$4 sm:$0xff]  }
 0xf7d   :  { %7114 = vmatprep.subr.bf16.mxu0 %v10260_v62  ;;  %v10301_v62 = vld [vmem:[%s14380_s13 + $0xc50] ss:$28 sps:$4 sm:$0xff]  }
 0xf80   :  { %7115 = vmatpush1.bf16.msra.mxu0 %v10261_v20  ;;  %v10302_v20 = vld [vmem:[%s14380_s13 + $0xc8c] ss:$28 sps:$4 sm:$0xff]  }
 0xf81   :  { %7116 = vmatprep.subr.bf16.mxu0 %v10262_v31 }
 0xf84   :  { %7117 = vmatpush1.bf16.msra.mxu0 %v10263_v19 }
 0xf85   :  { %7118 = vmatprep.subr.bf16.mxu0 %v10264_v34 }
 0xf88   :  { %7119 = vmatpush1.bf16.msra.mxu0 %v10265_v27  ;;  %v10303_v27 = vld [vmem:[%s14380_s13 + $0xc88] ss:$28 sps:$4 sm:$0xff]  }
 0xf89   :  { %7120 = vmatprep.subr.bf16.mxu0 %v10266_v28 }
 0xf8c   :  { %7121 = vmatpush1.bf16.msra.mxu0 %v10267_v51 }
 0xf8d   :  { %7122 = vmatprep.subr.bf16.mxu0 %v10268_v4  ;;  %v10304_v4 = vld [vmem:[%s14380_s13 + $0xcc4] ss:$28 sps:$4 sm:$0xff]  }
 0xf90   :  { %7123 = vmatpush1.bf16.msra.mxu0 %v10269_v17 }
 0xf91   :  { %7124 = vmatprep.subr.bf16.mxu0 %v10270_v18 }
 0xf94   :  { %7125 = vmatpush1.bf16.msra.mxu0 %v10271_v63 }
 0xf95   :  { %7126 = vmatprep.subr.bf16.mxu0 %v10272_v61  ;;  %v10305_v61 = vld [vmem:[%s14380_s13 + $0xcc0] ss:$28 sps:$4 sm:$0xff]  }
 0xf98   :  { %7127 = vmatpush1.bf16.msra.mxu0 %v10273_v49  ;;  %v10306_v49 = vld [vmem:[%s14380_s13 + $0xcfc] ss:$28 sps:$4 sm:$0xff]  }
 0xf99   :  { %7128 = vmatprep.subr.bf16.mxu0 %v10274_v14  ;;  %v10307_v14 = vld [vmem:[%s14380_s13 + $0xcf8] ss:$28 sps:$4 sm:$0xff]  }
 0xf9c   :  { %7129 = vmatpush1.bf16.msra.mxu0 %v10275_v33  ;;  %v10308_v33 = vld [vmem:[%s14380_s13 + $0xd34] ss:$28 sps:$4 sm:$0xff]  }
 0xf9d   :  { %7130 = vmatprep.subr.bf16.mxu0 %v10276_v6 }
 0xfa0   :  { %7131 = vmatpush1.bf16.msra.mxu0 %v10277_v23  ;;  %v10309_v23 = vld [vmem:[%s14380_s13 + $0xd30] ss:$28 sps:$4 sm:$0xff]  }
 0xfa1   :  { %7132 = vmatprep.subr.bf16.mxu0 %v10278_v38 }
 0xfa4   :  { %7133 = vmatpush1.bf16.msra.mxu0 %v10279_v37 }
 0xfa5   :  { %7134 = vmatprep.subr.bf16.mxu0 %v10280_v50  ;;  %v10310_v50 = vld [vmem:[%s14380_s13 + $0xd6c] ss:$28 sps:$4 sm:$0xff]  }
 0xfa8   :  { %7135 = vmatpush1.bf16.msra.mxu0 %v10281_v39 }
 0xfa9   :  { %7136 = vmatprep.subr.bf16.mxu0 %v10282_v53 }
 0xfac   :  { %7137 = vmatpush1.bf16.msra.mxu0 %v10283_v54 }
 0xfad   :  { %7147 = vmatprep.subr.bf16.mxu0 %v10284_v35 }
 0xfaf   :  { %7139 = vmatmul.mubr.bf16.vlgmr.msra.gmra.mrb[76].mxu0 %v13537_v36  ;;  %v10288_v36 = vld [vmem:[%s14380_s13 + $0xb04] ss:$28 sps:$4 sm:$0xff]  }
 0xfb0   :  { %7148 = vmatpush1.bf16.msra.mxu0 %v10285_v57  ;;  %7179 = vmatprep.mubr.bf16.mxu0 %v13548_v48  ;;  %v10290_v48 = vld [vmem:[%s14380_s13 + $0xb3c] ss:$28 sps:$4 sm:$0xff]  }
 0xfb1   :  { %7149 = vmatprep.subr.bf16.mxu0 %v10286_v59 }
 0xfb4   :  { %7150 = vmatpush1.bf16.msra.mxu0 %v10287_v60 }
 0xfb5   :  { %7151 = vmatprep.subr.bf16.mxu0 %v10288_v36 }
 0xfb8   :  { %7152 = vmatpush1.bf16.msra.mxu0 %v10289_v52 }
 0xfb9   :  { %7153 = vmatprep.subr.bf16.mxu0 %v10290_v48  ;;  %v10311_v48 = vld [vmem:[%s14380_s13 + $0xd68] ss:$28 sps:$4 sm:$0xff]  }
 0xfbc   :  { %7154 = vmatpush1.bf16.msra.mxu0 %v10291_v43 }
 0xfbd   :  { %7155 = vmatprep.subr.bf16.mxu0 %v10292_v44 }
 0xfc0   :  { %7156 = vmatpush1.bf16.msra.mxu0 %v10293_v56 }
 0xfc1   :  { %7157 = vmatprep.subr.bf16.mxu0 %v10294_v55  ;;  %v10312_v55 = vld [vmem:[%s14380_s13 + $0xda4] ss:$28 sps:$4 sm:$0xff]  }
 0xfc2   :  { %v6853_v46 = vpop.f32.mrb[72].mxu0 }
 0xfc3   :  { %v7465_v30 = vmax.f32 %v6853_v46, -30.0  ;;  %v7017_v5 = vpop.f32.mrb[92].mxu1  ;;  %v6855_v3 = vpop.f32.mrb[73].mxu0 }
 0xfc4   :  { %v7467_v7 = vmax.f32 %v7017_v5, -30.0  ;;  %v7466_v8 = vmax.f32 %v6855_v3, -30.0  ;;  %v7019_v0 = vpop.f32.mrb[93].mxu1  ;;  %v6857_v13 = vpop.f32.mrb[74].mxu0  ;;  %7158 = vmatpush1.bf16.msra.mxu0 %v10295_v15 }
 0xfc5   :  { %v7472_v22 = vsub.f32 0.0, %v7465_v30  ;;  %v7468_v40 = vmax.f32 %v7019_v0, -30.0  ;;  %v7021_v21 = vpop.f32.mrb[94].mxu1  ;;  %v6858_v16 = vpop.f32.mrb[75].mxu0  ;;  %7159 = vmatprep.subr.bf16.mxu0 %v10296_v10  ;;  %v10314_v0 = vld [vmem:[%s14380_s13 + $0xddc] ss:$28 sps:$4 sm:$0xff]  }
 0xfc6   :  { %v7474_v25 = vsub.f32 0.0, %v7467_v7  ;;  %v7473_v9 = vsub.f32 0.0, %v7466_v8  ;;  %v7022_v29 = vpop.f32.mrb[95].mxu1  ;;  %v10313_v7 = vld [vmem:[%s14380_s13 + $0xda0] ss:$28 sps:$4 sm:$0xff]  }
 0xfc7   :  { %v7479_v47 = vmul.f32 1.442695, %v7472_v22  ;;  %v7475_v11 = vsub.f32 0.0, %v7468_v40  ;;  %v10315_v22 = vld [vmem:[%s14380_s13 + $0xdd8] ss:$28 sps:$4 sm:$0xff]  }
 0xfc8   :  { %v7483_v12 = vmul.f32 1.442695, %v7474_v25  ;;  %v7481_v45 = vmul.f32 1.442695, %v7473_v9  ;;  %7160 = vmatpush1.bf16.msra.mxu0 %v10297_v41 }
 0xfc9   :  { %9839 = vpow2.f32 %v7479_v47  ;;  %v7485_v58 = vmul.f32 1.442695, %v7475_v11  ;;  %7161 = vmatprep.subr.bf16.mxu0 %v10298_v26 }
 0xfca   :  { %9841 = vpow2.f32 %v7483_v12 }
 0xfcb   :  { %9843 = vpow2.f32 %v7481_v45 }
 0xfcc   :  { %9845 = vpow2.f32 %v7485_v58  ;;  %7162 = vmatpush1.bf16.msra.mxu0 %v10299_v42 }
 0xfcd   :  { %7163 = vmatprep.subr.bf16.mxu0 %v10300_v1 }
 0xfd0   :  { %7164 = vmatpush1.bf16.msra.mxu0 %v10301_v62 }
 0xfd1   :  { %7165 = vmatprep.subr.bf16.mxu0 %v10302_v20 }
 0xfd3   :  { %v9840_v31 = vpop.eup %9839 }
 0xfd4   :  { %v9842_v19 = vpop.eup %9841  ;;  %v7493_v34 = vadd.f32 1.0, %v9840_v31  ;;  %7166 = vmatpush1.bf16.msra.mxu0 %v10303_v27 }
 0xfd5   :  { %v9844_v28 = vpop.eup %9843  ;;  %v7495_v51 = vadd.f32 1.0, %v9842_v19  ;;  %7167 = vmatprep.subr.bf16.mxu0 %v10304_v4 }
 0xfd6   :  { %v9846_v17 = vpop.eup %9845  ;;  %9847 = vrcp.f32 %v7493_v34  ;;  %v7494_v18 = vadd.f32 1.0, %v9844_v28 }
 0xfd7   :  { %9849 = vrcp.f32 %v7495_v51  ;;  %v7496_v63 = vadd.f32 1.0, %v9846_v17 }
 0xfd8   :  { %9851 = vrcp.f32 %v7494_v18  ;;  %7168 = vmatpush1.bf16.msra.mxu0 %v10305_v61 }
 0xfd9   :  { %9853 = vrcp.f32 %v7496_v63  ;;  %7169 = vmatprep.subr.bf16.mxu0 %v10306_v49 }
 0xfdc   :  { %7170 = vmatpush1.bf16.msra.mxu0 %v10307_v14 }
 0xfdd   :  { %7171 = vmatprep.subr.bf16.mxu0 %v10308_v33 }
 0xfe0   :  { %v9848_v6 = vpop.eup %9847  ;;  %7172 = vmatpush1.bf16.msra.mxu0 %v10309_v23 }
 0xfe1   :  { %v9850_v38 = vpop.eup %9849  ;;  %v7507_v37 = vmax.f32 %v9848_v6, 0.0  ;;  %7173 = vmatprep.subr.bf16.mxu0 %v10310_v50 }
 0xfe2   :  { %v9852_v39 = vpop.eup %9851  ;;  %v7509_v53 = vmax.f32 %v9850_v38, 0.0 }
 0xfe3   :  { %v9854_v54 = vpop.eup %9853  ;;  %v7514_v35 = vmin.f32 %v7507_v37, 1.0  ;;  %v7508_v57 = vmax.f32 %v9852_v39, 0.0  ;;  %v8460_v59 = vpop.f32.mrb[96].mxu1 }
 0xfe4   :  { %v7516_v60 = vmin.f32 %v7509_v53, 1.0  ;;  %v7510_v36 = vmax.f32 %v9854_v54, 0.0  ;;  %v8461_v52 = vpop.f32.mrb[97].mxu1  ;;  %7174 = vmatpush1.bf16.msra.mxu0 %v10311_v48 }
 0xfe5   :  { %v7515_v43 = vmin.f32 %v7508_v57, 1.0  ;;  %v8462_v44 = vadd.f32 %v8461_v52, %v8460_v59  ;;  %v8463_v56 = vpop.f32.mrb[98].mxu1  ;;  %7175 = vmatprep.subr.bf16.mxu0 %v10312_v55 }
 0xfe6   :  { %v7517_v46 = vmin.f32 %v7510_v36, 1.0  ;;  %v8464_v30 = vpop.f32.mrb[99].mxu1 }
 0xfe7   :  { %v7528_v5 = vcombine.low %v7514_v35, %v7515_v43 }
 0xfe8   :  { %v7529_v3 = vcombine.low %v7516_v60, %v7517_v46  ;;  %7176 = vmatpush1.bf16.msra.mxu0 %v10313_v7 }
 0xfe9   :  { %v14348_v8 = vrot.slane %v7528_v5, %v13010_v32  ;;  %7177 = vmatprep.subr.bf16.mxu0 %v10314_v0 }
 0xfea   :  { %v7544_v13 = vrot.slane %v7529_v3, %v13010_v32 }
 0xfec   :  { %v7559_v15 = vcombine.low %v14348_v8, %v7544_v13  ;;  %7178 = vmatpush1.bf16.msra.mxu0 %v10315_v22 }
 0xfee   :  { %v7567_v56 = vrot.slane %v7559_v15, %v13010_v32 }
 0xfef   :  { %7180 = vmatmul.mubr.bf16.vlgmr.msra.gmra.mrb[76].mxu0 %v13755_v24 }
0x1003   :  { %v8482_v40 = vpop.f32.mrb[100].mxu1 }
0x1004   :  { %v8483_v21 = vpop.f32.mrb[101].mxu1 }
0x1005   :  { %v8484_v16 = vadd.f32 %v8483_v21, %v8482_v40  ;;  %v8485_v10 = vpop.f32.mrb[102].mxu1 }
0x1006   :  { %v8486_v25 = vpop.f32.mrb[103].mxu1 }
0x1007   :  { %v7263_v9 = vadd.f32 %v8484_v16, %v8462_v44 }
0x1023   :  { %v8504_v29 = vpop.f32.mrb[104].mxu1 }
0x1024   :  { %v8505_v47 = vpop.f32.mrb[105].mxu1 }
0x1025   :  { %v8506_v11 = vadd.f32 %v8505_v47, %v8504_v29  ;;  %v8507_v12 = vpop.f32.mrb[106].mxu1 }
0x1026   :  { %v8508_v45 = vpop.f32.mrb[107].mxu1 }
0x1027   :  { %v7303_v41 = vadd.f32 %v8506_v11, %v7263_v9 }
0x1043   :  { %v8526_v58 = vpop.f32.mrb[108].mxu1 }
0x1044   :  { %v8527_v26 = vpop.f32.mrb[109].mxu1 }
0x1045   :  { %v8528_v42 = vadd.f32 %v8527_v26, %v8526_v58  ;;  %v8529_v1 = vpop.f32.mrb[110].mxu1 }
0x1046   :  { %v8530_v62 = vpop.f32.mrb[111].mxu1 }
0x1047   :  { %v7343_v20 = vadd.f32 %v8528_v42, %v7303_v41 }
0x1049   :  { %v7471_v31 = vmax.f32 %v7343_v20, -30.0 }
0x104b   :  { %v7478_v24 = vsub.f32 0.0, %v7471_v31 }
0x104d   :  { %v7491_v19 = vmul.f32 1.442695, %v7478_v24 }
0x104f   :  { %9855 = vpow2.f32 %v7491_v19 }
0x1059   :  { %v9856_v14 = vpop.eup %9855 }
0x105a   :  { %v7499_v33 = vadd.f32 1.0, %v9856_v14 }
0x10c2   :  { %v7181_v34 = vpop.f32.mrb[76].mxu0 }
0x10c3   :  { %v7469_v27 = vmax.f32 %v7181_v34, -30.0  ;;  %v7183_v28 = vpop.f32.mrb[77].mxu0 }
0x10c4   :  { %v7470_v51 = vmax.f32 %v7183_v28, -30.0  ;;  %v7185_v4 = vpop.f32.mrb[78].mxu0 }
0x10c5   :  { %v7476_v17 = vsub.f32 0.0, %v7469_v27  ;;  %v7186_v18 = vpop.f32.mrb[79].mxu0 }
0x10c6   :  { %v7477_v63 = vsub.f32 0.0, %v7470_v51 }
0x10c7   :  { %v7487_v61 = vmul.f32 1.442695, %v7476_v17 }
0x10c8   :  { %v7489_v49 = vmul.f32 1.442695, %v7477_v63 }
0x10c9   :  { %9857 = vpow2.f32 %v7487_v61 }
0x10ca   :  { %9859 = vpow2.f32 %v7489_v49 }
0x10cb   :  { %9861 = vrcp.f32 %v7499_v33 }
0x10d3   :  { %v9858_v6 = vpop.eup %9857 }
0x10d4   :  { %v9860_v23 = vpop.eup %9859  ;;  %v7497_v38 = vadd.f32 1.0, %v9858_v6 }
0x10d5   :  { %v7498_v37 = vadd.f32 1.0, %v9860_v23  ;;  %v9862_v50 = vpop.eup %9861 }
0x10d6   :  { %9863 = vrcp.f32 %v7497_v38  ;;  %v7513_v53 = vmax.f32 %v9862_v50, 0.0 }
0x10d7   :  { %9865 = vrcp.f32 %v7498_v37 }
0x10d8   :  { %v7520_v60 = vmin.f32 %v7513_v53, 1.0 }
0x10da   :  { %v7558_v48 = vrot.slane %v7520_v60, %v13010_v32 }
0x10e0   :  { %v9864_v39 = vpop.eup %9863 }
0x10e1   :  { %v9866_v54 = vpop.eup %9865  ;;  %v7511_v35 = vmax.f32 %v9864_v39, 0.0 }
0x10e2   :  { %v7512_v57 = vmax.f32 %v9866_v54, 0.0 }
0x10e3   :  { %v7518_v59 = vmin.f32 %v7511_v35, 1.0 }
0x10e4   :  { %v7519_v36 = vmin.f32 %v7512_v57, 1.0 }
0x10e6   :  { %v7530_v52 = vcombine.low %v7518_v59, %v7519_v36 }
0x10e8   :  { %v7551_v43 = vrot.slane %v7530_v52, %v13010_v32 }
0x10ea   :  { %v7560_v44 = vcombine.low %v7551_v43, %v7558_v48 }
0x10ec   :  { %v7574_v55 = vrot.slane %v7560_v44, %v13010_v32 }
0x10ee   :  { %v7575_v46 = vcombine.low %v7567_v56, %v7574_v55 }
0x10f0   :  { %8259 = vst.msk [vmem:[%s14382_s14 + $0x1] ss:$2 sm:$0x7f] %vm13646_vm15, %v7575_v46 }

</bundles_post_ra>
